<compile_context>
chip_gen: v6e
topology: v6e:2x2x1
jax: 0.10.0
libtpu: 0.0.40
codegen_flags: <defaults>
</compile_context>

<pallas_src>
import math

import numpy as np
import jax
import jax.numpy as jnp
from jax.experimental import pallas as pl
from jax.experimental.pallas import tpu as pltpu

# ----------------------------- model config ---------------------------------
IMG = 16
IN_CH = 3
EMBED = [16, 32]          # embed_dim per stage
DEPTH = [1, 1]            # layers per stage
HEADS = [2, 2]
NWIN = [(2, 1), (1, 1)]   # n_window pair per stage (layer i uses pair[i % 2])
MLP_RATIO = 2.0
NUM_CLASSES = 10
TEMPERATURE = 0.1
BN_EPS = 1e-5
LN_EPS = 1e-5
NEG_INF = -1e9


# --------------------------- in-kernel helpers --------------------------------
def _ln(x, g, b):
    """LayerNorm over the last dim (matches nn.LayerNorm, eps=1e-5)."""
    mu = jnp.mean(x, axis=-1, keepdims=True)
    var = jnp.mean(jnp.square(x - mu), axis=-1, keepdims=True)
    return (x - mu) * jax.lax.rsqrt(var + LN_EPS) * g + b


_ERF_P = 0.3275911
_ERF_A = (0.254829592, -0.284496736, 1.421413741, -1.453152027, 1.061405429)


def _erf_poly(x):
    # TODO(synk): erf approximated with Abramowitz-Stegun 7.1.26 (|err|<=1.5e-7,
    # f32-level) so the fused exact-flavour GELU is guaranteed to lower in Mosaic.
    s = jnp.where(x >= 0.0, 1.0, -1.0)
    ax = jnp.abs(x)
    t = 1.0 / (1.0 + _ERF_P * ax)
    a1, a2, a3, a4, a5 = _ERF_A
    poly = ((((a5 * t + a4) * t + a3) * t + a2) * t + a1) * t
    return s * (1.0 - poly * jnp.exp(-ax * ax))


def _gelu(x):
    # nn.GELU(approximate='none') via the erf polynomial above.
    return 0.5 * x * (1.0 + _erf_poly(x * 0.7071067811865476))


# ----------------------------- the fused kernel --------------------------------
def _layer_block(x, nxt, inv_temp):
    """One AngularLayer on a (B*T, D) token slab; pulls its refs from nxt()."""
    peg_sel = nxt(); peg_w = nxt(); peg_b = nxt()
    ln1_g = nxt(); ln1_b = nxt()
    qw = nxt(); kw = nxt(); vw = nxt()
    qb = nxt(); kb = nxt(); vb = nxt()
    pw = nxt(); pb = nxt()
    ln2_g = nxt(); ln2_b = nxt()
    f1w = nxt(); f1b = nxt()
    f2w = nxt(); f2b = nxt()
    mask = nxt()

    # ---- PEG: depthwise 3x3 conv (zero pad, taps via constant selections) + residual
    peg = x + peg_b[...]
    for t in range(peg_sel.shape[0]):
        tap = jnp.dot(peg_sel[t], x, preferred_element_type=jnp.float32)
        peg = peg + tap * peg_w[t]
    x = peg

    # ---- LN1 + window cosine attention (all heads, window/batch block mask)
    cur = _ln(x, ln1_g[...], ln1_b[...])
    m = mask[...]
    attn = pb[...]
    for h in range(qw.shape[0]):
        qh = jnp.dot(cur, qw[h], preferred_element_type=jnp.float32) + qb[h]
        kh = jnp.dot(cur, kw[h], preferred_element_type=jnp.float32) + kb[h]
        vh = jnp.dot(cur, vw[h], preferred_element_type=jnp.float32) + vb[h]
        # F.normalize(dim=-1, eps=1e-12) on the EUP rsqrt path
        qn = qh * jax.lax.rsqrt(jnp.maximum(jnp.sum(qh * qh, -1, keepdims=True), 1e-24))
        kn = kh * jax.lax.rsqrt(jnp.maximum(jnp.sum(kh * kh, -1, keepdims=True), 1e-24))
        # contract last axes of both operands -- no transpose / XLU relayout
        s = jax.lax.dot_general(qn, kn, (((1,), (1,)), ((), ())),
                                preferred_element_type=jnp.float32)
        s = s * inv_temp + m
        s = s - jnp.max(s, axis=-1, keepdims=True)
        p = jnp.exp(s)
        p = p / jnp.sum(p, axis=-1, keepdims=True)   # exact (parity with PyTorch)
        oh = jnp.dot(p, vh, preferred_element_type=jnp.float32)
        attn = attn + jnp.dot(oh, pw[h], preferred_element_type=jnp.float32)
    x = x + attn

    # ---- LN2 + MLP (GELU) + residual
    cur2 = _ln(x, ln2_g[...], ln2_b[...])
    hid = _gelu(jnp.dot(cur2, f1w[...], preferred_element_type=jnp.float32) + f1b[...])
    x = x + jnp.dot(hid, f2w[...], preferred_element_type=jnp.float32) + f2b[...]
    return x


def _fwd_kernel(*refs):
    *ins, o_ref = refs
    it = iter(ins)
    nxt = lambda: next(it)
    inv_temp = 1.0 / TEMPERATURE

    # ---- stem conv1 (im2col'ed on the raw input in XLA) + folded BN + GELU
    p1 = nxt(); w1 = nxt(); b1 = nxt()
    x = _gelu(jnp.dot(p1[...], w1[...], preferred_element_type=jnp.float32) + b1[...])

    # ---- stem conv2: im2col via constant tap-selection matmuls, + folded BN + GELU
    s2 = nxt(); w2 = nxt(); b2 = nxt()
    y = b2[...]
    for t in range(s2.shape[0]):
        tap = jnp.dot(s2[t], x, preferred_element_type=jnp.float32)
        y = y + jnp.dot(tap, w2[t], preferred_element_type=jnp.float32)
    x = _gelu(y)

    # ---- stages: AngularLayers (+ ConvDownsample between stages)
    n_stages = len(DEPTH)
    for si in range(n_stages):
        for _ in range(DEPTH[si]):
            x = _layer_block(x, nxt, inv_temp)
        if si < n_stages - 1:
            sd = nxt(); wd = nxt(); bd = nxt()
            y = bd[...]
            for t in range(sd.shape[0]):
                tap = jnp.dot(sd[t], x, preferred_element_type=jnp.float32)
                y = y + jnp.dot(tap, wd[t], preferred_element_type=jnp.float32)
            x = y

    # ---- head: final LN + per-batch token mean-pool + classifier (one store)
    pool = nxt(); ng = nxt(); nb = nxt(); hw = nxt(); hb = nxt()
    xn = _ln(x, ng[...], nb[...])
    pooled = jnp.dot(pool[...], xn, preferred_element_type=jnp.float32)
    o_ref[...] = jnp.dot(pooled, hw[...], preferred_element_type=jnp.float32) + hb[...]


# ------------------------ trace-time constant builders -------------------------
def _conv_tap_selection(B, Hin, Win, Hout, Wout, k, stride, pad):
    """(k*k, B*Hout*Wout, B*Hin*Win) 0/1 tap-gather matrices, block-diag over batch."""
    S = np.zeros((k * k, B * Hout * Wout, B * Hin * Win), np.float32)
    for ki in range(k):
        for kj in range(k):
            t = ki * k + kj
            for b in range(B):
                for ho in range(Hout):
                    for wo in range(Wout):
                        h = ho * stride - pad + ki
                        w = wo * stride - pad + kj
                        if 0 <= h < Hin and 0 <= w < Win:
                            S[t, b * Hout * Wout + ho * Wout + wo,
                              b * Hin * Win + h * Win + w] = 1.0
    return jnp.asarray(S)


def _window_attn_mask(B, H, W, n_window):
    """Additive mask: 0 for same-batch & same-window token pairs, -1e9 otherwise."""
    T = H * W
    win_h, win_w = H // n_window, W // n_window
    wid = np.zeros((T,), np.int64)
    for h in range(H):
        for w in range(W):
            wid[h * W + w] = (h // win_h) * n_window + (w // win_w)
    same = (wid[:, None] == wid[None, :])
    m = np.full((B * T, B * T), NEG_INF, np.float32)
    for b in range(B):
        m[b * T:(b + 1) * T, b * T:(b + 1) * T] = np.where(same, 0.0, NEG_INF)
    return jnp.asarray(m)


def _mean_pool_matrix(B, T):
    m = np.zeros((B, B * T), np.float32)
    for b in range(B):
        m[b, b * T:(b + 1) * T] = 1.0 / T
    return jnp.asarray(m)


def _stem_conv1_patches(x_nhwc):
    """(B,H,W,C) -> (B*Ho*Wo, 9*C) for the 3x3/stride-2/pad-1 stem conv.
    TODO(synk): left in XLA -- it acts on the raw input only (a few KB), so there
    is no intermediate-activation HBM bounce to eliminate."""
    B, H, W, C = x_nhwc.shape
    Ho, Wo = H // 2, W // 2
    xp = jnp.pad(x_nhwc, ((0, 0), (1, 1), (1, 1), (0, 0)))
    cols = [xp[:, i:i + 2 * Ho:2, j:j + 2 * Wo:2, :] for i in range(3) for j in range(3)]
    patches = jnp.stack(cols, axis=3)                   # (B, Ho, Wo, 9, C)
    return patches.reshape(B * Ho * Wo, 9 * C), Ho, Wo


# --------------------------------- forward ------------------------------------
def angular_vit(x_nchw, params):
    B = x_nchw.shape[0]
    x = jnp.transpose(x_nchw, (0, 2, 3, 1))             # NCHW -> NHWC
    patches1, H1, W1 = _stem_conv1_patches(x)            # (B*64, 27)
    H, W = H1 // 2, W1 // 2                               # spatial after conv2

    pe = params["patch_embed"]
    args = [patches1,
            pe["conv1_w"], pe["conv1_b"].reshape(1, -1),
            _conv_tap_selection(B, H1, W1, H, W, 3, 2, 1),
            pe["conv2_w"], pe["conv2_b"].reshape(1, -1)]

    n_stages = len(params["stages"])
    for si, sp in enumerate(params["stages"]):
        for li, lp in enumerate(sp["layers"]):
            nwin = NWIN[si][li % 2]
            # TODO(synk): replicate-pad branch of AngularAttention (H or W not
            # divisible by n_window) is unimplemented; never hit for this config.
            assert H % nwin == 0 and W % nwin == 0
            args += [
                _conv_tap_selection(B, H, W, H, W, 3, 1, 1),       # PEG 3x3 taps
                lp["peg_w"], lp["peg_b"].reshape(1, -1),
                lp["ln1_g"].reshape(1, -1), lp["ln1_b"].reshape(1, -1),
                lp["q_w"], lp["k_w"], lp["v_w"],
                lp["q_b"], lp["k_b"], lp["v_b"],
                lp["proj_w"], lp["proj_b"].reshape(1, -1),
                lp["ln2_g"].reshape(1, -1), lp["ln2_b"].reshape(1, -1),
                lp["fc1_w"], lp["fc1_b"].reshape(1, -1),
                lp["fc2_w"], lp["fc2_b"].reshape(1, -1),
                _window_attn_mask(B, H, W, nwin),
            ]
        if si < n_stages - 1:
            args += [
                _conv_tap_selection(B, H, W, H // 2, W // 2, 2, 2, 0),
                sp["down_w"], sp["down_b"].reshape(1, -1),
            ]
            H, W = H // 2, W // 2

    args += [
        _mean_pool_matrix(B, H * W),
        params["norm_g"].reshape(1, -1), params["norm_b"].reshape(1, -1),
        params["head_w"], params["head_b"].reshape(1, -1),
    ]

    return pl.pallas_call(
        _fwd_kernel,
        out_shape=jax.ShapeDtypeStruct((B, NUM_CLASSES), jnp.float32),
        in_specs=[pl.BlockSpec(memory_space=pltpu.MemorySpace.VMEM)] * len(args),
        out_specs=pl.BlockSpec(memory_space=pltpu.MemorySpace.VMEM),
    )(*args)


# ----------------------------- parameter init ---------------------------------
def init_params(key):
    keys = iter(jax.random.split(key, 128))

    def nrm(shape, scale=0.02):
        return jax.random.normal(next(keys), shape, jnp.float32) * scale

    bn_scale = 1.0 / math.sqrt(1.0 + BN_EPS)   # eval-mode BN (default stats) folded in

    c_half = EMBED[0] // 2
    params = {
        "patch_embed": {
            "conv1_w": nrm((9 * IN_CH, c_half)) * bn_scale,
            "conv1_b": nrm((c_half,)) * bn_scale,
            "conv2_w": nrm((9, c_half, EMBED[0])) * bn_scale,   # per-tap (Cin, Cout)
            "conv2_b": nrm((EMBED[0],)) * bn_scale,
        }
    }

    stages = []
    for si in range(len(DEPTH)):
        D = EMBED[si]
        heads = HEADS[si]
        hd = D // heads
        hidden = int(MLP_RATIO * D)
        layers = []
        for _ in range(DEPTH[si]):
            layers.append({
                "peg_w": nrm((9, 1, D)),
                "peg_b": nrm((D,)),
                "ln1_g": jnp.ones((D,), jnp.float32),
                "ln1_b": jnp.zeros((D,), jnp.float32),
                # qkv / proj Linear weights stored pre-split per head so the
                # fused kernel only needs leading-dim indexing (no lane slicing).
                "q_w": nrm((heads, D, hd)),
                "k_w": nrm((heads, D, hd)),
                "v_w": nrm((heads, D, hd)),
                "q_b": jnp.zeros((heads, 1, hd), jnp.float32),
                "k_b": jnp.zeros((heads, 1, hd), jnp.float32),
                "v_b": jnp.zeros((heads, 1, hd), jnp.float32),
                "proj_w": nrm((heads, hd, D)),
                "proj_b": jnp.zeros((D,), jnp.float32),
                "ln2_g": jnp.ones((D,), jnp.float32),
                "ln2_b": jnp.zeros((D,), jnp.float32),
                "fc1_w": nrm((D, hidden)),
                "fc1_b": jnp.zeros((hidden,), jnp.float32),
                "fc2_w": nrm((hidden, D)),
                "fc2_b": jnp.zeros((D,), jnp.float32),
            })
        stage = {"layers": layers}
        if si < len(DEPTH) - 1:
            stage["down_w"] = nrm((4, D, EMBED[si + 1]))        # per-tap (Cin, Cout)
            stage["down_b"] = nrm((EMBED[si + 1],))
        stages.append(stage)
    params["stages"] = stages

    Df = EMBED[-1]
    params["norm_g"] = jnp.ones((Df,), jnp.float32)
    params["norm_b"] = jnp.zeros((Df,), jnp.float32)
    params["head_w"] = nrm((Df, NUM_CLASSES))
    params["head_b"] = jnp.zeros((NUM_CLASSES,), jnp.float32)
    return params


# ----------------------------------- main --------------------------------------
if __name__ == "__main__":
    key = jax.random.PRNGKey(0)
    pkey, xkey = jax.random.split(key)
    params = init_params(pkey)
    x = jax.random.normal(xkey, (2, IN_CH, IMG, IMG), jnp.float32)   # NCHW input

    fwd = jax.jit(lambda inp: angular_vit(inp, params))
    out = jax.block_until_ready(fwd(x))
    assert out.shape == (2, NUM_CLASSES), out.shape
    assert bool(jnp.all(jnp.isfinite(out)))
    print("KERNEL_OK")
</pallas_src>

<mosaic_0001>
module attributes {stable_mosaic.version = 11 : i64} {
  func.func @_fwd_kernel(%arg0: memref<128x27xf32, #tpu.memory_space<vmem>>, %arg1: memref<27x8xf32, #tpu.memory_space<vmem>>, %arg2: memref<1x8xf32, #tpu.memory_space<vmem>>, %arg3: memref<9x32x128xf32, #tpu.memory_space<vmem>>, %arg4: memref<9x8x16xf32, #tpu.memory_space<vmem>>, %arg5: memref<1x16xf32, #tpu.memory_space<vmem>>, %arg6: memref<9x32x32xf32, #tpu.memory_space<vmem>>, %arg7: memref<9x1x16xf32, #tpu.memory_space<vmem>>, %arg8: memref<1x16xf32, #tpu.memory_space<vmem>>, %arg9: memref<1x16xf32, #tpu.memory_space<vmem>>, %arg10: memref<1x16xf32, #tpu.memory_space<vmem>>, %arg11: memref<2x16x8xf32, #tpu.memory_space<vmem>>, %arg12: memref<2x16x8xf32, #tpu.memory_space<vmem>>, %arg13: memref<2x16x8xf32, #tpu.memory_space<vmem>>, %arg14: memref<2x1x8xf32, #tpu.memory_space<vmem>>, %arg15: memref<2x1x8xf32, #tpu.memory_space<vmem>>, %arg16: memref<2x1x8xf32, #tpu.memory_space<vmem>>, %arg17: memref<2x8x16xf32, #tpu.memory_space<vmem>>, %arg18: memref<1x16xf32, #tpu.memory_space<vmem>>, %arg19: memref<1x16xf32, #tpu.memory_space<vmem>>, %arg20: memref<1x16xf32, #tpu.memory_space<vmem>>, %arg21: memref<16x32xf32, #tpu.memory_space<vmem>>, %arg22: memref<1x32xf32, #tpu.memory_space<vmem>>, %arg23: memref<32x16xf32, #tpu.memory_space<vmem>>, %arg24: memref<1x16xf32, #tpu.memory_space<vmem>>, %arg25: memref<32x32xf32, #tpu.memory_space<vmem>>, %arg26: memref<4x8x32xf32, #tpu.memory_space<vmem>>, %arg27: memref<4x16x32xf32, #tpu.memory_space<vmem>>, %arg28: memref<1x32xf32, #tpu.memory_space<vmem>>, %arg29: memref<9x8x8xf32, #tpu.memory_space<vmem>>, %arg30: memref<9x1x32xf32, #tpu.memory_space<vmem>>, %arg31: memref<1x32xf32, #tpu.memory_space<vmem>>, %arg32: memref<1x32xf32, #tpu.memory_space<vmem>>, %arg33: memref<1x32xf32, #tpu.memory_space<vmem>>, %arg34: memref<2x32x16xf32, #tpu.memory_space<vmem>>, %arg35: memref<2x32x16xf32, #tpu.memory_space<vmem>>, %arg36: memref<2x32x16xf32, #tpu.memory_space<vmem>>, %arg37: memref<2x1x16xf32, #tpu.memory_space<vmem>>, %arg38: memref<2x1x16xf32, #tpu.memory_space<vmem>>, %arg39: memref<2x1x16xf32, #tpu.memory_space<vmem>>, %arg40: memref<2x16x32xf32, #tpu.memory_space<vmem>>, %arg41: memref<1x32xf32, #tpu.memory_space<vmem>>, %arg42: memref<1x32xf32, #tpu.memory_space<vmem>>, %arg43: memref<1x32xf32, #tpu.memory_space<vmem>>, %arg44: memref<32x64xf32, #tpu.memory_space<vmem>>, %arg45: memref<1x64xf32, #tpu.memory_space<vmem>>, %arg46: memref<64x32xf32, #tpu.memory_space<vmem>>, %arg47: memref<1x32xf32, #tpu.memory_space<vmem>>, %arg48: memref<8x8xf32, #tpu.memory_space<vmem>>, %arg49: memref<2x8xf32, #tpu.memory_space<vmem>>, %arg50: memref<1x32xf32, #tpu.memory_space<vmem>>, %arg51: memref<1x32xf32, #tpu.memory_space<vmem>>, %arg52: memref<32x10xf32, #tpu.memory_space<vmem>>, %arg53: memref<1x10xf32, #tpu.memory_space<vmem>>, %arg54: memref<2x10xf32, #tpu.memory_space<vmem>>) attributes {dimension_semantics = [], scalar_prefetch = 0 : i64, scratch_operands = 0 : i64, tpu.core_type = #tpu.core_type<tc>} {
    %c0 = arith.constant 0 : index
    %c0_0 = arith.constant 0 : index
    %0 = vector.load %arg0[%c0, %c0_0] : memref<128x27xf32, #tpu.memory_space<vmem>>, vector<128x27xf32>
    %c0_1 = arith.constant 0 : index
    %c0_2 = arith.constant 0 : index
    %1 = vector.load %arg1[%c0_1, %c0_2] : memref<27x8xf32, #tpu.memory_space<vmem>>, vector<27x8xf32>
    %cst = arith.constant dense<0.000000e+00> : vector<128x8xf32>
    %2 = tpu.matmul %0, %1, %cst {dimension_numbers = #tpu.dot_dimension_numbers<[1], [0], [0], [1], [0, 0, 1, 1], [], []>} : vector<128x27xf32>, vector<27x8xf32>, vector<128x8xf32> -> vector<128x8xf32>
    %c0_3 = arith.constant 0 : index
    %c0_4 = arith.constant 0 : index
    %3 = vector.load %arg2[%c0_3, %c0_4] : memref<1x8xf32, #tpu.memory_space<vmem>>, vector<1x8xf32>
    %4 = vector.broadcast %3 : vector<1x8xf32> to vector<128x8xf32>
    %5 = arith.addf %2, %4 : vector<128x8xf32>
    %cst_5 = arith.constant 5.000000e-01 : f32
    %6 = vector.broadcast %cst_5 : f32 to vector<128x8xf32>
    %7 = arith.mulf %6, %5 : vector<128x8xf32>
    %cst_6 = arith.constant 0.707106769 : f32
    %8 = vector.broadcast %cst_6 : f32 to vector<128x8xf32>
    %9 = arith.mulf %5, %8 : vector<128x8xf32>
    %cst_7 = arith.constant 0.000000e+00 : f32
    %10 = vector.broadcast %cst_7 : f32 to vector<128x8xf32>
    %11 = arith.cmpf oge, %9, %10 : vector<128x8xf32>
    %cst_8 = arith.constant 1.000000e+00 : f32
    %cst_9 = arith.constant -1.000000e+00 : f32
    %12 = vector.broadcast %cst_8 : f32 to vector<128x8xf32>
    %13 = vector.broadcast %cst_9 : f32 to vector<128x8xf32>
    %14 = arith.select %11, %12, %13 : vector<128x8xi1>, vector<128x8xf32>
    %15 = math.absf %9 : vector<128x8xf32>
    %cst_10 = arith.constant 0.327591091 : f32
    %16 = vector.broadcast %cst_10 : f32 to vector<128x8xf32>
    %17 = arith.mulf %16, %15 : vector<128x8xf32>
    %cst_11 = arith.constant 1.000000e+00 : f32
    %18 = vector.broadcast %cst_11 : f32 to vector<128x8xf32>
    %19 = arith.addf %18, %17 : vector<128x8xf32>
    %cst_12 = arith.constant 1.000000e+00 : f32
    %20 = vector.broadcast %cst_12 : f32 to vector<128x8xf32>
    %21 = arith.divf %20, %19 : vector<128x8xf32>
    %cst_13 = arith.constant 1.06140542 : f32
    %22 = vector.broadcast %cst_13 : f32 to vector<128x8xf32>
    %23 = arith.mulf %22, %21 : vector<128x8xf32>
    %cst_14 = arith.constant -1.45315206 : f32
    %24 = vector.broadcast %cst_14 : f32 to vector<128x8xf32>
    %25 = arith.addf %23, %24 : vector<128x8xf32>
    %26 = arith.mulf %25, %21 : vector<128x8xf32>
    %cst_15 = arith.constant 1.42141378 : f32
    %27 = vector.broadcast %cst_15 : f32 to vector<128x8xf32>
    %28 = arith.addf %26, %27 : vector<128x8xf32>
    %29 = arith.mulf %28, %21 : vector<128x8xf32>
    %cst_16 = arith.constant -0.284496725 : f32
    %30 = vector.broadcast %cst_16 : f32 to vector<128x8xf32>
    %31 = arith.addf %29, %30 : vector<128x8xf32>
    %32 = arith.mulf %31, %21 : vector<128x8xf32>
    %cst_17 = arith.constant 0.254829586 : f32
    %33 = vector.broadcast %cst_17 : f32 to vector<128x8xf32>
    %34 = arith.addf %32, %33 : vector<128x8xf32>
    %35 = arith.mulf %34, %21 : vector<128x8xf32>
    %cst_18 = arith.constant 0.000000e+00 : f32
    %36 = vector.broadcast %cst_18 : f32 to vector<128x8xf32>
    %37 = arith.subf %36, %15 : vector<128x8xf32>
    %38 = arith.mulf %37, %15 : vector<128x8xf32>
    %39 = math.exp %38 : vector<128x8xf32>
    %40 = arith.mulf %35, %39 : vector<128x8xf32>
    %cst_19 = arith.constant 1.000000e+00 : f32
    %41 = vector.broadcast %cst_19 : f32 to vector<128x8xf32>
    %42 = arith.subf %41, %40 : vector<128x8xf32>
    %43 = arith.mulf %14, %42 : vector<128x8xf32>
    %cst_20 = arith.constant 1.000000e+00 : f32
    %44 = vector.broadcast %cst_20 : f32 to vector<128x8xf32>
    %45 = arith.addf %44, %43 : vector<128x8xf32>
    %46 = arith.mulf %7, %45 : vector<128x8xf32>
    %c0_21 = arith.constant 0 : index
    %c0_22 = arith.constant 0 : index
    %47 = vector.load %arg5[%c0_21, %c0_22] : memref<1x16xf32, #tpu.memory_space<vmem>>, vector<1x16xf32>
    %c0_23 = arith.constant 0 : index
    %c0_24 = arith.constant 0 : index
    %c0_25 = arith.constant 0 : index
    %48 = vector.load %arg3[%c0_23, %c0_24, %c0_25] : memref<9x32x128xf32, #tpu.memory_space<vmem>>, vector<1x32x128xf32>
    %49 = vector.shape_cast %48 : vector<1x32x128xf32> to vector<32x128xf32>
    %cst_26 = arith.constant dense<0.000000e+00> : vector<32x8xf32>
    %50 = tpu.matmul %49, %46, %cst_26 {dimension_numbers = #tpu.dot_dimension_numbers<[1], [0], [0], [1], [0, 0, 1, 1], [], []>} : vector<32x128xf32>, vector<128x8xf32>, vector<32x8xf32> -> vector<32x8xf32>
    %c0_27 = arith.constant 0 : index
    %c0_28 = arith.constant 0 : index
    %c0_29 = arith.constant 0 : index
    %51 = vector.load %arg4[%c0_27, %c0_28, %c0_29] : memref<9x8x16xf32, #tpu.memory_space<vmem>>, vector<1x8x16xf32>
    %52 = vector.shape_cast %51 : vector<1x8x16xf32> to vector<8x16xf32>
    %cst_30 = arith.constant dense<0.000000e+00> : vector<32x16xf32>
    %53 = tpu.matmul %50, %52, %cst_30 {dimension_numbers = #tpu.dot_dimension_numbers<[1], [0], [0], [1], [0, 0, 1, 1], [], []>} : vector<32x8xf32>, vector<8x16xf32>, vector<32x16xf32> -> vector<32x16xf32>
    %54 = vector.broadcast %47 : vector<1x16xf32> to vector<32x16xf32>
    %55 = arith.addf %54, %53 : vector<32x16xf32>
    %c1 = arith.constant 1 : index
    %c0_31 = arith.constant 0 : index
    %c0_32 = arith.constant 0 : index
    %56 = vector.load %arg3[%c1, %c0_31, %c0_32] : memref<9x32x128xf32, #tpu.memory_space<vmem>>, vector<1x32x128xf32>
    %57 = vector.shape_cast %56 : vector<1x32x128xf32> to vector<32x128xf32>
    %cst_33 = arith.constant dense<0.000000e+00> : vector<32x8xf32>
    %58 = tpu.matmul %57, %46, %cst_33 {dimension_numbers = #tpu.dot_dimension_numbers<[1], [0], [0], [1], [0, 0, 1, 1], [], []>} : vector<32x128xf32>, vector<128x8xf32>, vector<32x8xf32> -> vector<32x8xf32>
    %c1_34 = arith.constant 1 : index
    %c0_35 = arith.constant 0 : index
    %c0_36 = arith.constant 0 : index
    %59 = vector.load %arg4[%c1_34, %c0_35, %c0_36] : memref<9x8x16xf32, #tpu.memory_space<vmem>>, vector<1x8x16xf32>
    %60 = vector.shape_cast %59 : vector<1x8x16xf32> to vector<8x16xf32>
    %cst_37 = arith.constant dense<0.000000e+00> : vector<32x16xf32>
    %61 = tpu.matmul %58, %60, %cst_37 {dimension_numbers = #tpu.dot_dimension_numbers<[1], [0], [0], [1], [0, 0, 1, 1], [], []>} : vector<32x8xf32>, vector<8x16xf32>, vector<32x16xf32> -> vector<32x16xf32>
    %62 = arith.addf %55, %61 : vector<32x16xf32>
    %c2 = arith.constant 2 : index
    %c0_38 = arith.constant 0 : index
    %c0_39 = arith.constant 0 : index
    %63 = vector.load %arg3[%c2, %c0_38, %c0_39] : memref<9x32x128xf32, #tpu.memory_space<vmem>>, vector<1x32x128xf32>
    %64 = vector.shape_cast %63 : vector<1x32x128xf32> to vector<32x128xf32>
    %cst_40 = arith.constant dense<0.000000e+00> : vector<32x8xf32>
    %65 = tpu.matmul %64, %46, %cst_40 {dimension_numbers = #tpu.dot_dimension_numbers<[1], [0], [0], [1], [0, 0, 1, 1], [], []>} : vector<32x128xf32>, vector<128x8xf32>, vector<32x8xf32> -> vector<32x8xf32>
    %c2_41 = arith.constant 2 : index
    %c0_42 = arith.constant 0 : index
    %c0_43 = arith.constant 0 : index
    %66 = vector.load %arg4[%c2_41, %c0_42, %c0_43] : memref<9x8x16xf32, #tpu.memory_space<vmem>>, vector<1x8x16xf32>
    %67 = vector.shape_cast %66 : vector<1x8x16xf32> to vector<8x16xf32>
    %cst_44 = arith.constant dense<0.000000e+00> : vector<32x16xf32>
    %68 = tpu.matmul %65, %67, %cst_44 {dimension_numbers = #tpu.dot_dimension_numbers<[1], [0], [0], [1], [0, 0, 1, 1], [], []>} : vector<32x8xf32>, vector<8x16xf32>, vector<32x16xf32> -> vector<32x16xf32>
    %69 = arith.addf %62, %68 : vector<32x16xf32>
    %c3 = arith.constant 3 : index
    %c0_45 = arith.constant 0 : index
    %c0_46 = arith.constant 0 : index
    %70 = vector.load %arg3[%c3, %c0_45, %c0_46] : memref<9x32x128xf32, #tpu.memory_space<vmem>>, vector<1x32x128xf32>
    %71 = vector.shape_cast %70 : vector<1x32x128xf32> to vector<32x128xf32>
    %cst_47 = arith.constant dense<0.000000e+00> : vector<32x8xf32>
    %72 = tpu.matmul %71, %46, %cst_47 {dimension_numbers = #tpu.dot_dimension_numbers<[1], [0], [0], [1], [0, 0, 1, 1], [], []>} : vector<32x128xf32>, vector<128x8xf32>, vector<32x8xf32> -> vector<32x8xf32>
    %c3_48 = arith.constant 3 : index
    %c0_49 = arith.constant 0 : index
    %c0_50 = arith.constant 0 : index
    %73 = vector.load %arg4[%c3_48, %c0_49, %c0_50] : memref<9x8x16xf32, #tpu.memory_space<vmem>>, vector<1x8x16xf32>
    %74 = vector.shape_cast %73 : vector<1x8x16xf32> to vector<8x16xf32>
    %cst_51 = arith.constant dense<0.000000e+00> : vector<32x16xf32>
    %75 = tpu.matmul %72, %74, %cst_51 {dimension_numbers = #tpu.dot_dimension_numbers<[1], [0], [0], [1], [0, 0, 1, 1], [], []>} : vector<32x8xf32>, vector<8x16xf32>, vector<32x16xf32> -> vector<32x16xf32>
    %76 = arith.addf %69, %75 : vector<32x16xf32>
    %c4 = arith.constant 4 : index
    %c0_52 = arith.constant 0 : index
    %c0_53 = arith.constant 0 : index
    %77 = vector.load %arg3[%c4, %c0_52, %c0_53] : memref<9x32x128xf32, #tpu.memory_space<vmem>>, vector<1x32x128xf32>
    %78 = vector.shape_cast %77 : vector<1x32x128xf32> to vector<32x128xf32>
    %cst_54 = arith.constant dense<0.000000e+00> : vector<32x8xf32>
    %79 = tpu.matmul %78, %46, %cst_54 {dimension_numbers = #tpu.dot_dimension_numbers<[1], [0], [0], [1], [0, 0, 1, 1], [], []>} : vector<32x128xf32>, vector<128x8xf32>, vector<32x8xf32> -> vector<32x8xf32>
    %c4_55 = arith.constant 4 : index
    %c0_56 = arith.constant 0 : index
    %c0_57 = arith.constant 0 : index
    %80 = vector.load %arg4[%c4_55, %c0_56, %c0_57] : memref<9x8x16xf32, #tpu.memory_space<vmem>>, vector<1x8x16xf32>
    %81 = vector.shape_cast %80 : vector<1x8x16xf32> to vector<8x16xf32>
    %cst_58 = arith.constant dense<0.000000e+00> : vector<32x16xf32>
    %82 = tpu.matmul %79, %81, %cst_58 {dimension_numbers = #tpu.dot_dimension_numbers<[1], [0], [0], [1], [0, 0, 1, 1], [], []>} : vector<32x8xf32>, vector<8x16xf32>, vector<32x16xf32> -> vector<32x16xf32>
    %83 = arith.addf %76, %82 : vector<32x16xf32>
    %c5 = arith.constant 5 : index
    %c0_59 = arith.constant 0 : index
    %c0_60 = arith.constant 0 : index
    %84 = vector.load %arg3[%c5, %c0_59, %c0_60] : memref<9x32x128xf32, #tpu.memory_space<vmem>>, vector<1x32x128xf32>
    %85 = vector.shape_cast %84 : vector<1x32x128xf32> to vector<32x128xf32>
    %cst_61 = arith.constant dense<0.000000e+00> : vector<32x8xf32>
    %86 = tpu.matmul %85, %46, %cst_61 {dimension_numbers = #tpu.dot_dimension_numbers<[1], [0], [0], [1], [0, 0, 1, 1], [], []>} : vector<32x128xf32>, vector<128x8xf32>, vector<32x8xf32> -> vector<32x8xf32>
    %c5_62 = arith.constant 5 : index
    %c0_63 = arith.constant 0 : index
    %c0_64 = arith.constant 0 : index
    %87 = vector.load %arg4[%c5_62, %c0_63, %c0_64] : memref<9x8x16xf32, #tpu.memory_space<vmem>>, vector<1x8x16xf32>
    %88 = vector.shape_cast %87 : vector<1x8x16xf32> to vector<8x16xf32>
    %cst_65 = arith.constant dense<0.000000e+00> : vector<32x16xf32>
    %89 = tpu.matmul %86, %88, %cst_65 {dimension_numbers = #tpu.dot_dimension_numbers<[1], [0], [0], [1], [0, 0, 1, 1], [], []>} : vector<32x8xf32>, vector<8x16xf32>, vector<32x16xf32> -> vector<32x16xf32>
    %90 = arith.addf %83, %89 : vector<32x16xf32>
    %c6 = arith.constant 6 : index
    %c0_66 = arith.constant 0 : index
    %c0_67 = arith.constant 0 : index
    %91 = vector.load %arg3[%c6, %c0_66, %c0_67] : memref<9x32x128xf32, #tpu.memory_space<vmem>>, vector<1x32x128xf32>
    %92 = vector.shape_cast %91 : vector<1x32x128xf32> to vector<32x128xf32>
    %cst_68 = arith.constant dense<0.000000e+00> : vector<32x8xf32>
    %93 = tpu.matmul %92, %46, %cst_68 {dimension_numbers = #tpu.dot_dimension_numbers<[1], [0], [0], [1], [0, 0, 1, 1], [], []>} : vector<32x128xf32>, vector<128x8xf32>, vector<32x8xf32> -> vector<32x8xf32>
    %c6_69 = arith.constant 6 : index
    %c0_70 = arith.constant 0 : index
    %c0_71 = arith.constant 0 : index
    %94 = vector.load %arg4[%c6_69, %c0_70, %c0_71] : memref<9x8x16xf32, #tpu.memory_space<vmem>>, vector<1x8x16xf32>
    %95 = vector.shape_cast %94 : vector<1x8x16xf32> to vector<8x16xf32>
    %cst_72 = arith.constant dense<0.000000e+00> : vector<32x16xf32>
    %96 = tpu.matmul %93, %95, %cst_72 {dimension_numbers = #tpu.dot_dimension_numbers<[1], [0], [0], [1], [0, 0, 1, 1], [], []>} : vector<32x8xf32>, vector<8x16xf32>, vector<32x16xf32> -> vector<32x16xf32>
    %97 = arith.addf %90, %96 : vector<32x16xf32>
    %c7 = arith.constant 7 : index
    %c0_73 = arith.constant 0 : index
    %c0_74 = arith.constant 0 : index
    %98 = vector.load %arg3[%c7, %c0_73, %c0_74] : memref<9x32x128xf32, #tpu.memory_space<vmem>>, vector<1x32x128xf32>
    %99 = vector.shape_cast %98 : vector<1x32x128xf32> to vector<32x128xf32>
    %cst_75 = arith.constant dense<0.000000e+00> : vector<32x8xf32>
    %100 = tpu.matmul %99, %46, %cst_75 {dimension_numbers = #tpu.dot_dimension_numbers<[1], [0], [0], [1], [0, 0, 1, 1], [], []>} : vector<32x128xf32>, vector<128x8xf32>, vector<32x8xf32> -> vector<32x8xf32>
    %c7_76 = arith.constant 7 : index
    %c0_77 = arith.constant 0 : index
    %c0_78 = arith.constant 0 : index
    %101 = vector.load %arg4[%c7_76, %c0_77, %c0_78] : memref<9x8x16xf32, #tpu.memory_space<vmem>>, vector<1x8x16xf32>
    %102 = vector.shape_cast %101 : vector<1x8x16xf32> to vector<8x16xf32>
    %cst_79 = arith.constant dense<0.000000e+00> : vector<32x16xf32>
    %103 = tpu.matmul %100, %102, %cst_79 {dimension_numbers = #tpu.dot_dimension_numbers<[1], [0], [0], [1], [0, 0, 1, 1], [], []>} : vector<32x8xf32>, vector<8x16xf32>, vector<32x16xf32> -> vector<32x16xf32>
    %104 = arith.addf %97, %103 : vector<32x16xf32>
    %c8 = arith.constant 8 : index
    %c0_80 = arith.constant 0 : index
    %c0_81 = arith.constant 0 : index
    %105 = vector.load %arg3[%c8, %c0_80, %c0_81] : memref<9x32x128xf32, #tpu.memory_space<vmem>>, vector<1x32x128xf32>
    %106 = vector.shape_cast %105 : vector<1x32x128xf32> to vector<32x128xf32>
    %cst_82 = arith.constant dense<0.000000e+00> : vector<32x8xf32>
    %107 = tpu.matmul %106, %46, %cst_82 {dimension_numbers = #tpu.dot_dimension_numbers<[1], [0], [0], [1], [0, 0, 1, 1], [], []>} : vector<32x128xf32>, vector<128x8xf32>, vector<32x8xf32> -> vector<32x8xf32>
    %c8_83 = arith.constant 8 : index
    %c0_84 = arith.constant 0 : index
    %c0_85 = arith.constant 0 : index
    %108 = vector.load %arg4[%c8_83, %c0_84, %c0_85] : memref<9x8x16xf32, #tpu.memory_space<vmem>>, vector<1x8x16xf32>
    %109 = vector.shape_cast %108 : vector<1x8x16xf32> to vector<8x16xf32>
    %cst_86 = arith.constant dense<0.000000e+00> : vector<32x16xf32>
    %110 = tpu.matmul %107, %109, %cst_86 {dimension_numbers = #tpu.dot_dimension_numbers<[1], [0], [0], [1], [0, 0, 1, 1], [], []>} : vector<32x8xf32>, vector<8x16xf32>, vector<32x16xf32> -> vector<32x16xf32>
    %111 = arith.addf %104, %110 : vector<32x16xf32>
    %cst_87 = arith.constant 5.000000e-01 : f32
    %112 = vector.broadcast %cst_87 : f32 to vector<32x16xf32>
    %113 = arith.mulf %112, %111 : vector<32x16xf32>
    %cst_88 = arith.constant 0.707106769 : f32
    %114 = vector.broadcast %cst_88 : f32 to vector<32x16xf32>
    %115 = arith.mulf %111, %114 : vector<32x16xf32>
    %cst_89 = arith.constant 0.000000e+00 : f32
    %116 = vector.broadcast %cst_89 : f32 to vector<32x16xf32>
    %117 = arith.cmpf oge, %115, %116 : vector<32x16xf32>
    %cst_90 = arith.constant 1.000000e+00 : f32
    %cst_91 = arith.constant -1.000000e+00 : f32
    %118 = vector.broadcast %cst_90 : f32 to vector<32x16xf32>
    %119 = vector.broadcast %cst_91 : f32 to vector<32x16xf32>
    %120 = arith.select %117, %118, %119 : vector<32x16xi1>, vector<32x16xf32>
    %121 = math.absf %115 : vector<32x16xf32>
    %cst_92 = arith.constant 0.327591091 : f32
    %122 = vector.broadcast %cst_92 : f32 to vector<32x16xf32>
    %123 = arith.mulf %122, %121 : vector<32x16xf32>
    %cst_93 = arith.constant 1.000000e+00 : f32
    %124 = vector.broadcast %cst_93 : f32 to vector<32x16xf32>
    %125 = arith.addf %124, %123 : vector<32x16xf32>
    %cst_94 = arith.constant 1.000000e+00 : f32
    %126 = vector.broadcast %cst_94 : f32 to vector<32x16xf32>
    %127 = arith.divf %126, %125 : vector<32x16xf32>
    %cst_95 = arith.constant 1.06140542 : f32
    %128 = vector.broadcast %cst_95 : f32 to vector<32x16xf32>
    %129 = arith.mulf %128, %127 : vector<32x16xf32>
    %cst_96 = arith.constant -1.45315206 : f32
    %130 = vector.broadcast %cst_96 : f32 to vector<32x16xf32>
    %131 = arith.addf %129, %130 : vector<32x16xf32>
    %132 = arith.mulf %131, %127 : vector<32x16xf32>
    %cst_97 = arith.constant 1.42141378 : f32
    %133 = vector.broadcast %cst_97 : f32 to vector<32x16xf32>
    %134 = arith.addf %132, %133 : vector<32x16xf32>
    %135 = arith.mulf %134, %127 : vector<32x16xf32>
    %cst_98 = arith.constant -0.284496725 : f32
    %136 = vector.broadcast %cst_98 : f32 to vector<32x16xf32>
    %137 = arith.addf %135, %136 : vector<32x16xf32>
    %138 = arith.mulf %137, %127 : vector<32x16xf32>
    %cst_99 = arith.constant 0.254829586 : f32
    %139 = vector.broadcast %cst_99 : f32 to vector<32x16xf32>
    %140 = arith.addf %138, %139 : vector<32x16xf32>
    %141 = arith.mulf %140, %127 : vector<32x16xf32>
    %cst_100 = arith.constant 0.000000e+00 : f32
    %142 = vector.broadcast %cst_100 : f32 to vector<32x16xf32>
    %143 = arith.subf %142, %121 : vector<32x16xf32>
    %144 = arith.mulf %143, %121 : vector<32x16xf32>
    %145 = math.exp %144 : vector<32x16xf32>
    %146 = arith.mulf %141, %145 : vector<32x16xf32>
    %cst_101 = arith.constant 1.000000e+00 : f32
    %147 = vector.broadcast %cst_101 : f32 to vector<32x16xf32>
    %148 = arith.subf %147, %146 : vector<32x16xf32>
    %149 = arith.mulf %120, %148 : vector<32x16xf32>
    %cst_102 = arith.constant 1.000000e+00 : f32
    %150 = vector.broadcast %cst_102 : f32 to vector<32x16xf32>
    %151 = arith.addf %150, %149 : vector<32x16xf32>
    %152 = arith.mulf %113, %151 : vector<32x16xf32>
    %c0_103 = arith.constant 0 : index
    %c0_104 = arith.constant 0 : index
    %153 = vector.load %arg8[%c0_103, %c0_104] : memref<1x16xf32, #tpu.memory_space<vmem>>, vector<1x16xf32>
    %154 = vector.broadcast %153 : vector<1x16xf32> to vector<32x16xf32>
    %155 = arith.addf %152, %154 : vector<32x16xf32>
    %c0_105 = arith.constant 0 : index
    %c0_106 = arith.constant 0 : index
    %c0_107 = arith.constant 0 : index
    %156 = vector.load %arg6[%c0_105, %c0_106, %c0_107] : memref<9x32x32xf32, #tpu.memory_space<vmem>>, vector<1x32x32xf32>
    %157 = vector.shape_cast %156 : vector<1x32x32xf32> to vector<32x32xf32>
    %cst_108 = arith.constant dense<0.000000e+00> : vector<32x16xf32>
    %158 = tpu.matmul %157, %152, %cst_108 {dimension_numbers = #tpu.dot_dimension_numbers<[1], [0], [0], [1], [0, 0, 1, 1], [], []>} : vector<32x32xf32>, vector<32x16xf32>, vector<32x16xf32> -> vector<32x16xf32>
    %c0_109 = arith.constant 0 : index
    %c0_110 = arith.constant 0 : index
    %c0_111 = arith.constant 0 : index
    %159 = vector.load %arg7[%c0_109, %c0_110, %c0_111] : memref<9x1x16xf32, #tpu.memory_space<vmem>>, vector<1x1x16xf32>
    %160 = vector.shape_cast %159 : vector<1x1x16xf32> to vector<1x16xf32>
    %161 = vector.broadcast %160 : vector<1x16xf32> to vector<32x16xf32>
    %162 = arith.mulf %158, %161 : vector<32x16xf32>
    %163 = arith.addf %155, %162 : vector<32x16xf32>
    %c1_112 = arith.constant 1 : index
    %c0_113 = arith.constant 0 : index
    %c0_114 = arith.constant 0 : index
    %164 = vector.load %arg6[%c1_112, %c0_113, %c0_114] : memref<9x32x32xf32, #tpu.memory_space<vmem>>, vector<1x32x32xf32>
    %165 = vector.shape_cast %164 : vector<1x32x32xf32> to vector<32x32xf32>
    %cst_115 = arith.constant dense<0.000000e+00> : vector<32x16xf32>
    %166 = tpu.matmul %165, %152, %cst_115 {dimension_numbers = #tpu.dot_dimension_numbers<[1], [0], [0], [1], [0, 0, 1, 1], [], []>} : vector<32x32xf32>, vector<32x16xf32>, vector<32x16xf32> -> vector<32x16xf32>
    %c1_116 = arith.constant 1 : index
    %c0_117 = arith.constant 0 : index
    %c0_118 = arith.constant 0 : index
    %167 = vector.load %arg7[%c1_116, %c0_117, %c0_118] : memref<9x1x16xf32, #tpu.memory_space<vmem>>, vector<1x1x16xf32>
    %168 = vector.shape_cast %167 : vector<1x1x16xf32> to vector<1x16xf32>
    %169 = vector.broadcast %168 : vector<1x16xf32> to vector<32x16xf32>
    %170 = arith.mulf %166, %169 : vector<32x16xf32>
    %171 = arith.addf %163, %170 : vector<32x16xf32>
    %c2_119 = arith.constant 2 : index
    %c0_120 = arith.constant 0 : index
    %c0_121 = arith.constant 0 : index
    %172 = vector.load %arg6[%c2_119, %c0_120, %c0_121] : memref<9x32x32xf32, #tpu.memory_space<vmem>>, vector<1x32x32xf32>
    %173 = vector.shape_cast %172 : vector<1x32x32xf32> to vector<32x32xf32>
    %cst_122 = arith.constant dense<0.000000e+00> : vector<32x16xf32>
    %174 = tpu.matmul %173, %152, %cst_122 {dimension_numbers = #tpu.dot_dimension_numbers<[1], [0], [0], [1], [0, 0, 1, 1], [], []>} : vector<32x32xf32>, vector<32x16xf32>, vector<32x16xf32> -> vector<32x16xf32>
    %c2_123 = arith.constant 2 : index
    %c0_124 = arith.constant 0 : index
    %c0_125 = arith.constant 0 : index
    %175 = vector.load %arg7[%c2_123, %c0_124, %c0_125] : memref<9x1x16xf32, #tpu.memory_space<vmem>>, vector<1x1x16xf32>
    %176 = vector.shape_cast %175 : vector<1x1x16xf32> to vector<1x16xf32>
    %177 = vector.broadcast %176 : vector<1x16xf32> to vector<32x16xf32>
    %178 = arith.mulf %174, %177 : vector<32x16xf32>
    %179 = arith.addf %171, %178 : vector<32x16xf32>
    %c3_126 = arith.constant 3 : index
    %c0_127 = arith.constant 0 : index
    %c0_128 = arith.constant 0 : index
    %180 = vector.load %arg6[%c3_126, %c0_127, %c0_128] : memref<9x32x32xf32, #tpu.memory_space<vmem>>, vector<1x32x32xf32>
    %181 = vector.shape_cast %180 : vector<1x32x32xf32> to vector<32x32xf32>
    %cst_129 = arith.constant dense<0.000000e+00> : vector<32x16xf32>
    %182 = tpu.matmul %181, %152, %cst_129 {dimension_numbers = #tpu.dot_dimension_numbers<[1], [0], [0], [1], [0, 0, 1, 1], [], []>} : vector<32x32xf32>, vector<32x16xf32>, vector<32x16xf32> -> vector<32x16xf32>
    %c3_130 = arith.constant 3 : index
    %c0_131 = arith.constant 0 : index
    %c0_132 = arith.constant 0 : index
    %183 = vector.load %arg7[%c3_130, %c0_131, %c0_132] : memref<9x1x16xf32, #tpu.memory_space<vmem>>, vector<1x1x16xf32>
    %184 = vector.shape_cast %183 : vector<1x1x16xf32> to vector<1x16xf32>
    %185 = vector.broadcast %184 : vector<1x16xf32> to vector<32x16xf32>
    %186 = arith.mulf %182, %185 : vector<32x16xf32>
    %187 = arith.addf %179, %186 : vector<32x16xf32>
    %c4_133 = arith.constant 4 : index
    %c0_134 = arith.constant 0 : index
    %c0_135 = arith.constant 0 : index
    %188 = vector.load %arg6[%c4_133, %c0_134, %c0_135] : memref<9x32x32xf32, #tpu.memory_space<vmem>>, vector<1x32x32xf32>
    %189 = vector.shape_cast %188 : vector<1x32x32xf32> to vector<32x32xf32>
    %cst_136 = arith.constant dense<0.000000e+00> : vector<32x16xf32>
    %190 = tpu.matmul %189, %152, %cst_136 {dimension_numbers = #tpu.dot_dimension_numbers<[1], [0], [0], [1], [0, 0, 1, 1], [], []>} : vector<32x32xf32>, vector<32x16xf32>, vector<32x16xf32> -> vector<32x16xf32>
    %c4_137 = arith.constant 4 : index
    %c0_138 = arith.constant 0 : index
    %c0_139 = arith.constant 0 : index
    %191 = vector.load %arg7[%c4_137, %c0_138, %c0_139] : memref<9x1x16xf32, #tpu.memory_space<vmem>>, vector<1x1x16xf32>
    %192 = vector.shape_cast %191 : vector<1x1x16xf32> to vector<1x16xf32>
    %193 = vector.broadcast %192 : vector<1x16xf32> to vector<32x16xf32>
    %194 = arith.mulf %190, %193 : vector<32x16xf32>
    %195 = arith.addf %187, %194 : vector<32x16xf32>
    %c5_140 = arith.constant 5 : index
    %c0_141 = arith.constant 0 : index
    %c0_142 = arith.constant 0 : index
    %196 = vector.load %arg6[%c5_140, %c0_141, %c0_142] : memref<9x32x32xf32, #tpu.memory_space<vmem>>, vector<1x32x32xf32>
    %197 = vector.shape_cast %196 : vector<1x32x32xf32> to vector<32x32xf32>
    %cst_143 = arith.constant dense<0.000000e+00> : vector<32x16xf32>
    %198 = tpu.matmul %197, %152, %cst_143 {dimension_numbers = #tpu.dot_dimension_numbers<[1], [0], [0], [1], [0, 0, 1, 1], [], []>} : vector<32x32xf32>, vector<32x16xf32>, vector<32x16xf32> -> vector<32x16xf32>
    %c5_144 = arith.constant 5 : index
    %c0_145 = arith.constant 0 : index
    %c0_146 = arith.constant 0 : index
    %199 = vector.load %arg7[%c5_144, %c0_145, %c0_146] : memref<9x1x16xf32, #tpu.memory_space<vmem>>, vector<1x1x16xf32>
    %200 = vector.shape_cast %199 : vector<1x1x16xf32> to vector<1x16xf32>
    %201 = vector.broadcast %200 : vector<1x16xf32> to vector<32x16xf32>
    %202 = arith.mulf %198, %201 : vector<32x16xf32>
    %203 = arith.addf %195, %202 : vector<32x16xf32>
    %c6_147 = arith.constant 6 : index
    %c0_148 = arith.constant 0 : index
    %c0_149 = arith.constant 0 : index
    %204 = vector.load %arg6[%c6_147, %c0_148, %c0_149] : memref<9x32x32xf32, #tpu.memory_space<vmem>>, vector<1x32x32xf32>
    %205 = vector.shape_cast %204 : vector<1x32x32xf32> to vector<32x32xf32>
    %cst_150 = arith.constant dense<0.000000e+00> : vector<32x16xf32>
    %206 = tpu.matmul %205, %152, %cst_150 {dimension_numbers = #tpu.dot_dimension_numbers<[1], [0], [0], [1], [0, 0, 1, 1], [], []>} : vector<32x32xf32>, vector<32x16xf32>, vector<32x16xf32> -> vector<32x16xf32>
    %c6_151 = arith.constant 6 : index
    %c0_152 = arith.constant 0 : index
    %c0_153 = arith.constant 0 : index
    %207 = vector.load %arg7[%c6_151, %c0_152, %c0_153] : memref<9x1x16xf32, #tpu.memory_space<vmem>>, vector<1x1x16xf32>
    %208 = vector.shape_cast %207 : vector<1x1x16xf32> to vector<1x16xf32>
    %209 = vector.broadcast %208 : vector<1x16xf32> to vector<32x16xf32>
    %210 = arith.mulf %206, %209 : vector<32x16xf32>
    %211 = arith.addf %203, %210 : vector<32x16xf32>
    %c7_154 = arith.constant 7 : index
    %c0_155 = arith.constant 0 : index
    %c0_156 = arith.constant 0 : index
    %212 = vector.load %arg6[%c7_154, %c0_155, %c0_156] : memref<9x32x32xf32, #tpu.memory_space<vmem>>, vector<1x32x32xf32>
    %213 = vector.shape_cast %212 : vector<1x32x32xf32> to vector<32x32xf32>
    %cst_157 = arith.constant dense<0.000000e+00> : vector<32x16xf32>
    %214 = tpu.matmul %213, %152, %cst_157 {dimension_numbers = #tpu.dot_dimension_numbers<[1], [0], [0], [1], [0, 0, 1, 1], [], []>} : vector<32x32xf32>, vector<32x16xf32>, vector<32x16xf32> -> vector<32x16xf32>
    %c7_158 = arith.constant 7 : index
    %c0_159 = arith.constant 0 : index
    %c0_160 = arith.constant 0 : index
    %215 = vector.load %arg7[%c7_158, %c0_159, %c0_160] : memref<9x1x16xf32, #tpu.memory_space<vmem>>, vector<1x1x16xf32>
    %216 = vector.shape_cast %215 : vector<1x1x16xf32> to vector<1x16xf32>
    %217 = vector.broadcast %216 : vector<1x16xf32> to vector<32x16xf32>
    %218 = arith.mulf %214, %217 : vector<32x16xf32>
    %219 = arith.addf %211, %218 : vector<32x16xf32>
    %c8_161 = arith.constant 8 : index
    %c0_162 = arith.constant 0 : index
    %c0_163 = arith.constant 0 : index
    %220 = vector.load %arg6[%c8_161, %c0_162, %c0_163] : memref<9x32x32xf32, #tpu.memory_space<vmem>>, vector<1x32x32xf32>
    %221 = vector.shape_cast %220 : vector<1x32x32xf32> to vector<32x32xf32>
    %cst_164 = arith.constant dense<0.000000e+00> : vector<32x16xf32>
    %222 = tpu.matmul %221, %152, %cst_164 {dimension_numbers = #tpu.dot_dimension_numbers<[1], [0], [0], [1], [0, 0, 1, 1], [], []>} : vector<32x32xf32>, vector<32x16xf32>, vector<32x16xf32> -> vector<32x16xf32>
    %c8_165 = arith.constant 8 : index
    %c0_166 = arith.constant 0 : index
    %c0_167 = arith.constant 0 : index
    %223 = vector.load %arg7[%c8_165, %c0_166, %c0_167] : memref<9x1x16xf32, #tpu.memory_space<vmem>>, vector<1x1x16xf32>
    %224 = vector.shape_cast %223 : vector<1x1x16xf32> to vector<1x16xf32>
    %225 = vector.broadcast %224 : vector<1x16xf32> to vector<32x16xf32>
    %226 = arith.mulf %222, %225 : vector<32x16xf32>
    %227 = arith.addf %219, %226 : vector<32x16xf32>
    %c0_168 = arith.constant 0 : index
    %c0_169 = arith.constant 0 : index
    %228 = vector.load %arg9[%c0_168, %c0_169] : memref<1x16xf32, #tpu.memory_space<vmem>>, vector<1x16xf32>
    %c0_170 = arith.constant 0 : index
    %c0_171 = arith.constant 0 : index
    %229 = vector.load %arg10[%c0_170, %c0_171] : memref<1x16xf32, #tpu.memory_space<vmem>>, vector<1x16xf32>
    %cst_172 = arith.constant dense<0.000000e+00> : vector<32xf32>
    %230 = vector.multi_reduction <add>, %227, %cst_172 [1] : vector<32x16xf32> to vector<32xf32>
    %231 = vector.shape_cast %230 : vector<32xf32> to vector<32x1xf32>
    %cst_173 = arith.constant 1.600000e+01 : f32
    %232 = vector.broadcast %cst_173 : f32 to vector<32x1xf32>
    %233 = arith.divf %231, %232 : vector<32x1xf32>
    %234 = vector.broadcast %233 : vector<32x1xf32> to vector<32x16xf32>
    %235 = arith.subf %227, %234 : vector<32x16xf32>
    %236 = arith.mulf %235, %235 : vector<32x16xf32>
    %cst_174 = arith.constant dense<0.000000e+00> : vector<32xf32>
    %237 = vector.multi_reduction <add>, %236, %cst_174 [1] : vector<32x16xf32> to vector<32xf32>
    %238 = vector.shape_cast %237 : vector<32xf32> to vector<32x1xf32>
    %cst_175 = arith.constant 1.600000e+01 : f32
    %239 = vector.broadcast %cst_175 : f32 to vector<32x1xf32>
    %240 = arith.divf %238, %239 : vector<32x1xf32>
    %241 = vector.broadcast %233 : vector<32x1xf32> to vector<32x16xf32>
    %242 = arith.subf %227, %241 : vector<32x16xf32>
    %cst_176 = arith.constant 9.99999974E-6 : f32
    %243 = vector.broadcast %cst_176 : f32 to vector<32x1xf32>
    %244 = arith.addf %240, %243 : vector<32x1xf32>
    %245 = math.rsqrt %244 : vector<32x1xf32>
    %246 = vector.broadcast %245 : vector<32x1xf32> to vector<32x16xf32>
    %247 = arith.mulf %242, %246 : vector<32x16xf32>
    %248 = vector.broadcast %228 : vector<1x16xf32> to vector<32x16xf32>
    %249 = arith.mulf %247, %248 : vector<32x16xf32>
    %250 = vector.broadcast %229 : vector<1x16xf32> to vector<32x16xf32>
    %251 = arith.addf %249, %250 : vector<32x16xf32>
    %c0_177 = arith.constant 0 : index
    %c0_178 = arith.constant 0 : index
    %252 = vector.load %arg25[%c0_177, %c0_178] : memref<32x32xf32, #tpu.memory_space<vmem>>, vector<32x32xf32>
    %c0_179 = arith.constant 0 : index
    %c0_180 = arith.constant 0 : index
    %253 = vector.load %arg18[%c0_179, %c0_180] : memref<1x16xf32, #tpu.memory_space<vmem>>, vector<1x16xf32>
    %c0_181 = arith.constant 0 : index
    %c0_182 = arith.constant 0 : index
    %c0_183 = arith.constant 0 : index
    %254 = vector.load %arg11[%c0_181, %c0_182, %c0_183] : memref<2x16x8xf32, #tpu.memory_space<vmem>>, vector<1x16x8xf32>
    %255 = vector.shape_cast %254 : vector<1x16x8xf32> to vector<16x8xf32>
    %cst_184 = arith.constant dense<0.000000e+00> : vector<32x8xf32>
    %256 = tpu.matmul %251, %255, %cst_184 {dimension_numbers = #tpu.dot_dimension_numbers<[1], [0], [0], [1], [0, 0, 1, 1], [], []>} : vector<32x16xf32>, vector<16x8xf32>, vector<32x8xf32> -> vector<32x8xf32>
    %c0_185 = arith.constant 0 : index
    %c0_186 = arith.constant 0 : index
    %c0_187 = arith.constant 0 : index
    %257 = vector.load %arg14[%c0_185, %c0_186, %c0_187] : memref<2x1x8xf32, #tpu.memory_space<vmem>>, vector<1x1x8xf32>
    %258 = vector.shape_cast %257 : vector<1x1x8xf32> to vector<1x8xf32>
    %259 = vector.broadcast %258 : vector<1x8xf32> to vector<32x8xf32>
    %260 = arith.addf %256, %259 : vector<32x8xf32>
    %c0_188 = arith.constant 0 : index
    %c0_189 = arith.constant 0 : index
    %c0_190 = arith.constant 0 : index
    %261 = vector.load %arg12[%c0_188, %c0_189, %c0_190] : memref<2x16x8xf32, #tpu.memory_space<vmem>>, vector<1x16x8xf32>
    %262 = vector.shape_cast %261 : vector<1x16x8xf32> to vector<16x8xf32>
    %cst_191 = arith.constant dense<0.000000e+00> : vector<32x8xf32>
    %263 = tpu.matmul %251, %262, %cst_191 {dimension_numbers = #tpu.dot_dimension_numbers<[1], [0], [0], [1], [0, 0, 1, 1], [], []>} : vector<32x16xf32>, vector<16x8xf32>, vector<32x8xf32> -> vector<32x8xf32>
    %c0_192 = arith.constant 0 : index
    %c0_193 = arith.constant 0 : index
    %c0_194 = arith.constant 0 : index
    %264 = vector.load %arg15[%c0_192, %c0_193, %c0_194] : memref<2x1x8xf32, #tpu.memory_space<vmem>>, vector<1x1x8xf32>
    %265 = vector.shape_cast %264 : vector<1x1x8xf32> to vector<1x8xf32>
    %266 = vector.broadcast %265 : vector<1x8xf32> to vector<32x8xf32>
    %267 = arith.addf %263, %266 : vector<32x8xf32>
    %c0_195 = arith.constant 0 : index
    %c0_196 = arith.constant 0 : index
    %c0_197 = arith.constant 0 : index
    %268 = vector.load %arg13[%c0_195, %c0_196, %c0_197] : memref<2x16x8xf32, #tpu.memory_space<vmem>>, vector<1x16x8xf32>
    %269 = vector.shape_cast %268 : vector<1x16x8xf32> to vector<16x8xf32>
    %cst_198 = arith.constant dense<0.000000e+00> : vector<32x8xf32>
    %270 = tpu.matmul %251, %269, %cst_198 {dimension_numbers = #tpu.dot_dimension_numbers<[1], [0], [0], [1], [0, 0, 1, 1], [], []>} : vector<32x16xf32>, vector<16x8xf32>, vector<32x8xf32> -> vector<32x8xf32>
    %c0_199 = arith.constant 0 : index
    %c0_200 = arith.constant 0 : index
    %c0_201 = arith.constant 0 : index
    %271 = vector.load %arg16[%c0_199, %c0_200, %c0_201] : memref<2x1x8xf32, #tpu.memory_space<vmem>>, vector<1x1x8xf32>
    %272 = vector.shape_cast %271 : vector<1x1x8xf32> to vector<1x8xf32>
    %273 = vector.broadcast %272 : vector<1x8xf32> to vector<32x8xf32>
    %274 = arith.addf %270, %273 : vector<32x8xf32>
    %275 = arith.mulf %260, %260 : vector<32x8xf32>
    %cst_202 = arith.constant dense<0.000000e+00> : vector<32xf32>
    %276 = vector.multi_reduction <add>, %275, %cst_202 [1] : vector<32x8xf32> to vector<32xf32>
    %277 = vector.shape_cast %276 : vector<32xf32> to vector<32x1xf32>
    %cst_203 = arith.constant 1.000000e-24 : f32
    %278 = vector.broadcast %cst_203 : f32 to vector<32x1xf32>
    %279 = arith.maximumf %277, %278 : vector<32x1xf32>
    %280 = math.rsqrt %279 : vector<32x1xf32>
    %281 = vector.broadcast %280 : vector<32x1xf32> to vector<32x8xf32>
    %282 = arith.mulf %260, %281 : vector<32x8xf32>
    %283 = arith.mulf %267, %267 : vector<32x8xf32>
    %cst_204 = arith.constant dense<0.000000e+00> : vector<32xf32>
    %284 = vector.multi_reduction <add>, %283, %cst_204 [1] : vector<32x8xf32> to vector<32xf32>
    %285 = vector.shape_cast %284 : vector<32xf32> to vector<32x1xf32>
    %cst_205 = arith.constant 1.000000e-24 : f32
    %286 = vector.broadcast %cst_205 : f32 to vector<32x1xf32>
    %287 = arith.maximumf %285, %286 : vector<32x1xf32>
    %288 = math.rsqrt %287 : vector<32x1xf32>
    %289 = vector.broadcast %288 : vector<32x1xf32> to vector<32x8xf32>
    %290 = arith.mulf %267, %289 : vector<32x8xf32>
    %cst_206 = arith.constant dense<0.000000e+00> : vector<32x32xf32>
    %291 = tpu.matmul %282, %290, %cst_206 {dimension_numbers = #tpu.dot_dimension_numbers<[1], [1], [0], [0], [0, 0, 1, 0], [], []>} : vector<32x8xf32>, vector<32x8xf32>, vector<32x32xf32> -> vector<32x32xf32>
    %cst_207 = arith.constant 1.000000e+01 : f32
    %292 = vector.broadcast %cst_207 : f32 to vector<32x32xf32>
    %293 = arith.mulf %291, %292 : vector<32x32xf32>
    %294 = arith.addf %293, %252 : vector<32x32xf32>
    %cst_208 = arith.constant dense<0xFF800000> : vector<32xf32>
    %295 = vector.multi_reduction <maximumf>, %294, %cst_208 [1] : vector<32x32xf32> to vector<32xf32>
    %296 = vector.shape_cast %295 : vector<32xf32> to vector<32x1xf32>
    %297 = vector.broadcast %296 : vector<32x1xf32> to vector<32x32xf32>
    %298 = arith.subf %294, %297 : vector<32x32xf32>
    %299 = math.exp %298 : vector<32x32xf32>
    %cst_209 = arith.constant dense<0.000000e+00> : vector<32xf32>
    %300 = vector.multi_reduction <add>, %299, %cst_209 [1] : vector<32x32xf32> to vector<32xf32>
    %301 = vector.shape_cast %300 : vector<32xf32> to vector<32x1xf32>
    %302 = vector.broadcast %301 : vector<32x1xf32> to vector<32x32xf32>
    %303 = arith.divf %299, %302 : vector<32x32xf32>
    %cst_210 = arith.constant dense<0.000000e+00> : vector<32x8xf32>
    %304 = tpu.matmul %303, %274, %cst_210 {dimension_numbers = #tpu.dot_dimension_numbers<[1], [0], [0], [1], [0, 0, 1, 1], [], []>} : vector<32x32xf32>, vector<32x8xf32>, vector<32x8xf32> -> vector<32x8xf32>
    %c0_211 = arith.constant 0 : index
    %c0_212 = arith.constant 0 : index
    %c0_213 = arith.constant 0 : index
    %305 = vector.load %arg17[%c0_211, %c0_212, %c0_213] : memref<2x8x16xf32, #tpu.memory_space<vmem>>, vector<1x8x16xf32>
    %306 = vector.shape_cast %305 : vector<1x8x16xf32> to vector<8x16xf32>
    %cst_214 = arith.constant dense<0.000000e+00> : vector<32x16xf32>
    %307 = tpu.matmul %304, %306, %cst_214 {dimension_numbers = #tpu.dot_dimension_numbers<[1], [0], [0], [1], [0, 0, 1, 1], [], []>} : vector<32x8xf32>, vector<8x16xf32>, vector<32x16xf32> -> vector<32x16xf32>
    %308 = vector.broadcast %253 : vector<1x16xf32> to vector<32x16xf32>
    %309 = arith.addf %308, %307 : vector<32x16xf32>
    %c1_215 = arith.constant 1 : index
    %c0_216 = arith.constant 0 : index
    %c0_217 = arith.constant 0 : index
    %310 = vector.load %arg11[%c1_215, %c0_216, %c0_217] : memref<2x16x8xf32, #tpu.memory_space<vmem>>, vector<1x16x8xf32>
    %311 = vector.shape_cast %310 : vector<1x16x8xf32> to vector<16x8xf32>
    %cst_218 = arith.constant dense<0.000000e+00> : vector<32x8xf32>
    %312 = tpu.matmul %251, %311, %cst_218 {dimension_numbers = #tpu.dot_dimension_numbers<[1], [0], [0], [1], [0, 0, 1, 1], [], []>} : vector<32x16xf32>, vector<16x8xf32>, vector<32x8xf32> -> vector<32x8xf32>
    %c1_219 = arith.constant 1 : index
    %c0_220 = arith.constant 0 : index
    %c0_221 = arith.constant 0 : index
    %313 = vector.load %arg14[%c1_219, %c0_220, %c0_221] : memref<2x1x8xf32, #tpu.memory_space<vmem>>, vector<1x1x8xf32>
    %314 = vector.shape_cast %313 : vector<1x1x8xf32> to vector<1x8xf32>
    %315 = vector.broadcast %314 : vector<1x8xf32> to vector<32x8xf32>
    %316 = arith.addf %312, %315 : vector<32x8xf32>
    %c1_222 = arith.constant 1 : index
    %c0_223 = arith.constant 0 : index
    %c0_224 = arith.constant 0 : index
    %317 = vector.load %arg12[%c1_222, %c0_223, %c0_224] : memref<2x16x8xf32, #tpu.memory_space<vmem>>, vector<1x16x8xf32>
    %318 = vector.shape_cast %317 : vector<1x16x8xf32> to vector<16x8xf32>
    %cst_225 = arith.constant dense<0.000000e+00> : vector<32x8xf32>
    %319 = tpu.matmul %251, %318, %cst_225 {dimension_numbers = #tpu.dot_dimension_numbers<[1], [0], [0], [1], [0, 0, 1, 1], [], []>} : vector<32x16xf32>, vector<16x8xf32>, vector<32x8xf32> -> vector<32x8xf32>
    %c1_226 = arith.constant 1 : index
    %c0_227 = arith.constant 0 : index
    %c0_228 = arith.constant 0 : index
    %320 = vector.load %arg15[%c1_226, %c0_227, %c0_228] : memref<2x1x8xf32, #tpu.memory_space<vmem>>, vector<1x1x8xf32>
    %321 = vector.shape_cast %320 : vector<1x1x8xf32> to vector<1x8xf32>
    %322 = vector.broadcast %321 : vector<1x8xf32> to vector<32x8xf32>
    %323 = arith.addf %319, %322 : vector<32x8xf32>
    %c1_229 = arith.constant 1 : index
    %c0_230 = arith.constant 0 : index
    %c0_231 = arith.constant 0 : index
    %324 = vector.load %arg13[%c1_229, %c0_230, %c0_231] : memref<2x16x8xf32, #tpu.memory_space<vmem>>, vector<1x16x8xf32>
    %325 = vector.shape_cast %324 : vector<1x16x8xf32> to vector<16x8xf32>
    %cst_232 = arith.constant dense<0.000000e+00> : vector<32x8xf32>
    %326 = tpu.matmul %251, %325, %cst_232 {dimension_numbers = #tpu.dot_dimension_numbers<[1], [0], [0], [1], [0, 0, 1, 1], [], []>} : vector<32x16xf32>, vector<16x8xf32>, vector<32x8xf32> -> vector<32x8xf32>
    %c1_233 = arith.constant 1 : index
    %c0_234 = arith.constant 0 : index
    %c0_235 = arith.constant 0 : index
    %327 = vector.load %arg16[%c1_233, %c0_234, %c0_235] : memref<2x1x8xf32, #tpu.memory_space<vmem>>, vector<1x1x8xf32>
    %328 = vector.shape_cast %327 : vector<1x1x8xf32> to vector<1x8xf32>
    %329 = vector.broadcast %328 : vector<1x8xf32> to vector<32x8xf32>
    %330 = arith.addf %326, %329 : vector<32x8xf32>
    %331 = arith.mulf %316, %316 : vector<32x8xf32>
    %cst_236 = arith.constant dense<0.000000e+00> : vector<32xf32>
    %332 = vector.multi_reduction <add>, %331, %cst_236 [1] : vector<32x8xf32> to vector<32xf32>
    %333 = vector.shape_cast %332 : vector<32xf32> to vector<32x1xf32>
    %cst_237 = arith.constant 1.000000e-24 : f32
    %334 = vector.broadcast %cst_237 : f32 to vector<32x1xf32>
    %335 = arith.maximumf %333, %334 : vector<32x1xf32>
    %336 = math.rsqrt %335 : vector<32x1xf32>
    %337 = vector.broadcast %336 : vector<32x1xf32> to vector<32x8xf32>
    %338 = arith.mulf %316, %337 : vector<32x8xf32>
    %339 = arith.mulf %323, %323 : vector<32x8xf32>
    %cst_238 = arith.constant dense<0.000000e+00> : vector<32xf32>
    %340 = vector.multi_reduction <add>, %339, %cst_238 [1] : vector<32x8xf32> to vector<32xf32>
    %341 = vector.shape_cast %340 : vector<32xf32> to vector<32x1xf32>
    %cst_239 = arith.constant 1.000000e-24 : f32
    %342 = vector.broadcast %cst_239 : f32 to vector<32x1xf32>
    %343 = arith.maximumf %341, %342 : vector<32x1xf32>
    %344 = math.rsqrt %343 : vector<32x1xf32>
    %345 = vector.broadcast %344 : vector<32x1xf32> to vector<32x8xf32>
    %346 = arith.mulf %323, %345 : vector<32x8xf32>
    %cst_240 = arith.constant dense<0.000000e+00> : vector<32x32xf32>
    %347 = tpu.matmul %338, %346, %cst_240 {dimension_numbers = #tpu.dot_dimension_numbers<[1], [1], [0], [0], [0, 0, 1, 0], [], []>} : vector<32x8xf32>, vector<32x8xf32>, vector<32x32xf32> -> vector<32x32xf32>
    %cst_241 = arith.constant 1.000000e+01 : f32
    %348 = vector.broadcast %cst_241 : f32 to vector<32x32xf32>
    %349 = arith.mulf %347, %348 : vector<32x32xf32>
    %350 = arith.addf %349, %252 : vector<32x32xf32>
    %cst_242 = arith.constant dense<0xFF800000> : vector<32xf32>
    %351 = vector.multi_reduction <maximumf>, %350, %cst_242 [1] : vector<32x32xf32> to vector<32xf32>
    %352 = vector.shape_cast %351 : vector<32xf32> to vector<32x1xf32>
    %353 = vector.broadcast %352 : vector<32x1xf32> to vector<32x32xf32>
    %354 = arith.subf %350, %353 : vector<32x32xf32>
    %355 = math.exp %354 : vector<32x32xf32>
    %cst_243 = arith.constant dense<0.000000e+00> : vector<32xf32>
    %356 = vector.multi_reduction <add>, %355, %cst_243 [1] : vector<32x32xf32> to vector<32xf32>
    %357 = vector.shape_cast %356 : vector<32xf32> to vector<32x1xf32>
    %358 = vector.broadcast %357 : vector<32x1xf32> to vector<32x32xf32>
    %359 = arith.divf %355, %358 : vector<32x32xf32>
    %cst_244 = arith.constant dense<0.000000e+00> : vector<32x8xf32>
    %360 = tpu.matmul %359, %330, %cst_244 {dimension_numbers = #tpu.dot_dimension_numbers<[1], [0], [0], [1], [0, 0, 1, 1], [], []>} : vector<32x32xf32>, vector<32x8xf32>, vector<32x8xf32> -> vector<32x8xf32>
    %c1_245 = arith.constant 1 : index
    %c0_246 = arith.constant 0 : index
    %c0_247 = arith.constant 0 : index
    %361 = vector.load %arg17[%c1_245, %c0_246, %c0_247] : memref<2x8x16xf32, #tpu.memory_space<vmem>>, vector<1x8x16xf32>
    %362 = vector.shape_cast %361 : vector<1x8x16xf32> to vector<8x16xf32>
    %cst_248 = arith.constant dense<0.000000e+00> : vector<32x16xf32>
    %363 = tpu.matmul %360, %362, %cst_248 {dimension_numbers = #tpu.dot_dimension_numbers<[1], [0], [0], [1], [0, 0, 1, 1], [], []>} : vector<32x8xf32>, vector<8x16xf32>, vector<32x16xf32> -> vector<32x16xf32>
    %364 = arith.addf %309, %363 : vector<32x16xf32>
    %365 = arith.addf %227, %364 : vector<32x16xf32>
    %c0_249 = arith.constant 0 : index
    %c0_250 = arith.constant 0 : index
    %366 = vector.load %arg19[%c0_249, %c0_250] : memref<1x16xf32, #tpu.memory_space<vmem>>, vector<1x16xf32>
    %c0_251 = arith.constant 0 : index
    %c0_252 = arith.constant 0 : index
    %367 = vector.load %arg20[%c0_251, %c0_252] : memref<1x16xf32, #tpu.memory_space<vmem>>, vector<1x16xf32>
    %cst_253 = arith.constant dense<0.000000e+00> : vector<32xf32>
    %368 = vector.multi_reduction <add>, %365, %cst_253 [1] : vector<32x16xf32> to vector<32xf32>
    %369 = vector.shape_cast %368 : vector<32xf32> to vector<32x1xf32>
    %cst_254 = arith.constant 1.600000e+01 : f32
    %370 = vector.broadcast %cst_254 : f32 to vector<32x1xf32>
    %371 = arith.divf %369, %370 : vector<32x1xf32>
    %372 = vector.broadcast %371 : vector<32x1xf32> to vector<32x16xf32>
    %373 = arith.subf %365, %372 : vector<32x16xf32>
    %374 = arith.mulf %373, %373 : vector<32x16xf32>
    %cst_255 = arith.constant dense<0.000000e+00> : vector<32xf32>
    %375 = vector.multi_reduction <add>, %374, %cst_255 [1] : vector<32x16xf32> to vector<32xf32>
    %376 = vector.shape_cast %375 : vector<32xf32> to vector<32x1xf32>
    %cst_256 = arith.constant 1.600000e+01 : f32
    %377 = vector.broadcast %cst_256 : f32 to vector<32x1xf32>
    %378 = arith.divf %376, %377 : vector<32x1xf32>
    %379 = vector.broadcast %371 : vector<32x1xf32> to vector<32x16xf32>
    %380 = arith.subf %365, %379 : vector<32x16xf32>
    %cst_257 = arith.constant 9.99999974E-6 : f32
    %381 = vector.broadcast %cst_257 : f32 to vector<32x1xf32>
    %382 = arith.addf %378, %381 : vector<32x1xf32>
    %383 = math.rsqrt %382 : vector<32x1xf32>
    %384 = vector.broadcast %383 : vector<32x1xf32> to vector<32x16xf32>
    %385 = arith.mulf %380, %384 : vector<32x16xf32>
    %386 = vector.broadcast %366 : vector<1x16xf32> to vector<32x16xf32>
    %387 = arith.mulf %385, %386 : vector<32x16xf32>
    %388 = vector.broadcast %367 : vector<1x16xf32> to vector<32x16xf32>
    %389 = arith.addf %387, %388 : vector<32x16xf32>
    %c0_258 = arith.constant 0 : index
    %c0_259 = arith.constant 0 : index
    %390 = vector.load %arg21[%c0_258, %c0_259] : memref<16x32xf32, #tpu.memory_space<vmem>>, vector<16x32xf32>
    %cst_260 = arith.constant dense<0.000000e+00> : vector<32x32xf32>
    %391 = tpu.matmul %389, %390, %cst_260 {dimension_numbers = #tpu.dot_dimension_numbers<[1], [0], [0], [1], [0, 0, 1, 1], [], []>} : vector<32x16xf32>, vector<16x32xf32>, vector<32x32xf32> -> vector<32x32xf32>
    %c0_261 = arith.constant 0 : index
    %c0_262 = arith.constant 0 : index
    %392 = vector.load %arg22[%c0_261, %c0_262] : memref<1x32xf32, #tpu.memory_space<vmem>>, vector<1x32xf32>
    %393 = vector.broadcast %392 : vector<1x32xf32> to vector<32x32xf32>
    %394 = arith.addf %391, %393 : vector<32x32xf32>
    %cst_263 = arith.constant 5.000000e-01 : f32
    %395 = vector.broadcast %cst_263 : f32 to vector<32x32xf32>
    %396 = arith.mulf %395, %394 : vector<32x32xf32>
    %cst_264 = arith.constant 0.707106769 : f32
    %397 = vector.broadcast %cst_264 : f32 to vector<32x32xf32>
    %398 = arith.mulf %394, %397 : vector<32x32xf32>
    %cst_265 = arith.constant 0.000000e+00 : f32
    %399 = vector.broadcast %cst_265 : f32 to vector<32x32xf32>
    %400 = arith.cmpf oge, %398, %399 : vector<32x32xf32>
    %cst_266 = arith.constant 1.000000e+00 : f32
    %cst_267 = arith.constant -1.000000e+00 : f32
    %401 = vector.broadcast %cst_266 : f32 to vector<32x32xf32>
    %402 = vector.broadcast %cst_267 : f32 to vector<32x32xf32>
    %403 = arith.select %400, %401, %402 : vector<32x32xi1>, vector<32x32xf32>
    %404 = math.absf %398 : vector<32x32xf32>
    %cst_268 = arith.constant 0.327591091 : f32
    %405 = vector.broadcast %cst_268 : f32 to vector<32x32xf32>
    %406 = arith.mulf %405, %404 : vector<32x32xf32>
    %cst_269 = arith.constant 1.000000e+00 : f32
    %407 = vector.broadcast %cst_269 : f32 to vector<32x32xf32>
    %408 = arith.addf %407, %406 : vector<32x32xf32>
    %cst_270 = arith.constant 1.000000e+00 : f32
    %409 = vector.broadcast %cst_270 : f32 to vector<32x32xf32>
    %410 = arith.divf %409, %408 : vector<32x32xf32>
    %cst_271 = arith.constant 1.06140542 : f32
    %411 = vector.broadcast %cst_271 : f32 to vector<32x32xf32>
    %412 = arith.mulf %411, %410 : vector<32x32xf32>
    %cst_272 = arith.constant -1.45315206 : f32
    %413 = vector.broadcast %cst_272 : f32 to vector<32x32xf32>
    %414 = arith.addf %412, %413 : vector<32x32xf32>
    %415 = arith.mulf %414, %410 : vector<32x32xf32>
    %cst_273 = arith.constant 1.42141378 : f32
    %416 = vector.broadcast %cst_273 : f32 to vector<32x32xf32>
    %417 = arith.addf %415, %416 : vector<32x32xf32>
    %418 = arith.mulf %417, %410 : vector<32x32xf32>
    %cst_274 = arith.constant -0.284496725 : f32
    %419 = vector.broadcast %cst_274 : f32 to vector<32x32xf32>
    %420 = arith.addf %418, %419 : vector<32x32xf32>
    %421 = arith.mulf %420, %410 : vector<32x32xf32>
    %cst_275 = arith.constant 0.254829586 : f32
    %422 = vector.broadcast %cst_275 : f32 to vector<32x32xf32>
    %423 = arith.addf %421, %422 : vector<32x32xf32>
    %424 = arith.mulf %423, %410 : vector<32x32xf32>
    %cst_276 = arith.constant 0.000000e+00 : f32
    %425 = vector.broadcast %cst_276 : f32 to vector<32x32xf32>
    %426 = arith.subf %425, %404 : vector<32x32xf32>
    %427 = arith.mulf %426, %404 : vector<32x32xf32>
    %428 = math.exp %427 : vector<32x32xf32>
    %429 = arith.mulf %424, %428 : vector<32x32xf32>
    %cst_277 = arith.constant 1.000000e+00 : f32
    %430 = vector.broadcast %cst_277 : f32 to vector<32x32xf32>
    %431 = arith.subf %430, %429 : vector<32x32xf32>
    %432 = arith.mulf %403, %431 : vector<32x32xf32>
    %cst_278 = arith.constant 1.000000e+00 : f32
    %433 = vector.broadcast %cst_278 : f32 to vector<32x32xf32>
    %434 = arith.addf %433, %432 : vector<32x32xf32>
    %435 = arith.mulf %396, %434 : vector<32x32xf32>
    %c0_279 = arith.constant 0 : index
    %c0_280 = arith.constant 0 : index
    %436 = vector.load %arg23[%c0_279, %c0_280] : memref<32x16xf32, #tpu.memory_space<vmem>>, vector<32x16xf32>
    %cst_281 = arith.constant dense<0.000000e+00> : vector<32x16xf32>
    %437 = tpu.matmul %435, %436, %cst_281 {dimension_numbers = #tpu.dot_dimension_numbers<[1], [0], [0], [1], [0, 0, 1, 1], [], []>} : vector<32x32xf32>, vector<32x16xf32>, vector<32x16xf32> -> vector<32x16xf32>
    %438 = arith.addf %365, %437 : vector<32x16xf32>
    %c0_282 = arith.constant 0 : index
    %c0_283 = arith.constant 0 : index
    %439 = vector.load %arg24[%c0_282, %c0_283] : memref<1x16xf32, #tpu.memory_space<vmem>>, vector<1x16xf32>
    %440 = vector.broadcast %439 : vector<1x16xf32> to vector<32x16xf32>
    %441 = arith.addf %438, %440 : vector<32x16xf32>
    %c0_284 = arith.constant 0 : index
    %c0_285 = arith.constant 0 : index
    %442 = vector.load %arg28[%c0_284, %c0_285] : memref<1x32xf32, #tpu.memory_space<vmem>>, vector<1x32xf32>
    %c0_286 = arith.constant 0 : index
    %c0_287 = arith.constant 0 : index
    %c0_288 = arith.constant 0 : index
    %443 = vector.load %arg26[%c0_286, %c0_287, %c0_288] : memref<4x8x32xf32, #tpu.memory_space<vmem>>, vector<1x8x32xf32>
    %444 = vector.shape_cast %443 : vector<1x8x32xf32> to vector<8x32xf32>
    %cst_289 = arith.constant dense<0.000000e+00> : vector<8x16xf32>
    %445 = tpu.matmul %444, %441, %cst_289 {dimension_numbers = #tpu.dot_dimension_numbers<[1], [0], [0], [1], [0, 0, 1, 1], [], []>} : vector<8x32xf32>, vector<32x16xf32>, vector<8x16xf32> -> vector<8x16xf32>
    %c0_290 = arith.constant 0 : index
    %c0_291 = arith.constant 0 : index
    %c0_292 = arith.constant 0 : index
    %446 = vector.load %arg27[%c0_290, %c0_291, %c0_292] : memref<4x16x32xf32, #tpu.memory_space<vmem>>, vector<1x16x32xf32>
    %447 = vector.shape_cast %446 : vector<1x16x32xf32> to vector<16x32xf32>
    %cst_293 = arith.constant dense<0.000000e+00> : vector<8x32xf32>
    %448 = tpu.matmul %445, %447, %cst_293 {dimension_numbers = #tpu.dot_dimension_numbers<[1], [0], [0], [1], [0, 0, 1, 1], [], []>} : vector<8x16xf32>, vector<16x32xf32>, vector<8x32xf32> -> vector<8x32xf32>
    %449 = vector.broadcast %442 : vector<1x32xf32> to vector<8x32xf32>
    %450 = arith.addf %449, %448 : vector<8x32xf32>
    %c1_294 = arith.constant 1 : index
    %c0_295 = arith.constant 0 : index
    %c0_296 = arith.constant 0 : index
    %451 = vector.load %arg26[%c1_294, %c0_295, %c0_296] : memref<4x8x32xf32, #tpu.memory_space<vmem>>, vector<1x8x32xf32>
    %452 = vector.shape_cast %451 : vector<1x8x32xf32> to vector<8x32xf32>
    %cst_297 = arith.constant dense<0.000000e+00> : vector<8x16xf32>
    %453 = tpu.matmul %452, %441, %cst_297 {dimension_numbers = #tpu.dot_dimension_numbers<[1], [0], [0], [1], [0, 0, 1, 1], [], []>} : vector<8x32xf32>, vector<32x16xf32>, vector<8x16xf32> -> vector<8x16xf32>
    %c1_298 = arith.constant 1 : index
    %c0_299 = arith.constant 0 : index
    %c0_300 = arith.constant 0 : index
    %454 = vector.load %arg27[%c1_298, %c0_299, %c0_300] : memref<4x16x32xf32, #tpu.memory_space<vmem>>, vector<1x16x32xf32>
    %455 = vector.shape_cast %454 : vector<1x16x32xf32> to vector<16x32xf32>
    %cst_301 = arith.constant dense<0.000000e+00> : vector<8x32xf32>
    %456 = tpu.matmul %453, %455, %cst_301 {dimension_numbers = #tpu.dot_dimension_numbers<[1], [0], [0], [1], [0, 0, 1, 1], [], []>} : vector<8x16xf32>, vector<16x32xf32>, vector<8x32xf32> -> vector<8x32xf32>
    %457 = arith.addf %450, %456 : vector<8x32xf32>
    %c2_302 = arith.constant 2 : index
    %c0_303 = arith.constant 0 : index
    %c0_304 = arith.constant 0 : index
    %458 = vector.load %arg26[%c2_302, %c0_303, %c0_304] : memref<4x8x32xf32, #tpu.memory_space<vmem>>, vector<1x8x32xf32>
    %459 = vector.shape_cast %458 : vector<1x8x32xf32> to vector<8x32xf32>
    %cst_305 = arith.constant dense<0.000000e+00> : vector<8x16xf32>
    %460 = tpu.matmul %459, %441, %cst_305 {dimension_numbers = #tpu.dot_dimension_numbers<[1], [0], [0], [1], [0, 0, 1, 1], [], []>} : vector<8x32xf32>, vector<32x16xf32>, vector<8x16xf32> -> vector<8x16xf32>
    %c2_306 = arith.constant 2 : index
    %c0_307 = arith.constant 0 : index
    %c0_308 = arith.constant 0 : index
    %461 = vector.load %arg27[%c2_306, %c0_307, %c0_308] : memref<4x16x32xf32, #tpu.memory_space<vmem>>, vector<1x16x32xf32>
    %462 = vector.shape_cast %461 : vector<1x16x32xf32> to vector<16x32xf32>
    %cst_309 = arith.constant dense<0.000000e+00> : vector<8x32xf32>
    %463 = tpu.matmul %460, %462, %cst_309 {dimension_numbers = #tpu.dot_dimension_numbers<[1], [0], [0], [1], [0, 0, 1, 1], [], []>} : vector<8x16xf32>, vector<16x32xf32>, vector<8x32xf32> -> vector<8x32xf32>
    %464 = arith.addf %457, %463 : vector<8x32xf32>
    %c3_310 = arith.constant 3 : index
    %c0_311 = arith.constant 0 : index
    %c0_312 = arith.constant 0 : index
    %465 = vector.load %arg26[%c3_310, %c0_311, %c0_312] : memref<4x8x32xf32, #tpu.memory_space<vmem>>, vector<1x8x32xf32>
    %466 = vector.shape_cast %465 : vector<1x8x32xf32> to vector<8x32xf32>
    %cst_313 = arith.constant dense<0.000000e+00> : vector<8x16xf32>
    %467 = tpu.matmul %466, %441, %cst_313 {dimension_numbers = #tpu.dot_dimension_numbers<[1], [0], [0], [1], [0, 0, 1, 1], [], []>} : vector<8x32xf32>, vector<32x16xf32>, vector<8x16xf32> -> vector<8x16xf32>
    %c3_314 = arith.constant 3 : index
    %c0_315 = arith.constant 0 : index
    %c0_316 = arith.constant 0 : index
    %468 = vector.load %arg27[%c3_314, %c0_315, %c0_316] : memref<4x16x32xf32, #tpu.memory_space<vmem>>, vector<1x16x32xf32>
    %469 = vector.shape_cast %468 : vector<1x16x32xf32> to vector<16x32xf32>
    %cst_317 = arith.constant dense<0.000000e+00> : vector<8x32xf32>
    %470 = tpu.matmul %467, %469, %cst_317 {dimension_numbers = #tpu.dot_dimension_numbers<[1], [0], [0], [1], [0, 0, 1, 1], [], []>} : vector<8x16xf32>, vector<16x32xf32>, vector<8x32xf32> -> vector<8x32xf32>
    %471 = arith.addf %464, %470 : vector<8x32xf32>
    %c0_318 = arith.constant 0 : index
    %c0_319 = arith.constant 0 : index
    %472 = vector.load %arg31[%c0_318, %c0_319] : memref<1x32xf32, #tpu.memory_space<vmem>>, vector<1x32xf32>
    %473 = vector.broadcast %472 : vector<1x32xf32> to vector<8x32xf32>
    %474 = arith.addf %471, %473 : vector<8x32xf32>
    %c0_320 = arith.constant 0 : index
    %c0_321 = arith.constant 0 : index
    %c0_322 = arith.constant 0 : index
    %475 = vector.load %arg29[%c0_320, %c0_321, %c0_322] : memref<9x8x8xf32, #tpu.memory_space<vmem>>, vector<1x8x8xf32>
    %476 = vector.shape_cast %475 : vector<1x8x8xf32> to vector<8x8xf32>
    %cst_323 = arith.constant dense<0.000000e+00> : vector<8x32xf32>
    %477 = tpu.matmul %476, %471, %cst_323 {dimension_numbers = #tpu.dot_dimension_numbers<[1], [0], [0], [1], [0, 0, 1, 1], [], []>} : vector<8x8xf32>, vector<8x32xf32>, vector<8x32xf32> -> vector<8x32xf32>
    %c0_324 = arith.constant 0 : index
    %c0_325 = arith.constant 0 : index
    %c0_326 = arith.constant 0 : index
    %478 = vector.load %arg30[%c0_324, %c0_325, %c0_326] : memref<9x1x32xf32, #tpu.memory_space<vmem>>, vector<1x1x32xf32>
    %479 = vector.shape_cast %478 : vector<1x1x32xf32> to vector<1x32xf32>
    %480 = vector.broadcast %479 : vector<1x32xf32> to vector<8x32xf32>
    %481 = arith.mulf %477, %480 : vector<8x32xf32>
    %482 = arith.addf %474, %481 : vector<8x32xf32>
    %c1_327 = arith.constant 1 : index
    %c0_328 = arith.constant 0 : index
    %c0_329 = arith.constant 0 : index
    %483 = vector.load %arg29[%c1_327, %c0_328, %c0_329] : memref<9x8x8xf32, #tpu.memory_space<vmem>>, vector<1x8x8xf32>
    %484 = vector.shape_cast %483 : vector<1x8x8xf32> to vector<8x8xf32>
    %cst_330 = arith.constant dense<0.000000e+00> : vector<8x32xf32>
    %485 = tpu.matmul %484, %471, %cst_330 {dimension_numbers = #tpu.dot_dimension_numbers<[1], [0], [0], [1], [0, 0, 1, 1], [], []>} : vector<8x8xf32>, vector<8x32xf32>, vector<8x32xf32> -> vector<8x32xf32>
    %c1_331 = arith.constant 1 : index
    %c0_332 = arith.constant 0 : index
    %c0_333 = arith.constant 0 : index
    %486 = vector.load %arg30[%c1_331, %c0_332, %c0_333] : memref<9x1x32xf32, #tpu.memory_space<vmem>>, vector<1x1x32xf32>
    %487 = vector.shape_cast %486 : vector<1x1x32xf32> to vector<1x32xf32>
    %488 = vector.broadcast %487 : vector<1x32xf32> to vector<8x32xf32>
    %489 = arith.mulf %485, %488 : vector<8x32xf32>
    %490 = arith.addf %482, %489 : vector<8x32xf32>
    %c2_334 = arith.constant 2 : index
    %c0_335 = arith.constant 0 : index
    %c0_336 = arith.constant 0 : index
    %491 = vector.load %arg29[%c2_334, %c0_335, %c0_336] : memref<9x8x8xf32, #tpu.memory_space<vmem>>, vector<1x8x8xf32>
    %492 = vector.shape_cast %491 : vector<1x8x8xf32> to vector<8x8xf32>
    %cst_337 = arith.constant dense<0.000000e+00> : vector<8x32xf32>
    %493 = tpu.matmul %492, %471, %cst_337 {dimension_numbers = #tpu.dot_dimension_numbers<[1], [0], [0], [1], [0, 0, 1, 1], [], []>} : vector<8x8xf32>, vector<8x32xf32>, vector<8x32xf32> -> vector<8x32xf32>
    %c2_338 = arith.constant 2 : index
    %c0_339 = arith.constant 0 : index
    %c0_340 = arith.constant 0 : index
    %494 = vector.load %arg30[%c2_338, %c0_339, %c0_340] : memref<9x1x32xf32, #tpu.memory_space<vmem>>, vector<1x1x32xf32>
    %495 = vector.shape_cast %494 : vector<1x1x32xf32> to vector<1x32xf32>
    %496 = vector.broadcast %495 : vector<1x32xf32> to vector<8x32xf32>
    %497 = arith.mulf %493, %496 : vector<8x32xf32>
    %498 = arith.addf %490, %497 : vector<8x32xf32>
    %c3_341 = arith.constant 3 : index
    %c0_342 = arith.constant 0 : index
    %c0_343 = arith.constant 0 : index
    %499 = vector.load %arg29[%c3_341, %c0_342, %c0_343] : memref<9x8x8xf32, #tpu.memory_space<vmem>>, vector<1x8x8xf32>
    %500 = vector.shape_cast %499 : vector<1x8x8xf32> to vector<8x8xf32>
    %cst_344 = arith.constant dense<0.000000e+00> : vector<8x32xf32>
    %501 = tpu.matmul %500, %471, %cst_344 {dimension_numbers = #tpu.dot_dimension_numbers<[1], [0], [0], [1], [0, 0, 1, 1], [], []>} : vector<8x8xf32>, vector<8x32xf32>, vector<8x32xf32> -> vector<8x32xf32>
    %c3_345 = arith.constant 3 : index
    %c0_346 = arith.constant 0 : index
    %c0_347 = arith.constant 0 : index
    %502 = vector.load %arg30[%c3_345, %c0_346, %c0_347] : memref<9x1x32xf32, #tpu.memory_space<vmem>>, vector<1x1x32xf32>
    %503 = vector.shape_cast %502 : vector<1x1x32xf32> to vector<1x32xf32>
    %504 = vector.broadcast %503 : vector<1x32xf32> to vector<8x32xf32>
    %505 = arith.mulf %501, %504 : vector<8x32xf32>
    %506 = arith.addf %498, %505 : vector<8x32xf32>
    %c4_348 = arith.constant 4 : index
    %c0_349 = arith.constant 0 : index
    %c0_350 = arith.constant 0 : index
    %507 = vector.load %arg29[%c4_348, %c0_349, %c0_350] : memref<9x8x8xf32, #tpu.memory_space<vmem>>, vector<1x8x8xf32>
    %508 = vector.shape_cast %507 : vector<1x8x8xf32> to vector<8x8xf32>
    %cst_351 = arith.constant dense<0.000000e+00> : vector<8x32xf32>
    %509 = tpu.matmul %508, %471, %cst_351 {dimension_numbers = #tpu.dot_dimension_numbers<[1], [0], [0], [1], [0, 0, 1, 1], [], []>} : vector<8x8xf32>, vector<8x32xf32>, vector<8x32xf32> -> vector<8x32xf32>
    %c4_352 = arith.constant 4 : index
    %c0_353 = arith.constant 0 : index
    %c0_354 = arith.constant 0 : index
    %510 = vector.load %arg30[%c4_352, %c0_353, %c0_354] : memref<9x1x32xf32, #tpu.memory_space<vmem>>, vector<1x1x32xf32>
    %511 = vector.shape_cast %510 : vector<1x1x32xf32> to vector<1x32xf32>
    %512 = vector.broadcast %511 : vector<1x32xf32> to vector<8x32xf32>
    %513 = arith.mulf %509, %512 : vector<8x32xf32>
    %514 = arith.addf %506, %513 : vector<8x32xf32>
    %c5_355 = arith.constant 5 : index
    %c0_356 = arith.constant 0 : index
    %c0_357 = arith.constant 0 : index
    %515 = vector.load %arg29[%c5_355, %c0_356, %c0_357] : memref<9x8x8xf32, #tpu.memory_space<vmem>>, vector<1x8x8xf32>
    %516 = vector.shape_cast %515 : vector<1x8x8xf32> to vector<8x8xf32>
    %cst_358 = arith.constant dense<0.000000e+00> : vector<8x32xf32>
    %517 = tpu.matmul %516, %471, %cst_358 {dimension_numbers = #tpu.dot_dimension_numbers<[1], [0], [0], [1], [0, 0, 1, 1], [], []>} : vector<8x8xf32>, vector<8x32xf32>, vector<8x32xf32> -> vector<8x32xf32>
    %c5_359 = arith.constant 5 : index
    %c0_360 = arith.constant 0 : index
    %c0_361 = arith.constant 0 : index
    %518 = vector.load %arg30[%c5_359, %c0_360, %c0_361] : memref<9x1x32xf32, #tpu.memory_space<vmem>>, vector<1x1x32xf32>
    %519 = vector.shape_cast %518 : vector<1x1x32xf32> to vector<1x32xf32>
    %520 = vector.broadcast %519 : vector<1x32xf32> to vector<8x32xf32>
    %521 = arith.mulf %517, %520 : vector<8x32xf32>
    %522 = arith.addf %514, %521 : vector<8x32xf32>
    %c6_362 = arith.constant 6 : index
    %c0_363 = arith.constant 0 : index
    %c0_364 = arith.constant 0 : index
    %523 = vector.load %arg29[%c6_362, %c0_363, %c0_364] : memref<9x8x8xf32, #tpu.memory_space<vmem>>, vector<1x8x8xf32>
    %524 = vector.shape_cast %523 : vector<1x8x8xf32> to vector<8x8xf32>
    %cst_365 = arith.constant dense<0.000000e+00> : vector<8x32xf32>
    %525 = tpu.matmul %524, %471, %cst_365 {dimension_numbers = #tpu.dot_dimension_numbers<[1], [0], [0], [1], [0, 0, 1, 1], [], []>} : vector<8x8xf32>, vector<8x32xf32>, vector<8x32xf32> -> vector<8x32xf32>
    %c6_366 = arith.constant 6 : index
    %c0_367 = arith.constant 0 : index
    %c0_368 = arith.constant 0 : index
    %526 = vector.load %arg30[%c6_366, %c0_367, %c0_368] : memref<9x1x32xf32, #tpu.memory_space<vmem>>, vector<1x1x32xf32>
    %527 = vector.shape_cast %526 : vector<1x1x32xf32> to vector<1x32xf32>
    %528 = vector.broadcast %527 : vector<1x32xf32> to vector<8x32xf32>
    %529 = arith.mulf %525, %528 : vector<8x32xf32>
    %530 = arith.addf %522, %529 : vector<8x32xf32>
    %c7_369 = arith.constant 7 : index
    %c0_370 = arith.constant 0 : index
    %c0_371 = arith.constant 0 : index
    %531 = vector.load %arg29[%c7_369, %c0_370, %c0_371] : memref<9x8x8xf32, #tpu.memory_space<vmem>>, vector<1x8x8xf32>
    %532 = vector.shape_cast %531 : vector<1x8x8xf32> to vector<8x8xf32>
    %cst_372 = arith.constant dense<0.000000e+00> : vector<8x32xf32>
    %533 = tpu.matmul %532, %471, %cst_372 {dimension_numbers = #tpu.dot_dimension_numbers<[1], [0], [0], [1], [0, 0, 1, 1], [], []>} : vector<8x8xf32>, vector<8x32xf32>, vector<8x32xf32> -> vector<8x32xf32>
    %c7_373 = arith.constant 7 : index
    %c0_374 = arith.constant 0 : index
    %c0_375 = arith.constant 0 : index
    %534 = vector.load %arg30[%c7_373, %c0_374, %c0_375] : memref<9x1x32xf32, #tpu.memory_space<vmem>>, vector<1x1x32xf32>
    %535 = vector.shape_cast %534 : vector<1x1x32xf32> to vector<1x32xf32>
    %536 = vector.broadcast %535 : vector<1x32xf32> to vector<8x32xf32>
    %537 = arith.mulf %533, %536 : vector<8x32xf32>
    %538 = arith.addf %530, %537 : vector<8x32xf32>
    %c8_376 = arith.constant 8 : index
    %c0_377 = arith.constant 0 : index
    %c0_378 = arith.constant 0 : index
    %539 = vector.load %arg29[%c8_376, %c0_377, %c0_378] : memref<9x8x8xf32, #tpu.memory_space<vmem>>, vector<1x8x8xf32>
    %540 = vector.shape_cast %539 : vector<1x8x8xf32> to vector<8x8xf32>
    %cst_379 = arith.constant dense<0.000000e+00> : vector<8x32xf32>
    %541 = tpu.matmul %540, %471, %cst_379 {dimension_numbers = #tpu.dot_dimension_numbers<[1], [0], [0], [1], [0, 0, 1, 1], [], []>} : vector<8x8xf32>, vector<8x32xf32>, vector<8x32xf32> -> vector<8x32xf32>
    %c8_380 = arith.constant 8 : index
    %c0_381 = arith.constant 0 : index
    %c0_382 = arith.constant 0 : index
    %542 = vector.load %arg30[%c8_380, %c0_381, %c0_382] : memref<9x1x32xf32, #tpu.memory_space<vmem>>, vector<1x1x32xf32>
    %543 = vector.shape_cast %542 : vector<1x1x32xf32> to vector<1x32xf32>
    %544 = vector.broadcast %543 : vector<1x32xf32> to vector<8x32xf32>
    %545 = arith.mulf %541, %544 : vector<8x32xf32>
    %546 = arith.addf %538, %545 : vector<8x32xf32>
    %c0_383 = arith.constant 0 : index
    %c0_384 = arith.constant 0 : index
    %547 = vector.load %arg32[%c0_383, %c0_384] : memref<1x32xf32, #tpu.memory_space<vmem>>, vector<1x32xf32>
    %c0_385 = arith.constant 0 : index
    %c0_386 = arith.constant 0 : index
    %548 = vector.load %arg33[%c0_385, %c0_386] : memref<1x32xf32, #tpu.memory_space<vmem>>, vector<1x32xf32>
    %cst_387 = arith.constant dense<0.000000e+00> : vector<8xf32>
    %549 = vector.multi_reduction <add>, %546, %cst_387 [1] : vector<8x32xf32> to vector<8xf32>
    %550 = vector.shape_cast %549 : vector<8xf32> to vector<8x1xf32>
    %cst_388 = arith.constant 3.200000e+01 : f32
    %551 = vector.broadcast %cst_388 : f32 to vector<8x1xf32>
    %552 = arith.divf %550, %551 : vector<8x1xf32>
    %553 = vector.broadcast %552 : vector<8x1xf32> to vector<8x32xf32>
    %554 = arith.subf %546, %553 : vector<8x32xf32>
    %555 = arith.mulf %554, %554 : vector<8x32xf32>
    %cst_389 = arith.constant dense<0.000000e+00> : vector<8xf32>
    %556 = vector.multi_reduction <add>, %555, %cst_389 [1] : vector<8x32xf32> to vector<8xf32>
    %557 = vector.shape_cast %556 : vector<8xf32> to vector<8x1xf32>
    %cst_390 = arith.constant 3.200000e+01 : f32
    %558 = vector.broadcast %cst_390 : f32 to vector<8x1xf32>
    %559 = arith.divf %557, %558 : vector<8x1xf32>
    %560 = vector.broadcast %552 : vector<8x1xf32> to vector<8x32xf32>
    %561 = arith.subf %546, %560 : vector<8x32xf32>
    %cst_391 = arith.constant 9.99999974E-6 : f32
    %562 = vector.broadcast %cst_391 : f32 to vector<8x1xf32>
    %563 = arith.addf %559, %562 : vector<8x1xf32>
    %564 = math.rsqrt %563 : vector<8x1xf32>
    %565 = vector.broadcast %564 : vector<8x1xf32> to vector<8x32xf32>
    %566 = arith.mulf %561, %565 : vector<8x32xf32>
    %567 = vector.broadcast %547 : vector<1x32xf32> to vector<8x32xf32>
    %568 = arith.mulf %566, %567 : vector<8x32xf32>
    %569 = vector.broadcast %548 : vector<1x32xf32> to vector<8x32xf32>
    %570 = arith.addf %568, %569 : vector<8x32xf32>
    %c0_392 = arith.constant 0 : index
    %c0_393 = arith.constant 0 : index
    %571 = vector.load %arg48[%c0_392, %c0_393] : memref<8x8xf32, #tpu.memory_space<vmem>>, vector<8x8xf32>
    %c0_394 = arith.constant 0 : index
    %c0_395 = arith.constant 0 : index
    %572 = vector.load %arg41[%c0_394, %c0_395] : memref<1x32xf32, #tpu.memory_space<vmem>>, vector<1x32xf32>
    %c0_396 = arith.constant 0 : index
    %c0_397 = arith.constant 0 : index
    %c0_398 = arith.constant 0 : index
    %573 = vector.load %arg34[%c0_396, %c0_397, %c0_398] : memref<2x32x16xf32, #tpu.memory_space<vmem>>, vector<1x32x16xf32>
    %574 = vector.shape_cast %573 : vector<1x32x16xf32> to vector<32x16xf32>
    %cst_399 = arith.constant dense<0.000000e+00> : vector<8x16xf32>
    %575 = tpu.matmul %570, %574, %cst_399 {dimension_numbers = #tpu.dot_dimension_numbers<[1], [0], [0], [1], [0, 0, 1, 1], [], []>} : vector<8x32xf32>, vector<32x16xf32>, vector<8x16xf32> -> vector<8x16xf32>
    %c0_400 = arith.constant 0 : index
    %c0_401 = arith.constant 0 : index
    %c0_402 = arith.constant 0 : index
    %576 = vector.load %arg37[%c0_400, %c0_401, %c0_402] : memref<2x1x16xf32, #tpu.memory_space<vmem>>, vector<1x1x16xf32>
    %577 = vector.shape_cast %576 : vector<1x1x16xf32> to vector<1x16xf32>
    %578 = vector.broadcast %577 : vector<1x16xf32> to vector<8x16xf32>
    %579 = arith.addf %575, %578 : vector<8x16xf32>
    %c0_403 = arith.constant 0 : index
    %c0_404 = arith.constant 0 : index
    %c0_405 = arith.constant 0 : index
    %580 = vector.load %arg35[%c0_403, %c0_404, %c0_405] : memref<2x32x16xf32, #tpu.memory_space<vmem>>, vector<1x32x16xf32>
    %581 = vector.shape_cast %580 : vector<1x32x16xf32> to vector<32x16xf32>
    %cst_406 = arith.constant dense<0.000000e+00> : vector<8x16xf32>
    %582 = tpu.matmul %570, %581, %cst_406 {dimension_numbers = #tpu.dot_dimension_numbers<[1], [0], [0], [1], [0, 0, 1, 1], [], []>} : vector<8x32xf32>, vector<32x16xf32>, vector<8x16xf32> -> vector<8x16xf32>
    %c0_407 = arith.constant 0 : index
    %c0_408 = arith.constant 0 : index
    %c0_409 = arith.constant 0 : index
    %583 = vector.load %arg38[%c0_407, %c0_408, %c0_409] : memref<2x1x16xf32, #tpu.memory_space<vmem>>, vector<1x1x16xf32>
    %584 = vector.shape_cast %583 : vector<1x1x16xf32> to vector<1x16xf32>
    %585 = vector.broadcast %584 : vector<1x16xf32> to vector<8x16xf32>
    %586 = arith.addf %582, %585 : vector<8x16xf32>
    %c0_410 = arith.constant 0 : index
    %c0_411 = arith.constant 0 : index
    %c0_412 = arith.constant 0 : index
    %587 = vector.load %arg36[%c0_410, %c0_411, %c0_412] : memref<2x32x16xf32, #tpu.memory_space<vmem>>, vector<1x32x16xf32>
    %588 = vector.shape_cast %587 : vector<1x32x16xf32> to vector<32x16xf32>
    %cst_413 = arith.constant dense<0.000000e+00> : vector<8x16xf32>
    %589 = tpu.matmul %570, %588, %cst_413 {dimension_numbers = #tpu.dot_dimension_numbers<[1], [0], [0], [1], [0, 0, 1, 1], [], []>} : vector<8x32xf32>, vector<32x16xf32>, vector<8x16xf32> -> vector<8x16xf32>
    %c0_414 = arith.constant 0 : index
    %c0_415 = arith.constant 0 : index
    %c0_416 = arith.constant 0 : index
    %590 = vector.load %arg39[%c0_414, %c0_415, %c0_416] : memref<2x1x16xf32, #tpu.memory_space<vmem>>, vector<1x1x16xf32>
    %591 = vector.shape_cast %590 : vector<1x1x16xf32> to vector<1x16xf32>
    %592 = vector.broadcast %591 : vector<1x16xf32> to vector<8x16xf32>
    %593 = arith.addf %589, %592 : vector<8x16xf32>
    %594 = arith.mulf %579, %579 : vector<8x16xf32>
    %cst_417 = arith.constant dense<0.000000e+00> : vector<8xf32>
    %595 = vector.multi_reduction <add>, %594, %cst_417 [1] : vector<8x16xf32> to vector<8xf32>
    %596 = vector.shape_cast %595 : vector<8xf32> to vector<8x1xf32>
    %cst_418 = arith.constant 1.000000e-24 : f32
    %597 = vector.broadcast %cst_418 : f32 to vector<8x1xf32>
    %598 = arith.maximumf %596, %597 : vector<8x1xf32>
    %599 = math.rsqrt %598 : vector<8x1xf32>
    %600 = vector.broadcast %599 : vector<8x1xf32> to vector<8x16xf32>
    %601 = arith.mulf %579, %600 : vector<8x16xf32>
    %602 = arith.mulf %586, %586 : vector<8x16xf32>
    %cst_419 = arith.constant dense<0.000000e+00> : vector<8xf32>
    %603 = vector.multi_reduction <add>, %602, %cst_419 [1] : vector<8x16xf32> to vector<8xf32>
    %604 = vector.shape_cast %603 : vector<8xf32> to vector<8x1xf32>
    %cst_420 = arith.constant 1.000000e-24 : f32
    %605 = vector.broadcast %cst_420 : f32 to vector<8x1xf32>
    %606 = arith.maximumf %604, %605 : vector<8x1xf32>
    %607 = math.rsqrt %606 : vector<8x1xf32>
    %608 = vector.broadcast %607 : vector<8x1xf32> to vector<8x16xf32>
    %609 = arith.mulf %586, %608 : vector<8x16xf32>
    %cst_421 = arith.constant dense<0.000000e+00> : vector<8x8xf32>
    %610 = tpu.matmul %601, %609, %cst_421 {dimension_numbers = #tpu.dot_dimension_numbers<[1], [1], [0], [0], [0, 0, 1, 0], [], []>} : vector<8x16xf32>, vector<8x16xf32>, vector<8x8xf32> -> vector<8x8xf32>
    %cst_422 = arith.constant 1.000000e+01 : f32
    %611 = vector.broadcast %cst_422 : f32 to vector<8x8xf32>
    %612 = arith.mulf %610, %611 : vector<8x8xf32>
    %613 = arith.addf %612, %571 : vector<8x8xf32>
    %cst_423 = arith.constant dense<0xFF800000> : vector<8xf32>
    %614 = vector.multi_reduction <maximumf>, %613, %cst_423 [1] : vector<8x8xf32> to vector<8xf32>
    %615 = vector.shape_cast %614 : vector<8xf32> to vector<8x1xf32>
    %616 = vector.broadcast %615 : vector<8x1xf32> to vector<8x8xf32>
    %617 = arith.subf %613, %616 : vector<8x8xf32>
    %618 = math.exp %617 : vector<8x8xf32>
    %cst_424 = arith.constant dense<0.000000e+00> : vector<8xf32>
    %619 = vector.multi_reduction <add>, %618, %cst_424 [1] : vector<8x8xf32> to vector<8xf32>
    %620 = vector.shape_cast %619 : vector<8xf32> to vector<8x1xf32>
    %621 = vector.broadcast %620 : vector<8x1xf32> to vector<8x8xf32>
    %622 = arith.divf %618, %621 : vector<8x8xf32>
    %cst_425 = arith.constant dense<0.000000e+00> : vector<8x16xf32>
    %623 = tpu.matmul %622, %593, %cst_425 {dimension_numbers = #tpu.dot_dimension_numbers<[1], [0], [0], [1], [0, 0, 1, 1], [], []>} : vector<8x8xf32>, vector<8x16xf32>, vector<8x16xf32> -> vector<8x16xf32>
    %c0_426 = arith.constant 0 : index
    %c0_427 = arith.constant 0 : index
    %c0_428 = arith.constant 0 : index
    %624 = vector.load %arg40[%c0_426, %c0_427, %c0_428] : memref<2x16x32xf32, #tpu.memory_space<vmem>>, vector<1x16x32xf32>
    %625 = vector.shape_cast %624 : vector<1x16x32xf32> to vector<16x32xf32>
    %cst_429 = arith.constant dense<0.000000e+00> : vector<8x32xf32>
    %626 = tpu.matmul %623, %625, %cst_429 {dimension_numbers = #tpu.dot_dimension_numbers<[1], [0], [0], [1], [0, 0, 1, 1], [], []>} : vector<8x16xf32>, vector<16x32xf32>, vector<8x32xf32> -> vector<8x32xf32>
    %627 = vector.broadcast %572 : vector<1x32xf32> to vector<8x32xf32>
    %628 = arith.addf %627, %626 : vector<8x32xf32>
    %c1_430 = arith.constant 1 : index
    %c0_431 = arith.constant 0 : index
    %c0_432 = arith.constant 0 : index
    %629 = vector.load %arg34[%c1_430, %c0_431, %c0_432] : memref<2x32x16xf32, #tpu.memory_space<vmem>>, vector<1x32x16xf32>
    %630 = vector.shape_cast %629 : vector<1x32x16xf32> to vector<32x16xf32>
    %cst_433 = arith.constant dense<0.000000e+00> : vector<8x16xf32>
    %631 = tpu.matmul %570, %630, %cst_433 {dimension_numbers = #tpu.dot_dimension_numbers<[1], [0], [0], [1], [0, 0, 1, 1], [], []>} : vector<8x32xf32>, vector<32x16xf32>, vector<8x16xf32> -> vector<8x16xf32>
    %c1_434 = arith.constant 1 : index
    %c0_435 = arith.constant 0 : index
    %c0_436 = arith.constant 0 : index
    %632 = vector.load %arg37[%c1_434, %c0_435, %c0_436] : memref<2x1x16xf32, #tpu.memory_space<vmem>>, vector<1x1x16xf32>
    %633 = vector.shape_cast %632 : vector<1x1x16xf32> to vector<1x16xf32>
    %634 = vector.broadcast %633 : vector<1x16xf32> to vector<8x16xf32>
    %635 = arith.addf %631, %634 : vector<8x16xf32>
    %c1_437 = arith.constant 1 : index
    %c0_438 = arith.constant 0 : index
    %c0_439 = arith.constant 0 : index
    %636 = vector.load %arg35[%c1_437, %c0_438, %c0_439] : memref<2x32x16xf32, #tpu.memory_space<vmem>>, vector<1x32x16xf32>
    %637 = vector.shape_cast %636 : vector<1x32x16xf32> to vector<32x16xf32>
    %cst_440 = arith.constant dense<0.000000e+00> : vector<8x16xf32>
    %638 = tpu.matmul %570, %637, %cst_440 {dimension_numbers = #tpu.dot_dimension_numbers<[1], [0], [0], [1], [0, 0, 1, 1], [], []>} : vector<8x32xf32>, vector<32x16xf32>, vector<8x16xf32> -> vector<8x16xf32>
    %c1_441 = arith.constant 1 : index
    %c0_442 = arith.constant 0 : index
    %c0_443 = arith.constant 0 : index
    %639 = vector.load %arg38[%c1_441, %c0_442, %c0_443] : memref<2x1x16xf32, #tpu.memory_space<vmem>>, vector<1x1x16xf32>
    %640 = vector.shape_cast %639 : vector<1x1x16xf32> to vector<1x16xf32>
    %641 = vector.broadcast %640 : vector<1x16xf32> to vector<8x16xf32>
    %642 = arith.addf %638, %641 : vector<8x16xf32>
    %c1_444 = arith.constant 1 : index
    %c0_445 = arith.constant 0 : index
    %c0_446 = arith.constant 0 : index
    %643 = vector.load %arg36[%c1_444, %c0_445, %c0_446] : memref<2x32x16xf32, #tpu.memory_space<vmem>>, vector<1x32x16xf32>
    %644 = vector.shape_cast %643 : vector<1x32x16xf32> to vector<32x16xf32>
    %cst_447 = arith.constant dense<0.000000e+00> : vector<8x16xf32>
    %645 = tpu.matmul %570, %644, %cst_447 {dimension_numbers = #tpu.dot_dimension_numbers<[1], [0], [0], [1], [0, 0, 1, 1], [], []>} : vector<8x32xf32>, vector<32x16xf32>, vector<8x16xf32> -> vector<8x16xf32>
    %c1_448 = arith.constant 1 : index
    %c0_449 = arith.constant 0 : index
    %c0_450 = arith.constant 0 : index
    %646 = vector.load %arg39[%c1_448, %c0_449, %c0_450] : memref<2x1x16xf32, #tpu.memory_space<vmem>>, vector<1x1x16xf32>
    %647 = vector.shape_cast %646 : vector<1x1x16xf32> to vector<1x16xf32>
    %648 = vector.broadcast %647 : vector<1x16xf32> to vector<8x16xf32>
    %649 = arith.addf %645, %648 : vector<8x16xf32>
    %650 = arith.mulf %635, %635 : vector<8x16xf32>
    %cst_451 = arith.constant dense<0.000000e+00> : vector<8xf32>
    %651 = vector.multi_reduction <add>, %650, %cst_451 [1] : vector<8x16xf32> to vector<8xf32>
    %652 = vector.shape_cast %651 : vector<8xf32> to vector<8x1xf32>
    %cst_452 = arith.constant 1.000000e-24 : f32
    %653 = vector.broadcast %cst_452 : f32 to vector<8x1xf32>
    %654 = arith.maximumf %652, %653 : vector<8x1xf32>
    %655 = math.rsqrt %654 : vector<8x1xf32>
    %656 = vector.broadcast %655 : vector<8x1xf32> to vector<8x16xf32>
    %657 = arith.mulf %635, %656 : vector<8x16xf32>
    %658 = arith.mulf %642, %642 : vector<8x16xf32>
    %cst_453 = arith.constant dense<0.000000e+00> : vector<8xf32>
    %659 = vector.multi_reduction <add>, %658, %cst_453 [1] : vector<8x16xf32> to vector<8xf32>
    %660 = vector.shape_cast %659 : vector<8xf32> to vector<8x1xf32>
    %cst_454 = arith.constant 1.000000e-24 : f32
    %661 = vector.broadcast %cst_454 : f32 to vector<8x1xf32>
    %662 = arith.maximumf %660, %661 : vector<8x1xf32>
    %663 = math.rsqrt %662 : vector<8x1xf32>
    %664 = vector.broadcast %663 : vector<8x1xf32> to vector<8x16xf32>
    %665 = arith.mulf %642, %664 : vector<8x16xf32>
    %cst_455 = arith.constant dense<0.000000e+00> : vector<8x8xf32>
    %666 = tpu.matmul %657, %665, %cst_455 {dimension_numbers = #tpu.dot_dimension_numbers<[1], [1], [0], [0], [0, 0, 1, 0], [], []>} : vector<8x16xf32>, vector<8x16xf32>, vector<8x8xf32> -> vector<8x8xf32>
    %cst_456 = arith.constant 1.000000e+01 : f32
    %667 = vector.broadcast %cst_456 : f32 to vector<8x8xf32>
    %668 = arith.mulf %666, %667 : vector<8x8xf32>
    %669 = arith.addf %668, %571 : vector<8x8xf32>
    %cst_457 = arith.constant dense<0xFF800000> : vector<8xf32>
    %670 = vector.multi_reduction <maximumf>, %669, %cst_457 [1] : vector<8x8xf32> to vector<8xf32>
    %671 = vector.shape_cast %670 : vector<8xf32> to vector<8x1xf32>
    %672 = vector.broadcast %671 : vector<8x1xf32> to vector<8x8xf32>
    %673 = arith.subf %669, %672 : vector<8x8xf32>
    %674 = math.exp %673 : vector<8x8xf32>
    %cst_458 = arith.constant dense<0.000000e+00> : vector<8xf32>
    %675 = vector.multi_reduction <add>, %674, %cst_458 [1] : vector<8x8xf32> to vector<8xf32>
    %676 = vector.shape_cast %675 : vector<8xf32> to vector<8x1xf32>
    %677 = vector.broadcast %676 : vector<8x1xf32> to vector<8x8xf32>
    %678 = arith.divf %674, %677 : vector<8x8xf32>
    %cst_459 = arith.constant dense<0.000000e+00> : vector<8x16xf32>
    %679 = tpu.matmul %678, %649, %cst_459 {dimension_numbers = #tpu.dot_dimension_numbers<[1], [0], [0], [1], [0, 0, 1, 1], [], []>} : vector<8x8xf32>, vector<8x16xf32>, vector<8x16xf32> -> vector<8x16xf32>
    %c1_460 = arith.constant 1 : index
    %c0_461 = arith.constant 0 : index
    %c0_462 = arith.constant 0 : index
    %680 = vector.load %arg40[%c1_460, %c0_461, %c0_462] : memref<2x16x32xf32, #tpu.memory_space<vmem>>, vector<1x16x32xf32>
    %681 = vector.shape_cast %680 : vector<1x16x32xf32> to vector<16x32xf32>
    %cst_463 = arith.constant dense<0.000000e+00> : vector<8x32xf32>
    %682 = tpu.matmul %679, %681, %cst_463 {dimension_numbers = #tpu.dot_dimension_numbers<[1], [0], [0], [1], [0, 0, 1, 1], [], []>} : vector<8x16xf32>, vector<16x32xf32>, vector<8x32xf32> -> vector<8x32xf32>
    %683 = arith.addf %628, %682 : vector<8x32xf32>
    %684 = arith.addf %546, %683 : vector<8x32xf32>
    %c0_464 = arith.constant 0 : index
    %c0_465 = arith.constant 0 : index
    %685 = vector.load %arg42[%c0_464, %c0_465] : memref<1x32xf32, #tpu.memory_space<vmem>>, vector<1x32xf32>
    %c0_466 = arith.constant 0 : index
    %c0_467 = arith.constant 0 : index
    %686 = vector.load %arg43[%c0_466, %c0_467] : memref<1x32xf32, #tpu.memory_space<vmem>>, vector<1x32xf32>
    %cst_468 = arith.constant dense<0.000000e+00> : vector<8xf32>
    %687 = vector.multi_reduction <add>, %684, %cst_468 [1] : vector<8x32xf32> to vector<8xf32>
    %688 = vector.shape_cast %687 : vector<8xf32> to vector<8x1xf32>
    %cst_469 = arith.constant 3.200000e+01 : f32
    %689 = vector.broadcast %cst_469 : f32 to vector<8x1xf32>
    %690 = arith.divf %688, %689 : vector<8x1xf32>
    %691 = vector.broadcast %690 : vector<8x1xf32> to vector<8x32xf32>
    %692 = arith.subf %684, %691 : vector<8x32xf32>
    %693 = arith.mulf %692, %692 : vector<8x32xf32>
    %cst_470 = arith.constant dense<0.000000e+00> : vector<8xf32>
    %694 = vector.multi_reduction <add>, %693, %cst_470 [1] : vector<8x32xf32> to vector<8xf32>
    %695 = vector.shape_cast %694 : vector<8xf32> to vector<8x1xf32>
    %cst_471 = arith.constant 3.200000e+01 : f32
    %696 = vector.broadcast %cst_471 : f32 to vector<8x1xf32>
    %697 = arith.divf %695, %696 : vector<8x1xf32>
    %698 = vector.broadcast %690 : vector<8x1xf32> to vector<8x32xf32>
    %699 = arith.subf %684, %698 : vector<8x32xf32>
    %cst_472 = arith.constant 9.99999974E-6 : f32
    %700 = vector.broadcast %cst_472 : f32 to vector<8x1xf32>
    %701 = arith.addf %697, %700 : vector<8x1xf32>
    %702 = math.rsqrt %701 : vector<8x1xf32>
    %703 = vector.broadcast %702 : vector<8x1xf32> to vector<8x32xf32>
    %704 = arith.mulf %699, %703 : vector<8x32xf32>
    %705 = vector.broadcast %685 : vector<1x32xf32> to vector<8x32xf32>
    %706 = arith.mulf %704, %705 : vector<8x32xf32>
    %707 = vector.broadcast %686 : vector<1x32xf32> to vector<8x32xf32>
    %708 = arith.addf %706, %707 : vector<8x32xf32>
    %c0_473 = arith.constant 0 : index
    %c0_474 = arith.constant 0 : index
    %709 = vector.load %arg44[%c0_473, %c0_474] : memref<32x64xf32, #tpu.memory_space<vmem>>, vector<32x64xf32>
    %cst_475 = arith.constant dense<0.000000e+00> : vector<8x64xf32>
    %710 = tpu.matmul %708, %709, %cst_475 {dimension_numbers = #tpu.dot_dimension_numbers<[1], [0], [0], [1], [0, 0, 1, 1], [], []>} : vector<8x32xf32>, vector<32x64xf32>, vector<8x64xf32> -> vector<8x64xf32>
    %c0_476 = arith.constant 0 : index
    %c0_477 = arith.constant 0 : index
    %711 = vector.load %arg45[%c0_476, %c0_477] : memref<1x64xf32, #tpu.memory_space<vmem>>, vector<1x64xf32>
    %712 = vector.broadcast %711 : vector<1x64xf32> to vector<8x64xf32>
    %713 = arith.addf %710, %712 : vector<8x64xf32>
    %cst_478 = arith.constant 5.000000e-01 : f32
    %714 = vector.broadcast %cst_478 : f32 to vector<8x64xf32>
    %715 = arith.mulf %714, %713 : vector<8x64xf32>
    %cst_479 = arith.constant 0.707106769 : f32
    %716 = vector.broadcast %cst_479 : f32 to vector<8x64xf32>
    %717 = arith.mulf %713, %716 : vector<8x64xf32>
    %cst_480 = arith.constant 0.000000e+00 : f32
    %718 = vector.broadcast %cst_480 : f32 to vector<8x64xf32>
    %719 = arith.cmpf oge, %717, %718 : vector<8x64xf32>
    %cst_481 = arith.constant 1.000000e+00 : f32
    %cst_482 = arith.constant -1.000000e+00 : f32
    %720 = vector.broadcast %cst_481 : f32 to vector<8x64xf32>
    %721 = vector.broadcast %cst_482 : f32 to vector<8x64xf32>
    %722 = arith.select %719, %720, %721 : vector<8x64xi1>, vector<8x64xf32>
    %723 = math.absf %717 : vector<8x64xf32>
    %cst_483 = arith.constant 0.327591091 : f32
    %724 = vector.broadcast %cst_483 : f32 to vector<8x64xf32>
    %725 = arith.mulf %724, %723 : vector<8x64xf32>
    %cst_484 = arith.constant 1.000000e+00 : f32
    %726 = vector.broadcast %cst_484 : f32 to vector<8x64xf32>
    %727 = arith.addf %726, %725 : vector<8x64xf32>
    %cst_485 = arith.constant 1.000000e+00 : f32
    %728 = vector.broadcast %cst_485 : f32 to vector<8x64xf32>
    %729 = arith.divf %728, %727 : vector<8x64xf32>
    %cst_486 = arith.constant 1.06140542 : f32
    %730 = vector.broadcast %cst_486 : f32 to vector<8x64xf32>
    %731 = arith.mulf %730, %729 : vector<8x64xf32>
    %cst_487 = arith.constant -1.45315206 : f32
    %732 = vector.broadcast %cst_487 : f32 to vector<8x64xf32>
    %733 = arith.addf %731, %732 : vector<8x64xf32>
    %734 = arith.mulf %733, %729 : vector<8x64xf32>
    %cst_488 = arith.constant 1.42141378 : f32
    %735 = vector.broadcast %cst_488 : f32 to vector<8x64xf32>
    %736 = arith.addf %734, %735 : vector<8x64xf32>
    %737 = arith.mulf %736, %729 : vector<8x64xf32>
    %cst_489 = arith.constant -0.284496725 : f32
    %738 = vector.broadcast %cst_489 : f32 to vector<8x64xf32>
    %739 = arith.addf %737, %738 : vector<8x64xf32>
    %740 = arith.mulf %739, %729 : vector<8x64xf32>
    %cst_490 = arith.constant 0.254829586 : f32
    %741 = vector.broadcast %cst_490 : f32 to vector<8x64xf32>
    %742 = arith.addf %740, %741 : vector<8x64xf32>
    %743 = arith.mulf %742, %729 : vector<8x64xf32>
    %cst_491 = arith.constant 0.000000e+00 : f32
    %744 = vector.broadcast %cst_491 : f32 to vector<8x64xf32>
    %745 = arith.subf %744, %723 : vector<8x64xf32>
    %746 = arith.mulf %745, %723 : vector<8x64xf32>
    %747 = math.exp %746 : vector<8x64xf32>
    %748 = arith.mulf %743, %747 : vector<8x64xf32>
    %cst_492 = arith.constant 1.000000e+00 : f32
    %749 = vector.broadcast %cst_492 : f32 to vector<8x64xf32>
    %750 = arith.subf %749, %748 : vector<8x64xf32>
    %751 = arith.mulf %722, %750 : vector<8x64xf32>
    %cst_493 = arith.constant 1.000000e+00 : f32
    %752 = vector.broadcast %cst_493 : f32 to vector<8x64xf32>
    %753 = arith.addf %752, %751 : vector<8x64xf32>
    %754 = arith.mulf %715, %753 : vector<8x64xf32>
    %c0_494 = arith.constant 0 : index
    %c0_495 = arith.constant 0 : index
    %755 = vector.load %arg46[%c0_494, %c0_495] : memref<64x32xf32, #tpu.memory_space<vmem>>, vector<64x32xf32>
    %cst_496 = arith.constant dense<0.000000e+00> : vector<8x32xf32>
    %756 = tpu.matmul %754, %755, %cst_496 {dimension_numbers = #tpu.dot_dimension_numbers<[1], [0], [0], [1], [0, 0, 1, 1], [], []>} : vector<8x64xf32>, vector<64x32xf32>, vector<8x32xf32> -> vector<8x32xf32>
    %757 = arith.addf %684, %756 : vector<8x32xf32>
    %c0_497 = arith.constant 0 : index
    %c0_498 = arith.constant 0 : index
    %758 = vector.load %arg47[%c0_497, %c0_498] : memref<1x32xf32, #tpu.memory_space<vmem>>, vector<1x32xf32>
    %759 = vector.broadcast %758 : vector<1x32xf32> to vector<8x32xf32>
    %760 = arith.addf %757, %759 : vector<8x32xf32>
    %c0_499 = arith.constant 0 : index
    %c0_500 = arith.constant 0 : index
    %761 = vector.load %arg50[%c0_499, %c0_500] : memref<1x32xf32, #tpu.memory_space<vmem>>, vector<1x32xf32>
    %c0_501 = arith.constant 0 : index
    %c0_502 = arith.constant 0 : index
    %762 = vector.load %arg51[%c0_501, %c0_502] : memref<1x32xf32, #tpu.memory_space<vmem>>, vector<1x32xf32>
    %cst_503 = arith.constant dense<0.000000e+00> : vector<8xf32>
    %763 = vector.multi_reduction <add>, %760, %cst_503 [1] : vector<8x32xf32> to vector<8xf32>
    %764 = vector.shape_cast %763 : vector<8xf32> to vector<8x1xf32>
    %cst_504 = arith.constant 3.200000e+01 : f32
    %765 = vector.broadcast %cst_504 : f32 to vector<8x1xf32>
    %766 = arith.divf %764, %765 : vector<8x1xf32>
    %767 = vector.broadcast %766 : vector<8x1xf32> to vector<8x32xf32>
    %768 = arith.subf %760, %767 : vector<8x32xf32>
    %769 = arith.mulf %768, %768 : vector<8x32xf32>
    %cst_505 = arith.constant dense<0.000000e+00> : vector<8xf32>
    %770 = vector.multi_reduction <add>, %769, %cst_505 [1] : vector<8x32xf32> to vector<8xf32>
    %771 = vector.shape_cast %770 : vector<8xf32> to vector<8x1xf32>
    %cst_506 = arith.constant 3.200000e+01 : f32
    %772 = vector.broadcast %cst_506 : f32 to vector<8x1xf32>
    %773 = arith.divf %771, %772 : vector<8x1xf32>
    %774 = vector.broadcast %766 : vector<8x1xf32> to vector<8x32xf32>
    %775 = arith.subf %760, %774 : vector<8x32xf32>
    %cst_507 = arith.constant 9.99999974E-6 : f32
    %776 = vector.broadcast %cst_507 : f32 to vector<8x1xf32>
    %777 = arith.addf %773, %776 : vector<8x1xf32>
    %778 = math.rsqrt %777 : vector<8x1xf32>
    %779 = vector.broadcast %778 : vector<8x1xf32> to vector<8x32xf32>
    %780 = arith.mulf %775, %779 : vector<8x32xf32>
    %781 = vector.broadcast %761 : vector<1x32xf32> to vector<8x32xf32>
    %782 = arith.mulf %780, %781 : vector<8x32xf32>
    %783 = vector.broadcast %762 : vector<1x32xf32> to vector<8x32xf32>
    %784 = arith.addf %782, %783 : vector<8x32xf32>
    %c0_508 = arith.constant 0 : index
    %c0_509 = arith.constant 0 : index
    %785 = vector.load %arg49[%c0_508, %c0_509] : memref<2x8xf32, #tpu.memory_space<vmem>>, vector<2x8xf32>
    %cst_510 = arith.constant dense<0.000000e+00> : vector<2x32xf32>
    %786 = tpu.matmul %785, %784, %cst_510 {dimension_numbers = #tpu.dot_dimension_numbers<[1], [0], [0], [1], [0, 0, 1, 1], [], []>} : vector<2x8xf32>, vector<8x32xf32>, vector<2x32xf32> -> vector<2x32xf32>
    %c0_511 = arith.constant 0 : index
    %c0_512 = arith.constant 0 : index
    %787 = vector.load %arg52[%c0_511, %c0_512] : memref<32x10xf32, #tpu.memory_space<vmem>>, vector<32x10xf32>
    %cst_513 = arith.constant dense<0.000000e+00> : vector<2x10xf32>
    %788 = tpu.matmul %786, %787, %cst_513 {dimension_numbers = #tpu.dot_dimension_numbers<[1], [0], [0], [1], [0, 0, 1, 1], [], []>} : vector<2x32xf32>, vector<32x10xf32>, vector<2x10xf32> -> vector<2x10xf32>
    %c0_514 = arith.constant 0 : index
    %c0_515 = arith.constant 0 : index
    %789 = vector.load %arg53[%c0_514, %c0_515] : memref<1x10xf32, #tpu.memory_space<vmem>>, vector<1x10xf32>
    %790 = vector.broadcast %789 : vector<1x10xf32> to vector<2x10xf32>
    %791 = arith.addf %788, %790 : vector<2x10xf32>
    %c0_516 = arith.constant 0 : index
    %c0_517 = arith.constant 0 : index
    %792 = vector.load %arg54[%c0_516, %c0_517] : memref<2x10xf32, #tpu.memory_space<vmem>>, vector<2x10xf32>
    tpu.vector_store %arg54[%c0_516, %c0_517], %791 {strides = array<i32>} : memref<2x10xf32, #tpu.memory_space<vmem>>, vector<2x10xf32>,
    return
  }
}

</mosaic_0001>

<bundles_post_ra>
// kernel: _lambda_.1
= control target key start
LH: loop header
LB: loop body
LE: loop exit
PB: predicated region body
PF: predicated region fallthrough
CT: control target
= control target key end

     0   :  { %s10793_s6 = smov 1   ;;  %s10794_s10 = smov 2   ;;  %s12918_s0 = inlined_call_operand.smem [shape: u32[55], index: -1, kind: input, shape index: {}] }
   0x1   :  { %s10859_s5 = sld [smem:[%s12918_s0]]   ;;  %s10795_s14 = smov 3  }
   0x2   :  { %s10864_s9 = sld [smem:[%s12918_s0 + %s10793_s6]]   ;;  %s10796_s18 = smov 4  }
   0x3   :  { %s10869_s13 = sld [smem:[%s12918_s0 + %s10794_s10]]   ;;  %s10797_s22 = smov 5  }
   0x4   :  { %s10874_s17 = sld [smem:[%s12918_s0 + %s10795_s14]]   ;;  %s10798_s26 = smov 6  }
   0x5   :  { %s10879_s21 = sld [smem:[%s12918_s0 + %s10796_s18]]   ;;  %s10799_s30 = smov 7  }
   0x6   :  { %s10884_s25 = sld [smem:[%s12918_s0 + %s10797_s22]]   ;;  %s10800_s4 = smov 8  }
   0x7   :  { %s10889_s29 = sld [smem:[%s12918_s0 + %s10798_s26]]   ;;  %s10801_s10 = smov 9  }
   0x8   :  { %s10894_s3 = sld [smem:[%s12918_s0 + %s10799_s30]]   ;;  %s10802_s15 = smov 10  }
   0x9   :  { %s10899_s8 = sld [smem:[%s12918_s0 + %s10800_s4]]   ;;  %s10803_s20 = smov 11  }
   0xa   :  { %s10904_s14 = sld [smem:[%s12918_s0 + %s10801_s10]]   ;;  %s10804_s26 = smov 12  }
   0xb   :  { %s10909_s19 = sld [smem:[%s12918_s0 + %s10802_s15]]   ;;  %s10805_s1 = smov 13  }
   0xc   :  { %s10914_s24 = sld [smem:[%s12918_s0 + %s10803_s20]]   ;;  %s10806_s7 = smov 14  }
   0xd   :  { %s10919_s30 = sld [smem:[%s12918_s0 + %s10804_s26]]   ;;  %s10807_s15 = smov 15  }
   0xe   :  { %s10924_s6 = sld [smem:[%s12918_s0 + %s10805_s1]]   ;;  %s10808_s22 = smov 16  }
   0xf   :  { %s10929_s12 = sld [smem:[%s12918_s0 + %s10806_s7]]   ;;  %s10809_s28 = smov 17  }
  0x10   :  { %s10934_s20 = sld [smem:[%s12918_s0 + %s10807_s15]]   ;;  %s10810_s7 = smov 18  }
  0x11   :  { %s10939_s27 = sld [smem:[%s12918_s0 + %s10808_s22]]   ;;  %s10811_s15 = smov 19  }
  0x12   :  { %s10944_s4 = sld [smem:[%s12918_s0 + %s10809_s28]]   ;;  %s10812_s22 = smov 20  }
  0x13   :  { %s10813_s28 = smov 21  }
  0x15   :  { %12964 = sst [smem:[#allocation5_spill]] %s10929_s12 }
  0x16   :  { %12965 = sst [smem:[#allocation6_spill]] %s10934_s20 }
  0x17   :  { %12966 = sst [smem:[#allocation7_spill]] %s10939_s27 }
  0x18   :  { %12967 = sst [smem:[#allocation8_spill]] %s10944_s4 }
  0x19   :  { %s10949_s12 = sld [smem:[%s12918_s0 + %s10810_s7]]   ;;  %s10814_s7 = smov 22  }
  0x1a   :  { %s10954_s20 = sld [smem:[%s12918_s0 + %s10811_s15]]   ;;  %s10815_s15 = smov 23  }
  0x1b   :  { %s10959_s27 = sld [smem:[%s12918_s0 + %s10812_s22]]   ;;  %s10816_s22 = smov 24  }
  0x1c   :  { %s10964_s4 = sld [smem:[%s12918_s0 + %s10813_s28]]   ;;  %s10817_s28 = smov 25  }
  0x1f   :  { %12968 = sst [smem:[#allocation9_spill]] %s10949_s12 }
  0x20   :  { %12969 = sst [smem:[#allocation10_spill]] %s10954_s20 }
  0x21   :  { %12970 = sst [smem:[#allocation11_spill]] %s10959_s27 }
  0x22   :  { %12971 = sst [smem:[#allocation12_spill]] %s10964_s4 }
  0x23   :  { %s10969_s12 = sld [smem:[%s12918_s0 + %s10814_s7]]   ;;  %s10818_s7 = smov 26  }
  0x24   :  { %s10974_s20 = sld [smem:[%s12918_s0 + %s10815_s15]]   ;;  %s10819_s15 = smov 27  }
  0x25   :  { %s10979_s27 = sld [smem:[%s12918_s0 + %s10816_s22]]   ;;  %s10820_s22 = smov 28  }
  0x26   :  { %s10984_s4 = sld [smem:[%s12918_s0 + %s10817_s28]]   ;;  %s10821_s28 = smov 29  }
  0x29   :  { %12972 = sst [smem:[#allocation13_spill]] %s10969_s12 }
  0x2a   :  { %12973 = sst [smem:[#allocation14_spill]] %s10974_s20 }
  0x2b   :  { %12974 = sst [smem:[#allocation15_spill]] %s10979_s27 }
  0x2c   :  { %12975 = sst [smem:[#allocation16_spill]] %s10984_s4 }
  0x2d   :  { %s10989_s12 = sld [smem:[%s12918_s0 + %s10818_s7]]   ;;  %s10822_s7 = smov 30  }
  0x2e   :  { %s10994_s20 = sld [smem:[%s12918_s0 + %s10819_s15]]   ;;  %s10823_s15 = smov 31  }
  0x2f   :  { %s10999_s27 = sld [smem:[%s12918_s0 + %s10820_s22]]   ;;  %s10824_s22 = smov 32  }
  0x30   :  { %s11004_s4 = sld [smem:[%s12918_s0 + %s10821_s28]]   ;;  %s10825_s28 = smov 33  }
  0x33   :  { %12976 = sst [smem:[#allocation17_spill]] %s10989_s12 }
  0x34   :  { %12977 = sst [smem:[#allocation18_spill]] %s10994_s20 }
  0x35   :  { %12978 = sst [smem:[#allocation19_spill]] %s10999_s27 }
  0x36   :  { %12979 = sst [smem:[#allocation20_spill]] %s11004_s4 }
  0x37   :  { %s11009_s12 = sld [smem:[%s12918_s0 + %s10822_s7]]   ;;  %s10826_s7 = smov 34  }
  0x38   :  { %s11014_s20 = sld [smem:[%s12918_s0 + %s10823_s15]]   ;;  %s10827_s15 = smov 35  }
  0x39   :  { %s11019_s27 = sld [smem:[%s12918_s0 + %s10824_s22]]   ;;  %s10828_s22 = smov 36  }
  0x3a   :  { %s11024_s4 = sld [smem:[%s12918_s0 + %s10825_s28]]   ;;  %s10829_s28 = smov 37  }
  0x3d   :  { %12980 = sst [smem:[#allocation21_spill]] %s11009_s12 }
  0x3e   :  { %12981 = sst [smem:[#allocation22_spill]] %s11014_s20 }
  0x3f   :  { %12982 = sst [smem:[#allocation23_spill]] %s11019_s27 }
  0x40   :  { %12983 = sst [smem:[#allocation24_spill]] %s11024_s4 }
  0x41   :  { %s11029_s12 = sld [smem:[%s12918_s0 + %s10826_s7]]   ;;  %s10830_s7 = smov 38  }
  0x42   :  { %s11034_s20 = sld [smem:[%s12918_s0 + %s10827_s15]]   ;;  %s10831_s15 = smov 39  }
  0x43   :  { %s11039_s27 = sld [smem:[%s12918_s0 + %s10828_s22]]   ;;  %s10832_s22 = smov 40  }
  0x44   :  { %s11044_s4 = sld [smem:[%s12918_s0 + %s10829_s28]]   ;;  %s10833_s28 = smov 41  }
  0x47   :  { %12984 = sst [smem:[#allocation25_spill]] %s11029_s12 }
  0x48   :  { %12985 = sst [smem:[#allocation26_spill]] %s11034_s20 }
  0x49   :  { %12986 = sst [smem:[#allocation27_spill]] %s11039_s27 }
  0x4a   :  { %12987 = sst [smem:[#allocation28_spill]] %s11044_s4 }
  0x4b   :  { %s11049_s12 = sld [smem:[%s12918_s0 + %s10830_s7]]   ;;  %s10834_s7 = smov 42  }
  0x4c   :  { %s11054_s20 = sld [smem:[%s12918_s0 + %s10831_s15]]   ;;  %s10835_s15 = smov 43  }
  0x4d   :  { %s11059_s27 = sld [smem:[%s12918_s0 + %s10832_s22]]   ;;  %s10836_s22 = smov 44  }
  0x4e   :  { %s11064_s4 = sld [smem:[%s12918_s0 + %s10833_s28]]   ;;  %s10837_s28 = smov 45  }
  0x51   :  { %12988 = sst [smem:[#allocation29_spill]] %s11049_s12 }
  0x52   :  { %12989 = sst [smem:[#allocation30_spill]] %s11054_s20 }
  0x53   :  { %12990 = sst [smem:[#allocation31_spill]] %s11059_s27 }
  0x54   :  { %12991 = sst [smem:[#allocation32_spill]] %s11064_s4 }
  0x55   :  { %s11069_s12 = sld [smem:[%s12918_s0 + %s10834_s7]]   ;;  %s10838_s7 = smov 46  }
  0x56   :  { %s11074_s20 = sld [smem:[%s12918_s0 + %s10835_s15]]   ;;  %s10839_s15 = smov 47  }
  0x57   :  { %s11079_s27 = sld [smem:[%s12918_s0 + %s10836_s22]]   ;;  %s10840_s22 = smov 48  }
  0x58   :  { %s11084_s4 = sld [smem:[%s12918_s0 + %s10837_s28]]   ;;  %s10841_s28 = smov 49  }
  0x5b   :  { %12992 = sst [smem:[#allocation33_spill]] %s11069_s12 }
  0x5c   :  { %12993 = sst [smem:[#allocation34_spill]] %s11074_s20 }
  0x5d   :  { %12994 = sst [smem:[#allocation35_spill]] %s11079_s27 }
  0x5e   :  { %12995 = sst [smem:[#allocation36_spill]] %s11084_s4 }
  0x5f   :  { %s11089_s12 = sld [smem:[%s12918_s0 + %s10838_s7]]   ;;  %s10842_s7 = smov 50  }
  0x60   :  { %s11094_s20 = sld [smem:[%s12918_s0 + %s10839_s15]]   ;;  %s10843_s15 = smov 51  }
  0x61   :  { %s11099_s27 = sld [smem:[%s12918_s0 + %s10840_s22]]   ;;  %s10844_s22 = smov 52  }
  0x62   :  { %s11104_s4 = sld [smem:[%s12918_s0 + %s10841_s28]]   ;;  %s10845_s28 = smov 53  }
  0x65   :  { %12996 = sst [smem:[#allocation37_spill]] %s11089_s12 }
  0x66   :  { %12997 = sst [smem:[#allocation38_spill]] %s11094_s20 }
  0x67   :  { %12998 = sst [smem:[#allocation39_spill]] %s11099_s27 }
  0x68   :  { %12999 = sst [smem:[#allocation40_spill]] %s11104_s4 }
  0x69   :  { %s11109_s12 = sld [smem:[%s12918_s0 + %s10842_s7]]   ;;  %s10846_s7 = smov 54  }
  0x6a   :  { %s11114_s20 = sld [smem:[%s12918_s0 + %s10843_s15]]  }
  0x6b   :  { %s11119_s27 = sld [smem:[%s12918_s0 + %s10844_s22]]  }
  0x6c   :  { %s11124_s4 = sld [smem:[%s12918_s0 + %s10845_s28]]  }
  0x6f   :  { %13000 = sst [smem:[#allocation41_spill]] %s11109_s12 }
  0x70   :  { %s11129_s12 = sld [smem:[%s12918_s0 + %s10846_s7]]  }
  0x71   :  { %v242_v0 = vld [vmem:[%s10864_s9 + $0x18] sm:$0x7]  ;;  %vm299_vm0 = vcmask 1042432   ;;  %v241_v1 = vld [vmem:[%s10864_s9 + $0x10] sm:$0xff]  ;;  %vm250_vm1 = vcmask 220160   ;;  %v223_v2 = vld [vmem:[%s10859_s5] sm:$0xff] }
  0x72   :  { %9520 = vmatprep.subr.msk.mxu0 %vm299_vm0, %v242_v0  ;;  %v240_v3 = vld [vmem:[%s10864_s9 + $0x8] sm:$0xff]  ;;  %9528 = vmatprep.mubr.msk.f32.mxu0 %vm250_vm1, %v223_v2  ;;  %v239_v4 = vld [vmem:[%s10864_s9] sm:$0xff] }
  0x73   :  { %9521 = vmatpush3.msk.msra.mxu0 %vm299_vm0, %v242_v0  ;;  %v224_v5 = vld [vmem:[%s10859_s5 + $0x8] sm:$0xff] }
  0x74   :  { %9522 = vmatprep.subr.mxu0 %v241_v1 }
  0x75   :  { %9523 = vmatpush3.msra.mxu0 %v241_v1 }
  0x76   :  { %9524 = vmatprep.subr.mxu0 %v240_v3 }
  0x77   :  { %9525 = vmatpush3.msra.mxu0 %v240_v3 }
  0x78   :  { %114 = vsyncpa [#allocation3], 0  ;;  %9526 = vmatprep.subr.mxu0 %v239_v4  ;;  %v225_v6 = vld [vmem:[%s10859_s5 + $0x10] sm:$0xff]  ;;  %v226_v7 = vld [vmem:[%s10859_s5 + $0x18] sm:$0xff]  ;;  %s13058_s0 = sld [smem:[#allocation6_spill]] }
  0x79   :  { %9527 = vmatpush3.msra.mxu0 %v239_v4  ;;  %v227_v8 = vld [vmem:[%s10859_s5 + $0x20] sm:$0xff]  ;;  %v228_v9 = vld [vmem:[%s10859_s5 + $0x28] sm:$0xff]  ;;  %v229_v10 = vld [vmem:[%s10859_s5 + $0x30] sm:$0xff]  ;;  %s13060_s9 = sld [smem:[#allocation7_spill]] }
  0x7a   :  { %9529 = vmatmul.mubr.msk.f32.vlgmr.msra.gmra.mxu0 %vm250_vm1, %v224_v5  ;;  %v230_v11 = vld [vmem:[%s10859_s5 + $0x38] sm:$0xff]  ;;  %v231_v12 = vld [vmem:[%s10859_s5 + $0x40] sm:$0xff]  ;;  %v232_v13 = vld [vmem:[%s10859_s5 + $0x48] sm:$0xff]  ;;  %s13073_s15 = sld [smem:[#allocation20_spill]] }
  0x7b   :  { %9531 = vmatprep.mubr.msk.f32.mxu0 %vm250_vm1, %v225_v6  ;;  %v233_v14 = vld [vmem:[%s10859_s5 + $0x50] sm:$0xff]  ;;  %v234_v15 = vld [vmem:[%s10859_s5 + $0x58] sm:$0xff]  ;;  %v235_v16 = vld [vmem:[%s10859_s5 + $0x60] sm:$0xff]  ;;  %s13074_s16 = sld [smem:[#allocation22_spill]] }
  0x7c   :  { %v236_v17 = vld [vmem:[%s10859_s5 + $0x68] sm:$0xff]  ;;  %v237_v18 = vld [vmem:[%s10859_s5 + $0x70] sm:$0xff]  ;;  %v238_v19 = vld [vmem:[%s10859_s5 + $0x78] sm:$0xff]  ;;  %s13059_s5 = sld [smem:[#allocation5_spill]] }
  0x7d   :  { %v11168_v22 = vld [vmem:[%s10869_s13] ss:$0 sm:$0xff]  ;;  %s13061_s13 = sld [smem:[#allocation16_spill]] }
  0x7e   :  { %9532 = vmatmul.mubr.msk.f32.gmra.mxu0 %vm250_vm1, %v226_v7  ;;  %v881_v37 = vld [vmem:[%s10874_s17] sm:$0xff]  ;;  %s13075_s18 = sld [smem:[#allocation21_spill]] }
  0x7f   :  { %9534 = vmatprep.mubr.msk.f32.mxu0 %vm250_vm1, %v227_v8  ;;  %9584 = vmatprep.mubr.f32.mxu1 %v881_v37  ;;  %s13076_s22 = sld [smem:[#allocation25_spill]] }
  0x80   :  { %s13077_s23 = sld [smem:[#allocation26_spill]] }
  0x81   :  { %s13078_s26 = sld [smem:[#allocation23_spill]] }
  0x82   :  { %9535 = vmatmul.mubr.msk.f32.gmra.mxu0 %vm250_vm1, %v228_v9  ;;  %s13079_s28 = sld [smem:[#allocation24_spill]] }
  0x83   :  { %9537 = vmatprep.mubr.msk.f32.mxu0 %vm250_vm1, %v229_v10  ;;  %s13080_s1 = sld [smem:[#allocation27_spill]] }
  0x84   :  { %s13081_s2 = sld [smem:[#allocation28_spill]] }
  0x85   :  { %s13082_s7 = sld [smem:[#allocation29_spill]] }
  0x86   :  { %9538 = vmatmul.mubr.msk.f32.gmra.mxu0 %vm250_vm1, %v230_v11  ;;  %s13083_s10 = sld [smem:[#allocation30_spill]] }
  0x87   :  { %9540 = vmatprep.mubr.msk.f32.mxu0 %vm250_vm1, %v231_v12  ;;  %s13084_s11 = sld [smem:[#allocation39_spill]] }
  0x8a   :  { %9541 = vmatmul.mubr.msk.f32.gmra.mxu0 %vm250_vm1, %v232_v13 }
  0x8b   :  { %9543 = vmatprep.mubr.msk.f32.mxu0 %vm250_vm1, %v233_v14 }
  0x8e   :  { %9544 = vmatmul.mubr.msk.f32.gmra.mxu0 %vm250_vm1, %v234_v15 }
  0x8f   :  { %9546 = vmatprep.mubr.msk.f32.mxu0 %vm250_vm1, %v235_v16 }
  0x92   :  { %9547 = vmatmul.mubr.msk.f32.gmra.mxu0 %vm250_vm1, %v236_v17 }
  0x93   :  { %9549 = vmatprep.mubr.msk.f32.mxu0 %vm250_vm1, %v237_v18 }
  0x96   :  { %9550 = vmatmul.mubr.msk.f32.gmra.mxu0 %vm250_vm1, %v238_v19 }
 0x13a   :  { %v9530_v20 = vpop.f32.mrf.mxu0 }
 0x13b   :  { %v11171_v24 = vadd.f32 %v9530_v20, %v11168_v22 }
 0x13c   :  { %v369_v21 = vpop.f32.mrf.mxu0 }
 0x13d   :  { %13001 = vst [vmem:[#allocation42_spill] sm:$0xff] %v11171_v24  ;;  %v11174_v26 = vmul.f32 0.70710677, %v11171_v24  ;;  %v11181_v30 = vadd.f32 %v11168_v22, %v369_v21 }
 0x13e   :  { %v9533_v23 = vpop.f32.mrf.mxu0 }
 0x13f   :  { %13002 = vst [vmem:[#allocation43_spill] sm:$0xff] %v11174_v26  ;;  %v11177_v27 = vadd.f32 %v9533_v23, %v11168_v22  ;;  %v513_v29 = vand.u32 2147483647, %v11174_v26  ;;  %13004 = vst [vmem:[#allocation45_spill] sm:$0xff] %v11181_v30  ;;  %v11190_v35 = vmul.f32 0.70710677, %v11181_v30 }
 0x140   :  { %v379_v25 = vpop.f32.mrf.mxu0 }
 0x141   :  { %13003 = vst [vmem:[#allocation44_spill] sm:$0xff] %v11177_v27  ;;  %v11184_v31 = vmul.f32 0.70710677, %v11177_v27  ;;  %v529_v34 = vmul.f32 0.3275911, %v513_v29  ;;  %13007 = vst [vmem:[#allocation48_spill] sm:$0xff] %v11190_v35  ;;  %v11193_v36 = vadd.f32 %v11168_v22, %v379_v25 }
 0x142   :  { %v9536_v28 = vpop.f32.mrf.mxu0  ;;  %v512_v42 = vand.u32 2147483647, %v11190_v35  ;;  %v737_v63 = vsub.f32 0.0, %v513_v29 }
 0x143   :  { %13005 = vst [vmem:[#allocation46_spill] sm:$0xff] %v11184_v31  ;;  %v11187_v33 = vadd.f32 %v9536_v28, %v11168_v22  ;;  %13008 = vst [vmem:[#allocation49_spill] sm:$0xff] %v11193_v36  ;;  %v515_v38 = vand.u32 2147483647, %v11184_v31  ;;  %v545_v41 = vadd.f32 1.0, %v529_v34 }
 0x144   :  { %v389_v32 = vpop.f32.mrf.mxu0  ;;  %v11202_v43 = vmul.f32 0.70710677, %v11193_v36  ;;  %v528_v48 = vmul.f32 0.3275911, %v512_v42  ;;  %v736_v4 = vsub.f32 0.0, %v512_v42  ;;  %v753_v7 = vmul.f32 %v737_v63, %v513_v29 }
 0x145   :  { %13006 = vst [vmem:[#allocation47_spill] sm:$0xff] %v11187_v33  ;;  %v11198_v40 = vmul.f32 0.70710677, %v11187_v33  ;;  %v531_v45 = vmul.f32 0.3275911, %v515_v38  ;;  %v11211_v47 = vadd.f32 %v11168_v22, %v389_v32  ;;  %10569 = vrcp.f32 %v545_v41 }
 0x146   :  { %v9539_v39 = vpop.f32.mrf.mxu0  ;;  %13009 = vst [vmem:[#allocation50_spill] sm:$0xff] %v11202_v43  ;;  %v514_v50 = vand.u32 2147483647, %v11202_v43  ;;  %v544_v55 = vadd.f32 1.0, %v528_v48  ;;  %v739_v8 = vsub.f32 0.0, %v515_v38  ;;  %v752_v14 = vmul.f32 %v736_v4, %v512_v42 }
 0x147   :  { %v11205_v44 = vadd.f32 %v9539_v39, %v11168_v22  ;;  %v11208_v46 = vand.u32 2147483647, %v11198_v40  ;;  %13011 = vst [vmem:[#allocation52_spill] sm:$0xff] %v11211_v47  ;;  %v547_v52 = vadd.f32 1.0, %v531_v45  ;;  %v11219_v54 = vmul.f32 0.70710677, %v11211_v47 }
 0x148   :  { %v399_v49 = vpop.f32.mrf.mxu0  ;;  %v530_v57 = vmul.f32 0.3275911, %v514_v50  ;;  %v770_v18 = vmul.f32 1.442695, %v753_v7  ;;  %v755_v19 = vmul.f32 %v739_v8, %v515_v38  ;;  %v738_v20 = vsub.f32 0.0, %v514_v50 }
 0x149   :  { %13010 = vst [vmem:[#allocation51_spill] sm:$0xff] %v11205_v44  ;;  %v11215_v51 = vmul.f32 0.70710677, %v11205_v44  ;;  %v533_v53 = vmul.f32 0.3275911, %v11208_v46  ;;  %v11225_v59 = vadd.f32 %v11168_v22, %v399_v49  ;;  %10571 = vrcp.f32 %v547_v52 }
 0x14a   :  { %v9542_v56 = vpop.f32.mrf.mxu0  ;;  %v11228_v61 = vand.u32 2147483647, %v11219_v54  ;;  %10573 = vrcp.f32 %v544_v55  ;;  %v546_v0 = vadd.f32 1.0, %v530_v57  ;;  %v768_v29 = vmul.f32 1.442695, %v752_v14 }
 0x14b   :  { %v11222_v58 = vand.u32 2147483647, %v11215_v51  ;;  %13012 = vst [vmem:[#allocation53_spill] sm:$0xff] %v11225_v59  ;;  %v549_v60 = vadd.f32 1.0, %v533_v53  ;;  %v11231_v62 = vadd.f32 %v9542_v56, %v11168_v22  ;;  %v11235_v2 = vmul.f32 0.70710677, %v11225_v59 }
 0x14c   :  { %v409_v3 = vpop.f32.mrf.mxu0  ;;  %v532_v5 = vmul.f32 0.3275911, %v11228_v61  ;;  %v774_v38 = vmul.f32 1.442695, %v755_v19  ;;  %v754_v39 = vmul.f32 %v738_v20, %v514_v50  ;;  %v741_v42 = vsub.f32 0.0, %v11208_v46 }
 0x14d   :  { %13013 = vst [vmem:[#allocation54_spill] sm:$0xff] %v11231_v62  ;;  %v535_v1 = vmul.f32 0.3275911, %v11222_v58  ;;  %10575 = vrcp.f32 %v549_v60  ;;  %v11239_v6 = vmul.f32 0.70710677, %v11231_v62  ;;  %v11247_v12 = vadd.f32 %v11168_v22, %v409_v3 }
 0x14e   :  { %10577 = vrcp.f32 %v546_v0  ;;  %v11244_v11 = vand.u32 2147483647, %v11235_v2  ;;  %v9545_v13 = vpop.f32.mrf.mxu0  ;;  %v548_v15 = vadd.f32 1.0, %v532_v5  ;;  %v740_v55 = vsub.f32 0.0, %v11228_v61 }
 0x14f   :  { %v551_v10 = vadd.f32 1.0, %v535_v1  ;;  %13015 = vst [vmem:[#allocation56_spill] sm:$0xff] %v11247_v12  ;;  %v11250_v16 = vand.u32 2147483647, %v11239_v6  ;;  %v11255_v23 = vmul.f32 0.70710677, %v11247_v12  ;;  %v11261_v34 = vadd.f32 %v9545_v13, %v11168_v22 }
 0x150   :  { %v534_v21 = vmul.f32 0.3275911, %v11244_v11  ;;  %v419_v25 = vpop.f32.mrf.mxu0  ;;  %v743_v56 = vsub.f32 0.0, %v11222_v58  ;;  %v772_v3 = vmul.f32 1.442695, %v754_v39  ;;  %v757_v4 = vmul.f32 %v741_v42, %v11208_v46 }
 0x151   :  { %10579 = vrcp.f32 %v551_v10  ;;  %v537_v32 = vmul.f32 0.3275911, %v11250_v16  ;;  %13017 = vst [vmem:[#allocation58_spill] sm:$0xff] %v11261_v34  ;;  %v11267_v48 = vand.u32 2147483647, %v11255_v23  ;;  %v11276_v50 = vadd.f32 %v11168_v22, %v419_v25 }
 0x152   :  { %v11241_v9 = vpop.eup %10569  ;;  %10581 = vrcp.f32 %v548_v15  ;;  %v550_v45 = vadd.f32 1.0, %v534_v21  ;;  %v11270_v49 = vmul.f32 0.70710677, %v11261_v34  ;;  %v9548_v52 = vpop.f32.mrf.mxu0  ;;  %v756_v14 = vmul.f32 %v740_v55, %v11228_v61 }
 0x153   :  { %13014 = vst [vmem:[#allocation55_spill] sm:$0xff] %v11241_v9  ;;  %v593_v17 = vmul.f32 1.0614054, %v11241_v9  ;;  %10583 = vpow2.f32 %v770_v18  ;;  %13018 = vst [vmem:[#allocation59_spill] sm:$0xff] %v11276_v50  ;;  %v553_v57 = vadd.f32 1.0, %v537_v32  ;;  %v759_v15 = vmul.f32 %v743_v56, %v11222_v58 }
 0x154   :  { %10585 = vpow2.f32 %v768_v29  ;;  %v11279_v60 = vand.u32 2147483647, %v11270_v49  ;;  %v536_v5 = vmul.f32 0.3275911, %v11267_v48  ;;  %v429_v8 = vpop.f32.mrf.mxu0  ;;  %v11297_v19 = vadd.f32 %v9548_v52, %v11168_v22  ;;  %v970_v52 = vld [vmem:[%s10879_s21] sm:$0xff] }
 0x155   :  { %v609_v37 = vadd.f32 -1.4531521, %v593_v17  ;;  %10587 = vpow2.f32 %v774_v38  ;;  %v11293_v17 = vmul.f32 0.70710677, %v11276_v50  ;;  %v11303_v61 = vadd.f32 %v11168_v22, %v429_v8  ;;  %9590 = vmatprep.subr.mxu0 %v970_v52 }
 0x156   :  { %v11257_v28 = vpop.eup %10571  ;;  %10589 = vrcp.f32 %v550_v45  ;;  %v539_v7 = vmul.f32 0.3275911, %v11279_v60  ;;  %v778_v29 = vmul.f32 1.442695, %v757_v4  ;;  %v552_v32 = vadd.f32 1.0, %v536_v5  ;;  %9591 = vmatpush3.msra.mxu0 %v970_v52 }
 0x157   :  { %13016 = vst [vmem:[#allocation57_spill] sm:$0xff] %v11257_v28  ;;  %v11263_v41 = vpop.eup %10573  ;;  %v595_v53 = vmul.f32 1.0614054, %v11257_v28  ;;  %v625_v0 = vmul.f32 %v11241_v9, %v609_v37  ;;  %10591 = vrcp.f32 %v553_v57  ;;  %v11300_v25 = vand.u32 2147483647, %v11293_v17  ;;  %13019 = vst [vmem:[#allocation60_spill] sm:$0xff] %v11303_v61  ;;  %v9551_v57 = vpop.f32.mrf.mxu0 }
 0x158   :  { %v592_v1 = vmul.f32 1.0614054, %v11263_v41  ;;  %v555_v46 = vadd.f32 1.0, %v539_v7  ;;  %v776_v39 = vmul.f32 1.442695, %v756_v14  ;;  %v742_v42 = vsub.f32 0.0, %v11244_v11 }
 0x159   :  { %v611_v13 = vadd.f32 -1.4531521, %v595_v53  ;;  %v641_v20 = vadd.f32 1.4214138, %v625_v0  ;;  %v538_v45 = vmul.f32 0.3275911, %v11300_v25 }
 0x15a   :  { %v11281_v63 = vpop.eup %10575  ;;  %v608_v21 = vadd.f32 -1.4531521, %v592_v1  ;;  %10593 = vrcp.f32 %v555_v46  ;;  %v782_v55 = vmul.f32 1.442695, %v759_v15  ;;  %v11313_v56 = vmul.f32 0.70710677, %v11297_v19 }
 0x15b   :  { %v11288_v10 = vpop.eup %10577  ;;  %v597_v18 = vmul.f32 1.0614054, %v11281_v63  ;;  %v627_v38 = vmul.f32 %v11257_v28, %v611_v13  ;;  %10595 = vpow2.f32 %v772_v3  ;;  %v657_v1 = vmul.f32 %v11241_v9, %v641_v20 }
 0x15c   :  { %v594_v58 = vmul.f32 1.0614054, %v11288_v10  ;;  %v624_v4 = vmul.f32 %v11263_v41, %v608_v21  ;;  %v554_v5 = vadd.f32 1.0, %v538_v45  ;;  %v11320_v7 = vmul.f32 0.70710677, %v11303_v61 }
 0x15d   :  { %v613_v53 = vadd.f32 -1.4531521, %v597_v18  ;;  %10597 = vrcp.f32 %v552_v32  ;;  %v11326_v14 = vand.u32 2147483647, %v11313_v56  ;;  %v643_v15 = vadd.f32 1.4214138, %v627_v38 }
 0x15e   :  { %v11306_v37 = vpop.eup %10579  ;;  %v610_v3 = vadd.f32 -1.4531521, %v594_v58  ;;  %v758_v18 = vmul.f32 %v742_v42, %v11244_v11  ;;  %10599 = vrcp.f32 %v554_v5  ;;  %v11330_v46 = vadd.f32 %v9551_v57, %v11168_v22  ;;  %v439_v11 = vpop.f32.mrf.mxu0 }
 0x15f   :  { %v11315_v0 = vpop.eup %10581  ;;  %v599_v13 = vmul.f32 1.0614054, %v11306_v37  ;;  %v629_v20 = vmul.f32 %v11281_v63, %v613_v53  ;;  %10601 = vpow2.f32 %v778_v29  ;;  %v541_v58 = vmul.f32 0.3275911, %v11326_v14 }
 0x160   :  { %v11322_v8 = vpop.eup %10583  ;;  %v596_v21 = vmul.f32 1.0614054, %v11315_v0  ;;  %v673_v32 = vadd.f32 -0.28449672, %v657_v1  ;;  %v640_v52 = vadd.f32 1.4214138, %v624_v4  ;;  %10603 = vpow2.f32 %v776_v39 }
 0x161   :  { %13020 = vst [vmem:[#allocation61_spill] sm:$0xff] %v11322_v8  ;;  %v11335_v45 = vpop.eup %10585  ;;  %v11338_v38 = vand.u32 2147483647, %v11320_v7  ;;  %v626_v57 = vmul.f32 %v11288_v10, %v610_v3  ;;  %v615_v5 = vadd.f32 -1.4531521, %v599_v13  ;;  %10605 = vpow2.f32 %v782_v55 }
 0x162   :  { %13021 = vst [vmem:[#allocation62_spill] sm:$0xff] %v11335_v45  ;;  %v11340_v42 = vpop.eup %10587  ;;  %v557_v29 = vadd.f32 1.0, %v541_v58  ;;  %v659_v30 = vmul.f32 %v11257_v28, %v643_v15  ;;  %v780_v24 = vmul.f32 1.442695, %v758_v18  ;;  %v11348_v39 = vmul.f32 0.70710677, %v11330_v46 }
 0x163   :  { %13022 = vst [vmem:[#allocation63_spill] sm:$0xff] %v11340_v42  ;;  %v11343_v53 = vpop.eup %10589  ;;  %v540_v1 = vmul.f32 0.3275911, %v11338_v38  ;;  %v645_v4 = vadd.f32 1.4214138, %v629_v20  ;;  %v11351_v27 = vadd.f32 %v11168_v22, %v439_v11  ;;  %v689_v55 = vmul.f32 %v11241_v9, %v673_v32 }
 0x164   :  { %v612_v36 = vadd.f32 -1.4531521, %v596_v21  ;;  %10607 = vrcp.f32 %v557_v29  ;;  %v11353_v3 = vpop.eup %10591  ;;  %v656_v13 = vmul.f32 %v11263_v41, %v640_v52  ;;  %vm489_vm2 = vcmp.ge.f32.partialorder %v11239_v6, 0.0 }
 0x165   :  { %v556_v15 = vadd.f32 1.0, %v540_v1  ;;  %v642_v18 = vadd.f32 1.4214138, %v626_v57  ;;  %v631_v58 = vmul.f32 %v11306_v37, %v615_v5  ;;  %v598_v47 = vmul.f32 1.0614054, %v11343_v53 }
 0x166   :  { %v11361_v20 = vand.u32 2147483647, %v11348_v39  ;;  %v675_v22 = vadd.f32 -0.28449672, %v659_v30  ;;  %v745_v11 = vsub.f32 0.0, %v11250_v16  ;;  %v661_v52 = vmul.f32 %v11281_v63, %v645_v4 }
 0x167   :  { %v11363_v21 = vpop.eup %10593  ;;  %10609 = vrcp.f32 %v556_v15  ;;  %v11367_v32 = vmul.f32 0.70710677, %v11351_v27  ;;  %v628_v57 = vmul.f32 %v11315_v0, %v612_v36  ;;  %v601_v5 = vmul.f32 1.0614054, %v11353_v3 }
 0x168   :  { %v543_v29 = vmul.f32 0.3275911, %v11361_v20  ;;  %v11373_v1 = vpop.eup %10595  ;;  %v11375_v33 = vadd.f32 -0.28449672, %v656_v13  ;;  %10611 = vpow2.f32 %v780_v24  ;;  %v603_v30 = vmul.f32 1.0614054, %v11363_v21 }
 0x169   :  { %13023 = vst [vmem:[#allocation64_spill] sm:$0xff] %v11373_v1  ;;  %v11379_v15 = vand.u32 2147483647, %v11367_v32  ;;  %v658_v35 = vmul.f32 %v11288_v10, %v642_v18  ;;  %v647_v59 = vadd.f32 1.4214138, %v631_v58  ;;  %v691_v43 = vmul.f32 %v11257_v28, %v675_v22 }
 0x16a   :  { %v614_v4 = vadd.f32 -1.4531521, %v598_v47  ;;  %v559_v26 = vadd.f32 1.0, %v543_v29  ;;  %v11382_v36 = vpop.eup %10597  ;;  %v11384_v44 = vadd.f32 0.2548296, %v689_v55  ;;  %v761_v13 = vmul.f32 %v745_v11, %v11250_v16 }
 0x16b   :  { %v542_v24 = vmul.f32 0.3275911, %v11379_v15  ;;  %v11389_v45 = vpop.eup %10599  ;;  %v677_v12 = vadd.f32 -0.28449672, %v661_v52  ;;  %v644_v31 = vadd.f32 1.4214138, %v628_v57  ;;  %v663_v52 = vmul.f32 %v11306_v37, %v647_v59 }
 0x16c   :  { %13024 = vst [vmem:[#allocation65_spill] sm:$0xff] %v11384_v44  ;;  %v617_v8 = vadd.f32 -1.4531521, %v601_v5  ;;  %10613 = vrcp.f32 %v559_v26  ;;  %v11391_v18 = vpop.eup %10601  ;;  %v12956_v47 = vmov -1.0   ;;  %v619_v58 = vadd.f32 -1.4531521, %v603_v30 }
 0x16d   :  { %13025 = vst [vmem:[#allocation66_spill] sm:$0xff] %v11391_v18  ;;  %v11396_v55 = vsel %vm489_vm2, 1.0, %v12956_v47  ;;  %v602_v22 = vmul.f32 1.0614054, %v11389_v45  ;;  %v558_v16 = vadd.f32 1.0, %v542_v24  ;;  %v11399_v11 = vpop.eup %10603  ;;  %v630_v26 = vmul.f32 %v11343_v53, %v614_v4 }
 0x16e   :  { %13026 = vst [vmem:[#allocation67_spill] sm:$0xff] %v11396_v55  ;;  %13027 = vst [vmem:[#allocation68_spill] sm:$0xff] %v11399_v11  ;;  %v11401_v29 = vadd.f32 -0.28449672, %v658_v35  ;;  %v747_v57 = vsub.f32 0.0, %v11279_v60  ;;  %v11406_v5 = vpop.eup %10605  ;;  %v749_v30 = vsub.f32 0.0, %v11326_v14  ;;  %v11413_v24 = vmul.f32 %v11315_v0, %v644_v31 }
 0x16f   :  { %v600_v6 = vmul.f32 1.0614054, %v11382_v36  ;;  %v618_v47 = vadd.f32 -1.4531521, %v602_v22  ;;  %10615 = vrcp.f32 %v558_v16  ;;  %v11410_v62 = vadd.f32 0.2548296, %v691_v43 }
 0x170   :  { %v11415_v35 = vmul.f32 1.442695, %v761_v13  ;;  %v746_v59 = vsub.f32 0.0, %v11300_v25  ;;  %v11421_v1 = vmul.f32 %v11281_v63, %v677_v12  ;;  %v633_v50 = vmul.f32 %v11353_v3, %v617_v8 }
 0x171   :  { %13028 = vst [vmem:[#allocation69_spill] sm:$0xff] %v11410_v62  ;;  %v11418_v4 = vpop.eup %10607  ;;  %v635_v22 = vmul.f32 %v11363_v21, %v619_v58  ;;  %v748_v16 = vsub.f32 0.0, %v11338_v38  ;;  %v646_v43 = vadd.f32 1.4214138, %v630_v26  ;;  %v763_v42 = vmul.f32 %v747_v57, %v11279_v60 }
 0x172   :  { %v605_v31 = vmul.f32 1.0614054, %v11418_v4  ;;  %v751_v13 = vsub.f32 0.0, %v11361_v20  ;;  %v11429_v9 = vadd.f32 -0.28449672, %v663_v52  ;;  %v634_v34 = vmul.f32 %v11389_v45, %v618_v47 }
 0x173   :  { %v616_v44 = vadd.f32 -1.4531521, %v600_v6  ;;  %v765_v12 = vmul.f32 %v749_v30, %v11326_v14  ;;  %v744_v8 = vsub.f32 0.0, %v11267_v48  ;;  %v762_v58 = vmul.f32 %v746_v59, %v11300_v25 }
 0x174   :  { %v11433_v11 = vpop.eup %10609  ;;  %v621_v26 = vadd.f32 -1.4531521, %v605_v31  ;;  %v750_v60 = vsub.f32 0.0, %v11379_v15  ;;  %v649_v57 = vadd.f32 1.4214138, %v633_v50  ;;  %v764_v52 = vmul.f32 %v748_v16, %v11338_v38 }
 0x175   :  { %v651_v61 = vadd.f32 1.4214138, %v635_v22  ;;  %v604_v55 = vmul.f32 1.0614054, %v11433_v11  ;;  %v11440_v6 = vpop.eup %10611  ;;  %v662_v47 = vmul.f32 %v11343_v53, %v646_v43  ;;  %v790_v14 = vmul.f32 1.442695, %v763_v42 }
 0x176   :  { %v637_v30 = vmul.f32 %v11418_v4, %v621_v26  ;;  %v767_v18 = vmul.f32 %v751_v13, %v11361_v20  ;;  %v632_v25 = vmul.f32 %v11382_v36, %v616_v44  ;;  %v650_v59 = vadd.f32 1.4214138, %v634_v34 }
 0x177   :  { %v794_v31 = vmul.f32 1.442695, %v765_v12  ;;  %v620_v28 = vadd.f32 -1.4531521, %v604_v55  ;;  %v760_v50 = vmul.f32 %v744_v8, %v11267_v48  ;;  %v788_v22 = vmul.f32 1.442695, %v762_v58 }
 0x178   :  { %v653_v62 = vadd.f32 1.4214138, %v637_v30  ;;  %v766_v38 = vmul.f32 %v750_v60, %v11379_v15  ;;  %v665_v43 = vmul.f32 %v11353_v3, %v649_v57  ;;  %v667_v42 = vmul.f32 %v11363_v21, %v651_v61 }
 0x179   :  { %v11448_v16 = vpop.eup %10613  ;;  %v636_v26 = vmul.f32 %v11433_v11, %v620_v28  ;;  %v792_v20 = vmul.f32 1.442695, %v764_v52  ;;  %10617 = vpow2.f32 %v790_v14  ;;  %v798_v55 = vmul.f32 1.442695, %v767_v18 }
 0x17a   :  { %v669_v44 = vmul.f32 %v11418_v4, %v653_v62  ;;  %v607_v34 = vmul.f32 1.0614054, %v11448_v16  ;;  %v648_v48 = vadd.f32 1.4214138, %v632_v25  ;;  %v666_v13 = vmul.f32 %v11389_v45, %v650_v59 }
 0x17b   :  { %10619 = vpow2.f32 %v794_v31  ;;  %v652_v15 = vadd.f32 1.4214138, %v636_v26  ;;  %v796_v61 = vmul.f32 1.442695, %v766_v38  ;;  %v683_v60 = vadd.f32 -0.28449672, %v667_v42 }
 0x17c   :  { %v11456_v12 = vpop.eup %10615  ;;  %10621 = vpow2.f32 %v788_v22  ;;  %v685_v8 = vadd.f32 -0.28449672, %v669_v44  ;;  %v623_v58 = vadd.f32 -1.4531521, %v607_v34  ;;  %v678_v57 = vadd.f32 -0.28449672, %v662_v47 }
 0x17d   :  { %v668_v28 = vmul.f32 %v11433_v11, %v652_v15  ;;  %10623 = vpow2.f32 %v792_v20  ;;  %v606_v62 = vmul.f32 1.0614054, %v11456_v12  ;;  %v664_v14 = vmul.f32 %v11382_v36, %v648_v48 }
 0x17e   :  { %v701_v18 = vmul.f32 %v11418_v4, %v685_v8  ;;  %v639_v52 = vmul.f32 %v11448_v16, %v623_v58  ;;  %10625 = vpow2.f32 %v798_v55  ;;  %v682_v30 = vadd.f32 -0.28449672, %v666_v13 }
 0x17f   :  { %v684_v25 = vadd.f32 -0.28449672, %v668_v28  ;;  %v622_v59 = vadd.f32 -1.4531521, %v606_v62  ;;  %v681_v31 = vadd.f32 -0.28449672, %v665_v43  ;;  %10627 = vpow2.f32 %v796_v61 }
 0x180   :  { %v784_v22 = vmul.f32 1.442695, %v760_v50  ;;  %v655_v38 = vadd.f32 1.4214138, %v639_v52  ;;  %v699_v42 = vmul.f32 %v11363_v21, %v683_v60  ;;  %v717_v26 = vadd.f32 0.2548296, %v701_v18 }
 0x181   :  { %v700_v20 = vmul.f32 %v11433_v11, %v684_v25  ;;  %v638_v47 = vmul.f32 %v11456_v12, %v622_v59  ;;  %v676_v44 = vadd.f32 -0.28449672, %v11413_v24  ;;  %v695_v34 = vmul.f32 %v11306_v37, %v11429_v9 }
 0x182   :  { %10629 = vpow2.f32 %v11415_v35  ;;  %v671_v55 = vmul.f32 %v11448_v16, %v655_v38  ;;  %v680_v43 = vadd.f32 -0.28449672, %v664_v14  ;;  %v698_v50 = vmul.f32 %v11389_v45, %v682_v30 }
 0x183   :  { %v716_v48 = vadd.f32 0.2548296, %v700_v20  ;;  %v654_v13 = vadd.f32 1.4214138, %v638_v47  ;;  %v690_v15 = vmul.f32 %v11288_v10, %v11401_v29  ;;  %v694_v8 = vmul.f32 %v11343_v53, %v678_v57 }
 0x184   :  { %v697_v58 = vmul.f32 %v11353_v3, %v681_v31  ;;  %v687_v24 = vadd.f32 -0.28449672, %v671_v55  ;;  %10631 = vpow2.f32 %v784_v22  ;;  %v715_v61 = vadd.f32 0.2548296, %v699_v42 }
 0x185   :  { %v733_v9 = vmul.f32 %v11418_v4, %v717_v26  ;;  %v670_v35 = vmul.f32 %v11456_v12, %v654_v13  ;;  %v709_v60 = vadd.f32 0.2548296, %v11421_v1  ;;  %v692_v28 = vmul.f32 %v11315_v0, %v676_v44 }
 0x186   :  { %v711_v62 = vadd.f32 0.2548296, %v695_v34  ;;  %v703_v18 = vmul.f32 %v11448_v16, %v687_v24  ;;  %v10618_v52 = vpop.eup %10617  ;;  %v696_v29 = vmul.f32 %v11382_v36, %v680_v43  ;;  %v714_v57 = vadd.f32 0.2548296, %v698_v50 }
 0x187   :  { %v732_v14 = vmul.f32 %v11433_v11, %v716_v48  ;;  %v686_v30 = vadd.f32 -0.28449672, %v670_v35  ;;  %v11485_v4 = vmul.f32 %v11263_v41, %v11375_v33  ;;  %v710_v59 = vadd.f32 0.2548296, %v694_v8 }
 0x188   :  { %v10620_v25 = vpop.eup %10619  ;;  %v713_v31 = vadd.f32 0.2548296, %v697_v58  ;;  %v719_v1 = vadd.f32 0.2548296, %v703_v18  ;;  %v11487_v38 = vadd.f32 0.2548296, %v690_v15  ;;  %v731_v42 = vmul.f32 %v11363_v21, %v715_v61 }
 0x189   :  { %v10622_v22 = vpop.eup %10621  ;;  %v813_v26 = vmul.f32 %v10620_v25, %v733_v9  ;;  %v702_v20 = vmul.f32 %v11456_v12, %v686_v30  ;;  %v11492_v11 = vmul.f32 %v11281_v63, %v709_v60  ;;  %v708_v44 = vadd.f32 0.2548296, %v692_v28 }
 0x18a   :  { %v10624_v47 = vpop.eup %10623  ;;  %vm495_vm3 = vcmp.ge.f32.partialorder %v11348_v39, 0.0  ;;  %v735_v33 = vmul.f32 %v11448_v16, %v719_v1  ;;  %v712_v55 = vadd.f32 0.2548296, %v696_v29  ;;  %v730_v43 = vmul.f32 %v11389_v45, %v714_v57 }
 0x18b   :  { %v10626_v34 = vpop.eup %10625  ;;  %v812_v50 = vmul.f32 %v10624_v47, %v732_v14  ;;  %v718_v48 = vadd.f32 0.2548296, %v702_v20  ;;  %v727_v21 = vmul.f32 %v11306_v37, %v711_v62  ;;  %v726_v13 = vmul.f32 %v11343_v53, %v710_v59 }
 0x18c   :  { %v729_v15 = vmul.f32 %v11353_v3, %v713_v31  ;;  %v815_v8 = vmul.f32 %v10626_v34, %v735_v33  ;;  %v10628_v63 = vpop.eup %10627  ;;  %vm488_vm4 = vcmp.ge.f32.partialorder %v11255_v23, 0.0  ;;  %v811_v58 = vmul.f32 %v10618_v52, %v731_v42 }
 0x18d   :  { %vm493_vm5 = vcmp.ge.f32.partialorder %v11313_v56, 0.0  ;;  %v829_v16 = vsub.f32 1.0, %v813_v26  ;;  %v734_v24 = vmul.f32 %v11456_v12, %v718_v48  ;;  %vm492_vm6 = vcmp.ge.f32.partialorder %v11320_v7, 0.0 }
 0x18e   :  { %v13029_v45 = vmov -1.0   ;;  %v831_v61 = vsub.f32 1.0, %v815_v8  ;;  %vm494_vm7 = vcmp.ge.f32.partialorder %v11367_v32, 0.0  ;;  %v728_v3 = vmul.f32 %v11382_v36, %v712_v55 }
 0x18f   :  { %v511_v37 = vsel %vm495_vm3, 1.0, %v13029_v45  ;;  %v10630_v53 = vpop.eup %10629  ;;  %v810_v9 = vmul.f32 %v10622_v22, %v730_v43  ;;  %v828_v35 = vsub.f32 1.0, %v812_v50  ;;  %v814_v60 = vmul.f32 %v10628_v63, %v734_v24  ;;  %v13034_v63 = vld [vmem:[#allocation60_spill] sm:$0xff] }
 0x190   :  { %v809_v28 = vmul.f32 %v10630_v53, %v729_v15  ;;  %vm491_vm8 = vcmp.ge.f32.partialorder %v11270_v49, 0.0  ;;  %v509_v56 = vsel %vm493_vm5, 1.0, %v13029_v45  ;;  %v847_v12 = vmul.f32 %v831_v61, %v511_v37  ;;  %v13036_v61 = vld [vmem:[#allocation58_spill] sm:$0xff] }
 0x191   :  { %vm487_vm9 = vcmp.ge.f32.partialorder %v11215_v51, 0.0  ;;  %v827_v62 = vsub.f32 1.0, %v811_v58  ;;  %vm490_vm10 = vcmp.ge.f32.partialorder %v11293_v17, 0.0  ;;  %v845_v39 = vmul.f32 %v829_v16, %v509_v56  ;;  %v10632_v52 = vpop.eup %10631  ;;  %v13042_v51 = vld [vmem:[#allocation54_spill] sm:$0xff] }
 0x192   :  { %v830_v18 = vsub.f32 1.0, %v814_v60  ;;  %v508_v36 = vsel %vm492_vm6, 1.0, %v13029_v45  ;;  %v463_v29 = vmul.f32 0.5, %v11330_v46  ;;  %v863_v57 = vadd.f32 1.0, %v847_v12  ;;  %v13037_v60 = vld [vmem:[#allocation65_spill] sm:$0xff] }
 0x193   :  { %v510_v14 = vsel %vm494_vm7, 1.0, %v13029_v45  ;;  %vm486_vm11 = vcmp.ge.f32.partialorder %v11235_v2, 0.0  ;;  %v808_v30 = vmul.f32 %v10632_v52, %v728_v3  ;;  %v826_v25 = vsub.f32 1.0, %v810_v9  ;;  %v13040_v52 = vld [vmem:[#allocation59_spill] sm:$0xff] }
 0x194   :  { %v844_v59 = vmul.f32 %v828_v35, %v508_v36  ;;  %v846_v31 = vmul.f32 %v830_v18, %v510_v14  ;;  %v807_v1 = vmul.f32 %v11406_v5, %v727_v21  ;;  %v825_v22 = vsub.f32 1.0, %v809_v28  ;;  %v13033_v21 = vld [vmem:[#allocation67_spill] sm:$0xff] }
 0x195   :  { %v507_v7 = vsel %vm491_vm8, 1.0, %v13029_v45  ;;  %v11525_v42 = vmul.f32 %v863_v57, %v463_v29  ;;  %vm485_vm12 = vcmp.ge.f32.partialorder %v11198_v40, 0.0  ;;  %v861_v32 = vadd.f32 1.0, %v845_v39  ;;  %v13038_v28 = vld [vmem:[#allocation55_spill] sm:$0xff]  ;;  %v13041_v57 = vld [vmem:[#allocation64_spill] sm:$0xff] }
 0x196   :  { %v843_v46 = vmul.f32 %v827_v62, %v507_v7  ;;  %v462_v26 = vmul.f32 0.5, %v11351_v27  ;;  %v862_v20 = vadd.f32 1.0, %v846_v31  ;;  %v724_v47 = vmul.f32 %v11315_v0, %v708_v44  ;;  %v13030_v27 = vld [vmem:[#allocation69_spill] sm:$0xff]  ;;  %v13032_v44 = vld [vmem:[#allocation66_spill] sm:$0xff] }
 0x197   :  { %v806_v33 = vmul.f32 %v11440_v6, %v726_v13  ;;  %v506_v5 = vsel %vm490_vm10, 1.0, %v13029_v45  ;;  %v461_v49 = vmul.f32 0.5, %v11297_v19  ;;  %9552 = vmatprep.subr.mxu1 %v11525_v42  ;;  %vm484_vm13 = vcmp.ge.f32.partialorder %v11219_v54, 0.0  ;;  %v13031_v0 = vld [vmem:[#allocation57_spill] sm:$0xff] }
 0x198   :  { %v824_v34 = vsub.f32 1.0, %v808_v30  ;;  %v842_v55 = vmul.f32 %v826_v25, %v506_v5  ;;  %v860_v43 = vadd.f32 1.0, %v844_v59  ;;  %v11537_v50 = vmul.f32 %v862_v20, %v462_v26  ;;  %9553 = vmatpush3.msra.mxu1 %v11525_v42  ;;  %v13043_v7 = vld [vmem:[#allocation61_spill] sm:$0xff] }
 0x199   :  { %v723_v6 = vmul.f32 %v13031_v0, %v13030_v27  ;;  %v805_v17 = vmul.f32 %v13032_v44, %v11492_v11  ;;  %v823_v48 = vsub.f32 1.0, %v807_v1  ;;  %v504_v19 = vsel %vm488_vm4, 1.0, %v13029_v45  ;;  %v13035_v11 = vld [vmem:[#allocation68_spill] sm:$0xff] }
 0x19a   :  { %v841_v13 = vmul.f32 %v825_v22, %v13033_v21  ;;  %v859_v15 = vadd.f32 1.0, %v843_v46  ;;  %v11548_v8 = vmul.f32 %v861_v32, %v461_v49  ;;  %v460_v58 = vmul.f32 0.5, %v13034_v63  ;;  %9554 = vmatprep.subr.mxu1 %v11537_v50  ;;  %v13045_v32 = vld [vmem:[#allocation56_spill] sm:$0xff]  ;;  %v13046_v49 = vld [vmem:[#allocation62_spill] sm:$0xff]  ;;  %v13050_v21 = vld [vmem:[#allocation53_spill] sm:$0xff] }
 0x19b   :  { %v704_v16 = vadd.f32 0.2548296, %v11485_v4  ;;  %v722_v24 = vmul.f32 %v11288_v10, %v11487_v38  ;;  %v804_v37 = vmul.f32 %v13035_v11, %v724_v47  ;;  %v459_v53 = vmul.f32 0.5, %v13036_v61  ;;  %9555 = vmatpush3.msra.mxu1 %v11537_v50  ;;  %v13039_v4 = vld [vmem:[#allocation63_spill] sm:$0xff] }
 0x19c   :  { %v822_v23 = vsub.f32 1.0, %v806_v33  ;;  %v840_v3 = vmul.f32 %v824_v34, %v504_v19  ;;  %v858_v9 = vadd.f32 1.0, %v842_v55  ;;  %v11558_v35 = vmul.f32 %v860_v43, %v460_v58  ;;  %9556 = vmatprep.subr.mxu1 %v11548_v8  ;;  %v13047_v55 = vld [vmem:[#allocation50_spill] sm:$0xff]  ;;  %v13048_v43 = vld [vmem:[#allocation51_spill] sm:$0xff] }
 0x19d   :  { %v721_v56 = vmul.f32 %v13038_v28, %v13037_v60  ;;  %v803_v12 = vmul.f32 %v13039_v4, %v723_v6  ;;  %v821_v62 = vsub.f32 1.0, %v805_v17  ;;  %v503_v10 = vsel %vm487_vm9, 1.0, %v13029_v45  ;;  %9557 = vmatpush3.msra.mxu1 %v11548_v8  ;;  %v13052_v11 = vld [vmem:[#allocation47_spill] sm:$0xff]  ;;  %v13053_v4 = vld [vmem:[#allocation52_spill] sm:$0xff] }
 0x19e   :  { %v839_v38 = vmul.f32 %v823_v48, %v503_v10  ;;  %v857_v39 = vadd.f32 1.0, %v841_v13  ;;  %v11568_v18 = vmul.f32 %v859_v15, %v459_v53  ;;  %v458_v36 = vmul.f32 0.5, %v13040_v52  ;;  %9558 = vmatprep.subr.mxu1 %v11558_v35  ;;  %v13049_v48 = vld [vmem:[#allocation43_spill] sm:$0xff] }
 0x19f   :  { %v720_v29 = vmul.f32 %v11263_v41, %v704_v16  ;;  %v802_v14 = vmul.f32 %v13041_v57, %v722_v24  ;;  %v502_v30 = vsel %vm486_vm11, 1.0, %v13029_v45  ;;  %v457_v25 = vmul.f32 0.5, %v13042_v51  ;;  %9559 = vmatpush3.msra.mxu1 %v11558_v35  ;;  %v13044_v41 = vld [vmem:[#allocation46_spill] sm:$0xff]  ;;  %v13051_v16 = vld [vmem:[#allocation48_spill] sm:$0xff] }
 0x1a0   :  { %v820_v59 = vsub.f32 1.0, %v804_v37  ;;  %v838_v31 = vmul.f32 %v822_v23, %v502_v30  ;;  %v856_v1 = vadd.f32 1.0, %v840_v3  ;;  %v11579_v22 = vmul.f32 %v858_v9, %v458_v36  ;;  %9560 = vmatprep.subr.mxu1 %v11568_v18  ;;  %v13056_v51 = vld [vmem:[#allocation42_spill] sm:$0xff] }
 0x1a1   :  { %v801_v46 = vmul.f32 %v13043_v7, %v721_v56  ;;  %vm483_vm14 = vcmp.ge.f32.partialorder %v13044_v41, 0.0  ;;  %v501_v2 = vsel %vm485_vm12, 1.0, %v13029_v45  ;;  %v456_v26 = vmul.f32 0.5, %v13045_v32  ;;  %9561 = vmatpush3.msra.mxu1 %v11568_v18  ;;  %v13057_v7 = vld [vmem:[#allocation45_spill] sm:$0xff]  ;;  %v883_v32 = vld [vmem:[%s10874_s17 + $0x10] sm:$0xff] }
 0x1a2   :  { %v819_v20 = vsub.f32 1.0, %v803_v12  ;;  %v837_v47 = vmul.f32 %v821_v62, %v501_v2  ;;  %v855_v33 = vadd.f32 1.0, %v839_v38  ;;  %v11589_v5 = vmul.f32 %v857_v39, %v457_v25  ;;  %9562 = vmatprep.subr.mxu1 %v11579_v22  ;;  %v13054_v38 = vld [vmem:[#allocation44_spill] sm:$0xff]  ;;  %v882_v2 = vld [vmem:[%s10874_s17 + $0x8] sm:$0xff] }
 0x1a3   :  { %v800_v34 = vmul.f32 %v13046_v49, %v720_v29  ;;  %vm482_vm15 = vcmp.ge.f32.partialorder %v13047_v55, 0.0  ;;  %v500_v40 = vsel %vm484_vm13, 1.0, %v13029_v45  ;;  %v455_v27 = vmul.f32 0.5, %v13048_v43  ;;  %9563 = vmatpush3.msra.mxu1 %v11579_v22  ;;  %v8649_v49 = vld [vmem:[%s10874_s17 + $0x30] sm:$0xff]  ;;  %v8651_v55 = vld [vmem:[%s10879_s21 + $0x8] sm:$0xff] }
 0x1a4   :  { %v818_v0 = vsub.f32 1.0, %v802_v14  ;;  %v836_v6 = vmul.f32 %v820_v59, %v500_v40  ;;  %v854_v44 = vadd.f32 1.0, %v838_v31  ;;  %v11599_v17 = vmul.f32 %v856_v1, %v456_v26  ;;  %9564 = vmatprep.subr.mxu1 %v11589_v5  ;;  %v13055_v14 = vld [vmem:[#allocation49_spill] sm:$0xff]  ;;  %9636 = vmatprep.subr.mxu0 %v8651_v55 }
 0x1a5   :  { %vm481_vm0 = vcmp.ge.f32.partialorder %v13049_v48, 0.0  ;;  %v499_v19 = vsel %vm483_vm14, 1.0, %v13029_v45  ;;  %v454_v54 = vmul.f32 0.5, %v13050_v21  ;;  %9565 = vmatpush3.msra.mxu1 %v11589_v5  ;;  %v817_v13 = vsub.f32 1.0, %v801_v46  ;;  %v884_v26 = vld [vmem:[%s10874_s17 + $0x18] sm:$0xff]  ;;  %v8656_v21 = vld [vmem:[%s10874_s17 + $0x40] sm:$0xff] }
 0x1a6   :  { %v835_v15 = vmul.f32 %v819_v20, %v499_v19  ;;  %v853_v63 = vadd.f32 1.0, %v837_v47  ;;  %v11608_v58 = vmul.f32 %v855_v33, %v455_v27  ;;  %9566 = vmatprep.subr.mxu1 %v11599_v17  ;;  %vm480_vm1 = vcmp.ge.f32.partialorder %v13051_v16, 0.0  ;;  %v8647_v20 = vld [vmem:[%s10874_s17 + $0x20] sm:$0xff]  ;;  %v8648_v47 = vld [vmem:[%s10874_s17 + $0x28] sm:$0xff]  ;;  %v8660_v33 = vld [vmem:[%s10879_s21 + $0x10] sm:$0xff] }
 0x1a7   :  { %v498_v24 = vsel %vm482_vm15, 1.0, %v13029_v45  ;;  %v453_v37 = vmul.f32 0.5, %v13052_v11  ;;  %9567 = vmatpush3.msra.mxu1 %v11599_v17  ;;  %v816_v61 = vsub.f32 1.0, %v800_v34  ;;  %v852_v23 = vadd.f32 1.0, %v836_v6  ;;  %v8650_v34 = vld [vmem:[%s10874_s17 + $0x38] sm:$0xff] }
 0x1a8   :  { %v834_v53 = vmul.f32 %v818_v0, %v498_v24  ;;  %v11617_v3 = vmul.f32 %v854_v44, %v454_v54  ;;  %9568 = vmatprep.subr.mxu1 %v11608_v58  ;;  %v497_v9 = vsel %vm481_vm0, 1.0, %v13029_v45  ;;  %v851_v28 = vadd.f32 1.0, %v835_v15  ;;  %v8657_v54 = vld [vmem:[%s10874_s17 + $0x48] sm:$0xff]  ;;  %v8658_v15 = vld [vmem:[%s10874_s17 + $0x50] sm:$0xff] }
 0x1a9   :  { %9569 = vmatpush3.msra.mxu1 %v11608_v58  ;;  %v833_v60 = vmul.f32 %v817_v13, %v497_v9  ;;  %v11624_v56 = vmul.f32 %v853_v63, %v453_v37  ;;  %v452_v12 = vmul.f32 0.5, %v13053_v4  ;;  %v496_v62 = vsel %vm480_vm1, 1.0, %v13029_v45  ;;  %v8669_v13 = vld [vmem:[%s10879_s21 + $0x18] sm:$0xff]  ;;  %v11749_v37 = vld [vmem:[%s10884_s25] ss:$0 sm:$0xff]  ;;  %s13064_s25 = sld [smem:[#allocation12_spill]] }
 0x1aa   :  { %9570 = vmatprep.subr.mxu1 %v11617_v3  ;;  %v832_v10 = vmul.f32 %v816_v61, %v496_v62  ;;  %v451_v39 = vmul.f32 0.5, %v13054_v38  ;;  %v850_v52 = vadd.f32 1.0, %v834_v53  ;;  %v450_v30 = vmul.f32 0.5, %v13055_v14  ;;  %v8659_v63 = vld [vmem:[%s10874_s17 + $0x58] sm:$0xff] }
 0x1ab   :  { %9571 = vmatpush3.msra.mxu1 %v11617_v3  ;;  %v11633_v36 = vmul.f32 %v852_v23, %v452_v12  ;;  %v849_v29 = vadd.f32 1.0, %v833_v60  ;;  %v449_v25 = vmul.f32 0.5, %v13056_v51  ;;  %v448_v46 = vmul.f32 0.5, %v13057_v7  ;;  %v8666_v51 = vld [vmem:[%s10874_s17 + $0x68] sm:$0xff]  ;;  %v8668_v7 = vld [vmem:[%s10874_s17 + $0x78] sm:$0xff] }
 0x1ac   :  { %9572 = vmatprep.subr.mxu1 %v11624_v56  ;;  %v11637_v57 = vmul.f32 %v851_v28, %v451_v39  ;;  %v848_v59 = vadd.f32 1.0, %v832_v10  ;;  %v11643_v31 = vmul.f32 %v850_v52, %v450_v30  ;;  %vm971_vm2 = vcmask 64512   ;;  %v8665_v30 = vld [vmem:[%s10874_s17 + $0x60] sm:$0xff] }
 0x1ad   :  { %9573 = vmatpush3.msra.mxu1 %v11624_v56  ;;  %v11647_v1 = vmul.f32 %v849_v29, %v449_v25  ;;  %v8678_v25 = vld [vmem:[%s10879_s21 + $0x20] sm:$0xff]  ;;  %vm2746_vm3 = vcmask 261120   ;;  %vm3805_vm8 = vcmask 130048   ;;  %vm10849_vm13 = vmmov 0  }
 0x1ae   :  { %9574 = vmatprep.subr.mxu1 %v11633_v36  ;;  %v11652_v41 = vmul.f32 %v848_v59, %v448_v46  ;;  %v8667_v59 = vld [vmem:[%s10874_s17 + $0x70] sm:$0xff]  ;;  %vm8284_vm15 = vcmask 523264   ;;  %vm8554_vm0 = vcmask 74752  }
 0x1af   :  { %9575 = vmatpush3.msra.mxu1 %v11633_v36 }
 0x1b0   :  { %9576 = vmatprep.subr.mxu1 %v11637_v57 }
 0x1b1   :  { %9577 = vmatpush3.msra.mxu1 %v11637_v57 }
 0x1b2   :  { %9578 = vmatprep.subr.mxu1 %v11643_v31 }
 0x1b3   :  { %9579 = vmatpush3.msra.mxu1 %v11643_v31 }
 0x1b4   :  { %9580 = vmatprep.subr.mxu1 %v11647_v1 }
 0x1b5   :  { %9581 = vmatpush3.msra.mxu1 %v11647_v1 }
 0x1b6   :  { %9582 = vmatprep.subr.mxu1 %v11652_v41 }
 0x1b7   :  { %9583 = vmatpush3.msra.mxu1 %v11652_v41 }
 0x1b8   :  { %9585 = vmatmul.mubr.f32.vlgmr.msra.gmra.mxu1 %v882_v2  ;;  %9598 = vmatprep.subr.mxu1 %v11525_v42 }
 0x1b9   :  { %9599 = vmatpush3.msra.mxu1 %v11525_v42  ;;  %9587 = vmatprep.mubr.f32.mxu1 %v883_v32 }
 0x1ba   :  { %9600 = vmatprep.subr.mxu1 %v11537_v50 }
 0x1bb   :  { %9601 = vmatpush3.msra.mxu1 %v11537_v50 }
 0x1bc   :  { %9602 = vmatprep.subr.mxu1 %v11548_v8  ;;  %9588 = vmatmul.mubr.f32.gmra.mxu1 %v884_v26 }
 0x1bd   :  { %9603 = vmatpush3.msra.mxu1 %v11548_v8  ;;  %9630 = vmatprep.mubr.f32.mxu1 %v8647_v20 }
 0x1be   :  { %9604 = vmatprep.subr.mxu1 %v11558_v35 }
 0x1bf   :  { %9605 = vmatpush3.msra.mxu1 %v11558_v35 }
 0x1c0   :  { %9606 = vmatprep.subr.mxu1 %v11568_v18 }
 0x1c1   :  { %9607 = vmatpush3.msra.mxu1 %v11568_v18 }
 0x1c2   :  { %9608 = vmatprep.subr.mxu1 %v11579_v22 }
 0x1c3   :  { %9609 = vmatpush3.msra.mxu1 %v11579_v22 }
 0x1c4   :  { %9610 = vmatprep.subr.mxu1 %v11589_v5 }
 0x1c5   :  { %9611 = vmatpush3.msra.mxu1 %v11589_v5 }
 0x1c6   :  { %9612 = vmatprep.subr.mxu1 %v11599_v17 }
 0x1c7   :  { %9613 = vmatpush3.msra.mxu1 %v11599_v17 }
 0x1c8   :  { %9614 = vmatprep.subr.mxu1 %v11608_v58 }
 0x1c9   :  { %9615 = vmatpush3.msra.mxu1 %v11608_v58 }
 0x1ca   :  { %9616 = vmatprep.subr.mxu1 %v11617_v3 }
 0x1cb   :  { %9617 = vmatpush3.msra.mxu1 %v11617_v3 }
 0x1cc   :  { %9618 = vmatprep.subr.mxu1 %v11624_v56 }
 0x1cd   :  { %9619 = vmatpush3.msra.mxu1 %v11624_v56 }
 0x1ce   :  { %9620 = vmatprep.subr.mxu1 %v11633_v36 }
 0x1cf   :  { %9621 = vmatpush3.msra.mxu1 %v11633_v36 }
 0x1d0   :  { %9622 = vmatprep.subr.mxu1 %v11637_v57 }
 0x1d1   :  { %9623 = vmatpush3.msra.mxu1 %v11637_v57 }
 0x1d2   :  { %9624 = vmatprep.subr.mxu1 %v11643_v31 }
 0x1d3   :  { %9625 = vmatpush3.msra.mxu1 %v11643_v31 }
 0x1d4   :  { %9626 = vmatprep.subr.mxu1 %v11647_v1 }
 0x1d5   :  { %9627 = vmatpush3.msra.mxu1 %v11647_v1 }
 0x1d6   :  { %9628 = vmatprep.subr.mxu1 %v11652_v41 }
 0x1d7   :  { %9629 = vmatpush3.msra.mxu1 %v11652_v41 }
 0x1d8   :  { %9631 = vmatmul.mubr.f32.vlgmr.msra.gmra.mxu1 %v8648_v47  ;;  %9682 = vmatprep.subr.mxu1 %v8660_v33 }
 0x1d9   :  { %9683 = vmatpush3.msra.mxu1 %v8660_v33  ;;  %9633 = vmatprep.mubr.f32.mxu1 %v8649_v49 }
 0x1da   :  { %9690 = vmatprep.subr.mxu1 %v11525_v42 }
 0x1dc   :  { %9634 = vmatmul.mubr.f32.gmra.mxu1 %v8650_v34 }
 0x278   :  { %v9586_v40 = vpop.f32.mrf.mxu1 }
 0x27a   :  { %v951_v43 = vpop.f32.mrf.mxu1 }
 0x27b   :  { %9592 = vmatprep.mubr.msk.f32.mxu0 %vm971_vm2, %v951_v43 }
 0x27c   :  { %9593 = vmatmul.mubr.msk.f32.vlgmr.msra.gmra.mxu0 %vm971_vm2, %v9586_v40  ;;  %v9589_v27 = vpop.f32.mrf.mxu1 }
 0x27d   :  { %9637 = vmatpush3.msra.mxu0 %v8651_v55 }
 0x27e   :  { %9644 = vmatprep.subr.mxu0 %v11525_v42  ;;  %v961_v0 = vpop.f32.mrf.mxu1 }
 0x27f   :  { %9595 = vmatprep.mubr.msk.f32.mxu0 %vm971_vm2, %v961_v0 }
 0x280   :  { %9596 = vmatmul.mubr.msk.f32.gmra.mxu0 %vm971_vm2, %v9589_v27 }
 0x298   :  { %v9632_v6 = vpop.f32.mrf.mxu1 }
 0x29a   :  { %v1150_v44 = vpop.f32.mrf.mxu1 }
 0x29b   :  { %9638 = vmatprep.mubr.msk.f32.mxu0 %vm971_vm2, %v1150_v44  ;;  %v8675_v44 = vld [vmem:[%s10874_s17 + $0x88] sm:$0xff] }
 0x29c   :  { %v9635_v48 = vpop.f32.mrf.mxu1  ;;  %9639 = vmatmul.mubr.msk.f32.vlgmr.msra.gmra.mxu0 %vm971_vm2, %v9632_v6  ;;  %v8674_v6 = vld [vmem:[%s10874_s17 + $0x80] sm:$0xff] }
 0x29d   :  { %9645 = vmatpush3.msra.mxu0 %v11525_v42 }
 0x29e   :  { %9646 = vmatprep.subr.mxu0 %v11537_v50  ;;  %v1160_v19 = vpop.f32.mrf.mxu1 }
 0x29f   :  { %9647 = vmatpush3.msra.mxu0 %v11537_v50  ;;  %9641 = vmatprep.mubr.msk.f32.mxu0 %vm971_vm2, %v1160_v19  ;;  %v8676_v19 = vld [vmem:[%s10874_s17 + $0x90] sm:$0xff] }
 0x2a0   :  { %9648 = vmatprep.subr.mxu0 %v11548_v8  ;;  %9642 = vmatmul.mubr.msk.f32.gmra.mxu0 %vm971_vm2, %v9635_v48  ;;  %v8687_v48 = vld [vmem:[%s10879_s21 + $0x28] sm:$0xff] }
 0x2a1   :  { %9649 = vmatpush3.msra.mxu0 %v11548_v8  ;;  %9676 = vmatprep.mubr.f32.mxu0 %v8656_v21  ;;  %v8677_v21 = vld [vmem:[%s10874_s17 + $0x98] sm:$0xff] }
 0x2a2   :  { %9650 = vmatprep.subr.mxu0 %v11558_v35 }
 0x2a3   :  { %9651 = vmatpush3.msra.mxu0 %v11558_v35 }
 0x2a4   :  { %9652 = vmatprep.subr.mxu0 %v11568_v18 }
 0x2a5   :  { %9653 = vmatpush3.msra.mxu0 %v11568_v18 }
 0x2a6   :  { %9654 = vmatprep.subr.mxu0 %v11579_v22 }
 0x2a7   :  { %9655 = vmatpush3.msra.mxu0 %v11579_v22 }
 0x2a8   :  { %9656 = vmatprep.subr.mxu0 %v11589_v5 }
 0x2a9   :  { %9657 = vmatpush3.msra.mxu0 %v11589_v5 }
 0x2aa   :  { %9658 = vmatprep.subr.mxu0 %v11599_v17 }
 0x2ab   :  { %9659 = vmatpush3.msra.mxu0 %v11599_v17 }
 0x2ac   :  { %9660 = vmatprep.subr.mxu0 %v11608_v58 }
 0x2ad   :  { %9661 = vmatpush3.msra.mxu0 %v11608_v58 }
 0x2ae   :  { %9662 = vmatprep.subr.mxu0 %v11617_v3 }
 0x2af   :  { %9663 = vmatpush3.msra.mxu0 %v11617_v3 }
 0x2b0   :  { %9664 = vmatprep.subr.mxu0 %v11624_v56 }
 0x2b1   :  { %9665 = vmatpush3.msra.mxu0 %v11624_v56 }
 0x2b2   :  { %9666 = vmatprep.subr.mxu0 %v11633_v36 }
 0x2b3   :  { %9667 = vmatpush3.msra.mxu0 %v11633_v36 }
 0x2b4   :  { %9668 = vmatprep.subr.mxu0 %v11637_v57 }
 0x2b5   :  { %9669 = vmatpush3.msra.mxu0 %v11637_v57 }
 0x2b6   :  { %9670 = vmatprep.subr.mxu0 %v11643_v31 }
 0x2b7   :  { %9671 = vmatpush3.msra.mxu0 %v11643_v31 }
 0x2b8   :  { %9672 = vmatprep.subr.mxu0 %v11647_v1 }
 0x2b9   :  { %9673 = vmatpush3.msra.mxu0 %v11647_v1 }
 0x2ba   :  { %9674 = vmatprep.subr.mxu0 %v11652_v41 }
 0x2bb   :  { %9675 = vmatpush3.msra.mxu0 %v11652_v41 }
 0x2bc   :  { %9677 = vmatmul.mubr.f32.vlgmr.msra.gmra.mxu0 %v8657_v54  ;;  %9728 = vmatprep.subr.mxu0 %v8669_v13 }
 0x2bd   :  { %9729 = vmatpush3.msra.mxu0 %v8669_v13  ;;  %9679 = vmatprep.mubr.f32.mxu0 %v8658_v15 }
 0x2be   :  { %9736 = vmatprep.subr.mxu0 %v11525_v42 }
 0x2c0   :  { %9680 = vmatmul.mubr.f32.gmra.mxu0 %v8659_v63 }
 0x33c   :  { %v9594_v16 = vpop.f32.mrf.mxu0 }
 0x33d   :  { %v1076_v53 = vadd.f32 %v9594_v16, %v11749_v37 }
 0x33e   :  { %v11746_v24 = vpop.f32.mrf.mxu0 }
 0x33f   :  { %v1075_v46 = vadd.f32 %v11749_v37, %v11746_v24 }
 0x340   :  { %v9597_v11 = vpop.f32.mrf.mxu0 }
 0x341   :  { %v1078_v28 = vadd.f32 %v9597_v11, %v11749_v37 }
 0x342   :  { %v1060_v61 = vpop.f32.mrf.mxu0 }
 0x343   :  { %v1077_v12 = vadd.f32 %v11749_v37, %v1060_v61 }
 0x35c   :  { %v9640_v23 = vpop.f32.mrf.mxu0 }
 0x35d   :  { %v1269_v9 = vadd.f32 %v9640_v23, %v1076_v53 }
 0x35e   :  { %v1249_v60 = vpop.f32.mrf.mxu0 }
 0x35f   :  { %v1268_v32 = vadd.f32 %v1249_v60, %v1075_v46  ;;  %v8683_v60 = vld [vmem:[%s10874_s17 + $0xa0] sm:$0xff] }
 0x360   :  { %v9643_v4 = vpop.f32.mrf.mxu0 }
 0x361   :  { %v1271_v62 = vadd.f32 %v9643_v4, %v1078_v28  ;;  %v8684_v28 = vld [vmem:[%s10874_s17 + $0xa8] sm:$0xff]  ;;  %v8696_v4 = vld [vmem:[%s10879_s21 + $0x30] sm:$0xff] }
 0x362   :  { %v1259_v10 = vpop.f32.mrf.mxu0 }
 0x363   :  { %v1270_v38 = vadd.f32 %v1259_v10, %v1077_v12  ;;  %v8685_v12 = vld [vmem:[%s10874_s17 + $0xb0] sm:$0xff] }
 0x37c   :  { %v9678_v39 = vpop.f32.mrf.mxu0 }
 0x37e   :  { %v1343_v52 = vpop.f32.mrf.mxu0 }
 0x37f   :  { %9684 = vmatprep.mubr.msk.f32.mxu1 %vm971_vm2, %v1343_v52 }
 0x380   :  { %v9681_v29 = vpop.f32.mrf.mxu0  ;;  %9685 = vmatmul.mubr.msk.f32.vlgmr.msra.gmra.mxu1 %vm971_vm2, %v9678_v39 }
 0x381   :  { %9691 = vmatpush3.msra.mxu1 %v11525_v42 }
 0x382   :  { %9692 = vmatprep.subr.mxu1 %v11537_v50  ;;  %v1353_v14 = vpop.f32.mrf.mxu0 }
 0x383   :  { %9693 = vmatpush3.msra.mxu1 %v11537_v50  ;;  %9687 = vmatprep.mubr.msk.f32.mxu1 %vm971_vm2, %v1353_v14 }
 0x384   :  { %9694 = vmatprep.subr.mxu1 %v11548_v8  ;;  %9688 = vmatmul.mubr.msk.f32.gmra.mxu1 %vm971_vm2, %v9681_v29 }
 0x385   :  { %9695 = vmatpush3.msra.mxu1 %v11548_v8  ;;  %9722 = vmatprep.mubr.f32.mxu1 %v8665_v30 }
 0x386   :  { %9696 = vmatprep.subr.mxu1 %v11558_v35 }
 0x387   :  { %9697 = vmatpush3.msra.mxu1 %v11558_v35 }
 0x388   :  { %9698 = vmatprep.subr.mxu1 %v11568_v18 }
 0x389   :  { %9699 = vmatpush3.msra.mxu1 %v11568_v18 }
 0x38a   :  { %9700 = vmatprep.subr.mxu1 %v11579_v22 }
 0x38b   :  { %9701 = vmatpush3.msra.mxu1 %v11579_v22 }
 0x38c   :  { %9702 = vmatprep.subr.mxu1 %v11589_v5 }
 0x38d   :  { %9703 = vmatpush3.msra.mxu1 %v11589_v5 }
 0x38e   :  { %9704 = vmatprep.subr.mxu1 %v11599_v17 }
 0x38f   :  { %9705 = vmatpush3.msra.mxu1 %v11599_v17 }
 0x390   :  { %9706 = vmatprep.subr.mxu1 %v11608_v58 }
 0x391   :  { %9707 = vmatpush3.msra.mxu1 %v11608_v58 }
 0x392   :  { %9708 = vmatprep.subr.mxu1 %v11617_v3 }
 0x393   :  { %9709 = vmatpush3.msra.mxu1 %v11617_v3 }
 0x394   :  { %9710 = vmatprep.subr.mxu1 %v11624_v56 }
 0x395   :  { %9711 = vmatpush3.msra.mxu1 %v11624_v56 }
 0x396   :  { %9712 = vmatprep.subr.mxu1 %v11633_v36 }
 0x397   :  { %9713 = vmatpush3.msra.mxu1 %v11633_v36 }
 0x398   :  { %9714 = vmatprep.subr.mxu1 %v11637_v57 }
 0x399   :  { %9715 = vmatpush3.msra.mxu1 %v11637_v57 }
 0x39a   :  { %9716 = vmatprep.subr.mxu1 %v11643_v31 }
 0x39b   :  { %9717 = vmatpush3.msra.mxu1 %v11643_v31 }
 0x39c   :  { %9718 = vmatprep.subr.mxu1 %v11647_v1 }
 0x39d   :  { %9719 = vmatpush3.msra.mxu1 %v11647_v1 }
 0x39e   :  { %9720 = vmatprep.subr.mxu1 %v11652_v41 }
 0x39f   :  { %9721 = vmatpush3.msra.mxu1 %v11652_v41 }
 0x3a0   :  { %9723 = vmatmul.mubr.f32.vlgmr.msra.gmra.mxu1 %v8666_v51  ;;  %9774 = vmatprep.subr.mxu1 %v8678_v25 }
 0x3a1   :  { %9775 = vmatpush3.msra.mxu1 %v8678_v25  ;;  %9725 = vmatprep.mubr.f32.mxu1 %v8667_v59 }
 0x3a2   :  { %9782 = vmatprep.subr.mxu1 %v11525_v42 }
 0x3a4   :  { %9726 = vmatmul.mubr.f32.gmra.mxu1 %v8668_v7 }
 0x440   :  { %v9686_v2 = vpop.f32.mrf.mxu1 }
 0x441   :  { %v1462_v26 = vadd.f32 %v9686_v2, %v1269_v9  ;;  %v8692_v2 = vld [vmem:[%s10874_s17 + $0xc0] sm:$0xff] }
 0x442   :  { %v1442_v20 = vpop.f32.mrf.mxu1 }
 0x443   :  { %v1461_v47 = vadd.f32 %v1442_v20, %v1268_v32  ;;  %v8693_v32 = vld [vmem:[%s10874_s17 + $0xc8] sm:$0xff]  ;;  %v8694_v20 = vld [vmem:[%s10874_s17 + $0xd0] sm:$0xff] }
 0x444   :  { %v9689_v33 = vpop.f32.mrf.mxu1 }
 0x445   :  { %v1464_v49 = vadd.f32 %v9689_v33, %v1271_v62  ;;  %v8686_v62 = vld [vmem:[%s10874_s17 + $0xb8] sm:$0xff] }
 0x446   :  { %v1452_v34 = vpop.f32.mrf.mxu1 }
 0x447   :  { %v1463_v55 = vadd.f32 %v1452_v34, %v1270_v38 }
 0x460   :  { %v9724_v40 = vpop.f32.mrf.mxu1 }
 0x462   :  { %v1536_v43 = vpop.f32.mrf.mxu1 }
 0x463   :  { %9730 = vmatprep.mubr.msk.f32.mxu0 %vm971_vm2, %v1536_v43 }
 0x464   :  { %v9727_v27 = vpop.f32.mrf.mxu1  ;;  %9731 = vmatmul.mubr.msk.f32.vlgmr.msra.gmra.mxu0 %vm971_vm2, %v9724_v40 }
 0x465   :  { %9737 = vmatpush3.msra.mxu0 %v11525_v42 }
 0x466   :  { %9738 = vmatprep.subr.mxu0 %v11537_v50  ;;  %v1546_v0 = vpop.f32.mrf.mxu1 }
 0x467   :  { %9739 = vmatpush3.msra.mxu0 %v11537_v50  ;;  %9733 = vmatprep.mubr.msk.f32.mxu0 %vm971_vm2, %v1546_v0 }
 0x468   :  { %9740 = vmatprep.subr.mxu0 %v11548_v8  ;;  %9734 = vmatmul.mubr.msk.f32.gmra.mxu0 %vm971_vm2, %v9727_v27 }
 0x469   :  { %9741 = vmatpush3.msra.mxu0 %v11548_v8  ;;  %9768 = vmatprep.mubr.f32.mxu0 %v8674_v6 }
 0x46a   :  { %9742 = vmatprep.subr.mxu0 %v11558_v35 }
 0x46b   :  { %9743 = vmatpush3.msra.mxu0 %v11558_v35 }
 0x46c   :  { %9744 = vmatprep.subr.mxu0 %v11568_v18 }
 0x46d   :  { %9745 = vmatpush3.msra.mxu0 %v11568_v18 }
 0x46e   :  { %9746 = vmatprep.subr.mxu0 %v11579_v22 }
 0x46f   :  { %9747 = vmatpush3.msra.mxu0 %v11579_v22 }
 0x470   :  { %9748 = vmatprep.subr.mxu0 %v11589_v5 }
 0x471   :  { %9749 = vmatpush3.msra.mxu0 %v11589_v5 }
 0x472   :  { %9750 = vmatprep.subr.mxu0 %v11599_v17 }
 0x473   :  { %9751 = vmatpush3.msra.mxu0 %v11599_v17 }
 0x474   :  { %9752 = vmatprep.subr.mxu0 %v11608_v58 }
 0x475   :  { %9753 = vmatpush3.msra.mxu0 %v11608_v58 }
 0x476   :  { %9754 = vmatprep.subr.mxu0 %v11617_v3 }
 0x477   :  { %9755 = vmatpush3.msra.mxu0 %v11617_v3 }
 0x478   :  { %9756 = vmatprep.subr.mxu0 %v11624_v56 }
 0x479   :  { %9757 = vmatpush3.msra.mxu0 %v11624_v56 }
 0x47a   :  { %9758 = vmatprep.subr.mxu0 %v11633_v36 }
 0x47b   :  { %9759 = vmatpush3.msra.mxu0 %v11633_v36 }
 0x47c   :  { %9760 = vmatprep.subr.mxu0 %v11637_v57 }
 0x47d   :  { %9761 = vmatpush3.msra.mxu0 %v11637_v57 }
 0x47e   :  { %9762 = vmatprep.subr.mxu0 %v11643_v31 }
 0x47f   :  { %9763 = vmatpush3.msra.mxu0 %v11643_v31 }
 0x480   :  { %9764 = vmatprep.subr.mxu0 %v11647_v1 }
 0x481   :  { %9765 = vmatpush3.msra.mxu0 %v11647_v1 }
 0x482   :  { %9766 = vmatprep.subr.mxu0 %v11652_v41 }
 0x483   :  { %9767 = vmatpush3.msra.mxu0 %v11652_v41 }
 0x484   :  { %9769 = vmatmul.mubr.f32.vlgmr.msra.gmra.mxu0 %v8675_v44  ;;  %9820 = vmatprep.subr.mxu0 %v8687_v48 }
 0x485   :  { %9821 = vmatpush3.msra.mxu0 %v8687_v48  ;;  %9771 = vmatprep.mubr.f32.mxu0 %v8676_v19 }
 0x486   :  { %9828 = vmatprep.subr.mxu0 %v11525_v42 }
 0x488   :  { %9772 = vmatmul.mubr.f32.gmra.mxu0 %v8677_v21  ;;  %v8701_v21 = vld [vmem:[%s10874_s17 + $0xe0] sm:$0xff] }
 0x524   :  { %v9732_v54 = vpop.f32.mrf.mxu0 }
 0x525   :  { %v1655_v13 = vadd.f32 %v9732_v54, %v1462_v26  ;;  %v8705_v26 = vld [vmem:[%s10879_s21 + $0x38] sm:$0xff]  ;;  %v8702_v54 = vld [vmem:[%s10874_s17 + $0xe8] sm:$0xff] }
 0x526   :  { %v1635_v15 = vpop.f32.mrf.mxu0 }
 0x527   :  { %v1654_v63 = vadd.f32 %v1635_v15, %v1461_v47  ;;  %v8695_v47 = vld [vmem:[%s10874_s17 + $0xd8] sm:$0xff] }
 0x528   :  { %v9735_v16 = vpop.f32.mrf.mxu0  ;;  %v8704_v15 = vld [vmem:[%s10874_s17 + $0xf8] sm:$0xff] }
 0x529   :  { %v1657_v24 = vadd.f32 %v9735_v16, %v1464_v49 }
 0x52a   :  { %v1645_v11 = vpop.f32.mrf.mxu0 }
 0x52b   :  { %v1656_v37 = vadd.f32 %v1645_v11, %v1463_v55 }
 0x544   :  { %v9770_v61 = vpop.f32.mrf.mxu0 }
 0x546   :  { %v1729_v53 = vpop.f32.mrf.mxu0 }
 0x547   :  { %9776 = vmatprep.mubr.msk.f32.mxu1 %vm971_vm2, %v1729_v53 }
 0x548   :  { %v9773_v23 = vpop.f32.mrf.mxu0  ;;  %9777 = vmatmul.mubr.msk.f32.vlgmr.msra.gmra.mxu1 %vm971_vm2, %v9770_v61 }
 0x549   :  { %9783 = vmatpush3.msra.mxu1 %v11525_v42 }
 0x54a   :  { %9784 = vmatprep.subr.mxu1 %v11537_v50  ;;  %v1739_v9 = vpop.f32.mrf.mxu0 }
 0x54b   :  { %9785 = vmatpush3.msra.mxu1 %v11537_v50  ;;  %9779 = vmatprep.mubr.msk.f32.mxu1 %vm971_vm2, %v1739_v9 }
 0x54c   :  { %9786 = vmatprep.subr.mxu1 %v11548_v8  ;;  %9780 = vmatmul.mubr.msk.f32.gmra.mxu1 %vm971_vm2, %v9773_v23 }
 0x54d   :  { %9787 = vmatpush3.msra.mxu1 %v11548_v8  ;;  %9814 = vmatprep.mubr.f32.mxu1 %v8683_v60 }
 0x54e   :  { %9788 = vmatprep.subr.mxu1 %v11558_v35 }
 0x54f   :  { %9789 = vmatpush3.msra.mxu1 %v11558_v35 }
 0x550   :  { %9790 = vmatprep.subr.mxu1 %v11568_v18 }
 0x551   :  { %9791 = vmatpush3.msra.mxu1 %v11568_v18 }
 0x552   :  { %9792 = vmatprep.subr.mxu1 %v11579_v22 }
 0x553   :  { %9793 = vmatpush3.msra.mxu1 %v11579_v22 }
 0x554   :  { %9794 = vmatprep.subr.mxu1 %v11589_v5 }
 0x555   :  { %9795 = vmatpush3.msra.mxu1 %v11589_v5 }
 0x556   :  { %9796 = vmatprep.subr.mxu1 %v11599_v17 }
 0x557   :  { %9797 = vmatpush3.msra.mxu1 %v11599_v17 }
 0x558   :  { %9798 = vmatprep.subr.mxu1 %v11608_v58 }
 0x559   :  { %9799 = vmatpush3.msra.mxu1 %v11608_v58 }
 0x55a   :  { %9800 = vmatprep.subr.mxu1 %v11617_v3 }
 0x55b   :  { %9801 = vmatpush3.msra.mxu1 %v11617_v3 }
 0x55c   :  { %9802 = vmatprep.subr.mxu1 %v11624_v56 }
 0x55d   :  { %9803 = vmatpush3.msra.mxu1 %v11624_v56 }
 0x55e   :  { %9804 = vmatprep.subr.mxu1 %v11633_v36 }
 0x55f   :  { %9805 = vmatpush3.msra.mxu1 %v11633_v36 }
 0x560   :  { %9806 = vmatprep.subr.mxu1 %v11637_v57 }
 0x561   :  { %9807 = vmatpush3.msra.mxu1 %v11637_v57 }
 0x562   :  { %9808 = vmatprep.subr.mxu1 %v11643_v31 }
 0x563   :  { %9809 = vmatpush3.msra.mxu1 %v11643_v31 }
 0x564   :  { %9810 = vmatprep.subr.mxu1 %v11647_v1 }
 0x565   :  { %9811 = vmatpush3.msra.mxu1 %v11647_v1 }
 0x566   :  { %9812 = vmatprep.subr.mxu1 %v11652_v41 }
 0x567   :  { %9813 = vmatpush3.msra.mxu1 %v11652_v41 }
 0x568   :  { %9815 = vmatmul.mubr.f32.vlgmr.msra.gmra.mxu1 %v8684_v28  ;;  %9866 = vmatprep.subr.mxu1 %v8696_v4 }
 0x569   :  { %9867 = vmatpush3.msra.mxu1 %v8696_v4  ;;  %9817 = vmatprep.mubr.f32.mxu1 %v8685_v12  ;;  %v8710_v12 = vld [vmem:[%s10874_s17 + $0x100] sm:$0xff] }
 0x56a   :  { %9874 = vmatprep.subr.mxu1 %v11525_v42 }
 0x56c   :  { %9818 = vmatmul.mubr.f32.gmra.mxu1 %v8686_v62  ;;  %v2742_v62 = vld [vmem:[%s10889_s29] sm:$0xff] }
 0x608   :  { %v9778_v10 = vpop.f32.mrf.mxu1 }
 0x609   :  { %v1848_v38 = vadd.f32 %v9778_v10, %v1655_v13  ;;  %v8703_v13 = vld [vmem:[%s10874_s17 + $0xf0] sm:$0xff]  ;;  %v8725_v10 = vld [vmem:[%s10889_s29 + $0x20] sm:$0xff] }
 0x60a   :  { %v1828_v39 = vpop.f32.mrf.mxu1 }
 0x60b   :  { %v1847_v52 = vadd.f32 %v1828_v39, %v1654_v63 }
 0x60c   :  { %v9781_v29 = vpop.f32.mrf.mxu1 }
 0x60d   :  { %v1850_v14 = vadd.f32 %v9781_v29, %v1657_v24 }
 0x60e   :  { %v1838_v30 = vpop.f32.mrf.mxu1 }
 0x60f   :  { %v1849_v51 = vadd.f32 %v1838_v30, %v1656_v37 }
 0x628   :  { %v9816_v25 = vpop.f32.mrf.mxu1 }
 0x62a   :  { %v1922_v59 = vpop.f32.mrf.mxu1 }
 0x62b   :  { %9822 = vmatprep.mubr.msk.f32.mxu0 %vm971_vm2, %v1922_v59 }
 0x62c   :  { %v9819_v7 = vpop.f32.mrf.mxu1  ;;  %9823 = vmatmul.mubr.msk.f32.vlgmr.msra.gmra.mxu0 %vm971_vm2, %v9816_v25 }
 0x62d   :  { %9829 = vmatpush3.msra.mxu0 %v11525_v42 }
 0x62e   :  { %9830 = vmatprep.subr.mxu0 %v11537_v50  ;;  %v1932_v46 = vpop.f32.mrf.mxu1 }
 0x62f   :  { %9831 = vmatpush3.msra.mxu0 %v11537_v50  ;;  %9825 = vmatprep.mubr.msk.f32.mxu0 %vm971_vm2, %v1932_v46 }
 0x630   :  { %9832 = vmatprep.subr.mxu0 %v11548_v8  ;;  %9826 = vmatmul.mubr.msk.f32.gmra.mxu0 %vm971_vm2, %v9819_v7 }
 0x631   :  { %9833 = vmatpush3.msra.mxu0 %v11548_v8  ;;  %9860 = vmatprep.mubr.f32.mxu0 %v8692_v2 }
 0x632   :  { %9834 = vmatprep.subr.mxu0 %v11558_v35 }
 0x633   :  { %9835 = vmatpush3.msra.mxu0 %v11558_v35 }
 0x634   :  { %9836 = vmatprep.subr.mxu0 %v11568_v18 }
 0x635   :  { %9837 = vmatpush3.msra.mxu0 %v11568_v18 }
 0x636   :  { %9838 = vmatprep.subr.mxu0 %v11579_v22 }
 0x637   :  { %9839 = vmatpush3.msra.mxu0 %v11579_v22 }
 0x638   :  { %9840 = vmatprep.subr.mxu0 %v11589_v5 }
 0x639   :  { %9841 = vmatpush3.msra.mxu0 %v11589_v5 }
 0x63a   :  { %9842 = vmatprep.subr.mxu0 %v11599_v17 }
 0x63b   :  { %9843 = vmatpush3.msra.mxu0 %v11599_v17 }
 0x63c   :  { %9844 = vmatprep.subr.mxu0 %v11608_v58 }
 0x63d   :  { %9845 = vmatpush3.msra.mxu0 %v11608_v58 }
 0x63e   :  { %9846 = vmatprep.subr.mxu0 %v11617_v3 }
 0x63f   :  { %9847 = vmatpush3.msra.mxu0 %v11617_v3 }
 0x640   :  { %9848 = vmatprep.subr.mxu0 %v11624_v56 }
 0x641   :  { %9849 = vmatpush3.msra.mxu0 %v11624_v56 }
 0x642   :  { %9850 = vmatprep.subr.mxu0 %v11633_v36 }
 0x643   :  { %9851 = vmatpush3.msra.mxu0 %v11633_v36 }
 0x644   :  { %9852 = vmatprep.subr.mxu0 %v11637_v57 }
 0x645   :  { %9853 = vmatpush3.msra.mxu0 %v11637_v57 }
 0x646   :  { %9854 = vmatprep.subr.mxu0 %v11643_v31 }
 0x647   :  { %9855 = vmatpush3.msra.mxu0 %v11643_v31 }
 0x648   :  { %9856 = vmatprep.subr.mxu0 %v11647_v1 }
 0x649   :  { %9857 = vmatpush3.msra.mxu0 %v11647_v1 }
 0x64a   :  { %9858 = vmatprep.subr.mxu0 %v11652_v41 }
 0x64b   :  { %9859 = vmatpush3.msra.mxu0 %v11652_v41 }
 0x64c   :  { %9861 = vmatmul.mubr.f32.vlgmr.msra.gmra.mxu0 %v8693_v32  ;;  %9912 = vmatprep.subr.mxu0 %v8705_v26 }
 0x64d   :  { %9913 = vmatpush3.msra.mxu0 %v8705_v26  ;;  %9863 = vmatprep.mubr.f32.mxu0 %v8694_v20 }
 0x64e   :  { %9920 = vmatprep.subr.mxu0 %v11525_v42 }
 0x650   :  { %9864 = vmatmul.mubr.f32.gmra.mxu0 %v8695_v47 }
 0x6ec   :  { %v9824_v33 = vpop.f32.mrf.mxu0 }
 0x6ed   :  { %v2041_v49 = vadd.f32 %v9824_v33, %v1848_v38 }
 0x6ee   :  { %v2021_v34 = vpop.f32.mrf.mxu0 }
 0x6ef   :  { %v2040_v55 = vadd.f32 %v2021_v34, %v1847_v52 }
 0x6f0   :  { %v9827_v40 = vpop.f32.mrf.mxu0 }
 0x6f1   :  { %v2043_v43 = vadd.f32 %v9827_v40, %v1850_v14 }
 0x6f2   :  { %v2031_v27 = vpop.f32.mrf.mxu0 }
 0x6f3   :  { %v2042_v0 = vadd.f32 %v2031_v27, %v1849_v51 }
 0x70c   :  { %v9862_v6 = vpop.f32.mrf.mxu0 }
 0x70e   :  { %v2115_v44 = vpop.f32.mrf.mxu0 }
 0x70f   :  { %9868 = vmatprep.mubr.msk.f32.mxu1 %vm971_vm2, %v2115_v44 }
 0x710   :  { %v9865_v48 = vpop.f32.mrf.mxu0  ;;  %9869 = vmatmul.mubr.msk.f32.vlgmr.msra.gmra.mxu1 %vm971_vm2, %v9862_v6 }
 0x711   :  { %9875 = vmatpush3.msra.mxu1 %v11525_v42 }
 0x712   :  { %9876 = vmatprep.subr.mxu1 %v11537_v50  ;;  %v2125_v19 = vpop.f32.mrf.mxu0 }
 0x713   :  { %9877 = vmatpush3.msra.mxu1 %v11537_v50  ;;  %9871 = vmatprep.mubr.msk.f32.mxu1 %vm971_vm2, %v2125_v19 }
 0x714   :  { %9878 = vmatprep.subr.mxu1 %v11548_v8  ;;  %9872 = vmatmul.mubr.msk.f32.gmra.mxu1 %vm971_vm2, %v9865_v48 }
 0x715   :  { %9879 = vmatpush3.msra.mxu1 %v11548_v8  ;;  %9906 = vmatprep.mubr.f32.mxu1 %v8701_v21 }
 0x716   :  { %9880 = vmatprep.subr.mxu1 %v11558_v35 }
 0x717   :  { %9881 = vmatpush3.msra.mxu1 %v11558_v35 }
 0x718   :  { %9882 = vmatprep.subr.mxu1 %v11568_v18 }
 0x719   :  { %9883 = vmatpush3.msra.mxu1 %v11568_v18 }
 0x71a   :  { %9884 = vmatprep.subr.mxu1 %v11579_v22 }
 0x71b   :  { %9885 = vmatpush3.msra.mxu1 %v11579_v22 }
 0x71c   :  { %9886 = vmatprep.subr.mxu1 %v11589_v5 }
 0x71d   :  { %9887 = vmatpush3.msra.mxu1 %v11589_v5 }
 0x71e   :  { %9888 = vmatprep.subr.mxu1 %v11599_v17 }
 0x71f   :  { %9889 = vmatpush3.msra.mxu1 %v11599_v17 }
 0x720   :  { %9890 = vmatprep.subr.mxu1 %v11608_v58 }
 0x721   :  { %9891 = vmatpush3.msra.mxu1 %v11608_v58 }
 0x722   :  { %9892 = vmatprep.subr.mxu1 %v11617_v3 }
 0x723   :  { %9893 = vmatpush3.msra.mxu1 %v11617_v3 }
 0x724   :  { %9894 = vmatprep.subr.mxu1 %v11624_v56 }
 0x725   :  { %9895 = vmatpush3.msra.mxu1 %v11624_v56 }
 0x726   :  { %9896 = vmatprep.subr.mxu1 %v11633_v36 }
 0x727   :  { %9897 = vmatpush3.msra.mxu1 %v11633_v36 }
 0x728   :  { %9898 = vmatprep.subr.mxu1 %v11637_v57 }
 0x729   :  { %9899 = vmatpush3.msra.mxu1 %v11637_v57 }
 0x72a   :  { %9900 = vmatprep.subr.mxu1 %v11643_v31 }
 0x72b   :  { %9901 = vmatpush3.msra.mxu1 %v11643_v31 }
 0x72c   :  { %9902 = vmatprep.subr.mxu1 %v11647_v1 }
 0x72d   :  { %9903 = vmatpush3.msra.mxu1 %v11647_v1 }
 0x72e   :  { %9904 = vmatprep.subr.mxu1 %v11652_v41 }
 0x72f   :  { %9905 = vmatpush3.msra.mxu1 %v11652_v41 }
 0x730   :  { %9907 = vmatmul.mubr.f32.vlgmr.msra.gmra.mxu1 %v8702_v54 }
 0x731   :  { %9909 = vmatprep.mubr.f32.mxu1 %v8703_v13 }
 0x734   :  { %9910 = vmatmul.mubr.f32.gmra.mxu1 %v8704_v15 }
 0x7d0   :  { %v9870_v63 = vpop.f32.mrf.mxu1 }
 0x7d1   :  { %v2234_v16 = vadd.f32 %v9870_v63, %v2041_v49 }
 0x7d2   :  { %v2214_v24 = vpop.f32.mrf.mxu1 }
 0x7d3   :  { %v2233_v11 = vadd.f32 %v2214_v24, %v2040_v55 }
 0x7d4   :  { %v9873_v37 = vpop.f32.mrf.mxu1 }
 0x7d5   :  { %v2236_v61 = vadd.f32 %v9873_v37, %v2043_v43 }
 0x7d6   :  { %v2224_v53 = vpop.f32.mrf.mxu1 }
 0x7d7   :  { %v2235_v23 = vadd.f32 %v2224_v53, %v2042_v0 }
 0x7f0   :  { %v9908_v9 = vpop.f32.mrf.mxu1 }
 0x7f2   :  { %v2308_v60 = vpop.f32.mrf.mxu1 }
 0x7f3   :  { %9914 = vmatprep.mubr.msk.f32.mxu0 %vm971_vm2, %v2308_v60 }
 0x7f4   :  { %v9911_v28 = vpop.f32.mrf.mxu1  ;;  %9915 = vmatmul.mubr.msk.f32.vlgmr.msra.gmra.mxu0 %vm971_vm2, %v9908_v9 }
 0x7f5   :  { %9921 = vmatpush3.msra.mxu0 %v11525_v42  ;;  %v8711_v42 = vld [vmem:[%s10874_s17 + $0x108] sm:$0xff] }
 0x7f6   :  { %9922 = vmatprep.subr.mxu0 %v11537_v50  ;;  %v2318_v4 = vpop.f32.mrf.mxu1 }
 0x7f7   :  { %9923 = vmatpush3.msra.mxu0 %v11537_v50  ;;  %9917 = vmatprep.mubr.msk.f32.mxu0 %vm971_vm2, %v2318_v4  ;;  %v8712_v50 = vld [vmem:[%s10874_s17 + $0x110] sm:$0xff] }
 0x7f8   :  { %9924 = vmatprep.subr.mxu0 %v11548_v8  ;;  %9918 = vmatmul.mubr.msk.f32.gmra.mxu0 %vm971_vm2, %v9911_v28 }
 0x7f9   :  { %9925 = vmatpush3.msra.mxu0 %v11548_v8  ;;  %9952 = vmatprep.mubr.f32.mxu0 %v8710_v12  ;;  %v8713_v8 = vld [vmem:[%s10874_s17 + $0x118] sm:$0xff]  ;;  %s13062_s17 = sld [smem:[#allocation8_spill]] }
 0x7fa   :  { %9926 = vmatprep.subr.mxu0 %v11558_v35 }
 0x7fb   :  { %9927 = vmatpush3.msra.mxu0 %v11558_v35  ;;  %v8714_v35 = vld [vmem:[%s10879_s21 + $0x40] sm:$0xff]  ;;  %s13063_s21 = sld [smem:[#allocation9_spill]] }
 0x7fc   :  { %9928 = vmatprep.subr.mxu0 %v11568_v18  ;;  %9958 = vmatprep.subr.mxu1 %v8714_v35 }
 0x7fd   :  { %9929 = vmatpush3.msra.mxu0 %v11568_v18  ;;  %9959 = vmatpush3.msra.mxu1 %v8714_v35 }
 0x7fe   :  { %9930 = vmatprep.subr.mxu0 %v11579_v22 }
 0x7ff   :  { %9931 = vmatpush3.msra.mxu0 %v11579_v22 }
 0x800   :  { %9932 = vmatprep.subr.mxu0 %v11589_v5 }
 0x801   :  { %9933 = vmatpush3.msra.mxu0 %v11589_v5 }
 0x802   :  { %9934 = vmatprep.subr.mxu0 %v11599_v17 }
 0x803   :  { %9935 = vmatpush3.msra.mxu0 %v11599_v17 }
 0x804   :  { %9936 = vmatprep.subr.mxu0 %v11608_v58 }
 0x805   :  { %9937 = vmatpush3.msra.mxu0 %v11608_v58 }
 0x806   :  { %9938 = vmatprep.subr.mxu0 %v11617_v3 }
 0x807   :  { %9939 = vmatpush3.msra.mxu0 %v11617_v3 }
 0x808   :  { %9940 = vmatprep.subr.mxu0 %v11624_v56 }
 0x809   :  { %9941 = vmatpush3.msra.mxu0 %v11624_v56 }
 0x80a   :  { %9942 = vmatprep.subr.mxu0 %v11633_v36 }
 0x80b   :  { %9943 = vmatpush3.msra.mxu0 %v11633_v36 }
 0x80c   :  { %9944 = vmatprep.subr.mxu0 %v11637_v57 }
 0x80d   :  { %9945 = vmatpush3.msra.mxu0 %v11637_v57 }
 0x80e   :  { %9946 = vmatprep.subr.mxu0 %v11643_v31 }
 0x80f   :  { %9947 = vmatpush3.msra.mxu0 %v11643_v31 }
 0x810   :  { %9948 = vmatprep.subr.mxu0 %v11647_v1 }
 0x811   :  { %9949 = vmatpush3.msra.mxu0 %v11647_v1 }
 0x812   :  { %9950 = vmatprep.subr.mxu0 %v11652_v41 }
 0x813   :  { %9951 = vmatpush3.msra.mxu0 %v11652_v41 }
 0x814   :  { %9953 = vmatmul.mubr.f32.vlgmr.msra.gmra.mxu0 %v8711_v42 }
 0x815   :  { %9955 = vmatprep.mubr.f32.mxu0 %v8712_v50 }
 0x818   :  { %9956 = vmatmul.mubr.f32.gmra.mxu0 %v8713_v8 }
 0x819   :  { %9988 = vmatprep.mubr.msk.f32.mxu0 %vm2746_vm3, %v8725_v10 }
 0x8b4   :  { %v9916_v18 = vpop.f32.mrf.mxu0 }
 0x8b5   :  { %v2427_v22 = vadd.f32 %v9916_v18, %v2234_v16 }
 0x8b6   :  { %v2407_v5 = vpop.f32.mrf.mxu0 }
 0x8b7   :  { %v2426_v17 = vadd.f32 %v2407_v5, %v2233_v11 }
 0x8b8   :  { %v9919_v58 = vpop.f32.mrf.mxu0 }
 0x8b9   :  { %v2429_v3 = vadd.f32 %v9919_v58, %v2236_v61 }
 0x8ba   :  { %v2417_v56 = vpop.f32.mrf.mxu0 }
 0x8bb   :  { %v2428_v36 = vadd.f32 %v2417_v56, %v2235_v23 }
 0x8d4   :  { %v9954_v57 = vpop.f32.mrf.mxu0 }
 0x8d6   :  { %v2501_v31 = vpop.f32.mrf.mxu0 }
 0x8d7   :  { %9960 = vmatprep.mubr.msk.f32.mxu1 %vm971_vm2, %v2501_v31 }
 0x8d8   :  { %v9957_v1 = vpop.f32.mrf.mxu0  ;;  %9961 = vmatmul.mubr.msk.f32.vlgmr.msra.gmra.mxu1 %vm971_vm2, %v9954_v57 }
 0x8da   :  { %v2511_v41 = vpop.f32.mrf.mxu0 }
 0x8db   :  { %9963 = vmatprep.mubr.msk.f32.mxu1 %vm971_vm2, %v2511_v41 }
 0x8dc   :  { %9964 = vmatmul.mubr.msk.f32.gmra.mxu1 %vm971_vm2, %v9957_v1 }
 0x8dd   :  { %9974 = vmatprep.mubr.msk.f32.mxu1 %vm2746_vm3, %v2742_v62 }
 0x998   :  { %v9962_v38 = vpop.f32.mrf.mxu1 }
 0x999   :  { %v12007_v39 = vadd.f32 %v9962_v38, %v2427_v22 }
 0x99a   :  { %v2600_v52 = vpop.f32.mrf.mxu1 }
 0x99b   :  { %v12010_v29 = vmul.f32 0.70710677, %v12007_v39  ;;  %v12012_v14 = vadd.f32 %v2600_v52, %v2426_v17 }
 0x99c   :  { %v9965_v30 = vpop.f32.mrf.mxu1 }
 0x99d   :  { %v2640_v51 = vand.u32 2147483647, %v12010_v29  ;;  %v12016_v25 = vmul.f32 0.70710677, %v12012_v14  ;;  %v12018_v59 = vadd.f32 %v9965_v30, %v2429_v3  ;;  %vm2632_vm5 = vcmp.ge.f32.partialorder %v12010_v29, 0.0 }
 0x99e   :  { %v2610_v7 = vpop.f32.mrf.mxu1 }
 0x99f   :  { %v2644_v46 = vmul.f32 0.3275911, %v2640_v51  ;;  %v2639_v2 = vand.u32 2147483647, %v12016_v25  ;;  %v12022_v32 = vmul.f32 0.70710677, %v12018_v59  ;;  %v12024_v26 = vadd.f32 %v2610_v7, %v2428_v36 }
 0x9a0   :  { %v2696_v6 = vsub.f32 0.0, %v2640_v51  ;;  %vm2631_vm6 = vcmp.ge.f32.partialorder %v12016_v25, 0.0  ;;  %v2626_v29 = vmul.f32 0.5, %v12018_v59 }
 0x9a1   :  { %v2648_v20 = vadd.f32 1.0, %v2644_v46  ;;  %v2643_v47 = vmul.f32 0.3275911, %v2639_v2  ;;  %v2642_v33 = vand.u32 2147483647, %v12022_v32  ;;  %v2695_v44 = vsub.f32 0.0, %v2639_v2 }
 0x9a2   :  { %v12028_v49 = vmul.f32 0.70710677, %v12024_v26  ;;  %v2700_v19 = vmul.f32 %v2696_v6, %v2640_v51  ;;  %vm2634_vm4 = vcmp.ge.f32.partialorder %v12022_v32, 0.0 }
 0x9a3   :  { %10633 = vrcp.f32 %v2648_v20  ;;  %v2647_v34 = vadd.f32 1.0, %v2643_v47  ;;  %v2646_v55 = vmul.f32 0.3275911, %v2642_v33  ;;  %v2698_v48 = vsub.f32 0.0, %v2642_v33 }
 0x9a4   :  { %v2641_v40 = vand.u32 2147483647, %v12028_v49  ;;  %v2699_v13 = vmul.f32 %v2695_v44, %v2639_v2  ;;  %v2705_v11 = vmul.f32 1.442695, %v2700_v19  ;;  %vm2633_vm7 = vcmp.ge.f32.partialorder %v12028_v49, 0.0 }
 0x9a5   :  { %10635 = vrcp.f32 %v2647_v34  ;;  %v2650_v43 = vadd.f32 1.0, %v2646_v55  ;;  %v2702_v63 = vmul.f32 %v2698_v48, %v2642_v33  ;;  %v2625_v49 = vmul.f32 0.5, %v12024_v26 }
 0x9a6   :  { %v2645_v27 = vmul.f32 0.3275911, %v2641_v40  ;;  %v2697_v15 = vsub.f32 0.0, %v2641_v40  ;;  %v2703_v23 = vmul.f32 1.442695, %v2699_v13  ;;  %v2623_v26 = vmul.f32 0.5, %v12012_v14 }
 0x9a7   :  { %10637 = vrcp.f32 %v2650_v43  ;;  %v2709_v4 = vmul.f32 1.442695, %v2702_v63  ;;  %v2743_v14 = vld [vmem:[%s10889_s29 + $0x8] sm:$0xff] }
 0x9a8   :  { %v2649_v0 = vadd.f32 1.0, %v2645_v27  ;;  %v2701_v9 = vmul.f32 %v2697_v15, %v2641_v40  ;;  %v2638_v15 = vsel %vm2634_vm4, 1.0, %v13029_v45 }
 0x9aa   :  { %10639 = vrcp.f32 %v2649_v0  ;;  %v2707_v22 = vmul.f32 1.442695, %v2701_v9 }
 0x9ab   :  { %10641 = vpow2.f32 %v2705_v11 }
 0x9ac   :  { %10643 = vpow2.f32 %v2703_v23 }
 0x9ad   :  { %10645 = vpow2.f32 %v2709_v4  ;;  %v2624_v4 = vmul.f32 0.5, %v12007_v39 }
 0x9ae   :  { %10647 = vpow2.f32 %v2707_v22  ;;  %v8728_v22 = vld [vmem:[%s10889_s29 + $0x38] sm:$0xff] }
 0x9b0   :  { %v10634_v21 = vpop.eup %10633 }
 0x9b1   :  { %v2660_v54 = vmul.f32 1.0614054, %v10634_v21 }
 0x9b2   :  { %v10636_v16 = vpop.eup %10635 }
 0x9b3   :  { %v2664_v24 = vadd.f32 -1.4531521, %v2660_v54  ;;  %v2659_v37 = vmul.f32 1.0614054, %v10636_v16 }
 0x9b4   :  { %v10638_v61 = vpop.eup %10637 }
 0x9b5   :  { %v2668_v53 = vmul.f32 %v10634_v21, %v2664_v24  ;;  %v2663_v60 = vadd.f32 -1.4531521, %v2659_v37  ;;  %v2662_v28 = vmul.f32 1.0614054, %v10638_v61  ;;  %v2635_v37 = vsel %vm2631_vm6, 1.0, %v13029_v45 }
 0x9b7   :  { %v2672_v12 = vadd.f32 1.4214138, %v2668_v53  ;;  %v10640_v42 = vpop.eup %10639  ;;  %v2667_v50 = vmul.f32 %v10636_v16, %v2663_v60  ;;  %v2666_v8 = vadd.f32 -1.4531521, %v2662_v28  ;;  %v2637_v53 = vsel %vm2633_vm7, 1.0, %v13029_v45 }
 0x9b8   :  { %v2661_v18 = vmul.f32 1.0614054, %v10640_v42  ;;  %v10642_v20 = vpop.eup %10641 }
 0x9b9   :  { %v2676_v35 = vmul.f32 %v10634_v21, %v2672_v12  ;;  %v2671_v5 = vadd.f32 1.4214138, %v2667_v50  ;;  %v2670_v17 = vmul.f32 %v10638_v61, %v2666_v8  ;;  %v10644_v40 = vpop.eup %10643  ;;  %v8726_v50 = vld [vmem:[%s10889_s29 + $0x28] sm:$0xff]  ;;  %v2744_v8 = vld [vmem:[%s10889_s29 + $0x10] sm:$0xff] }
 0x9ba   :  { %v2665_v3 = vadd.f32 -1.4531521, %v2661_v18  ;;  %v10646_v27 = vpop.eup %10645  ;;  %v8727_v18 = vld [vmem:[%s10889_s29 + $0x30] sm:$0xff] }
 0x9bb   :  { %v2680_v58 = vadd.f32 -0.28449672, %v2676_v35  ;;  %v2675_v56 = vmul.f32 %v10636_v16, %v2671_v5  ;;  %v2674_v36 = vadd.f32 1.4214138, %v2670_v17  ;;  %v2745_v35 = vld [vmem:[%s10889_s29 + $0x18] sm:$0xff]  ;;  %v8735_v5 = vld [vmem:[%s10889_s29 + $0x40] sm:$0xff] }
 0x9bc   :  { %v2669_v31 = vmul.f32 %v10640_v42, %v2665_v3  ;;  %v8736_v17 = vld [vmem:[%s10889_s29 + $0x48] sm:$0xff] }
 0x9bd   :  { %v2684_v57 = vmul.f32 %v10634_v21, %v2680_v58  ;;  %v2679_v1 = vadd.f32 -0.28449672, %v2675_v56  ;;  %v2678_v41 = vmul.f32 %v10638_v61, %v2674_v36  ;;  %v8745_v58 = vld [vmem:[%s10889_s29 + $0x60] sm:$0xff]  ;;  %v8746_v3 = vld [vmem:[%s10889_s29 + $0x68] sm:$0xff]  ;;  %v8737_v56 = vld [vmem:[%s10889_s29 + $0x50] sm:$0xff] }
 0x9be   :  { %v2673_v10 = vadd.f32 1.4214138, %v2669_v31  ;;  %v8738_v36 = vld [vmem:[%s10889_s29 + $0x58] sm:$0xff] }
 0x9bf   :  { %v2688_v62 = vadd.f32 0.2548296, %v2684_v57  ;;  %v2683_v38 = vmul.f32 %v10636_v16, %v2679_v1  ;;  %v2682_v52 = vadd.f32 -0.28449672, %v2678_v41  ;;  %v8747_v57 = vld [vmem:[%s10889_s29 + $0x70] sm:$0xff]  ;;  %v8748_v31 = vld [vmem:[%s10889_s29 + $0x78] sm:$0xff] }
 0x9c0   :  { %v2677_v51 = vmul.f32 %v10640_v42, %v2673_v10  ;;  %v8755_v1 = vld [vmem:[%s10889_s29 + $0x80] sm:$0xff]  ;;  %v8756_v41 = vld [vmem:[%s10889_s29 + $0x88] sm:$0xff] }
 0x9c1   :  { %v2692_v30 = vmul.f32 %v10634_v21, %v2688_v62  ;;  %v2687_v7 = vadd.f32 0.2548296, %v2683_v38  ;;  %v2686_v46 = vmul.f32 %v10638_v61, %v2682_v52  ;;  %v10648_v21 = vpop.eup %10647  ;;  %v8765_v62 = vld [vmem:[%s10889_s29 + $0xa0] sm:$0xff]  ;;  %v8766_v10 = vld [vmem:[%s10889_s29 + $0xa8] sm:$0xff]  ;;  %v8757_v38 = vld [vmem:[%s10889_s29 + $0x90] sm:$0xff] }
 0x9c2   :  { %v2681_v2 = vadd.f32 -0.28449672, %v2677_v51  ;;  %v8758_v52 = vld [vmem:[%s10889_s29 + $0x98] sm:$0xff] }
 0x9c3   :  { %v2691_v47 = vmul.f32 %v10636_v16, %v2687_v7  ;;  %v2690_v33 = vadd.f32 0.2548296, %v2686_v46  ;;  %v2712_v34 = vmul.f32 %v10642_v20, %v2692_v30  ;;  %v2636_v16 = vsel %vm2632_vm5, 1.0, %v13029_v45  ;;  %v8767_v30 = vld [vmem:[%s10889_s29 + $0xb0] sm:$0xff]  ;;  %v8768_v51 = vld [vmem:[%s10889_s29 + $0xb8] sm:$0xff]  ;;  %v8775_v7 = vld [vmem:[%s10889_s29 + $0xc0] sm:$0xff] }
 0x9c4   :  { %v2685_v55 = vmul.f32 %v10640_v42, %v2681_v2  ;;  %v8776_v46 = vld [vmem:[%s10889_s29 + $0xc8] sm:$0xff]  ;;  %v8785_v2 = vld [vmem:[%s10889_s29 + $0xe0] sm:$0xff] }
 0x9c5   :  { %v2694_v43 = vmul.f32 %v10638_v61, %v2690_v33  ;;  %v2711_v0 = vmul.f32 %v10644_v40, %v2691_v47  ;;  %v2716_v48 = vsub.f32 1.0, %v2712_v34  ;;  %v8786_v20 = vld [vmem:[%s10889_s29 + $0xe8] sm:$0xff]  ;;  %v8777_v47 = vld [vmem:[%s10889_s29 + $0xd0] sm:$0xff]  ;;  %v8778_v34 = vld [vmem:[%s10889_s29 + $0xd8] sm:$0xff] }
 0x9c6   :  { %v2689_v6 = vadd.f32 0.2548296, %v2685_v55  ;;  %v8787_v33 = vld [vmem:[%s10889_s29 + $0xf0] sm:$0xff]  ;;  %v8788_v55 = vld [vmem:[%s10889_s29 + $0xf8] sm:$0xff]  ;;  %v8795_v40 = vld [vmem:[%s10889_s29 + $0x100] sm:$0xff] }
 0x9c7   :  { %v2714_v44 = vmul.f32 %v10646_v27, %v2694_v43  ;;  %v2715_v13 = vsub.f32 1.0, %v2711_v0  ;;  %v2720_v11 = vmul.f32 %v2716_v48, %v2636_v16  ;;  %v8796_v43 = vld [vmem:[%s10889_s29 + $0x108] sm:$0xff]  ;;  %v8797_v27 = vld [vmem:[%s10889_s29 + $0x110] sm:$0xff]  ;;  %v8798_v0 = vld [vmem:[%s10889_s29 + $0x118] sm:$0xff]  ;;  %s13065_s29 = sld [smem:[#allocation10_spill]] }
 0x9c8   :  { %v2693_v19 = vmul.f32 %v10640_v42, %v2689_v6 }
 0x9c9   :  { %v2718_v54 = vsub.f32 1.0, %v2714_v44  ;;  %v2719_v25 = vmul.f32 %v2715_v13, %v2635_v37  ;;  %v2724_v60 = vadd.f32 1.0, %v2720_v11  ;;  %v8724_v37 = vld [vmem:[%s10894_s3] ss:$0 sm:$0xff] }
 0x9ca   :  { %v2713_v63 = vmul.f32 %v10648_v21, %v2693_v19 }
 0x9cb   :  { %v2722_v24 = vmul.f32 %v2718_v54, %v2638_v15  ;;  %v2723_v12 = vadd.f32 1.0, %v2719_v25  ;;  %v12050_v42 = vmul.f32 %v2724_v60, %v2624_v4 }
 0x9cc   :  { %v2717_v32 = vsub.f32 1.0, %v2713_v63 }
 0x9cd   :  { %v2726_v61 = vadd.f32 1.0, %v2722_v24  ;;  %v12057_v39 = vmul.f32 %v2723_v12, %v2623_v26 }
 0x9ce   :  { %v2721_v23 = vmul.f32 %v2717_v32, %v2637_v53  ;;  %v8719_v53 = vld [vmem:[%s10899_s8] ss:$0 sm:$0xff]  ;;  %s13067_s8 = sld [smem:[#allocation14_spill]] }
 0x9cf   :  { %v12040_v9 = vmul.f32 %v2726_v61, %v2626_v29  ;;  %v2739_v12 = vadd.f32 %v8719_v53, %v12050_v42 }
 0x9d0   :  { %v2725_v28 = vadd.f32 1.0, %v2721_v23 }
 0x9d1   :  { %9966 = vmatprep.subr.mxu1 %v12040_v9  ;;  %9980 = vmatprep.subr.mxu0 %v12040_v9 }
 0x9d2   :  { %v12046_v59 = vmul.f32 %v2725_v28, %v2625_v49  ;;  %9967 = vmatpush3.msra.mxu1 %v12040_v9  ;;  %9981 = vmatpush3.msra.mxu0 %v12040_v9  ;;  %v2738_v49 = vadd.f32 %v8719_v53, %v12057_v39  ;;  %v8734_v28 = vld [vmem:[%s10894_s3 + $0x1] ss:$0 sm:$0xff] }
 0x9d4   :  { %9968 = vmatprep.subr.mxu1 %v12046_v59  ;;  %9982 = vmatprep.subr.mxu0 %v12046_v59 }
 0x9d5   :  { %9969 = vmatpush3.msra.mxu1 %v12046_v59  ;;  %9983 = vmatpush3.msra.mxu0 %v12046_v59 }
 0x9d6   :  { %9970 = vmatprep.subr.mxu1 %v12050_v42  ;;  %9984 = vmatprep.subr.mxu0 %v12050_v42 }
 0x9d7   :  { %9971 = vmatpush3.msra.mxu1 %v12050_v42  ;;  %9985 = vmatpush3.msra.mxu0 %v12050_v42 }
 0x9d8   :  { %9972 = vmatprep.subr.mxu1 %v12057_v39  ;;  %9986 = vmatprep.subr.mxu0 %v12057_v39 }
 0x9d9   :  { %9973 = vmatpush3.msra.mxu1 %v12057_v39  ;;  %9987 = vmatpush3.msra.mxu0 %v12057_v39 }
 0x9da   :  { %9975 = vmatmul.mubr.msk.f32.vlgmr.msra.gmra.mxu1 %vm2746_vm3, %v2743_v14  ;;  %9994 = vmatprep.subr.mxu1 %v12040_v9 }
 0x9db   :  { %10008 = vmatprep.subr.mxu0 %v12040_v9  ;;  %9989 = vmatmul.mubr.msk.f32.vlgmr.msra.gmra.mxu0 %vm2746_vm3, %v8726_v50 }
 0x9dc   :  { %9995 = vmatpush3.msra.mxu1 %v12040_v9  ;;  %10009 = vmatpush3.msra.mxu0 %v12040_v9 }
 0x9dd   :  { %9996 = vmatprep.subr.mxu1 %v12046_v59  ;;  %10010 = vmatprep.subr.mxu0 %v12046_v59 }
 0x9de   :  { %9977 = vmatprep.mubr.msk.f32.mxu1 %vm2746_vm3, %v2744_v8  ;;  %9997 = vmatpush3.msra.mxu1 %v12046_v59  ;;  %v8744_v8 = vld [vmem:[%s10894_s3 + $0x2] ss:$0 sm:$0xff] }
 0x9df   :  { %10011 = vmatpush3.msra.mxu0 %v12046_v59  ;;  %9978 = vmatmul.mubr.msk.f32.gmra.mxu1 %vm2746_vm3, %v2745_v35 }
 0x9e0   :  { %9991 = vmatprep.mubr.msk.f32.mxu0 %vm2746_vm3, %v8727_v18  ;;  %9998 = vmatprep.subr.mxu1 %v12050_v42 }
 0x9e1   :  { %10012 = vmatprep.subr.mxu0 %v12050_v42  ;;  %9992 = vmatmul.mubr.msk.f32.gmra.mxu0 %vm2746_vm3, %v8728_v22 }
 0x9e2   :  { %9999 = vmatpush3.msra.mxu1 %v12050_v42  ;;  %10013 = vmatpush3.msra.mxu0 %v12050_v42 }
 0x9e3   :  { %10000 = vmatprep.subr.mxu1 %v12057_v39  ;;  %10014 = vmatprep.subr.mxu0 %v12057_v39 }
 0x9e4   :  { %10001 = vmatpush3.msra.mxu1 %v12057_v39  ;;  %10002 = vmatprep.mubr.msk.f32.mxu1 %vm2746_vm3, %v8735_v5 }
 0x9e5   :  { %10015 = vmatpush3.msra.mxu0 %v12057_v39  ;;  %10003 = vmatmul.mubr.msk.f32.vlgmr.msra.gmra.mxu1 %vm2746_vm3, %v8736_v17 }
 0x9e6   :  { %10016 = vmatprep.mubr.msk.f32.mxu0 %vm2746_vm3, %v8745_v58  ;;  %10022 = vmatprep.subr.mxu1 %v12040_v9  ;;  %v2740_v58 = vadd.f32 %v8719_v53, %v12046_v59 }
 0x9e7   :  { %10036 = vmatprep.subr.mxu0 %v12040_v9  ;;  %10017 = vmatmul.mubr.msk.f32.vlgmr.msra.gmra.mxu0 %vm2746_vm3, %v8746_v3 }
 0x9e8   :  { %10023 = vmatpush3.msra.mxu1 %v12040_v9  ;;  %10037 = vmatpush3.msra.mxu0 %v12040_v9 }
 0x9e9   :  { %10024 = vmatprep.subr.mxu1 %v12046_v59  ;;  %10038 = vmatprep.subr.mxu0 %v12046_v59 }
 0x9ea   :  { %10005 = vmatprep.mubr.msk.f32.mxu1 %vm2746_vm3, %v8737_v56  ;;  %10025 = vmatpush3.msra.mxu1 %v12046_v59 }
 0x9eb   :  { %10039 = vmatpush3.msra.mxu0 %v12046_v59  ;;  %10006 = vmatmul.mubr.msk.f32.gmra.mxu1 %vm2746_vm3, %v8738_v36 }
 0x9ec   :  { %10019 = vmatprep.mubr.msk.f32.mxu0 %vm2746_vm3, %v8747_v57  ;;  %10026 = vmatprep.subr.mxu1 %v12050_v42 }
 0x9ed   :  { %10040 = vmatprep.subr.mxu0 %v12050_v42  ;;  %10020 = vmatmul.mubr.msk.f32.gmra.mxu0 %vm2746_vm3, %v8748_v31  ;;  %v8754_v31 = vld [vmem:[%s10894_s3 + $0x3] ss:$0 sm:$0xff] }
 0x9ee   :  { %10027 = vmatpush3.msra.mxu1 %v12050_v42  ;;  %10041 = vmatpush3.msra.mxu0 %v12050_v42 }
 0x9ef   :  { %10028 = vmatprep.subr.mxu1 %v12057_v39  ;;  %10042 = vmatprep.subr.mxu0 %v12057_v39 }
 0x9f0   :  { %10029 = vmatpush3.msra.mxu1 %v12057_v39  ;;  %10030 = vmatprep.mubr.msk.f32.mxu1 %vm2746_vm3, %v8755_v1 }
 0x9f1   :  { %10043 = vmatpush3.msra.mxu0 %v12057_v39  ;;  %10031 = vmatmul.mubr.msk.f32.vlgmr.msra.gmra.mxu1 %vm2746_vm3, %v8756_v41 }
 0x9f2   :  { %10044 = vmatprep.mubr.msk.f32.mxu0 %vm2746_vm3, %v8765_v62  ;;  %10050 = vmatprep.subr.mxu1 %v12040_v9 }
 0x9f3   :  { %10064 = vmatprep.subr.mxu0 %v12040_v9  ;;  %10045 = vmatmul.mubr.msk.f32.vlgmr.msra.gmra.mxu0 %vm2746_vm3, %v8766_v10 }
 0x9f4   :  { %10051 = vmatpush3.msra.mxu1 %v12040_v9  ;;  %10065 = vmatpush3.msra.mxu0 %v12040_v9 }
 0x9f5   :  { %10052 = vmatprep.subr.mxu1 %v12046_v59  ;;  %10066 = vmatprep.subr.mxu0 %v12046_v59 }
 0x9f6   :  { %10033 = vmatprep.mubr.msk.f32.mxu1 %vm2746_vm3, %v8757_v38  ;;  %10053 = vmatpush3.msra.mxu1 %v12046_v59 }
 0x9f7   :  { %10067 = vmatpush3.msra.mxu0 %v12046_v59  ;;  %10034 = vmatmul.mubr.msk.f32.gmra.mxu1 %vm2746_vm3, %v8758_v52 }
 0x9f8   :  { %10054 = vmatprep.subr.mxu1 %v12050_v42  ;;  %10068 = vmatprep.subr.mxu0 %v12050_v42 }
 0x9f9   :  { %10047 = vmatprep.mubr.msk.f32.mxu0 %vm2746_vm3, %v8767_v30  ;;  %10055 = vmatpush3.msra.mxu1 %v12050_v42 }
 0x9fa   :  { %10069 = vmatpush3.msra.mxu0 %v12050_v42  ;;  %10056 = vmatprep.subr.mxu1 %v12057_v39 }
 0x9fb   :  { %10048 = vmatmul.mubr.msk.f32.gmra.mxu0 %vm2746_vm3, %v8768_v51  ;;  %10070 = vmatprep.subr.mxu0 %v12057_v39 }
 0x9fc   :  { %10057 = vmatpush3.msra.mxu1 %v12057_v39  ;;  %10058 = vmatprep.mubr.msk.f32.mxu1 %vm2746_vm3, %v8775_v7  ;;  %v8764_v7 = vld [vmem:[%s10894_s3 + $0x4] ss:$0 sm:$0xff] }
 0x9fd   :  { %10071 = vmatpush3.msra.mxu0 %v12057_v39  ;;  %10059 = vmatmul.mubr.msk.f32.vlgmr.msra.gmra.mxu1 %vm2746_vm3, %v8776_v46 }
 0x9fe   :  { %10078 = vmatprep.subr.mxu1 %v12040_v9  ;;  %10072 = vmatprep.mubr.msk.f32.mxu0 %vm2746_vm3, %v8785_v2 }
 0x9ff   :  { %10079 = vmatpush3.msra.mxu1 %v12040_v9  ;;  %10073 = vmatmul.mubr.msk.f32.vlgmr.msra.gmra.mxu0 %vm2746_vm3, %v8786_v20 }
 0xa00   :  { %10080 = vmatprep.subr.mxu1 %v12046_v59  ;;  %10061 = vmatprep.mubr.msk.f32.mxu1 %vm2746_vm3, %v8777_v47 }
 0xa01   :  { %10081 = vmatpush3.msra.mxu1 %v12046_v59  ;;  %10075 = vmatprep.mubr.msk.f32.mxu0 %vm2746_vm3, %v8787_v33 }
 0xa02   :  { %10062 = vmatmul.mubr.msk.f32.gmra.mxu1 %vm2746_vm3, %v8778_v34  ;;  %10082 = vmatprep.subr.mxu1 %v12050_v42 }
 0xa03   :  { %10083 = vmatpush3.msra.mxu1 %v12050_v42  ;;  %10076 = vmatmul.mubr.msk.f32.gmra.mxu0 %vm2746_vm3, %v8788_v55 }
 0xa04   :  { %10084 = vmatprep.subr.mxu1 %v12057_v39  ;;  %10086 = vmatprep.mubr.msk.f32.mxu1 %vm2746_vm3, %v8795_v40 }
 0xa05   :  { %10085 = vmatpush3.msra.mxu1 %v12057_v39  ;;  %v2741_v39 = vadd.f32 %v8719_v53, %v12040_v9 }
 0xa06   :  { %10087 = vmatmul.mubr.msk.f32.vlgmr.msra.gmra.mxu1 %vm2746_vm3, %v8796_v43 }
 0xa07   :  { %10089 = vmatprep.mubr.msk.f32.mxu1 %vm2746_vm3, %v8797_v27 }
 0xa0a   :  { %10090 = vmatmul.mubr.msk.f32.gmra.mxu1 %vm2746_vm3, %v8798_v0  ;;  %v8774_v0 = vld [vmem:[%s10894_s3 + $0x5] ss:$0 sm:$0xff] }
 0xa9a   :  { %v9976_v6 = vpop.f32.mrf.mxu1 }
 0xa9b   :  { %v9990_v44 = vpop.f32.mrf.mxu0  ;;  %v2852_v60 = vmul.f32 %v9976_v6, %v8724_v37 }
 0xa9c   :  { %v2825_v48 = vpop.f32.mrf.mxu1  ;;  %v2970_v5 = vmul.f32 %v9990_v44, %v8734_v28 }
 0xa9d   :  { %v2942_v19 = vpop.f32.mrf.mxu0  ;;  %v2851_v25 = vmul.f32 %v8724_v37, %v2825_v48  ;;  %v2856_v22 = vadd.f32 %v2852_v60, %v2739_v12 }
 0xa9e   :  { %v2969_v50 = vmul.f32 %v8734_v28, %v2942_v19 }
 0xa9f   :  { %v9979_v21 = vpop.f32.mrf.mxu1  ;;  %v2855_v14 = vadd.f32 %v2851_v25, %v2738_v49  ;;  %v2974_v62 = vadd.f32 %v2970_v5, %v2856_v22 }
 0xaa0   :  { %v2854_v17 = vmul.f32 %v9979_v21, %v8724_v37 }
 0xaa1   :  { %v2835_v54 = vpop.f32.mrf.mxu1  ;;  %v9993_v13 = vpop.f32.mrf.mxu0  ;;  %v2973_v42 = vadd.f32 %v2969_v50, %v2855_v14  ;;  %v8794_v50 = vld [vmem:[%s10894_s3 + $0x7] ss:$0 sm:$0xff] }
 0xaa2   :  { %v2853_v26 = vmul.f32 %v8724_v37, %v2835_v54  ;;  %v2858_v10 = vadd.f32 %v2854_v17, %v2741_v39  ;;  %v2972_v38 = vmul.f32 %v9993_v13, %v8734_v28  ;;  %v8804_v39 = vld [vmem:[%s10894_s3 + $0x8] ss:$0 sm:$0xff] }
 0xaa3   :  { %v2952_v15 = vpop.f32.mrf.mxu0 }
 0xaa4   :  { %v2857_v56 = vadd.f32 %v2853_v26, %v2740_v58  ;;  %v2971_v36 = vmul.f32 %v8734_v28, %v2952_v15  ;;  %v2976_v34 = vadd.f32 %v2972_v38, %v2858_v10 }
 0xaa5   :  { %v10004_v63 = vpop.f32.mrf.mxu1 }
 0xaa6   :  { %v3088_v57 = vmul.f32 %v10004_v63, %v8744_v8  ;;  %v2975_v46 = vadd.f32 %v2971_v36, %v2857_v56 }
 0xaa7   :  { %v3060_v16 = vpop.f32.mrf.mxu1  ;;  %v10018_v24 = vpop.f32.mrf.mxu0 }
 0xaa8   :  { %v3087_v3 = vmul.f32 %v8744_v8, %v3060_v16  ;;  %v3092_v2 = vadd.f32 %v3088_v57, %v2974_v62  ;;  %v3206_v20 = vmul.f32 %v10018_v24, %v8754_v31 }
 0xaa9   :  { %v3178_v11 = vpop.f32.mrf.mxu0 }
 0xaaa   :  { %v3091_v30 = vadd.f32 %v3087_v3, %v2973_v42  ;;  %v3205_v51 = vmul.f32 %v8754_v31, %v3178_v11  ;;  %v3210_v48 = vadd.f32 %v3206_v20, %v3092_v2 }
 0xaab   :  { %v10007_v32 = vpop.f32.mrf.mxu1 }
 0xaac   :  { %v3090_v9 = vmul.f32 %v10007_v32, %v8744_v8  ;;  %v3209_v27 = vadd.f32 %v3205_v51, %v3091_v30 }
 0xaad   :  { %v3070_v29 = vpop.f32.mrf.mxu1  ;;  %v10021_v61 = vpop.f32.mrf.mxu0 }
 0xaae   :  { %v3089_v52 = vmul.f32 %v8744_v8, %v3070_v29  ;;  %v3094_v19 = vadd.f32 %v3090_v9, %v2976_v34  ;;  %v3208_v21 = vmul.f32 %v10021_v61, %v8754_v31  ;;  %v8784_v29 = vld [vmem:[%s10894_s3 + $0x6] ss:$0 sm:$0xff]  ;;  %s13066_s3 = sld [smem:[#allocation11_spill]] }
 0xaaf   :  { %v3188_v23 = vpop.f32.mrf.mxu0 }
 0xab0   :  { %v3093_v55 = vadd.f32 %v3089_v52, %v2975_v46  ;;  %v3207_v40 = vmul.f32 %v8754_v31, %v3188_v23  ;;  %v3212_v23 = vadd.f32 %v3208_v21, %v3094_v19 }
 0xab1   :  { %v10032_v4 = vpop.f32.mrf.mxu1 }
 0xab2   :  { %v3324_v43 = vmul.f32 %v10032_v4, %v8764_v7  ;;  %v3211_v24 = vadd.f32 %v3207_v40, %v3093_v55 }
 0xab3   :  { %v3296_v35 = vpop.f32.mrf.mxu1  ;;  %v10046_v18 = vpop.f32.mrf.mxu0 }
 0xab4   :  { %v3323_v47 = vmul.f32 %v8764_v7, %v3296_v35  ;;  %v3328_v11 = vadd.f32 %v3324_v43, %v3210_v48  ;;  %v3442_v32 = vmul.f32 %v10046_v18, %v8774_v0 }
 0xab5   :  { %v3414_v41 = vpop.f32.mrf.mxu0 }
 0xab6   :  { %v3327_v13 = vadd.f32 %v3323_v47, %v3209_v27  ;;  %v3441_v15 = vmul.f32 %v8774_v0, %v3414_v41  ;;  %v3446_v26 = vadd.f32 %v3442_v32, %v3328_v11 }
 0xab7   :  { %v10035_v1 = vpop.f32.mrf.mxu1 }
 0xab8   :  { %v3326_v37 = vmul.f32 %v10035_v1, %v8764_v7  ;;  %v3445_v4 = vadd.f32 %v3441_v15, %v3327_v13 }
 0xab9   :  { %v3306_v59 = vpop.f32.mrf.mxu1 }
 0xaba   :  { %v3325_v54 = vmul.f32 %v8764_v7, %v3306_v59  ;;  %v3330_v14 = vadd.f32 %v3326_v37, %v3212_v23 }
 0xabb   :  { %v10049_v33 = vpop.f32.mrf.mxu0 }
 0xabc   :  { %v3329_v60 = vadd.f32 %v3325_v54, %v3211_v24  ;;  %v3444_v35 = vmul.f32 %v10049_v33, %v8774_v0 }
 0xabd   :  { %v3424_v6 = vpop.f32.mrf.mxu0  ;;  %v10060_v44 = vpop.f32.mrf.mxu1 }
 0xabe   :  { %v3443_v49 = vmul.f32 %v8774_v0, %v3424_v6  ;;  %v3560_v61 = vmul.f32 %v10060_v44, %v8784_v29  ;;  %v3448_v41 = vadd.f32 %v3444_v35, %v3330_v14 }
 0xabf   :  { %v3532_v63 = vpop.f32.mrf.mxu1  ;;  %v10074_v16 = vpop.f32.mrf.mxu0 }
 0xac0   :  { %v3559_v53 = vmul.f32 %v8784_v29, %v3532_v63  ;;  %v3447_v58 = vadd.f32 %v3443_v49, %v3329_v60  ;;  %v3564_v56 = vadd.f32 %v3560_v61, %v3446_v26  ;;  %v3678_v36 = vmul.f32 %v10074_v16, %v8794_v50  ;;  %v3884_v61 = vld [vmem:[%s10914_s24] sm:$0xff]  ;;  %v4085_v26 = vld [vmem:[%s10924_s6 + $0x8] sm:$0xff] }
 0xac1   :  { %v3650_v25 = vpop.f32.mrf.mxu0 }
 0xac2   :  { %v10063_v28 = vpop.f32.mrf.mxu1  ;;  %v3563_v22 = vadd.f32 %v3559_v53, %v3445_v4  ;;  %v3677_v5 = vmul.f32 %v8794_v50, %v3650_v25  ;;  %v3682_v30 = vadd.f32 %v3678_v36, %v3564_v56  ;;  %v3885_v4 = vld [vmem:[%s10914_s24 + $0x8] sm:$0xff] }
 0xac3   :  { %v10077_v12 = vpop.f32.mrf.mxu0  ;;  %v3562_v57 = vmul.f32 %v10063_v28, %v8784_v29  ;;  %v3991_v28 = vld [vmem:[%s10919_s30 + $0x8] sm:$0xff]  ;;  %10092 = vmatprep.subr.mxu0 %v3885_v4 }
 0xac4   :  { %v3542_v8 = vpop.f32.mrf.mxu1  ;;  %v3681_v62 = vadd.f32 %v3677_v5, %v3563_v22  ;;  %v3680_v7 = vmul.f32 %v10077_v12, %v8794_v50  ;;  %10102 = vmatprep.subr.mxu1 %v3991_v28  ;;  %10093 = vmatpush3.msra.mxu0 %v3885_v4  ;;  %v3990_v12 = vld [vmem:[%s10919_s30] sm:$0xff] }
 0xac5   :  { %v3561_v18 = vmul.f32 %v8784_v29, %v3542_v8  ;;  %v3660_v17 = vpop.f32.mrf.mxu0  ;;  %v3566_v51 = vadd.f32 %v3562_v57, %v3448_v41  ;;  %10103 = vmatpush3.msra.mxu1 %v3991_v28  ;;  %10094 = vmatprep.subr.mxu0 %v3884_v61  ;;  %v8805_v57 = vld [vmem:[%s10904_s14] ss:$0 sm:$0xff]  ;;  %s13068_s14 = sld [smem:[#allocation13_spill]] }
 0xac6   :  { %v10088_v3 = vpop.f32.mrf.mxu1  ;;  %v3679_v31 = vmul.f32 %v8794_v50, %v3660_v17  ;;  %10104 = vmatprep.subr.mxu1 %v3990_v12  ;;  %10095 = vmatpush3.msra.mxu0 %v3884_v61  ;;  %v8817_v4 = vld [vmem:[%s13060_s9] ss:$0 sm:$0xff] }
 0xac7   :  { %v3565_v42 = vadd.f32 %v3561_v18, %v3447_v58  ;;  %v3796_v10 = vmul.f32 %v10088_v3, %v8804_v39  ;;  %v3684_v34 = vadd.f32 %v3680_v7, %v3566_v51  ;;  %10105 = vmatpush3.msra.mxu1 %v3990_v12  ;;  %10112 = vmatprep.subr.mxu0 %v4085_v26 }
 0xac8   :  { %v3768_v1 = vpop.f32.mrf.mxu1 }
 0xac9   :  { %v3795_v38 = vmul.f32 %v8804_v39, %v3768_v1  ;;  %v3683_v46 = vadd.f32 %v3679_v31, %v3565_v42  ;;  %v12207_v20 = vadd.f32 %v3796_v10, %v3682_v30  ;;  %v8806_v31 = vld [vmem:[%s10909_s19] ss:$0 sm:$0xff]  ;;  %s13069_s19 = sld [smem:[#allocation18_spill]] }
 0xaca   :  { %v10091_v52 = vpop.f32.mrf.mxu1 }
 0xacb   :  { %v12205_v59 = vadd.f32 %v3795_v38, %v3681_v62  ;;  %v3798_v9 = vmul.f32 %v10091_v52, %v8804_v39  ;;  %v3809_v43 = vsel %vm3805_vm8, %v12207_v20, 0.0 }
 0xacc   :  { %v3778_v2 = vpop.f32.mrf.mxu1 }
 0xacd   :  { %v3797_v47 = vmul.f32 %v8804_v39, %v3778_v2  ;;  %v3806_v33 = vsel %vm3805_vm8, %v12205_v59, 0.0  ;;  %v12213_v40 = vadd.f32 %v3798_v9, %v3684_v34 }
 0xace   :  { %3807 = vadd.xlane.f32.xlu0 %v3806_v33  ;;  %v4084_v33 = vld [vmem:[%s10924_s6] sm:$0xff] }
 0xacf   :  { %v12211_v55 = vadd.f32 %v3797_v47, %v3683_v46  ;;  %v3815_v0 = vsel %vm3805_vm8, %v12213_v40, 0.0 }
 0xad1   :  { %v3812_v27 = vsel %vm3805_vm8, %v12211_v55, 0.0 }
 0xad2   :  { %3810 = vadd.xlane.f32.xlu0 %v3809_v43  ;;  %3813 = vadd.xlane.f32.xlu1 %v3812_v27 }
 0xad6   :  { %3816 = vadd.xlane.f32.xlu1 %v3815_v0  ;;  %v8812_v0 = vld [vmem:[%s13058_s0] ss:$0 sm:$0xff] }
 0xb57   :  { %v3808_v6 = vpop.xlane.xlu0 %3807 }
 0xb58   :  { %v3819_v44 = vmul.f32 0.0625, %v3808_v6 }
 0xb5a   :  { %v3823_v48 = vsub.f32 %v12205_v59, %v3819_v44 }
 0xb5b   :  { %v3811_v19 = vpop.xlane.xlu0 %3810  ;;  %v3814_v21 = vpop.xlane.xlu1 %3813 }
 0xb5c   :  { %v3820_v54 = vmul.f32 0.0625, %v3811_v19  ;;  %v3821_v13 = vmul.f32 0.0625, %v3814_v21  ;;  %v3827_v15 = vmul.f32 %v3823_v48, %v3823_v48 }
 0xb5e   :  { %v3824_v63 = vsub.f32 %v12207_v20, %v3820_v54  ;;  %v3825_v16 = vsub.f32 %v12211_v55, %v3821_v13  ;;  %v3831_v24 = vsel %vm3805_vm8, %v3827_v15, 0.0 }
 0xb5f   :  { %3832 = vadd.xlane.f32.xlu0 %v3831_v24  ;;  %v3817_v11 = vpop.xlane.xlu1 %3816 }
 0xb60   :  { %v3822_v32 = vmul.f32 0.0625, %v3817_v11  ;;  %v3828_v37 = vmul.f32 %v3824_v63, %v3824_v63  ;;  %v3829_v29 = vmul.f32 %v3825_v16, %v3825_v16  ;;  %v8807_v11 = vld [vmem:[%s13059_s5] ss:$0 sm:$0xff] }
 0xb62   :  { %v3826_v53 = vsub.f32 %v12213_v40, %v3822_v32  ;;  %v3834_v25 = vsel %vm3805_vm8, %v3828_v37, 0.0  ;;  %v3837_v23 = vsel %vm3805_vm8, %v3829_v29, 0.0 }
 0xb63   :  { %3835 = vadd.xlane.f32.xlu1 %v3834_v25  ;;  %3838 = vadd.xlane.f32.xlu0 %v3837_v23 }
 0xb64   :  { %v3830_v60 = vmul.f32 %v3826_v53, %v3826_v53 }
 0xb66   :  { %v3840_v49 = vsel %vm3805_vm8, %v3830_v60, 0.0 }
 0xb67   :  { %3841 = vadd.xlane.f32.xlu1 %v3840_v49 }
 0xbe8   :  { %v3833_v14 = vpop.xlane.xlu0 %3832 }
 0xbe9   :  { %v3843_v50 = vmul.f32 0.0625, %v3833_v14 }
 0xbeb   :  { %v3847_v8 = vadd.f32 1e-05, %v3843_v50 }
 0xbec   :  { %v3839_v35 = vpop.xlane.xlu0 %3838  ;;  %v3836_v22 = vpop.xlane.xlu1 %3835 }
 0xbed   :  { %10649 = vrsqrt.f32 %v3847_v8  ;;  %v3845_v5 = vmul.f32 0.0625, %v3839_v35  ;;  %v3844_v18 = vmul.f32 0.0625, %v3836_v22 }
 0xbef   :  { %v3849_v17 = vadd.f32 1e-05, %v3845_v5  ;;  %v3848_v58 = vadd.f32 1e-05, %v3844_v18 }
 0xbf0   :  { %v3842_v3 = vpop.xlane.xlu1 %3841 }
 0xbf1   :  { %10651 = vrsqrt.f32 %v3849_v17  ;;  %v3846_v39 = vmul.f32 0.0625, %v3842_v3 }
 0xbf2   :  { %10653 = vrsqrt.f32 %v3848_v58 }
 0xbf3   :  { %v3850_v56 = vadd.f32 1e-05, %v3846_v39 }
 0xbf5   :  { %10655 = vrsqrt.f32 %v3850_v56 }
 0xbfa   :  { %v10650_v36 = vpop.eup %10649 }
 0xbfb   :  { %v3855_v42 = vmul.f32 %v10650_v36, %v3823_v48 }
 0xbfd   :  { %v3865_v1 = vmul.f32 %v8805_v57, %v3855_v42 }
 0xbfe   :  { %v10652_v41 = vpop.eup %10651 }
 0xbff   :  { %v10654_v62 = vpop.eup %10653  ;;  %v3857_v10 = vmul.f32 %v10652_v41, %v3825_v16  ;;  %v12236_v38 = vadd.f32 %v8806_v31, %v3865_v1 }
 0xc00   :  { %v3856_v52 = vmul.f32 %v10654_v62, %v3824_v63 }
 0xc01   :  { %v3867_v30 = vmul.f32 %v8805_v57, %v3857_v10  ;;  %10096 = vmatprep.mubr.msk.f32.mxu0 %vm3805_vm8, %v12236_v38  ;;  %10106 = vmatprep.mubr.msk.f32.mxu1 %vm3805_vm8, %v12236_v38 }
 0xc02   :  { %v10656_v51 = vpop.eup %10655  ;;  %v3866_v7 = vmul.f32 %v8805_v57, %v3856_v52 }
 0xc03   :  { %v3858_v46 = vmul.f32 %v10656_v51, %v3826_v53  ;;  %v12242_v2 = vadd.f32 %v8806_v31, %v3867_v30 }
 0xc04   :  { %v12244_v9 = vadd.f32 %v8806_v31, %v3866_v7 }
 0xc05   :  { %v3868_v47 = vmul.f32 %v8805_v57, %v3858_v46 }
 0xc06   :  { %10097 = vmatmul.mubr.msk.f32.vlgmr.msra.gmra.mxu0 %vm3805_vm8, %v12244_v9  ;;  %10107 = vmatmul.mubr.msk.f32.vlgmr.msra.gmra.mxu1 %vm3805_vm8, %v12244_v9 }
 0xc07   :  { %10099 = vmatprep.mubr.msk.f32.mxu0 %vm3805_vm8, %v12242_v2  ;;  %10109 = vmatprep.mubr.msk.f32.mxu1 %vm3805_vm8, %v12242_v2  ;;  %v12255_v34 = vadd.f32 %v8806_v31, %v3868_v47 }
 0xc08   :  { %10113 = vmatpush3.msra.mxu0 %v4085_v26 }
 0xc09   :  { %10114 = vmatprep.subr.mxu0 %v4084_v33 }
 0xc0a   :  { %10100 = vmatmul.mubr.msk.f32.gmra.mxu0 %vm3805_vm8, %v12255_v34  ;;  %10110 = vmatmul.mubr.msk.f32.gmra.mxu1 %vm3805_vm8, %v12255_v34 }
 0xc0b   :  { %10116 = vmatprep.mubr.msk.f32.mxu0 %vm3805_vm8, %v12236_v38  ;;  %10115 = vmatpush3.msra.mxu0 %v4084_v33 }
 0xc0e   :  { %10117 = vmatmul.mubr.msk.f32.vlgmr.msra.gmra.mxu0 %vm3805_vm8, %v12244_v9 }
 0xc0f   :  { %10119 = vmatprep.mubr.msk.f32.mxu0 %vm3805_vm8, %v12242_v2 }
 0xc12   :  { %10120 = vmatmul.mubr.msk.f32.gmra.mxu0 %vm3805_vm8, %v12255_v34 }
 0xcc6   :  { %v10098_v43 = vpop.f32.mrf.mxu0  ;;  %v10108_v27 = vpop.f32.mrf.mxu1 }
 0xcc7   :  { %v12270_v21 = vadd.f32 %v10108_v27, %v8812_v0  ;;  %v12288_v60 = vadd.f32 %v10098_v43, %v8807_v11 }
 0xcc8   :  { %v3971_v6 = vpop.f32.mrf.mxu0  ;;  %v4065_v44 = vpop.f32.mrf.mxu1 }
 0xcc9   :  { %v12274_v63 = vadd.f32 %v8812_v0, %v4065_v44  ;;  %v12281_v37 = vadd.f32 %v8807_v11, %v3971_v6  ;;  %v4207_v25 = vmul.f32 %v12270_v21, %v12270_v21  ;;  %v4179_v18 = vmul.f32 %v12288_v60, %v12288_v60 }
 0xcca   :  { %v10101_v48 = vpop.f32.mrf.mxu0  ;;  %v10111_v19 = vpop.f32.mrf.mxu1 }
 0xccb   :  { %v12272_v54 = vadd.f32 %v10111_v19, %v8812_v0  ;;  %v4206_v28 = vmul.f32 %v12274_v63, %v12274_v63  ;;  %v4213_v14 = vsel %vm971_vm2, %v4207_v25, 0.0  ;;  %v4178_v50 = vmul.f32 %v12281_v37, %v12281_v37 }
 0xccc   :  { %v3981_v13 = vpop.f32.mrf.mxu0  ;;  %v4075_v15 = vpop.f32.mrf.mxu1  ;;  %v12299_v35 = vadd.f32 %v10101_v48, %v8807_v11  ;;  %v4185_v56 = vsel %vm971_vm2, %v4179_v18, 0.0 }
 0xccd   :  { %v12276_v16 = vadd.f32 %v8812_v0, %v4075_v15  ;;  %v4209_v24 = vmul.f32 %v12272_v54, %v12272_v54  ;;  %v12294_v12 = vadd.f32 %v8807_v11, %v3981_v13  ;;  %v4210_v5 = vsel %vm971_vm2, %v4206_v28, 0.0 }
 0xcce   :  { %v10118_v32 = vpop.f32.mrf.mxu0  ;;  %v4182_v58 = vsel %vm971_vm2, %v4178_v50, 0.0  ;;  %v4181_v36 = vmul.f32 %v12299_v35, %v12299_v35 }
 0xccf   :  { %v4219_v29 = vsel %vm971_vm2, %v4209_v24, 0.0  ;;  %v4208_v53 = vmul.f32 %v12276_v16, %v12276_v16  ;;  %v4165_v17 = vadd.f32 %v10118_v32, %v8817_v4  ;;  %v4180_v3 = vmul.f32 %v12294_v12, %v12294_v12 }
 0xcd0   :  { %4220 = vadd.xlane.f32.xlu0 %v4219_v29  ;;  %v4159_v23 = vpop.f32.mrf.mxu0  ;;  %v4191_v42 = vsel %vm971_vm2, %v4181_v36, 0.0 }
 0xcd1   :  { %v4216_v49 = vsel %vm971_vm2, %v4208_v53, 0.0  ;;  %v4160_v39 = vadd.f32 %v8817_v4, %v4159_v23  ;;  %v4188_v57 = vsel %vm971_vm2, %v4180_v3, 0.0  ;;  %v8840_v53 = vld [vmem:[%s10914_s24 + $0x18] sm:$0xff]  ;;  %v12365_v3 = vld [vmem:[%s13061_s13 + $0x10] sm:$0xff] }
 0xcd2   :  { %4217 = vadd.xlane.f32.xlu1 %v4216_v49  ;;  %v10121_v61 = vpop.f32.mrf.mxu0  ;;  %v8839_v49 = vld [vmem:[%s10914_s24 + $0x10] sm:$0xff]  ;;  %s13070_s24 = sld [smem:[#allocation15_spill]] }
 0xcd3   :  { %v4175_v26 = vadd.f32 %v10121_v61, %v8817_v4  ;;  %v12353_v61 = vld [vmem:[%s13061_s13 + $0x8] sm:$0xff] }
 0xcd4   :  { %4214 = vadd.xlane.f32.xlu0 %v4213_v14  ;;  %v4169_v8 = vpop.f32.mrf.mxu0  ;;  %v12356_v14 = vld [vmem:[%s13061_s13] sm:$0xff] }
 0xcd5   :  { %v4170_v22 = vadd.f32 %v8817_v4, %v4169_v8  ;;  %10136 = vmatprep.subr.mxu0 %v4175_v26 }
 0xcd6   :  { %4211 = vadd.xlane.f32.xlu1 %v4210_v5  ;;  %10137 = vmatpush3.msra.mxu0 %v4175_v26 }
 0xcd7   :  { %10138 = vmatprep.subr.mxu0 %v4170_v22 }
 0xcd8   :  { %4183 = vadd.xlane.f32.xlu0 %v4182_v58  ;;  %10139 = vmatpush3.msra.mxu0 %v4170_v22  ;;  %v12360_v22 = vld [vmem:[%s13061_s13 + $0x18] sm:$0xff]  ;;  %s13088_s13 = sld [smem:[#allocation33_spill]] }
 0xcd9   :  { %10140 = vmatprep.subr.mxu0 %v4165_v17 }
 0xcda   :  { %4186 = vadd.xlane.f32.xlu1 %v4185_v56  ;;  %10141 = vmatpush3.msra.mxu0 %v4165_v17 }
 0xcdb   :  { %10142 = vmatprep.subr.mxu0 %v4160_v39 }
 0xcdc   :  { %10143 = vmatpush3.msra.mxu0 %v4160_v39  ;;  %4189 = vadd.xlane.f32.xlu0 %v4188_v57 }
 0xcde   :  { %4192 = vadd.xlane.f32.xlu1 %v4191_v42 }
 0xd59   :  { %v4221_v31 = vpop.xlane.xlu0 %4220 }
 0xd5a   :  { %v4225_v1 = vmax.f32 %v4221_v31, 1e-24 }
 0xd5b   :  { %v4218_v41 = vpop.xlane.xlu1 %4217 }
 0xd5c   :  { %10657 = vrsqrt.f32 %v4225_v1  ;;  %v4224_v62 = vmax.f32 %v4218_v41, 1e-24 }
 0xd5d   :  { %v4215_v10 = vpop.xlane.xlu0 %4214 }
 0xd5e   :  { %10659 = vrsqrt.f32 %v4224_v62  ;;  %v4223_v52 = vmax.f32 %v4215_v10, 1e-24 }
 0xd5f   :  { %v4212_v30 = vpop.xlane.xlu1 %4211 }
 0xd60   :  { %10661 = vrsqrt.f32 %v4223_v52  ;;  %v4222_v51 = vmax.f32 %v4212_v30, 1e-24 }
 0xd61   :  { %v4184_v7 = vpop.xlane.xlu0 %4183 }
 0xd62   :  { %v4194_v46 = vmax.f32 %v4184_v7, 1e-24  ;;  %10663 = vrsqrt.f32 %v4222_v51  ;;  %v8858_v51 = vld [vmem:[%s13060_s9 + $0x1] ss:$0 sm:$0xff]  ;;  %s13087_s9 = sld [smem:[#allocation35_spill]] }
 0xd63   :  { %v4187_v47 = vpop.xlane.xlu1 %4186 }
 0xd64   :  { %10665 = vrsqrt.f32 %v4194_v46  ;;  %v4195_v43 = vmax.f32 %v4187_v47, 1e-24 }
 0xd65   :  { %v4190_v33 = vpop.xlane.xlu0 %4189 }
 0xd66   :  { %v4196_v27 = vmax.f32 %v4190_v33, 1e-24  ;;  %10667 = vrsqrt.f32 %v4195_v43 }
 0xd67   :  { %v4193_v0 = vpop.xlane.xlu1 %4192 }
 0xd68   :  { %v4197_v44 = vmax.f32 %v4193_v0, 1e-24  ;;  %10669 = vrsqrt.f32 %v4196_v27 }
 0xd69   :  { %v10658_v6 = vpop.eup %10657 }
 0xd6a   :  { %v4233_v48 = vmul.f32 %v10658_v6, %v12272_v54  ;;  %10671 = vrsqrt.f32 %v4197_v44 }
 0xd6b   :  { %v10660_v19 = vpop.eup %10659 }
 0xd6c   :  { %10122 = vmatprep.subr.msk.mxu1 %vm971_vm2, %v4233_v48  ;;  %v4232_v13 = vmul.f32 %v10660_v19, %v12276_v16 }
 0xd6d   :  { %v10662_v15 = vpop.eup %10661  ;;  %10123 = vmatpush3.xpose.msk.msra.mxu1 %vm971_vm2, %v4233_v48 }
 0xd6e   :  { %10124 = vmatprep.subr.msk.mxu1 %vm971_vm2, %v4232_v13  ;;  %v4231_v11 = vmul.f32 %v10662_v15, %v12270_v21 }
 0xd6f   :  { %v10664_v24 = vpop.eup %10663 }
 0xd70   :  { %v4230_v16 = vmul.f32 %v10664_v24, %v12274_v63  ;;  %v8856_v63 = vld [vmem:[%s10924_s6 + $0x18] sm:$0xff] }
 0xd71   :  { %v10666_v32 = vpop.eup %10665  ;;  %10125 = vmatpush3.xpose.msk.msra.mxu1 %vm971_vm2, %v4232_v13 }
 0xd72   :  { %10126 = vmatprep.subr.msk.mxu1 %vm971_vm2, %v4231_v11  ;;  %v4202_v54 = vmul.f32 %v10666_v32, %v12281_v37 }
 0xd73   :  { %v10668_v29 = vpop.eup %10667 }
 0xd74   :  { %10130 = vmatprep.mubr.msk.f32.mxu1 %vm971_vm2, %v4202_v54  ;;  %v4203_v25 = vmul.f32 %v10668_v29, %v12288_v60  ;;  %v8855_v60 = vld [vmem:[%s10924_s6 + $0x10] sm:$0xff]  ;;  %s13072_s6 = sld [smem:[#allocation19_spill]] }
 0xd75   :  { %10127 = vmatpush3.xpose.msk.msra.mxu1 %vm971_vm2, %v4231_v11  ;;  %v10670_v21 = vpop.eup %10669 }
 0xd76   :  { %10128 = vmatprep.subr.msk.mxu1 %vm971_vm2, %v4230_v16  ;;  %v4204_v37 = vmul.f32 %v10670_v21, %v12294_v12 }
 0xd77   :  { %v10672_v23 = vpop.eup %10671 }
 0xd78   :  { %v4205_v28 = vmul.f32 %v10672_v23, %v12299_v35 }
 0xd79   :  { %10129 = vmatpush3.xpose.msk.msra.mxu1 %vm971_vm2, %v4230_v16 }
 0xd7a   :  { %10158 = vmatprep.subr.mxu1 %v8840_v53 }
 0xd7c   :  { %10131 = vmatmul.mubr.msk.f32.vlgmr.msra.gmra.mxu1 %vm971_vm2, %v4203_v25 }
 0xd7d   :  { %10133 = vmatprep.mubr.msk.f32.mxu1 %vm971_vm2, %v4204_v37  ;;  %10159 = vmatpush3.msra.mxu1 %v8840_v53 }
 0xd7e   :  { %10160 = vmatprep.subr.mxu1 %v8839_v49 }
 0xd7f   :  { %10161 = vmatpush3.msra.mxu1 %v8839_v49 }
 0xd80   :  { %10134 = vmatmul.mubr.msk.f32.gmra.mxu1 %vm971_vm2, %v4205_v28  ;;  %10178 = vmatprep.subr.mxu1 %v8856_v63  ;;  %v4492_v28 = vld [vmem:[%s13062_s17] sm:$0xff] }
 0xd81   :  { %10162 = vmatprep.mubr.msk.f32.mxu1 %vm3805_vm8, %v12236_v38  ;;  %10150 = vmatprep.subr.mxu0 %v4492_v28 }
 0xd84   :  { %10163 = vmatmul.mubr.msk.f32.vlgmr.msra.gmra.mxu1 %vm3805_vm8, %v12244_v9 }
 0xd85   :  { %10165 = vmatprep.mubr.msk.f32.mxu1 %vm3805_vm8, %v12242_v2  ;;  %10179 = vmatpush3.msra.mxu1 %v8856_v63 }
 0xd86   :  { %10180 = vmatprep.subr.mxu1 %v8855_v60 }
 0xd87   :  { %10181 = vmatpush3.msra.mxu1 %v8855_v60 }
 0xd88   :  { %10166 = vmatmul.mubr.msk.f32.gmra.mxu1 %vm3805_vm8, %v12255_v34 }
 0xd89   :  { %10182 = vmatprep.mubr.msk.f32.mxu1 %vm3805_vm8, %v12236_v38 }
 0xd8c   :  { %10183 = vmatmul.mubr.msk.f32.vlgmr.msra.gmra.mxu1 %vm3805_vm8, %v12244_v9 }
 0xd8d   :  { %10185 = vmatprep.mubr.msk.f32.mxu1 %vm3805_vm8, %v12242_v2 }
 0xd90   :  { %10186 = vmatmul.mubr.msk.f32.gmra.mxu1 %vm3805_vm8, %v12255_v34 }
 0xe3c   :  { %v10132_v4 = vpop.f32.mrf.mxu1 }
 0xe3d   :  { %v4344_v12 = vmul.f32 10.0, %v10132_v4 }
 0xe3e   :  { %v4324_v26 = vpop.f32.mrf.mxu1 }
 0xe3f   :  { %v4343_v50 = vmul.f32 10.0, %v4324_v26  ;;  %v4348_v8 = vadd.f32 %v4344_v12, %v12353_v61 }
 0xe40   :  { %v10135_v35 = vpop.f32.mrf.mxu1 }
 0xe41   :  { %v4346_v5 = vmul.f32 10.0, %v10135_v35  ;;  %v4354_v18 = vsel %vm2746_vm3, %v4348_v8, -inf  ;;  %v4347_v17 = vadd.f32 %v4343_v50, %v12356_v14 }
 0xe42   :  { %4355 = vmax.xlane.f32.xlu1 %v4354_v18  ;;  %v4334_v58 = vpop.f32.mrf.mxu1 }
 0xe43   :  { %v4345_v39 = vmul.f32 10.0, %v4334_v58  ;;  %v4351_v56 = vsel %vm2746_vm3, %v4347_v17, -inf  ;;  %v4350_v36 = vadd.f32 %v4346_v5, %v12360_v22 }
 0xe44   :  { %4352 = vmax.xlane.f32.xlu0 %v4351_v56  ;;  %v12369_v57 = vpop.f32.mrf.mxu1  ;;  %v8848_v56 = vld [vmem:[%s10919_s30 + $0x18] sm:$0xff] }
 0xe45   :  { %v4360_v42 = vsel %vm2746_vm3, %v4350_v36, -inf  ;;  %v4349_v31 = vadd.f32 %v4345_v39, %v12365_v3 }
 0xe46   :  { %4361 = vmax.xlane.f32.xlu1 %v4360_v42  ;;  %v12373_v1 = vpop.f32.mrf.mxu1 }
 0xe47   :  { %v4357_v41 = vsel %vm2746_vm3, %v4349_v31, -inf }
 0xe48   :  { %v12376_v62 = vpop.f32.mrf.mxu1  ;;  %4358 = vmax.xlane.f32.xlu0 %v4357_v41 }
 0xe4a   :  { %v12378_v10 = vpop.f32.mrf.mxu1 }
 0xe4c   :  { %v10184_v52 = vpop.f32.mrf.mxu1 }
 0xe4d   :  { %v4875_v43 = vadd.f32 %v10184_v52, %v8858_v51 }
 0xe4e   :  { %v4869_v30 = vpop.f32.mrf.mxu1 }
 0xe4f   :  { %v4870_v27 = vadd.f32 %v8858_v51, %v4869_v30 }
 0xe50   :  { %v10187_v7 = vpop.f32.mrf.mxu1 }
 0xe51   :  { %v4885_v46 = vadd.f32 %v10187_v7, %v8858_v51 }
 0xe52   :  { %v4879_v47 = vpop.f32.mrf.mxu1 }
 0xe53   :  { %v4880_v33 = vadd.f32 %v8858_v51, %v4879_v47  ;;  %10202 = vmatprep.subr.mxu1 %v4885_v46 }
 0xe54   :  { %10203 = vmatpush3.msra.mxu1 %v4885_v46 }
 0xe55   :  { %10204 = vmatprep.subr.mxu1 %v4880_v33 }
 0xe56   :  { %10205 = vmatpush3.msra.mxu1 %v4880_v33 }
 0xe57   :  { %10206 = vmatprep.subr.mxu1 %v4875_v43 }
 0xe58   :  { %10207 = vmatpush3.msra.mxu1 %v4875_v43 }
 0xe59   :  { %10208 = vmatprep.subr.mxu1 %v4870_v27 }
 0xe5a   :  { %10209 = vmatpush3.msra.mxu1 %v4870_v27 }
 0xecb   :  { %v4356_v0 = vpop.xlane.xlu1 %4355 }
 0xecc   :  { %v4364_v6 = vsub.f32 %v4348_v8, %v4356_v0 }
 0xecd   :  { %v4353_v44 = vpop.xlane.xlu0 %4352 }
 0xece   :  { %v4369_v48 = vmul.f32 1.442695, %v4364_v6  ;;  %v4363_v19 = vsub.f32 %v4347_v17, %v4353_v44  ;;  %v8842_v44 = vld [vmem:[%s13059_s5 + $0x1] ss:$0 sm:$0xff]  ;;  %s13086_s5 = sld [smem:[#allocation32_spill]] }
 0xecf   :  { %v4362_v13 = vpop.xlane.xlu1 %4361 }
 0xed0   :  { %10673 = vpow2.f32 %v4369_v48  ;;  %v4367_v15 = vmul.f32 1.442695, %v4363_v19  ;;  %v4366_v24 = vsub.f32 %v4350_v36, %v4362_v13  ;;  %v12419_v48 = vadd.f32 %v8842_v44, %v12373_v1 }
 0xed1   :  { %v4359_v11 = vpop.xlane.xlu0 %4358 }
 0xed2   :  { %10675 = vpow2.f32 %v4367_v15  ;;  %v4373_v32 = vmul.f32 1.442695, %v4366_v24  ;;  %v4365_v54 = vsub.f32 %v4349_v31, %v4359_v11  ;;  %v8847_v31 = vld [vmem:[%s10919_s30 + $0x10] sm:$0xff]  ;;  %v12425_v24 = vadd.f32 %v12369_v57, %v8842_v44  ;;  %s13071_s30 = sld [smem:[#allocation17_spill]] }
 0xed4   :  { %10677 = vpow2.f32 %v4373_v32  ;;  %v4371_v16 = vmul.f32 1.442695, %v4365_v54  ;;  %v12431_v54 = vadd.f32 %v8842_v44, %v12378_v10 }
 0xed6   :  { %10679 = vpow2.f32 %v4371_v16  ;;  %v4888_v16 = vmul.f32 %v12419_v48, %v12419_v48  ;;  %v4890_v10 = vmul.f32 %v12431_v54, %v12431_v54 }
 0xedd   :  { %v10674_v29 = vpop.eup %10673 }
 0xede   :  { %v4378_v53 = vsel %vm2746_vm3, %v10674_v29, 0.0 }
 0xedf   :  { %v10676_v21 = vpop.eup %10675  ;;  %4379 = vadd.xlane.f32.xlu1 %v4378_v53  ;;  %v4889_v53 = vmul.f32 %v12425_v24, %v12425_v24 }
 0xee0   :  { %v4375_v25 = vsel %vm2746_vm3, %v10676_v21, 0.0 }
 0xee1   :  { %v10678_v23 = vpop.eup %10677  ;;  %4376 = vadd.xlane.f32.xlu0 %v4375_v25  ;;  %v4895_v25 = vsel %vm971_vm2, %v4889_v53, 0.0 }
 0xee2   :  { %v4384_v37 = vsel %vm2746_vm3, %v10678_v23, 0.0 }
 0xee3   :  { %v10680_v49 = vpop.eup %10679  ;;  %4385 = vadd.xlane.f32.xlu1 %v4384_v37 }
 0xee4   :  { %v4381_v63 = vsel %vm2746_vm3, %v10680_v49, 0.0 }
 0xee5   :  { %4382 = vadd.xlane.f32.xlu0 %v4381_v63 }
 0xf68   :  { %v4380_v60 = vpop.xlane.xlu1 %4379 }
 0xf69   :  { %10681 = vrcp.f32 %v4380_v60 }
 0xf6a   :  { %v4377_v4 = vpop.xlane.xlu0 %4376 }
 0xf6b   :  { %10683 = vrcp.f32 %v4377_v4 }
 0xf6c   :  { %v4386_v12 = vpop.xlane.xlu1 %4385 }
 0xf6d   :  { %10685 = vrcp.f32 %v4386_v12 }
 0xf6e   :  { %v4383_v26 = vpop.xlane.xlu0 %4382 }
 0xf6f   :  { %10687 = vrcp.f32 %v4383_v26 }
 0xf76   :  { %v10682_v50 = vpop.eup %10681 }
 0xf77   :  { %v4390_v5 = vmul.f32 %v10682_v50, %v10674_v29  ;;  %v12437_v29 = vadd.f32 %v12376_v62, %v8842_v44  ;;  %v4898_v62 = vsel %vm971_vm2, %v4890_v10, 0.0 }
 0xf78   :  { %v10684_v8 = vpop.eup %10683 }
 0xf79   :  { %v4388_v35 = vmul.f32 %v10684_v8, %v10676_v21  ;;  %v4892_v21 = vsel %vm971_vm2, %v4888_v16, 0.0 }
 0xf7a   :  { %v10686_v18 = vpop.eup %10685 }
 0xf7b   :  { %10144 = vmatprep.mubr.msk.f32.mxu0 %vm2746_vm3, %v4388_v35  ;;  %v4394_v39 = vmul.f32 %v10686_v18, %v10678_v23  ;;  %v4891_v23 = vmul.f32 %v12437_v29, %v12437_v29 }
 0xf7c   :  { %v10688_v17 = vpop.eup %10687  ;;  %10145 = vmatmul.mubr.msk.f32.vlgmr.msra.gmra.mxu0 %vm2746_vm3, %v4390_v5 }
 0xf7d   :  { %v4392_v58 = vmul.f32 %v10688_v17, %v10680_v49  ;;  %10151 = vmatpush3.msra.mxu0 %v4492_v28  ;;  %v4901_v37 = vsel %vm971_vm2, %v4891_v23, 0.0 }
 0xf7e   :  { %10168 = vmatprep.subr.mxu0 %v8848_v56 }
 0xf7f   :  { %10147 = vmatprep.mubr.msk.f32.mxu0 %vm2746_vm3, %v4392_v58 }
 0xf80   :  { %10148 = vmatmul.mubr.msk.f32.gmra.mxu0 %vm2746_vm3, %v4394_v39 }
0x103c   :  { %v10146_v36 = vpop.f32.mrf.mxu0 }
0x103e   :  { %v4473_v42 = vpop.f32.mrf.mxu0 }
0x103f   :  { %10152 = vmatprep.mubr.msk.f32.mxu0 %vm971_vm2, %v4473_v42 }
0x1040   :  { %v10149_v41 = vpop.f32.mrf.mxu0  ;;  %10153 = vmatmul.mubr.msk.f32.vlgmr.msra.gmra.mxu0 %vm971_vm2, %v10146_v36 }
0x1041   :  { %10169 = vmatpush3.msra.mxu0 %v8848_v56 }
0x1042   :  { %v4483_v52 = vpop.f32.mrf.mxu0  ;;  %10170 = vmatprep.subr.mxu0 %v8847_v31 }
0x1043   :  { %10155 = vmatprep.mubr.msk.f32.mxu0 %vm971_vm2, %v4483_v52  ;;  %10171 = vmatpush3.msra.mxu0 %v8847_v31 }
0x1044   :  { %10156 = vmatmul.mubr.msk.f32.gmra.mxu0 %vm971_vm2, %v10149_v41 }
0x1045   :  { %10172 = vmatprep.mubr.msk.f32.mxu0 %vm3805_vm8, %v12236_v38  ;;  %v8850_v38 = vld [vmem:[%s13058_s0 + $0x1] ss:$0 sm:$0xff]  ;;  %s13085_s0 = sld [smem:[#allocation31_spill]] }
0x1048   :  { %10173 = vmatmul.mubr.msk.f32.vlgmr.msra.gmra.mxu0 %vm3805_vm8, %v12244_v9 }
0x1049   :  { %10175 = vmatprep.mubr.msk.f32.mxu0 %vm3805_vm8, %v12242_v2 }
0x104c   :  { %10176 = vmatmul.mubr.msk.f32.gmra.mxu0 %vm3805_vm8, %v12255_v34 }
0x1100   :  { %v12404_v30 = vpop.f32.mrf.mxu0 }
0x1102   :  { %v12406_v51 = vpop.f32.mrf.mxu0 }
0x1104   :  { %v12408_v7 = vpop.f32.mrf.mxu0 }
0x1106   :  { %v12410_v46 = vpop.f32.mrf.mxu0 }
0x1108   :  { %v10174_v47 = vpop.f32.mrf.mxu0 }
0x1109   :  { %v12413_v9 = vadd.f32 %v10174_v47, %v8850_v38 }
0x110a   :  { %v4773_v33 = vpop.f32.mrf.mxu0 }
0x110b   :  { %v12415_v0 = vadd.f32 %v8850_v38, %v4773_v33  ;;  %v4917_v15 = vmul.f32 %v12413_v9, %v12413_v9 }
0x110c   :  { %v10177_v43 = vpop.f32.mrf.mxu0 }
0x110d   :  { %v4789_v27 = vadd.f32 %v10177_v43, %v8850_v38  ;;  %v4916_v32 = vmul.f32 %v12415_v0, %v12415_v0  ;;  %v4923_v1 = vsel %vm971_vm2, %v4917_v15, 0.0 }
0x110e   :  { %v4783_v2 = vpop.f32.mrf.mxu0 }
0x110f   :  { %v4784_v6 = vadd.f32 %v8850_v38, %v4783_v2  ;;  %v4919_v34 = vmul.f32 %v4789_v27, %v4789_v27  ;;  %v4920_v57 = vsel %vm971_vm2, %v4916_v32, 0.0 }
0x1111   :  { %v4929_v19 = vsel %vm971_vm2, %v4919_v34, 0.0  ;;  %v4918_v13 = vmul.f32 %v4784_v6, %v4784_v6 }
0x1112   :  { %4930 = vadd.xlane.f32.xlu0 %v4929_v19 }
0x1113   :  { %v4926_v11 = vsel %vm971_vm2, %v4918_v13, 0.0 }
0x1114   :  { %4927 = vadd.xlane.f32.xlu1 %v4926_v11 }
0x1116   :  { %4924 = vadd.xlane.f32.xlu0 %v4923_v1 }
0x1118   :  { %4921 = vadd.xlane.f32.xlu1 %v4920_v57 }
0x111a   :  { %4893 = vadd.xlane.f32.xlu0 %v4892_v21 }
0x111c   :  { %4896 = vadd.xlane.f32.xlu1 %v4895_v25 }
0x111e   :  { %4899 = vadd.xlane.f32.xlu0 %v4898_v62 }
0x1120   :  { %4902 = vadd.xlane.f32.xlu1 %v4901_v37 }
0x119b   :  { %v4931_v49 = vpop.xlane.xlu0 %4930 }
0x119c   :  { %v4935_v63 = vmax.f32 %v4931_v49, 1e-24 }
0x119d   :  { %v4928_v28 = vpop.xlane.xlu1 %4927 }
0x119e   :  { %10689 = vrsqrt.f32 %v4935_v63  ;;  %v4934_v60 = vmax.f32 %v4928_v28, 1e-24 }
0x119f   :  { %v4925_v4 = vpop.xlane.xlu0 %4924 }
0x11a0   :  { %10691 = vrsqrt.f32 %v4934_v60  ;;  %v4933_v12 = vmax.f32 %v4925_v4, 1e-24 }
0x11a1   :  { %v4922_v26 = vpop.xlane.xlu1 %4921 }
0x11a2   :  { %10693 = vrsqrt.f32 %v4933_v12  ;;  %v4932_v50 = vmax.f32 %v4922_v26, 1e-24 }
0x11a3   :  { %v4894_v8 = vpop.xlane.xlu0 %4893 }
0x11a4   :  { %v4904_v35 = vmax.f32 %v4894_v8, 1e-24  ;;  %10695 = vrsqrt.f32 %v4932_v50 }
0x11a5   :  { %v4897_v5 = vpop.xlane.xlu1 %4896 }
0x11a6   :  { %10697 = vrsqrt.f32 %v4904_v35  ;;  %v4905_v17 = vmax.f32 %v4897_v5, 1e-24 }
0x11a7   :  { %v4900_v18 = vpop.xlane.xlu0 %4899 }
0x11a8   :  { %v4906_v58 = vmax.f32 %v4900_v18, 1e-24  ;;  %10699 = vrsqrt.f32 %v4905_v17 }
0x11a9   :  { %v4903_v39 = vpop.xlane.xlu1 %4902 }
0x11aa   :  { %v4907_v36 = vmax.f32 %v4903_v39, 1e-24  ;;  %10701 = vrsqrt.f32 %v4906_v58  ;;  %v8875_v58 = vld [vmem:[%s13062_s17 + $0x8] sm:$0xff]  ;;  %s13089_s17 = sld [smem:[#allocation34_spill]] }
0x11ab   :  { %v10690_v56 = vpop.eup %10689  ;;  %10216 = vmatprep.subr.mxu1 %v8875_v58 }
0x11ac   :  { %v4943_v42 = vmul.f32 %v10690_v56, %v4789_v27  ;;  %10703 = vrsqrt.f32 %v4907_v36 }
0x11ad   :  { %v10692_v31 = vpop.eup %10691 }
0x11ae   :  { %10188 = vmatprep.subr.msk.mxu0 %vm971_vm2, %v4943_v42  ;;  %v4942_v41 = vmul.f32 %v10692_v31, %v4784_v6 }
0x11af   :  { %v10694_v52 = vpop.eup %10693  ;;  %10189 = vmatpush3.xpose.msk.msra.mxu0 %vm971_vm2, %v4943_v42 }
0x11b0   :  { %10190 = vmatprep.subr.msk.mxu0 %vm971_vm2, %v4942_v41  ;;  %v4941_v38 = vmul.f32 %v10694_v52, %v12413_v9 }
0x11b1   :  { %v10696_v47 = vpop.eup %10695 }
0x11b2   :  { %v4940_v27 = vmul.f32 %v10696_v47, %v12415_v0 }
0x11b3   :  { %v10698_v33 = vpop.eup %10697  ;;  %10191 = vmatpush3.xpose.msk.msra.mxu0 %vm971_vm2, %v4942_v41 }
0x11b4   :  { %10192 = vmatprep.subr.msk.mxu0 %vm971_vm2, %v4941_v38  ;;  %v4912_v43 = vmul.f32 %v10698_v33, %v12419_v48 }
0x11b5   :  { %v10700_v2 = vpop.eup %10699 }
0x11b6   :  { %10196 = vmatprep.mubr.msk.f32.mxu0 %vm971_vm2, %v4912_v43  ;;  %v4913_v9 = vmul.f32 %v10700_v2, %v12425_v24 }
0x11b7   :  { %10193 = vmatpush3.xpose.msk.msra.mxu0 %vm971_vm2, %v4941_v38  ;;  %v10702_v6 = vpop.eup %10701 }
0x11b8   :  { %10194 = vmatprep.subr.msk.mxu0 %vm971_vm2, %v4940_v27  ;;  %v4914_v44 = vmul.f32 %v10702_v6, %v12431_v54 }
0x11b9   :  { %v10704_v34 = vpop.eup %10703 }
0x11ba   :  { %v4915_v48 = vmul.f32 %v10704_v34, %v12437_v29 }
0x11bb   :  { %10195 = vmatpush3.xpose.msk.msra.mxu0 %vm971_vm2, %v4940_v27 }
0x11be   :  { %10197 = vmatmul.mubr.msk.f32.vlgmr.msra.gmra.mxu0 %vm971_vm2, %v4913_v9 }
0x11bf   :  { %10199 = vmatprep.mubr.msk.f32.mxu0 %vm971_vm2, %v4914_v44  ;;  %v8838_v44 = vld [vmem:[%s13063_s21] ss:$0 sm:$0xff]  ;;  %s13090_s21 = sld [smem:[#allocation37_spill]] }
0x11c2   :  { %10200 = vmatmul.mubr.msk.f32.gmra.mxu0 %vm971_vm2, %v4915_v48  ;;  %v4597_v48 = vadd.f32 %v12404_v30, %v8838_v44 }
0x127e   :  { %v10198_v0 = vpop.f32.mrf.mxu0 }
0x127f   :  { %v5054_v19 = vmul.f32 10.0, %v10198_v0 }
0x1280   :  { %v5034_v13 = vpop.f32.mrf.mxu0 }
0x1281   :  { %v5053_v15 = vmul.f32 10.0, %v5034_v13  ;;  %v5058_v11 = vadd.f32 %v5054_v19, %v12353_v61  ;;  %v4596_v19 = vadd.f32 %v8838_v44, %v12406_v51 }
0x1282   :  { %v10201_v32 = vpop.f32.mrf.mxu0 }
0x1283   :  { %v5056_v1 = vmul.f32 10.0, %v10201_v32  ;;  %v5064_v24 = vsel %vm2746_vm3, %v5058_v11, -inf  ;;  %v5057_v54 = vadd.f32 %v5053_v15, %v12356_v14 }
0x1284   :  { %5065 = vmax.xlane.f32.xlu1 %v5064_v24  ;;  %v5044_v16 = vpop.f32.mrf.mxu0 }
0x1285   :  { %v5055_v57 = vmul.f32 10.0, %v5044_v16  ;;  %v5061_v53 = vsel %vm2746_vm3, %v5057_v54, -inf  ;;  %v5060_v29 = vadd.f32 %v5056_v1, %v12360_v22 }
0x1286   :  { %5062 = vmax.xlane.f32.xlu0 %v5061_v53 }
0x1287   :  { %v5070_v21 = vsel %vm2746_vm3, %v5060_v29, -inf  ;;  %v5059_v10 = vadd.f32 %v5055_v57, %v12365_v3 }
0x1288   :  { %5071 = vmax.xlane.f32.xlu1 %v5070_v21 }
0x1289   :  { %v5067_v61 = vsel %vm2746_vm3, %v5059_v10, -inf }
0x128a   :  { %5068 = vmax.xlane.f32.xlu0 %v5067_v61 }
0x130d   :  { %v5066_v25 = vpop.xlane.xlu1 %5065 }
0x130e   :  { %v5074_v23 = vsub.f32 %v5058_v11, %v5066_v25  ;;  %v4599_v11 = vadd.f32 %v12408_v7, %v8838_v44 }
0x130f   :  { %v5063_v62 = vpop.xlane.xlu0 %5062 }
0x1310   :  { %v5079_v14 = vmul.f32 1.442695, %v5074_v23  ;;  %v5073_v37 = vsub.f32 %v5057_v54, %v5063_v62  ;;  %v4598_v54 = vadd.f32 %v8838_v44, %v12410_v46 }
0x1311   :  { %v5072_v49 = vpop.xlane.xlu1 %5071 }
0x1312   :  { %10705 = vpow2.f32 %v5079_v14  ;;  %v5077_v63 = vmul.f32 1.442695, %v5073_v37  ;;  %v5076_v28 = vsub.f32 %v5060_v29, %v5072_v49 }
0x1313   :  { %v5069_v60 = vpop.xlane.xlu0 %5068 }
0x1314   :  { %10707 = vpow2.f32 %v5077_v63  ;;  %v5083_v22 = vmul.f32 1.442695, %v5076_v28  ;;  %v5075_v4 = vsub.f32 %v5059_v10, %v5069_v60 }
0x1316   :  { %10709 = vpow2.f32 %v5083_v22  ;;  %v5081_v3 = vmul.f32 1.442695, %v5075_v4 }
0x1318   :  { %10711 = vpow2.f32 %v5081_v3 }
0x131f   :  { %v10706_v12 = vpop.eup %10705 }
0x1320   :  { %v5088_v26 = vsel %vm2746_vm3, %v10706_v12, 0.0 }
0x1321   :  { %v10708_v50 = vpop.eup %10707  ;;  %5089 = vadd.xlane.f32.xlu1 %v5088_v26 }
0x1322   :  { %v5085_v8 = vsel %vm2746_vm3, %v10708_v50, 0.0 }
0x1323   :  { %v10710_v35 = vpop.eup %10709  ;;  %5086 = vadd.xlane.f32.xlu0 %v5085_v8  ;;  %v5384_v8 = vld [vmem:[%s13064_s25 + $0x8] sm:$0xff] }
0x1324   :  { %v5094_v5 = vsel %vm2746_vm3, %v10710_v35, 0.0  ;;  %10224 = vmatprep.subr.mxu0 %v5384_v8 }
0x1325   :  { %v10712_v18 = vpop.eup %10711  ;;  %5095 = vadd.xlane.f32.xlu1 %v5094_v5  ;;  %10225 = vmatpush3.msra.mxu0 %v5384_v8 }
0x1326   :  { %v5091_v17 = vsel %vm2746_vm3, %v10712_v18, 0.0 }
0x1327   :  { %5092 = vadd.xlane.f32.xlu0 %v5091_v17 }
0x13aa   :  { %v5090_v39 = vpop.xlane.xlu1 %5089 }
0x13ab   :  { %10713 = vrcp.f32 %v5090_v39 }
0x13ac   :  { %v5087_v56 = vpop.xlane.xlu0 %5086 }
0x13ad   :  { %10715 = vrcp.f32 %v5087_v56 }
0x13ae   :  { %v5096_v36 = vpop.xlane.xlu1 %5095 }
0x13af   :  { %10717 = vrcp.f32 %v5096_v36 }
0x13b0   :  { %v5093_v42 = vpop.xlane.xlu0 %5092 }
0x13b1   :  { %10719 = vrcp.f32 %v5093_v42 }
0x13b8   :  { %v10714_v31 = vpop.eup %10713 }
0x13b9   :  { %v5100_v47 = vmul.f32 %v10714_v31, %v10706_v12 }
0x13ba   :  { %v10716_v41 = vpop.eup %10715 }
0x13bb   :  { %v5098_v52 = vmul.f32 %v10716_v41, %v10708_v50 }
0x13bc   :  { %v10718_v38 = vpop.eup %10717 }
0x13bd   :  { %10210 = vmatprep.mubr.msk.f32.mxu1 %vm2746_vm3, %v5098_v52  ;;  %v5104_v27 = vmul.f32 %v10718_v38, %v10710_v35  ;;  %v5383_v35 = vld [vmem:[%s13064_s25] sm:$0xff]  ;;  %s13091_s25 = sld [smem:[#allocation36_spill]] }
0x13be   :  { %v10720_v33 = vpop.eup %10719  ;;  %10211 = vmatmul.mubr.msk.f32.vlgmr.msra.gmra.mxu1 %vm2746_vm3, %v5100_v47  ;;  %10226 = vmatprep.subr.mxu0 %v5383_v35 }
0x13bf   :  { %v5102_v43 = vmul.f32 %v10720_v33, %v10712_v18  ;;  %10217 = vmatpush3.msra.mxu1 %v8875_v58  ;;  %10227 = vmatpush3.msra.mxu0 %v5383_v35 }
0x13c1   :  { %10213 = vmatprep.mubr.msk.f32.mxu1 %vm2746_vm3, %v5102_v43  ;;  %v8880_v43 = vld [vmem:[%s13065_s29] ss:$0 sm:$0xff]  ;;  %s13092_s29 = sld [smem:[#allocation38_spill]] }
0x13c2   :  { %10214 = vmatmul.mubr.msk.f32.gmra.mxu1 %vm2746_vm3, %v5104_v27 }
0x147e   :  { %v10212_v2 = vpop.f32.mrf.mxu1 }
0x1480   :  { %v5183_v6 = vpop.f32.mrf.mxu1 }
0x1481   :  { %10218 = vmatprep.mubr.msk.f32.mxu1 %vm971_vm2, %v5183_v6 }
0x1482   :  { %v10215_v9 = vpop.f32.mrf.mxu1  ;;  %10219 = vmatmul.mubr.msk.f32.vlgmr.msra.gmra.mxu1 %vm971_vm2, %v10212_v2 }
0x1484   :  { %v5193_v34 = vpop.f32.mrf.mxu1 }
0x1485   :  { %10221 = vmatprep.mubr.msk.f32.mxu1 %vm971_vm2, %v5193_v34  ;;  %v8881_v34 = vld [vmem:[%s13066_s3] ss:$0 sm:$0xff]  ;;  %s13093_s3 = sld [smem:[#allocation41_spill]] }
0x1486   :  { %10222 = vmatmul.mubr.msk.f32.gmra.mxu1 %vm971_vm2, %v10215_v9 }
0x1542   :  { %v10220_v0 = vpop.f32.mrf.mxu1 }
0x1543   :  { %v5302_v13 = vadd.f32 %v10220_v0, %v4597_v48 }
0x1544   :  { %v5282_v15 = vpop.f32.mrf.mxu1 }
0x1545   :  { %v12494_v32 = vadd.f32 %v5302_v13, %v12207_v20  ;;  %v5301_v1 = vadd.f32 %v5282_v15, %v4596_v19 }
0x1546   :  { %v10223_v24 = vpop.f32.mrf.mxu1 }
0x1547   :  { %v12498_v16 = vadd.f32 %v5301_v1, %v12205_v59  ;;  %v5304_v57 = vadd.f32 %v10223_v24, %v4599_v11  ;;  %v5314_v30 = vsel %vm3805_vm8, %v12494_v32, 0.0 }
0x1548   :  { %5315 = vadd.xlane.f32.xlu1 %v5314_v30  ;;  %v5292_v51 = vpop.f32.mrf.mxu1  ;;  %v5599_v30 = vld [vmem:[%s13067_s8 + $0x10] sm:$0xff] }
0x1549   :  { %v12503_v53 = vadd.f32 %v5304_v57, %v12213_v40  ;;  %v5303_v7 = vadd.f32 %v5292_v51, %v4598_v54  ;;  %v5311_v20 = vsel %vm3805_vm8, %v12498_v16, 0.0  ;;  %v5600_v57 = vld [vmem:[%s13067_s8 + $0x18] sm:$0xff]  ;;  %v5598_v51 = vld [vmem:[%s13067_s8 + $0x8] sm:$0xff] }
0x154a   :  { %5312 = vadd.xlane.f32.xlu0 %v5311_v20  ;;  %10234 = vmatprep.subr.mxu1 %v5600_v57  ;;  %v8882_v20 = vld [vmem:[%s13068_s14] ss:$0 sm:$0xff] }
0x154b   :  { %v12508_v29 = vadd.f32 %v5303_v7, %v12211_v55  ;;  %v5320_v59 = vsel %vm3805_vm8, %v12503_v53, 0.0  ;;  %10235 = vmatpush3.msra.mxu1 %v5600_v57  ;;  %v5597_v7 = vld [vmem:[%s13067_s8] sm:$0xff]  ;;  %s13094_s8 = sld [smem:[#allocation40_spill]] }
0x154c   :  { %5321 = vadd.xlane.f32.xlu1 %v5320_v59  ;;  %10236 = vmatprep.subr.mxu1 %v5599_v30 }
0x154d   :  { %v5317_v46 = vsel %vm3805_vm8, %v12508_v29, 0.0  ;;  %10237 = vmatpush3.msra.mxu1 %v5599_v30 }
0x154e   :  { %5318 = vadd.xlane.f32.xlu0 %v5317_v46  ;;  %10238 = vmatprep.subr.mxu1 %v5598_v51 }
0x154f   :  { %10239 = vmatpush3.msra.mxu1 %v5598_v51 }
0x1550   :  { %10240 = vmatprep.subr.mxu1 %v5597_v7 }
0x1551   :  { %10241 = vmatpush3.msra.mxu1 %v5597_v7 }
0x15d1   :  { %v5316_v21 = vpop.xlane.xlu1 %5315 }
0x15d2   :  { %v5324_v10 = vmul.f32 0.0625, %v5316_v21 }
0x15d3   :  { %v5313_v40 = vpop.xlane.xlu0 %5312 }
0x15d4   :  { %v5328_v61 = vsub.f32 %v12494_v32, %v5324_v10  ;;  %v5323_v25 = vmul.f32 0.0625, %v5313_v40 }
0x15d5   :  { %v5322_v23 = vpop.xlane.xlu1 %5321 }
0x15d6   :  { %v5327_v62 = vsub.f32 %v12498_v16, %v5323_v25  ;;  %v5326_v14 = vmul.f32 0.0625, %v5322_v23  ;;  %v5332_v55 = vmul.f32 %v5328_v61, %v5328_v61 }
0x15d7   :  { %v5319_v37 = vpop.xlane.xlu0 %5318 }
0x15d8   :  { %v5330_v49 = vsub.f32 %v12503_v53, %v5326_v14  ;;  %v5325_v63 = vmul.f32 0.0625, %v5319_v37  ;;  %v5338_v28 = vsel %vm3805_vm8, %v5332_v55, 0.0  ;;  %v5331_v60 = vmul.f32 %v5327_v62, %v5327_v62 }
0x15d9   :  { %5339 = vadd.xlane.f32.xlu1 %v5338_v28 }
0x15da   :  { %v5329_v22 = vsub.f32 %v12508_v29, %v5325_v63  ;;  %v5335_v4 = vsel %vm3805_vm8, %v5331_v60, 0.0  ;;  %v5334_v3 = vmul.f32 %v5330_v49, %v5330_v49 }
0x15db   :  { %5336 = vadd.xlane.f32.xlu0 %v5335_v4 }
0x15dc   :  { %v5344_v12 = vsel %vm3805_vm8, %v5334_v3, 0.0  ;;  %v5333_v26 = vmul.f32 %v5329_v22, %v5329_v22 }
0x15dd   :  { %5345 = vadd.xlane.f32.xlu1 %v5344_v12 }
0x15de   :  { %v5341_v50 = vsel %vm3805_vm8, %v5333_v26, 0.0 }
0x15df   :  { %5342 = vadd.xlane.f32.xlu0 %v5341_v50 }
0x1662   :  { %v5340_v5 = vpop.xlane.xlu1 %5339 }
0x1663   :  { %v5348_v18 = vmul.f32 0.0625, %v5340_v5 }
0x1664   :  { %v5337_v17 = vpop.xlane.xlu0 %5336 }
0x1665   :  { %v5352_v58 = vadd.f32 1e-05, %v5348_v18  ;;  %v5347_v39 = vmul.f32 0.0625, %v5337_v17 }
0x1666   :  { %v5346_v56 = vpop.xlane.xlu1 %5345 }
0x1667   :  { %10721 = vrsqrt.f32 %v5352_v58  ;;  %v5351_v36 = vadd.f32 1e-05, %v5347_v39  ;;  %v5350_v42 = vmul.f32 0.0625, %v5346_v56 }
0x1668   :  { %v5343_v31 = vpop.xlane.xlu0 %5342 }
0x1669   :  { %10723 = vrsqrt.f32 %v5351_v36  ;;  %v5354_v41 = vadd.f32 1e-05, %v5350_v42  ;;  %v5349_v52 = vmul.f32 0.0625, %v5343_v31 }
0x166b   :  { %10725 = vrsqrt.f32 %v5354_v41  ;;  %v5353_v47 = vadd.f32 1e-05, %v5349_v52 }
0x166d   :  { %10727 = vrsqrt.f32 %v5353_v47 }
0x1674   :  { %v10722_v38 = vpop.eup %10721 }
0x1675   :  { %v5360_v33 = vmul.f32 %v10722_v38, %v5328_v61 }
0x1676   :  { %v10724_v27 = vpop.eup %10723 }
0x1677   :  { %v5359_v2 = vmul.f32 %v10724_v27, %v5327_v62  ;;  %v5370_v9 = vmul.f32 %v8880_v43, %v5360_v33 }
0x1678   :  { %v10726_v6 = vpop.eup %10725 }
0x1679   :  { %v5369_v44 = vmul.f32 %v8880_v43, %v5359_v2  ;;  %v5362_v48 = vmul.f32 %v10726_v6, %v5330_v49  ;;  %v5380_v15 = vadd.f32 %v8881_v34, %v5370_v9 }
0x167a   :  { %v10728_v0 = vpop.eup %10727 }
0x167b   :  { %v5379_v19 = vadd.f32 %v8881_v34, %v5369_v44  ;;  %v5361_v13 = vmul.f32 %v10728_v0, %v5329_v22  ;;  %v5372_v11 = vmul.f32 %v8880_v43, %v5362_v48 }
0x167d   :  { %10228 = vmatprep.mubr.msk.f32.mxu0 %vm3805_vm8, %v5379_v19  ;;  %v5371_v1 = vmul.f32 %v8880_v43, %v5361_v13  ;;  %v5382_v54 = vadd.f32 %v8881_v34, %v5372_v11 }
0x167e   :  { %10229 = vmatmul.mubr.msk.f32.vlgmr.msra.gmra.mxu0 %vm3805_vm8, %v5380_v15 }
0x167f   :  { %v5381_v24 = vadd.f32 %v8881_v34, %v5371_v1 }
0x1681   :  { %10231 = vmatprep.mubr.msk.f32.mxu0 %vm3805_vm8, %v5381_v24 }
0x1682   :  { %10232 = vmatmul.mubr.msk.f32.gmra.mxu0 %vm3805_vm8, %v5382_v54 }
0x173e   :  { %v10230_v59 = vpop.f32.mrf.mxu0 }
0x173f   :  { %v12535_v46 = vadd.f32 %v10230_v59, %v8882_v20 }
0x1740   :  { %v5470_v21 = vpop.f32.mrf.mxu0 }
0x1741   :  { %v12538_v10 = vmul.f32 0.70710677, %v12535_v46  ;;  %v12540_v40 = vadd.f32 %v8882_v20, %v5470_v21 }
0x1742   :  { %v10233_v61 = vpop.f32.mrf.mxu0 }
0x1743   :  { %v5506_v25 = vand.u32 2147483647, %v12538_v10  ;;  %v12544_v23 = vmul.f32 0.70710677, %v12540_v40  ;;  %v12546_v62 = vadd.f32 %v10233_v61, %v8882_v20  ;;  %vm5498_vm9 = vcmp.ge.f32.partialorder %v12538_v10, 0.0 }
0x1744   :  { %v5480_v14 = vpop.f32.mrf.mxu0 }
0x1745   :  { %v5510_v55 = vmul.f32 0.3275911, %v5506_v25  ;;  %v5505_v37 = vand.u32 2147483647, %v12544_v23  ;;  %v12550_v49 = vmul.f32 0.70710677, %v12546_v62  ;;  %v12552_v63 = vadd.f32 %v8882_v20, %v5480_v14 }
0x1746   :  { %v5562_v35 = vsub.f32 0.0, %v5506_v25  ;;  %vm5497_vm10 = vcmp.ge.f32.partialorder %v12544_v23, 0.0 }
0x1747   :  { %v5514_v28 = vadd.f32 1.0, %v5510_v55  ;;  %v5509_v60 = vmul.f32 0.3275911, %v5505_v37  ;;  %v5508_v22 = vand.u32 2147483647, %v12550_v49  ;;  %v5561_v18 = vsub.f32 0.0, %v5505_v37 }
0x1748   :  { %v12556_v4 = vmul.f32 0.70710677, %v12552_v63  ;;  %v5566_v17 = vmul.f32 %v5562_v35, %v5506_v25  ;;  %vm5500_vm11 = vcmp.ge.f32.partialorder %v12550_v49, 0.0 }
0x1749   :  { %10729 = vrcp.f32 %v5514_v28  ;;  %v5513_v3 = vadd.f32 1.0, %v5509_v60  ;;  %v5512_v12 = vmul.f32 0.3275911, %v5508_v22  ;;  %v5564_v58 = vsub.f32 0.0, %v5508_v22 }
0x174a   :  { %v5507_v26 = vand.u32 2147483647, %v12556_v4  ;;  %v5565_v56 = vmul.f32 %v5561_v18, %v5505_v37  ;;  %v5571_v42 = vmul.f32 1.442695, %v5566_v17  ;;  %v5502_v17 = vsel %vm5498_vm9, 1.0, %v13029_v45 }
0x174b   :  { %10731 = vrcp.f32 %v5513_v3  ;;  %v5516_v50 = vadd.f32 1.0, %v5512_v12  ;;  %v5568_v41 = vmul.f32 %v5564_v58, %v5508_v22  ;;  %vm5499_vm12 = vcmp.ge.f32.partialorder %v12556_v4, 0.0 }
0x174c   :  { %v5511_v8 = vmul.f32 0.3275911, %v5507_v26  ;;  %v5563_v31 = vsub.f32 0.0, %v5507_v26  ;;  %v5569_v33 = vmul.f32 1.442695, %v5565_v56 }
0x174d   :  { %10733 = vrcp.f32 %v5516_v50  ;;  %v5575_v34 = vmul.f32 1.442695, %v5568_v41  ;;  %v5501_v41 = vsel %vm5497_vm10, 1.0, %v13029_v45 }
0x174e   :  { %v5515_v5 = vadd.f32 1.0, %v5511_v8  ;;  %v5567_v2 = vmul.f32 %v5563_v31, %v5507_v26 }
0x1750   :  { %10735 = vrcp.f32 %v5515_v5  ;;  %v5573_v11 = vmul.f32 1.442695, %v5567_v2  ;;  %v5504_v2 = vsel %vm5500_vm11, 1.0, %v13029_v45 }
0x1751   :  { %10737 = vpow2.f32 %v5571_v42 }
0x1752   :  { %10739 = vpow2.f32 %v5569_v33 }
0x1753   :  { %10741 = vpow2.f32 %v5575_v34  ;;  %v5490_v34 = vmul.f32 0.5, %v12535_v46  ;;  %v10848_v46 = vmov 0.0  }
0x1754   :  { %10743 = vpow2.f32 %v5573_v11  ;;  %10248 = vmatprep.subr.mxu0 %v10848_v46  ;;  %10259 = vmatprep.subr.mxu1 %v10848_v46 }
0x1755   :  { %10256 = vmatprep.mubr.msk.f32.mxu0 %vm10849_vm13, %v10848_v46 }
0x1756   :  { %v10730_v39 = vpop.eup %10729 }
0x1757   :  { %v5526_v36 = vmul.f32 1.0614054, %v10730_v39 }
0x1758   :  { %v10732_v52 = vpop.eup %10731 }
0x1759   :  { %v5530_v47 = vadd.f32 -1.4531521, %v5526_v36  ;;  %v5525_v38 = vmul.f32 1.0614054, %v10732_v52 }
0x175a   :  { %v10734_v43 = vpop.eup %10733 }
0x175b   :  { %v5534_v27 = vmul.f32 %v10730_v39, %v5530_v47  ;;  %v5529_v6 = vadd.f32 -1.4531521, %v5525_v38  ;;  %v5528_v9 = vmul.f32 1.0614054, %v10734_v43 }
0x175d   :  { %v5538_v44 = vadd.f32 1.4214138, %v5534_v27  ;;  %v10736_v48 = vpop.eup %10735  ;;  %v5533_v0 = vmul.f32 %v10732_v52, %v5529_v6  ;;  %v5532_v19 = vadd.f32 -1.4531521, %v5528_v9 }
0x175e   :  { %v5527_v15 = vmul.f32 1.0614054, %v10736_v48  ;;  %v10738_v60 = vpop.eup %10737 }
0x175f   :  { %v5542_v13 = vmul.f32 %v10730_v39, %v5538_v44  ;;  %v5537_v1 = vadd.f32 1.4214138, %v5533_v0  ;;  %v5536_v24 = vmul.f32 %v10734_v43, %v5532_v19  ;;  %v10740_v35 = vpop.eup %10739  ;;  %v5503_v0 = vsel %vm5499_vm12, 1.0, %v13029_v45 }
0x1760   :  { %v5531_v57 = vadd.f32 -1.4531521, %v5527_v15  ;;  %v5491_v15 = vmul.f32 0.5, %v12552_v63 }
0x1761   :  { %v5546_v54 = vadd.f32 -0.28449672, %v5542_v13  ;;  %v5541_v30 = vmul.f32 %v10732_v52, %v5537_v1  ;;  %v5540_v51 = vadd.f32 1.4214138, %v5536_v24 }
0x1762   :  { %v5535_v20 = vmul.f32 %v10736_v48, %v5531_v57 }
0x1763   :  { %v5550_v7 = vmul.f32 %v10730_v39, %v5546_v54  ;;  %v5545_v59 = vadd.f32 -0.28449672, %v5541_v30  ;;  %v5544_v21 = vmul.f32 %v10734_v43, %v5540_v51  ;;  %v8891_v30 = vld [vmem:[%s13070_s24] ss:$0 sm:$0xff] }
0x1764   :  { %v5539_v25 = vadd.f32 1.4214138, %v5535_v20 }
0x1765   :  { %v5554_v61 = vadd.f32 0.2548296, %v5550_v7  ;;  %v5549_v14 = vmul.f32 %v10732_v52, %v5545_v59  ;;  %v5548_v55 = vadd.f32 -0.28449672, %v5544_v21 }
0x1766   :  { %v5543_v28 = vmul.f32 %v10736_v48, %v5539_v25 }
0x1767   :  { %v5558_v37 = vmul.f32 %v10730_v39, %v5554_v61  ;;  %v5553_v22 = vadd.f32 0.2548296, %v5549_v14  ;;  %v5552_v3 = vmul.f32 %v10734_v43, %v5548_v55  ;;  %v10742_v39 = vpop.eup %10741  ;;  %v8898_v14 = vld [vmem:[%s13069_s19 + $0x18] sm:$0xff] }
0x1768   :  { %v5547_v26 = vadd.f32 -0.28449672, %v5543_v28  ;;  %v10744_v47 = vpop.eup %10743 }
0x1769   :  { %v5578_v12 = vmul.f32 %v10738_v60, %v5558_v37  ;;  %v5557_v50 = vmul.f32 %v10732_v52, %v5553_v22  ;;  %v5556_v8 = vadd.f32 0.2548296, %v5552_v3  ;;  %v8897_v37 = vld [vmem:[%s13069_s19 + $0x10] sm:$0xff] }
0x176a   :  { %v5551_v18 = vmul.f32 %v10736_v48, %v5547_v26  ;;  %v8900_v3 = vld [vmem:[%s13071_s30 + $0x10] sm:$0xff]  ;;  %v8902_v26 = vld [vmem:[%s13069_s19 + $0x20] sm:$0xff] }
0x176b   :  { %v5582_v5 = vsub.f32 1.0, %v5578_v12  ;;  %v5577_v58 = vmul.f32 %v10740_v35, %v5557_v50  ;;  %v5560_v56 = vmul.f32 %v10734_v43, %v5556_v8  ;;  %v5489_v43 = vmul.f32 0.5, %v12540_v40  ;;  %v8903_v12 = vld [vmem:[%s13069_s19 + $0x28] sm:$0xff]  ;;  %v8894_v35 = vld [vmem:[%s13072_s6] ss:$0 sm:$0xff] }
0x176c   :  { %v5555_v42 = vadd.f32 0.2548296, %v5551_v18  ;;  %v5492_v40 = vmul.f32 0.5, %v12546_v62  ;;  %v5789_v62 = vld [vmem:[%s13069_s19 + $0x8] sm:$0xff] }
0x176d   :  { %v5586_v36 = vmul.f32 %v5582_v5, %v5502_v17  ;;  %v5581_v31 = vsub.f32 1.0, %v5577_v58  ;;  %v5580_v10 = vmul.f32 %v10742_v39, %v5560_v56 }
0x176e   :  { %v5559_v52 = vmul.f32 %v10736_v48, %v5555_v42  ;;  %v8908_v42 = vld [vmem:[%s13069_s19 + $0x38] sm:$0xff] }
0x176f   :  { %v5585_v38 = vmul.f32 %v5581_v31, %v5501_v41  ;;  %v5584_v33 = vsub.f32 1.0, %v5580_v10  ;;  %v5590_v27 = vadd.f32 1.0, %v5586_v36  ;;  %v8905_v36 = vld [vmem:[%s13071_s30 + $0x18] sm:$0xff]  ;;  %v8907_v31 = vld [vmem:[%s13069_s19 + $0x30] sm:$0xff] }
0x1770   :  { %v5579_v23 = vmul.f32 %v10744_v47, %v5559_v52 }
0x1771   :  { %v5589_v6 = vadd.f32 1.0, %v5585_v38  ;;  %v5588_v9 = vmul.f32 %v5584_v33, %v5504_v2  ;;  %v5594_v48 = vmul.f32 %v5590_v27, %v5490_v34  ;;  %v6334_v2 = vld [vmem:[%s13073_s15] sm:$0xff] }
0x1772   :  { %v5583_v49 = vsub.f32 1.0, %v5579_v23  ;;  %v8913_v23 = vld [vmem:[%s13073_s15 + $0x8] sm:$0xff]  ;;  %v8925_v34 = vld [vmem:[%s13073_s15 + $0x20] sm:$0xff] }
0x1773   :  { %v5593_v44 = vmul.f32 %v5589_v6, %v5489_v43  ;;  %v5592_v13 = vadd.f32 1.0, %v5588_v9  ;;  %v8917_v6 = vld [vmem:[%s13073_s15 + $0x10] sm:$0xff]  ;;  %v8921_v9 = vld [vmem:[%s13073_s15 + $0x18] sm:$0xff] }
0x1774   :  { %v5587_v19 = vmul.f32 %v5583_v49, %v5503_v0  ;;  %v8929_v49 = vld [vmem:[%s13073_s15 + $0x28] sm:$0xff]  ;;  %v8937_v0 = vld [vmem:[%s13073_s15 + $0x38] sm:$0xff] }
0x1775   :  { %10242 = vmatprep.mubr.msk.f32.mxu1 %vm2746_vm3, %v5593_v44  ;;  %v5596_v1 = vmul.f32 %v5592_v13, %v5492_v40  ;;  %v8933_v44 = vld [vmem:[%s13073_s15 + $0x30] sm:$0xff]  ;;  %v8912_v13 = vld [vmem:[%s13075_s18] ss:$0 sm:$0xff] }
0x1776   :  { %v5591_v4 = vadd.f32 1.0, %v5587_v19  ;;  %10243 = vmatmul.mubr.msk.f32.vlgmr.msra.gmra.mxu1 %vm2746_vm3, %v5594_v48  ;;  %v8941_v48 = vld [vmem:[%s13073_s15 + $0x40] sm:$0xff] }
0x1777   :  { %10260 = vmatpush3.msra.mxu1 %v5789_v62  ;;  %v8910_v19 = vld [vmem:[%s13074_s16] ss:$0 sm:$0xff] }
0x1778   :  { %v5595_v11 = vmul.f32 %v5591_v4, %v5491_v15  ;;  %10261 = vmatprep.subr.mxu1 %v10848_v46  ;;  %v8916_v15 = vld [vmem:[%s13075_s18 + $0x1] ss:$0 sm:$0xff] }
0x177a   :  { %10245 = vmatprep.mubr.msk.f32.mxu1 %vm2746_vm3, %v5595_v11 }
0x177b   :  { %10246 = vmatmul.mubr.msk.f32.gmra.mxu1 %vm2746_vm3, %v5596_v1 }
0x177c   :  { %10263 = vmatprep.mubr.msk.f32.mxu1 %vm10849_vm13, %v10848_v46 }
0x1836   :  { %v10244_v63 = vpop.f32.mrf.mxu1 }
0x1837   :  { %v5699_v7 = vadd.f32 %v10244_v63, %v12494_v32 }
0x1838   :  { %v5679_v24 = vpop.f32.mrf.mxu1 }
0x1839   :  { %v5698_v21 = vadd.f32 %v5679_v24, %v12498_v16  ;;  %v12594_v25 = vadd.f32 %v8891_v30, %v5699_v7  ;;  %v8895_v16 = vld [vmem:[%s13071_s30 + $0x8] sm:$0xff] }
0x183b   :  { %v10247_v54 = vpop.f32.mrf.mxu1  ;;  %v12598_v32 = vadd.f32 %v8891_v30, %v5698_v21 }
0x183c   :  { %v5701_v57 = vadd.f32 %v10247_v54, %v12503_v53  ;;  %v5714_v53 = vld [vmem:[%s13071_s30] sm:$0xff] }
0x183d   :  { %v5689_v51 = vpop.f32.mrf.mxu1 }
0x183e   :  { %v12586_v20 = vadd.f32 %v8891_v30, %v5701_v57  ;;  %v5700_v59 = vadd.f32 %v5689_v51, %v12508_v29  ;;  %v5788_v29 = vld [vmem:[%s13069_s19] sm:$0xff] }
0x183f   :  { %10262 = vmatpush3.msra.mxu1 %v5788_v29  ;;  %v8920_v57 = vld [vmem:[%s13075_s18 + $0x2] ss:$0 sm:$0xff] }
0x1840   :  { %v12590_v61 = vadd.f32 %v8891_v30, %v5700_v59  ;;  %10249 = vmatpush3.msra.mxu0 %v12586_v20  ;;  %10277 = vmatprep.subr.mxu1 %v10848_v46  ;;  %v8924_v30 = vld [vmem:[%s13075_s18 + $0x3] ss:$0 sm:$0xff] }
0x1841   :  { %10250 = vmatprep.subr.mxu0 %v10848_v46 }
0x1842   :  { %10251 = vmatpush3.msra.mxu0 %v12590_v61 }
0x1843   :  { %10252 = vmatprep.subr.mxu0 %v10848_v46 }
0x1844   :  { %10253 = vmatpush3.msra.mxu0 %v12594_v25 }
0x1845   :  { %10254 = vmatprep.subr.mxu0 %v10848_v46 }
0x1846   :  { %10255 = vmatpush3.msra.mxu0 %v12598_v32 }
0x1847   :  { %10257 = vmatmul.mubr.msk.f32.vlgmr.msra.gmra.mxu0 %vm2746_vm3, %v5714_v53  ;;  %10266 = vmatprep.subr.mxu0 %v10848_v46  ;;  %v8932_v53 = vld [vmem:[%s13075_s18 + $0x5] ss:$0 sm:$0xff] }
0x1848   :  { %10267 = vmatpush3.msra.mxu0 %v12586_v20  ;;  %10274 = vmatprep.mubr.msk.f32.mxu0 %vm10849_vm13, %v10848_v46 }
0x1849   :  { %10268 = vmatprep.subr.mxu0 %v10848_v46 }
0x184a   :  { %10269 = vmatpush3.msra.mxu0 %v12590_v61 }
0x184b   :  { %10270 = vmatprep.subr.mxu0 %v10848_v46 }
0x184c   :  { %10271 = vmatpush3.msra.mxu0 %v12594_v25 }
0x184d   :  { %10272 = vmatprep.subr.mxu0 %v10848_v46 }
0x184e   :  { %10273 = vmatpush3.msra.mxu0 %v12598_v32 }
0x184f   :  { %10275 = vmatmul.mubr.msk.f32.vlgmr.msra.gmra.mxu0 %vm2746_vm3, %v8895_v16  ;;  %10295 = vmatprep.subr.mxu0 %v10848_v46 }
0x1850   :  { %10299 = vmatprep.mubr.msk.f32.mxu0 %vm10849_vm13, %v10848_v46  ;;  %10296 = vmatpush3.msra.mxu0 %v8903_v12  ;;  %v8940_v12 = vld [vmem:[%s13075_s18 + $0x7] ss:$0 sm:$0xff] }
0x1851   :  { %10297 = vmatprep.subr.mxu0 %v10848_v46 }
0x1852   :  { %10298 = vmatpush3.msra.mxu0 %v8902_v26 }
0x1853   :  { %10302 = vmatprep.subr.mxu0 %v10848_v46 }
0x1907   :  { %v5784_v55 = vpop.f32.mrf.mxu0 }
0x1908   :  { %10264 = vmatmul.mubr.msk.f32.vlgmr.msra.gmra.mxu1 %vm3805_vm8, %v5784_v55 }
0x1909   :  { %v10258_v28 = vpop.f32.mrf.mxu0  ;;  %10278 = vmatpush3.msra.mxu1 %v8898_v14  ;;  %10281 = vmatprep.mubr.msk.f32.mxu1 %vm10849_vm13, %v10848_v46 }
0x190a   :  { %10279 = vmatprep.subr.mxu1 %v10848_v46 }
0x190b   :  { %10280 = vmatpush3.msra.mxu1 %v8897_v37 }
0x190c   :  { %10284 = vmatprep.subr.mxu1 %v10848_v46 }
0x190f   :  { %v5941_v60 = vpop.f32.mrf.mxu0 }
0x1910   :  { %10282 = vmatmul.mubr.msk.f32.vlgmr.msra.gmra.mxu1 %vm3805_vm8, %v5941_v60 }
0x1911   :  { %10285 = vmatpush3.msra.mxu1 %v12586_v20  ;;  %v10276_v22 = vpop.f32.mrf.mxu0  ;;  %10292 = vmatprep.mubr.msk.f32.mxu1 %vm10849_vm13, %v10848_v46 }
0x1912   :  { %10286 = vmatprep.subr.mxu1 %v10848_v46 }
0x1913   :  { %10287 = vmatpush3.msra.mxu1 %v12590_v61 }
0x1914   :  { %10288 = vmatprep.subr.mxu1 %v10848_v46 }
0x1915   :  { %10289 = vmatpush3.msra.mxu1 %v12594_v25 }
0x1916   :  { %10290 = vmatprep.subr.mxu1 %v10848_v46 }
0x1917   :  { %10291 = vmatpush3.msra.mxu1 %v12598_v32 }
0x1918   :  { %10293 = vmatmul.mubr.msk.f32.vlgmr.msra.gmra.mxu1 %vm2746_vm3, %v8900_v3  ;;  %10313 = vmatprep.subr.mxu1 %v10848_v46  ;;  %v8936_v3 = vld [vmem:[%s13075_s18 + $0x6] ss:$0 sm:$0xff] }
0x1919   :  { %10317 = vmatprep.mubr.msk.f32.mxu1 %vm10849_vm13, %v10848_v46  ;;  %10314 = vmatpush3.msra.mxu1 %v8908_v42 }
0x191a   :  { %10315 = vmatprep.subr.mxu1 %v10848_v46 }
0x191b   :  { %10316 = vmatpush3.msra.mxu1 %v8907_v31 }
0x191c   :  { %10320 = vmatprep.subr.mxu1 %v10848_v46 }
0x19c8   :  { %v5859_v50 = vpop.f32.mrf.mxu1 }
0x19c9   :  { %v5869_v5 = vadd.f32 %v8894_v35, %v5859_v50 }
0x19ca   :  { %v10265_v8 = vpop.f32.mrf.mxu1 }
0x19d0   :  { %v6017_v18 = vpop.f32.mrf.mxu1 }
0x19d1   :  { %v6021_v17 = vadd.f32 %v6017_v18, %v5869_v5 }
0x19d2   :  { %v10283_v58 = vpop.f32.mrf.mxu1 }
0x19d8   :  { %v6093_v56 = vpop.f32.mrf.mxu1 }
0x19d9   :  { %10300 = vmatmul.mubr.msk.f32.vlgmr.msra.gmra.mxu0 %vm3805_vm8, %v6093_v56  ;;  %v8944_v56 = vld [vmem:[%s13075_s18 + $0x8] ss:$0 sm:$0xff] }
0x19da   :  { %10303 = vmatpush3.msra.mxu0 %v12586_v20  ;;  %v10294_v39 = vpop.f32.mrf.mxu1  ;;  %10310 = vmatprep.mubr.msk.f32.mxu0 %vm10849_vm13, %v10848_v46 }
0x19db   :  { %10304 = vmatprep.subr.mxu0 %v10848_v46 }
0x19dc   :  { %10305 = vmatpush3.msra.mxu0 %v12590_v61 }
0x19dd   :  { %10306 = vmatprep.subr.mxu0 %v10848_v46 }
0x19de   :  { %10307 = vmatpush3.msra.mxu0 %v12594_v25 }
0x19df   :  { %10308 = vmatprep.subr.mxu0 %v10848_v46 }
0x19e0   :  { %10309 = vmatpush3.msra.mxu0 %v12598_v32  ;;  %v8928_v32 = vld [vmem:[%s13075_s18 + $0x4] ss:$0 sm:$0xff] }
0x19e1   :  { %10311 = vmatmul.mubr.msk.f32.vlgmr.msra.gmra.mxu0 %vm2746_vm3, %v8905_v36  ;;  %10325 = vmatprep.subr.mxu0 %v10848_v46 }
0x19e2   :  { %10327 = vmatprep.mubr.msk.f32.mxu0 %vm10849_vm13, %v10848_v46 }
0x1a99   :  { %v6169_v10 = vpop.f32.mrf.mxu0 }
0x1a9a   :  { %v6173_v41 = vadd.f32 %v6169_v10, %v6021_v17 }
0x1a9b   :  { %v10301_v52 = vpop.f32.mrf.mxu0 }
0x1aa1   :  { %v6245_v47 = vpop.f32.mrf.mxu0 }
0x1aa2   :  { %10318 = vmatmul.mubr.msk.f32.vlgmr.msra.gmra.mxu1 %vm3805_vm8, %v6245_v47 }
0x1aa3   :  { %v10312_v38 = vpop.f32.mrf.mxu0  ;;  %10322 = vmatprep.mubr.msk.f32.mxu1 %vm10849_vm13, %v10848_v46 }
0x1b62   :  { %v6321_v33 = vpop.f32.mrf.mxu1 }
0x1b63   :  { %v6325_v27 = vadd.f32 %v6321_v33, %v6173_v41 }
0x1b64   :  { %v10319_v43 = vpop.f32.mrf.mxu1 }
0x1b65   :  { %10321 = vmatpush3.msra.mxu1 %v6325_v27  ;;  %10326 = vmatpush3.msra.mxu0 %v6325_v27  ;;  %v6333_v11 = vadd.f32 %v8910_v19, %v6325_v27  ;;  %v7216_v43 = vld [vmem:[%s13077_s23 + $0x18] sm:$0xff] }
0x1b66   :  { %10323 = vmatmul.mubr.msk.f32.vlgmr.msra.gmra.mxu1 %vm971_vm2, %v6334_v2  ;;  %10328 = vmatmul.mubr.msk.f32.vlgmr.msra.gmra.mxu0 %vm971_vm2, %v8913_v23  ;;  %v7132_v23 = vld [vmem:[%s13076_s22 + $0x18] sm:$0xff] }
0x1b67   :  { %10330 = vmatprep.subr.mxu1 %v10848_v46  ;;  %10335 = vmatprep.subr.mxu0 %v10848_v46 }
0x1b68   :  { %10331 = vmatpush3.msra.mxu1 %v6325_v27  ;;  %10336 = vmatpush3.msra.mxu0 %v6325_v27 }
0x1b69   :  { %10332 = vmatprep.mubr.msk.f32.mxu1 %vm10849_vm13, %v10848_v46  ;;  %10337 = vmatprep.mubr.msk.f32.mxu0 %vm10849_vm13, %v10848_v46 }
0x1b6a   :  { %10340 = vmatprep.subr.mxu1 %v10848_v46  ;;  %10345 = vmatprep.subr.mxu0 %v10848_v46 }
0x1b6b   :  { %10333 = vmatmul.mubr.msk.f32.vlgmr.msra.gmra.mxu1 %vm971_vm2, %v8917_v6  ;;  %10338 = vmatmul.mubr.msk.f32.vlgmr.msra.gmra.mxu0 %vm971_vm2, %v8921_v9  ;;  %v7131_v6 = vld [vmem:[%s13076_s22 + $0x10] sm:$0xff] }
0x1b6c   :  { %10341 = vmatpush3.msra.mxu1 %v6325_v27  ;;  %10346 = vmatpush3.msra.mxu0 %v6325_v27  ;;  %v7215_v9 = vld [vmem:[%s13077_s23 + $0x10] sm:$0xff] }
0x1b6d   :  { %10342 = vmatprep.mubr.msk.f32.mxu1 %vm10849_vm13, %v10848_v46  ;;  %10347 = vmatprep.mubr.msk.f32.mxu0 %vm10849_vm13, %v10848_v46 }
0x1b6e   :  { %10350 = vmatprep.subr.mxu1 %v10848_v46  ;;  %10355 = vmatprep.subr.mxu0 %v10848_v46 }
0x1b6f   :  { %10343 = vmatmul.mubr.msk.f32.vlgmr.msra.gmra.mxu1 %vm971_vm2, %v8925_v34  ;;  %10348 = vmatmul.mubr.msk.f32.vlgmr.msra.gmra.mxu0 %vm971_vm2, %v8929_v49  ;;  %v7130_v34 = vld [vmem:[%s13076_s22 + $0x8] sm:$0xff] }
0x1b70   :  { %10351 = vmatpush3.msra.mxu1 %v6325_v27  ;;  %10356 = vmatpush3.msra.mxu0 %v6325_v27  ;;  %v7214_v49 = vld [vmem:[%s13077_s23 + $0x8] sm:$0xff] }
0x1b71   :  { %10352 = vmatprep.mubr.msk.f32.mxu1 %vm10849_vm13, %v10848_v46  ;;  %10357 = vmatprep.mubr.msk.f32.mxu0 %vm10849_vm13, %v10848_v46 }
0x1b72   :  { %10360 = vmatprep.subr.mxu1 %v10848_v46  ;;  %10365 = vmatprep.subr.mxu0 %v10848_v46 }
0x1b73   :  { %10353 = vmatmul.mubr.msk.f32.vlgmr.msra.gmra.mxu1 %vm971_vm2, %v8933_v44  ;;  %10358 = vmatmul.mubr.msk.f32.vlgmr.msra.gmra.mxu0 %vm971_vm2, %v8937_v0  ;;  %v7129_v44 = vld [vmem:[%s13076_s22] sm:$0xff] }
0x1b74   :  { %10361 = vmatpush3.msra.mxu1 %v6325_v27  ;;  %10362 = vmatprep.mubr.msk.f32.mxu1 %vm10849_vm13, %v10848_v46  ;;  %v7213_v0 = vld [vmem:[%s13077_s23] sm:$0xff] }
0x1b75   :  { %10376 = vmatprep.subr.mxu1 %v10848_v46  ;;  %10373 = vmatprep.mubr.msk.f32.mxu0 %vm10849_vm13, %v10848_v46 }
0x1b76   :  { %10366 = vmatpush3.msra.mxu0 %v7132_v23  ;;  %v8961_v23 = vld [vmem:[%s13076_s22 + $0x38] sm:$0xff] }
0x1b77   :  { %10363 = vmatmul.mubr.msk.f32.vlgmr.msra.gmra.mxu1 %vm971_vm2, %v8941_v48  ;;  %10367 = vmatprep.subr.mxu0 %v10848_v46 }
0x1b78   :  { %10384 = vmatprep.mubr.msk.f32.mxu1 %vm10849_vm13, %v10848_v46  ;;  %10377 = vmatpush3.msra.mxu1 %v7216_v43  ;;  %v8960_v43 = vld [vmem:[%s13076_s22 + $0x30] sm:$0xff] }
0x1b79   :  { %10368 = vmatpush3.msra.mxu0 %v7131_v6  ;;  %10378 = vmatprep.subr.mxu1 %v10848_v46  ;;  %v8959_v6 = vld [vmem:[%s13076_s22 + $0x28] sm:$0xff] }
0x1b7a   :  { %10369 = vmatprep.subr.mxu0 %v10848_v46  ;;  %10379 = vmatpush3.msra.mxu1 %v7215_v9  ;;  %v8958_v9 = vld [vmem:[%s13076_s22 + $0x20] sm:$0xff] }
0x1b7b   :  { %10370 = vmatpush3.msra.mxu0 %v7130_v34  ;;  %10380 = vmatprep.subr.mxu1 %v10848_v46  ;;  %v8975_v34 = vld [vmem:[%s13080_s1 + $0x38] sm:$0xff] }
0x1b7c   :  { %10371 = vmatprep.subr.mxu0 %v10848_v46  ;;  %10381 = vmatpush3.msra.mxu1 %v7214_v49  ;;  %v8974_v49 = vld [vmem:[%s13080_s1 + $0x30] sm:$0xff] }
0x1b7d   :  { %10372 = vmatpush3.msra.mxu0 %v7129_v44  ;;  %10382 = vmatprep.subr.mxu1 %v10848_v46  ;;  %v8973_v44 = vld [vmem:[%s13080_s1 + $0x28] sm:$0xff] }
0x1b7e   :  { %10383 = vmatpush3.msra.mxu1 %v7213_v0  ;;  %10387 = vmatprep.subr.mxu0 %v10848_v46  ;;  %v8972_v0 = vld [vmem:[%s13080_s1 + $0x20] sm:$0xff] }
0x1b7f   :  { %10398 = vmatprep.subr.mxu1 %v10848_v46 }
0x1c26   :  { %v6404_v4 = vpop.f32.mrf.mxu1  ;;  %v6488_v40 = vpop.f32.mrf.mxu0 }
0x1c27   :  { %v6415_v1 = vmul.f32 %v8912_v13, %v6404_v4  ;;  %v6500_v62 = vmul.f32 %v8916_v15, %v6488_v40  ;;  %v8945_v4 = vld [vmem:[%s13078_s26] ss:$0 sm:$0xff] }
0x1c28   :  { %v10324_v63 = vpop.f32.mrf.mxu1  ;;  %v10329_v24 = vpop.f32.mrf.mxu0 }
0x1c29   :  { %v6416_v54 = vadd.f32 %v6415_v1, %v6333_v11  ;;  %v8946_v11 = vld [vmem:[%s13079_s28] ss:$0 sm:$0xff]  ;;  %v7297_v63 = vld [vmem:[%s13080_s1 + $0x18] sm:$0xff]  ;;  %v7296_v24 = vld [vmem:[%s13080_s1 + $0x10] sm:$0xff] }
0x1c2b   :  { %v6501_v51 = vadd.f32 %v6500_v62, %v6416_v54  ;;  %v6573_v7 = vpop.f32.mrf.mxu1  ;;  %v6658_v20 = vpop.f32.mrf.mxu0  ;;  %v7295_v54 = vld [vmem:[%s13080_s1 + $0x8] sm:$0xff] }
0x1c2c   :  { %v6585_v59 = vmul.f32 %v8920_v57, %v6573_v7  ;;  %v6670_v21 = vmul.f32 %v8924_v30, %v6658_v20  ;;  %v7294_v57 = vld [vmem:[%s13080_s1] sm:$0xff] }
0x1c2d   :  { %v10334_v61 = vpop.f32.mrf.mxu1  ;;  %v10339_v25 = vpop.f32.mrf.mxu0  ;;  %v8947_v30 = vld [vmem:[%s13081_s2] ss:$0 sm:$0xff] }
0x1c2e   :  { %v6586_v16 = vadd.f32 %v6585_v59, %v6501_v51  ;;  %v8949_v51 = vld [vmem:[%s13082_s7] ss:$0 sm:$0xff] }
0x1c2f   :  { %v6743_v29 = vpop.f32.mrf.mxu1  ;;  %v6828_v14 = vpop.f32.mrf.mxu0 }
0x1c30   :  { %v6671_v55 = vadd.f32 %v6670_v21, %v6586_v16  ;;  %v6755_v37 = vmul.f32 %v8928_v32, %v6743_v29  ;;  %v6840_v28 = vmul.f32 %v8932_v53, %v6828_v14 }
0x1c31   :  { %v10344_v60 = vpop.f32.mrf.mxu1  ;;  %v10349_v22 = vpop.f32.mrf.mxu0 }
0x1c32   :  { %v6756_v26 = vadd.f32 %v6755_v37, %v6671_v55 }
0x1c33   :  { %v6913_v50 = vpop.f32.mrf.mxu1  ;;  %v6998_v8 = vpop.f32.mrf.mxu0 }
0x1c34   :  { %v6841_v35 = vadd.f32 %v6840_v28, %v6756_v26  ;;  %v6925_v5 = vmul.f32 %v8936_v3, %v6913_v50  ;;  %v7010_v18 = vmul.f32 %v8940_v12, %v6998_v8  ;;  %v8951_v50 = vld [vmem:[%s13083_s10] ss:$0 sm:$0xff] }
0x1c35   :  { %v10354_v17 = vpop.f32.mrf.mxu1  ;;  %v10359_v58 = vpop.f32.mrf.mxu0 }
0x1c36   :  { %v6926_v39 = vadd.f32 %v6925_v5, %v6841_v35 }
0x1c37   :  { %v7083_v36 = vpop.f32.mrf.mxu1 }
0x1c38   :  { %v7011_v42 = vadd.f32 %v7010_v18, %v6926_v39  ;;  %v7095_v31 = vmul.f32 %v8944_v56, %v7083_v36  ;;  %v12784_v18 = vld [vmem:[%s13084_s11] sm:$0xff] }
0x1c39   :  { %v10364_v10 = vpop.f32.mrf.mxu1 }
0x1c3a   :  { %v12726_v41 = vadd.f32 %v7095_v31, %v7011_v42 }
0x1c3c   :  { %v7099_v52 = vsel %vm2746_vm3, %v12726_v41, 0.0 }
0x1c3d   :  { %7100 = vadd.xlane.f32.xlu0 %v7099_v52 }
0x1cc6   :  { %v7101_v47 = vpop.xlane.xlu0 %7100 }
0x1cc7   :  { %v7103_v38 = vmul.f32 0.03125, %v7101_v47  ;;  %v7552_v47 = vld [vmem:[%s13085_s0 + $0x8] sm:$0xff] }
0x1cc9   :  { %v7104_v33 = vsub.f32 %v12726_v41, %v7103_v38  ;;  %v7551_v38 = vld [vmem:[%s13085_s0] sm:$0xff] }
0x1ccb   :  { %v7105_v27 = vmul.f32 %v7104_v33, %v7104_v33 }
0x1ccd   :  { %v7106_v2 = vsel %vm2746_vm3, %v7105_v27, 0.0 }
0x1cce   :  { %7107 = vadd.xlane.f32.xlu1 %v7106_v2 }
0x1d57   :  { %v7108_v48 = vpop.xlane.xlu1 %7107 }
0x1d58   :  { %v7109_v19 = vmul.f32 0.03125, %v7108_v48  ;;  %v8968_v48 = vld [vmem:[%s13077_s23 + $0x38] sm:$0xff] }
0x1d5a   :  { %v7110_v13 = vadd.f32 1e-05, %v7109_v19 }
0x1d5c   :  { %10745 = vrsqrt.f32 %v7110_v13  ;;  %v8967_v13 = vld [vmem:[%s13077_s23 + $0x30] sm:$0xff] }
0x1d69   :  { %v10746_v15 = vpop.eup %10745 }
0x1d6a   :  { %v7112_v40 = vmul.f32 %v10746_v15, %v7104_v33 }
0x1d6c   :  { %v7119_v1 = vmul.f32 %v8945_v4, %v7112_v40  ;;  %v8966_v4 = vld [vmem:[%s13077_s23 + $0x28] sm:$0xff]  ;;  %v8965_v40 = vld [vmem:[%s13077_s23 + $0x20] sm:$0xff] }
0x1d6e   :  { %v12750_v62 = vadd.f32 %v8946_v11, %v7119_v1  ;;  %v8963_v11 = vld [vmem:[%s13081_s2 + $0x1] ss:$0 sm:$0xff] }
0x1d70   :  { %10374 = vmatmul.mubr.msk.f32.vlgmr.msra.gmra.mxu0 %vm2746_vm3, %v12750_v62  ;;  %10385 = vmatmul.mubr.msk.f32.vlgmr.msra.gmra.mxu1 %vm2746_vm3, %v12750_v62 }
0x1d71   :  { %10388 = vmatpush3.msra.mxu0 %v7297_v63  ;;  %10395 = vmatprep.mubr.msk.f32.mxu0 %vm10849_vm13, %v10848_v46 }
0x1d72   :  { %10389 = vmatprep.subr.mxu0 %v10848_v46  ;;  %10400 = vmatprep.mubr.msk.f32.mxu1 %vm10849_vm13, %v10848_v46 }
0x1d73   :  { %10390 = vmatpush3.msra.mxu0 %v7296_v24 }
0x1d74   :  { %10391 = vmatprep.subr.mxu0 %v10848_v46 }
0x1d75   :  { %10392 = vmatpush3.msra.mxu0 %v7295_v54 }
0x1d76   :  { %10393 = vmatprep.subr.mxu0 %v10848_v46 }
0x1d77   :  { %10394 = vmatpush3.msra.mxu0 %v7294_v57 }
0x1d78   :  { %10396 = vmatmul.mubr.msk.f32.vlgmr.msra.gmra.mxu0 %vm2746_vm3, %v12750_v62  ;;  %10408 = vmatprep.subr.mxu0 %v10848_v46 }
0x1d79   :  { %10412 = vmatprep.mubr.msk.f32.mxu0 %vm10849_vm13, %v10848_v46  ;;  %10409 = vmatpush3.msra.mxu0 %v7552_v47 }
0x1d7a   :  { %10410 = vmatprep.subr.mxu0 %v10848_v46 }
0x1d7b   :  { %10411 = vmatpush3.msra.mxu0 %v7551_v38  ;;  %v8957_v38 = vld [vmem:[%s13086_s5] ss:$0 sm:$0xff] }
0x1d7c   :  { %10426 = vmatprep.subr.mxu0 %v10848_v46 }
0x1e30   :  { %v7209_v7 = vpop.f32.mrf.mxu0  ;;  %v7290_v20 = vpop.f32.mrf.mxu1 }
0x1e31   :  { %v7210_v59 = vadd.f32 %v8947_v30, %v7209_v7  ;;  %v7291_v21 = vadd.f32 %v8949_v51, %v7290_v20 }
0x1e32   :  { %v10375_v61 = vpop.f32.mrf.mxu0  ;;  %v10386_v25 = vpop.f32.mrf.mxu1 }
0x1e33   :  { %v7382_v32 = vmul.f32 %v7291_v21, %v7291_v21  ;;  %v7375_v53 = vmul.f32 %v7210_v59, %v7210_v59 }
0x1e35   :  { %v7383_v16 = vsel %vm3805_vm8, %v7382_v32, 0.0  ;;  %v7376_v29 = vsel %vm3805_vm8, %v7375_v53, 0.0 }
0x1e36   :  { %7384 = vadd.xlane.f32.xlu0 %v7383_v16  ;;  %7377 = vadd.xlane.f32.xlu1 %v7376_v29 }
0x1e38   :  { %v7371_v14 = vpop.f32.mrf.mxu0 }
0x1e39   :  { %v7372_v35 = vadd.f32 %v8951_v50, %v7371_v14 }
0x1e3a   :  { %v10397_v55 = vpop.f32.mrf.mxu0 }
0x1ebf   :  { %v7385_v37 = vpop.xlane.xlu0 %7384  ;;  %v7378_v28 = vpop.xlane.xlu1 %7377 }
0x1ec0   :  { %v7386_v60 = vmax.f32 %v7385_v37, 1e-24  ;;  %v7379_v22 = vmax.f32 %v7378_v28, 1e-24 }
0x1ec2   :  { %10747 = vrsqrt.f32 %v7386_v60  ;;  %v8977_v60 = vld [vmem:[%s13083_s10 + $0x1] ss:$0 sm:$0xff] }
0x1ec3   :  { %10749 = vrsqrt.f32 %v7379_v22 }
0x1ecf   :  { %v10748_v3 = vpop.eup %10747 }
0x1ed0   :  { %v10750_v12 = vpop.eup %10749  ;;  %v7388_v26 = vmul.f32 %v10748_v3, %v7291_v21 }
0x1ed1   :  { %v7381_v8 = vmul.f32 %v10750_v12, %v7210_v59  ;;  %v8970_v59 = vld [vmem:[%s13082_s7 + $0x1] ss:$0 sm:$0xff] }
0x1ed2   :  { %10399 = vmatpush3.xpose.msk.msra.mxu1 %vm3805_vm8, %v7388_v26 }
0x1ed3   :  { %10403 = vmatprep.subr.mxu1 %v10848_v46 }
0x1ed5   :  { %10401 = vmatmul.mubr.msk.f32.vlgmr.msra.gmra.mxu1 %vm3805_vm8, %v7381_v8 }
0x1ed6   :  { %10404 = vmatpush3.msra.mxu1 %v7372_v35  ;;  %10405 = vmatprep.mubr.msk.f32.mxu1 %vm10849_vm13, %v10848_v46 }
0x1ed7   :  { %10415 = vmatprep.subr.mxu1 %v10848_v46 }
0x1f95   :  { %v7461_v5 = vpop.f32.mrf.mxu1 }
0x1f96   :  { %v7465_v17 = vmul.f32 10.0, %v7461_v5 }
0x1f97   :  { %v10402_v58 = vpop.f32.mrf.mxu1 }
0x1f98   :  { %v7466_v56 = vadd.f32 %v7465_v17, %v12784_v18 }
0x1f9a   :  { %v7467_v39 = vsel %vm971_vm2, %v7466_v56, -inf }
0x1f9b   :  { %7468 = vmax.xlane.f32.xlu0 %v7467_v39 }
0x2024   :  { %v7469_v36 = vpop.xlane.xlu0 %7468 }
0x2025   :  { %v7470_v42 = vsub.f32 %v7466_v56, %v7469_v36  ;;  %v8983_v36 = vld [vmem:[%s13085_s0 + $0x18] sm:$0xff] }
0x2027   :  { %v7471_v31 = vmul.f32 1.442695, %v7470_v42 }
0x2029   :  { %10751 = vpow2.f32 %v7471_v31 }
0x2036   :  { %v10752_v10 = vpop.eup %10751 }
0x2037   :  { %v7473_v52 = vsel %vm971_vm2, %v10752_v10, 0.0 }
0x2038   :  { %7474 = vadd.xlane.f32.xlu1 %v7473_v52 }
0x20c1   :  { %v7475_v33 = vpop.xlane.xlu1 %7474 }
0x20c2   :  { %10753 = vrcp.f32 %v7475_v33 }
0x20cf   :  { %v10754_v27 = vpop.eup %10753 }
0x20d0   :  { %v7477_v2 = vmul.f32 %v10754_v27, %v10752_v10  ;;  %v8982_v10 = vld [vmem:[%s13085_s0 + $0x10] sm:$0xff] }
0x20d2   :  { %10406 = vmatmul.mubr.msk.f32.vlgmr.msra.gmra.mxu1 %vm971_vm2, %v7477_v2 }
0x20d3   :  { %10416 = vmatpush3.msra.mxu1 %v8961_v23  ;;  %10423 = vmatprep.mubr.msk.f32.mxu1 %vm10849_vm13, %v10848_v46 }
0x20d4   :  { %10417 = vmatprep.subr.mxu1 %v10848_v46 }
0x20d5   :  { %10418 = vmatpush3.msra.mxu1 %v8960_v43 }
0x20d6   :  { %10419 = vmatprep.subr.mxu1 %v10848_v46 }
0x20d7   :  { %10420 = vmatpush3.msra.mxu1 %v8959_v6 }
0x20d8   :  { %10421 = vmatprep.subr.mxu1 %v10848_v46 }
0x20d9   :  { %10422 = vmatpush3.msra.mxu1 %v8958_v9 }
0x20da   :  { %10424 = vmatmul.mubr.msk.f32.vlgmr.msra.gmra.mxu1 %vm2746_vm3, %v12750_v62  ;;  %10437 = vmatprep.subr.mxu1 %v10848_v46 }
0x20db   :  { %10438 = vmatpush3.msra.mxu1 %v8975_v34  ;;  %10445 = vmatprep.mubr.msk.f32.mxu1 %vm10849_vm13, %v10848_v46 }
0x20dc   :  { %10439 = vmatprep.subr.mxu1 %v10848_v46 }
0x20dd   :  { %10440 = vmatpush3.msra.mxu1 %v8974_v49 }
0x20de   :  { %10441 = vmatprep.subr.mxu1 %v10848_v46 }
0x20df   :  { %10442 = vmatpush3.msra.mxu1 %v8973_v44 }
0x20e0   :  { %10443 = vmatprep.subr.mxu1 %v10848_v46 }
0x20e1   :  { %10444 = vmatpush3.msra.mxu1 %v8972_v0 }
0x20e2   :  { %10446 = vmatmul.mubr.msk.f32.vlgmr.msra.gmra.mxu1 %vm2746_vm3, %v12750_v62  ;;  %10458 = vmatprep.subr.mxu1 %v10848_v46 }
0x20e3   :  { %10462 = vmatprep.mubr.msk.f32.mxu1 %vm10849_vm13, %v10848_v46  ;;  %10459 = vmatpush3.msra.mxu1 %v8983_v36 }
0x20e4   :  { %10460 = vmatprep.subr.mxu1 %v10848_v46 }
0x20e5   :  { %10461 = vmatpush3.msra.mxu1 %v8982_v10 }
0x20e6   :  { %10476 = vmatprep.subr.mxu1 %v10848_v46 }
0x2192   :  { %v7547_v19 = vpop.f32.mrf.mxu1 }
0x2193   :  { %10413 = vmatmul.mubr.msk.f32.vlgmr.msra.gmra.mxu0 %vm3805_vm8, %v7547_v19  ;;  %v8166_v19 = vld [vmem:[%s13087_s9 + $0x8] sm:$0xff] }
0x2194   :  { %10427 = vmatpush3.msra.mxu0 %v8968_v48  ;;  %v10407_v15 = vpop.f32.mrf.mxu1  ;;  %10434 = vmatprep.mubr.msk.f32.mxu0 %vm10849_vm13, %v10848_v46  ;;  %v8168_v48 = vld [vmem:[%s13087_s9 + $0x18] sm:$0xff] }
0x2195   :  { %10428 = vmatprep.subr.mxu0 %v10848_v46 }
0x2196   :  { %10429 = vmatpush3.msra.mxu0 %v8967_v13  ;;  %v8165_v13 = vld [vmem:[%s13087_s9] sm:$0xff] }
0x2197   :  { %10430 = vmatprep.subr.mxu0 %v10848_v46 }
0x2198   :  { %10431 = vmatpush3.msra.mxu0 %v8966_v4 }
0x2199   :  { %10432 = vmatprep.subr.mxu0 %v10848_v46 }
0x219a   :  { %v7712_v1 = vpop.f32.mrf.mxu1  ;;  %10433 = vmatpush3.msra.mxu0 %v8965_v40 }
0x219b   :  { %v7713_v63 = vadd.f32 %v8963_v11, %v7712_v1  ;;  %10435 = vmatmul.mubr.msk.f32.vlgmr.msra.gmra.mxu0 %vm2746_vm3, %v12750_v62  ;;  %10448 = vmatprep.subr.mxu0 %v10848_v46  ;;  %v8985_v1 = vld [vmem:[%s13088_s13] ss:$0 sm:$0xff] }
0x219c   :  { %v10425_v24 = vpop.f32.mrf.mxu1  ;;  %10450 = vmatprep.mubr.msk.f32.mxu0 %vm10849_vm13, %v10848_v46 }
0x219d   :  { %v7882_v54 = vmul.f32 %v7713_v63, %v7713_v63  ;;  %v8986_v24 = vld [vmem:[%s13089_s17] ss:$0 sm:$0xff] }
0x219f   :  { %v7883_v57 = vsel %vm3805_vm8, %v7882_v54, 0.0 }
0x21a0   :  { %7884 = vadd.xlane.f32.xlu1 %v7883_v57 }
0x21a2   :  { %v7878_v30 = vpop.f32.mrf.mxu1 }
0x21a3   :  { %v7879_v3 = vadd.f32 %v8977_v60, %v7878_v30  ;;  %v8283_v30 = vld [vmem:[%s13090_s21 + $0x38] sm:$0xff] }
0x21a4   :  { %v10447_v51 = vpop.f32.mrf.mxu1 }
0x21a5   :  { %v8282_v51 = vld [vmem:[%s13090_s21 + $0x30] sm:$0xff] }
0x2229   :  { %v7885_v53 = vpop.xlane.xlu1 %7884 }
0x222a   :  { %v7886_v16 = vmax.f32 %v7885_v53, 1e-24 }
0x2253   :  { %v7622_v7 = vpop.f32.mrf.mxu0 }
0x2254   :  { %v7632_v33 = vadd.f32 %v8957_v38, %v7622_v7  ;;  %v8281_v7 = vld [vmem:[%s13090_s21 + $0x28] sm:$0xff] }
0x2255   :  { %v10414_v20 = vpop.f32.mrf.mxu0 }
0x2256   :  { %v8280_v20 = vld [vmem:[%s13090_s21 + $0x20] sm:$0xff] }
0x225b   :  { %v7795_v21 = vpop.f32.mrf.mxu0 }
0x225c   :  { %v7796_v61 = vadd.f32 %v8970_v59, %v7795_v21  ;;  %v8279_v59 = vld [vmem:[%s13090_s21 + $0x18] sm:$0xff]  ;;  %v8278_v21 = vld [vmem:[%s13090_s21 + $0x10] sm:$0xff] }
0x225d   :  { %v10436_v25 = vpop.f32.mrf.mxu0 }
0x225e   :  { %v7889_v62 = vmul.f32 %v7796_v61, %v7796_v61  ;;  %v8276_v25 = vld [vmem:[%s13090_s21] sm:$0xff] }
0x2260   :  { %v7890_v32 = vsel %vm3805_vm8, %v7889_v62, 0.0  ;;  %v8987_v62 = vld [vmem:[%s13091_s25] ss:$0 sm:$0xff] }
0x2261   :  { %7891 = vadd.xlane.f32.xlu0 %v7890_v32 }
0x22ea   :  { %v7892_v29 = vpop.xlane.xlu0 %7891 }
0x22eb   :  { %v7893_v14 = vmax.f32 %v7892_v29, 1e-24 }
0x22ed   :  { %10755 = vrsqrt.f32 %v7893_v14 }
0x22ee   :  { %10757 = vrsqrt.f32 %v7886_v16 }
0x22fa   :  { %v10756_v55 = vpop.eup %10755 }
0x22fb   :  { %v10758_v37 = vpop.eup %10757  ;;  %v7895_v28 = vmul.f32 %v10756_v55, %v7796_v61  ;;  %v8277_v61 = vld [vmem:[%s13090_s21 + $0x8] sm:$0xff] }
0x22fc   :  { %v7888_v22 = vmul.f32 %v10758_v37, %v7713_v63 }
0x22fd   :  { %10449 = vmatpush3.xpose.msk.msra.mxu0 %vm3805_vm8, %v7895_v28 }
0x22fe   :  { %10453 = vmatprep.subr.mxu0 %v10848_v46 }
0x2300   :  { %10451 = vmatmul.mubr.msk.f32.vlgmr.msra.gmra.mxu0 %vm3805_vm8, %v7888_v22 }
0x2301   :  { %10454 = vmatpush3.msra.mxu0 %v7879_v3  ;;  %10455 = vmatprep.mubr.msk.f32.mxu0 %vm10849_vm13, %v10848_v46 }
0x2302   :  { %10465 = vmatprep.subr.mxu0 %v10848_v46 }
0x23c0   :  { %v7968_v12 = vpop.f32.mrf.mxu0 }
0x23c1   :  { %v7972_v26 = vmul.f32 10.0, %v7968_v12 }
0x23c2   :  { %v10452_v50 = vpop.f32.mrf.mxu0 }
0x23c3   :  { %v7973_v8 = vadd.f32 %v7972_v26, %v12784_v18 }
0x23c5   :  { %v7974_v35 = vsel %vm971_vm2, %v7973_v8, -inf }
0x23c6   :  { %7975 = vmax.xlane.f32.xlu0 %v7974_v35 }
0x244f   :  { %v7976_v5 = vpop.xlane.xlu0 %7975 }
0x2450   :  { %v7977_v17 = vsub.f32 %v7973_v8, %v7976_v5 }
0x2452   :  { %v7978_v58 = vmul.f32 1.442695, %v7977_v17 }
0x2454   :  { %10759 = vpow2.f32 %v7978_v58 }
0x2461   :  { %v10760_v56 = vpop.eup %10759 }
0x2462   :  { %v7980_v39 = vsel %vm971_vm2, %v10760_v56, 0.0 }
0x2463   :  { %7981 = vadd.xlane.f32.xlu1 %v7980_v39 }
0x24ec   :  { %v7982_v42 = vpop.xlane.xlu1 %7981 }
0x24ed   :  { %10761 = vrcp.f32 %v7982_v42 }
0x24fa   :  { %v10762_v18 = vpop.eup %10761 }
0x24fb   :  { %v7984_v31 = vmul.f32 %v10762_v18, %v10760_v56 }
0x24fd   :  { %10456 = vmatmul.mubr.msk.f32.vlgmr.msra.gmra.mxu0 %vm971_vm2, %v7984_v31 }
0x24fe   :  { %10473 = vmatprep.mubr.msk.f32.mxu0 %vm10849_vm13, %v10848_v46  ;;  %10466 = vmatpush3.msra.mxu0 %v8168_v48 }
0x24ff   :  { %10467 = vmatprep.subr.mxu0 %v10848_v46 }
0x25bd   :  { %v8054_v52 = vpop.f32.mrf.mxu0 }
0x25be   :  { %10463 = vmatmul.mubr.msk.f32.vlgmr.msra.gmra.mxu1 %vm3805_vm8, %v8054_v52 }
0x25bf   :  { %v10457_v47 = vpop.f32.mrf.mxu0  ;;  %10492 = vmatprep.mubr.msk.f32.mxu1 %vm10849_vm13, %v10848_v46  ;;  %10477 = vmatpush3.msra.mxu1 %v8283_v30 }
0x25c0   :  { %10478 = vmatprep.subr.mxu1 %v10848_v46 }
0x25c1   :  { %10479 = vmatpush3.msra.mxu1 %v8282_v51  ;;  %v8994_v51 = vld [vmem:[%s11124_s4] ss:$0 sm:$0xff] }
0x25c2   :  { %10480 = vmatprep.subr.mxu1 %v10848_v46 }
0x25c3   :  { %10481 = vmatpush3.msra.mxu1 %v8281_v7 }
0x25c4   :  { %10482 = vmatprep.subr.mxu1 %v10848_v46 }
0x25c5   :  { %10483 = vmatpush3.msra.mxu1 %v8280_v20 }
0x25c6   :  { %10484 = vmatprep.subr.mxu1 %v10848_v46 }
0x25c7   :  { %10485 = vmatpush3.msra.mxu1 %v8279_v59 }
0x25c8   :  { %10486 = vmatprep.subr.mxu1 %v10848_v46 }
0x25c9   :  { %10487 = vmatpush3.msra.mxu1 %v8278_v21 }
0x25ca   :  { %10488 = vmatprep.subr.mxu1 %v10848_v46 }
0x25cb   :  { %10489 = vmatpush3.msra.mxu1 %v8277_v61 }
0x25cc   :  { %10490 = vmatprep.subr.mxu1 %v10848_v46 }
0x25cd   :  { %10491 = vmatpush3.msra.mxu1 %v8276_v25 }
0x267e   :  { %v8130_v27 = vpop.f32.mrf.mxu1 }
0x267f   :  { %v8134_v2 = vadd.f32 %v8130_v27, %v7632_v33  ;;  %v8990_v33 = vld [vmem:[%s13092_s29] ss:$0 sm:$0xff] }
0x2680   :  { %v10464_v23 = vpop.f32.mrf.mxu1 }
0x2681   :  { %v12861_v43 = vadd.f32 %v8134_v2, %v12726_v41  ;;  %v8167_v41 = vld [vmem:[%s13087_s9 + $0x10] sm:$0xff] }
0x2682   :  { %10468 = vmatpush3.msra.mxu0 %v8167_v41 }
0x2683   :  { %v8138_v6 = vsel %vm2746_vm3, %v12861_v43, 0.0  ;;  %10469 = vmatprep.subr.mxu0 %v10848_v46 }
0x2684   :  { %8139 = vadd.xlane.f32.xlu0 %v8138_v6  ;;  %10470 = vmatpush3.msra.mxu0 %v8166_v19  ;;  %v8991_v19 = vld [vmem:[%s13093_s3] ss:$0 sm:$0xff] }
0x2685   :  { %10471 = vmatprep.subr.mxu0 %v10848_v46 }
0x2686   :  { %10472 = vmatpush3.msra.mxu0 %v8165_v13 }
0x2687   :  { %10495 = vmatprep.subr.mxu0 %v10848_v46 }
0x270d   :  { %v8140_v9 = vpop.xlane.xlu0 %8139 }
0x270e   :  { %v8141_v34 = vmul.f32 0.03125, %v8140_v9 }
0x2710   :  { %v8142_v49 = vsub.f32 %v12861_v43, %v8141_v34 }
0x2712   :  { %v8143_v44 = vmul.f32 %v8142_v49, %v8142_v49 }
0x2714   :  { %v8144_v0 = vsel %vm2746_vm3, %v8143_v44, 0.0 }
0x2715   :  { %8145 = vadd.xlane.f32.xlu1 %v8144_v0 }
0x279e   :  { %v8146_v15 = vpop.xlane.xlu1 %8145 }
0x279f   :  { %v8147_v4 = vmul.f32 0.03125, %v8146_v15  ;;  %v8992_v15 = vld [vmem:[%s11114_s20] ss:$0 sm:$0xff]  ;;  %s10850_s20 = smov [#allocation2]  }
0x27a0   :  { %s8562_s14 = sshll.u32 %s10850_s20, 4  ;;  %s8563_s14 = int_to_ptr.vmem [resolvable:$true] %s8562_s14 }
0x27a1   :  { %v8148_v40 = vadd.f32 1e-05, %v8147_v4  ;;  %s10771_s19 = scalar_lea.vmem %s8563_s14, 32  ;;  %p10776_p1 = scmp.lt.s32.totalorder %s8563_s14, %s8563_s14 }
0x27a2   :  { %p10772_p0 = scmp.ne.s32.totalorder %s8563_s14, %s10771_s19  ;;  %p10777_p2 = scmp.lt.s32.totalorder %s10771_s19, %s10771_s19 }
0x27a3   :  { %10763 = vrsqrt.f32 %v8148_v40 }
0x27a4   :  { %p10778_p3 = por %p10777_p2, %p10776_p1 }
0x27a6   :  { %p10779_p4 = pnand %p10778_p3, %p10772_p0 }
0x27b0   :  { %v10764_v11 = vpop.eup %10763 }
0x27b1   :  { %v8150_v63 = vmul.f32 %v10764_v11, %v8142_v49  ;;  %v8396_v11 = vld [vmem:[%s13094_s8] sm:$0x3] }
0x27b3   :  { %v8157_v54 = vmul.f32 %v8985_v1, %v8150_v63  ;;  %v8473_v1 = vld [vmem:[%s11119_s27 + $0x18] sm:$0xff]  ;;  %v8472_v63 = vld [vmem:[%s11119_s27 + $0x10] sm:$0xff] }
0x27b5   :  { %v8164_v57 = vadd.f32 %v8986_v24, %v8157_v54  ;;  %v8471_v24 = vld [vmem:[%s11119_s27 + $0x8] sm:$0xff]  ;;  %v8470_v54 = vld [vmem:[%s11119_s27] sm:$0xff] }
0x27b7   :  { %10474 = vmatmul.mubr.msk.f32.vlgmr.msra.gmra.mxu0 %vm2746_vm3, %v8164_v57 }
0x27b8   :  { %10497 = vmatprep.mubr.msk.f32.mxu0 %vm10849_vm13, %v10848_v46 }
0x2877   :  { %v8245_v32 = vpop.f32.mrf.mxu0 }
0x2878   :  { %v8246_v53 = vadd.f32 %v8987_v62, %v8245_v32 }
0x2879   :  { %v10475_v16 = vpop.f32.mrf.mxu0 }
0x287a   :  { %v8250_v29 = vmul.f32 0.70710677, %v8246_v53  ;;  %v8249_v10 = vmul.f32 0.5, %v8246_v53 }
0x287c   :  { %v8253_v14 = vand.u32 2147483647, %v8250_v29  ;;  %vm8251_vm14 = vcmp.ge.f32.partialorder %v8250_v29, 0.0 }
0x287d   :  { %v8252_v18 = vsel %vm8251_vm14, 1.0, %v13029_v45 }
0x287e   :  { %v8254_v55 = vmul.f32 0.3275911, %v8253_v14  ;;  %v8267_v28 = vsub.f32 0.0, %v8253_v14 }
0x2880   :  { %v8255_v37 = vadd.f32 1.0, %v8254_v55  ;;  %v8268_v60 = vmul.f32 %v8267_v28, %v8253_v14 }
0x2882   :  { %10765 = vrcp.f32 %v8255_v37  ;;  %v8269_v12 = vmul.f32 1.442695, %v8268_v60 }
0x2884   :  { %10767 = vpow2.f32 %v8269_v12 }
0x288f   :  { %v10766_v22 = vpop.eup %10765 }
0x2890   :  { %v8258_v3 = vmul.f32 1.0614054, %v10766_v22 }
0x2891   :  { %v10768_v39 = vpop.eup %10767 }
0x2892   :  { %v8259_v26 = vadd.f32 -1.4531521, %v8258_v3 }
0x2894   :  { %v8260_v50 = vmul.f32 %v10766_v22, %v8259_v26 }
0x2896   :  { %v8261_v8 = vadd.f32 1.4214138, %v8260_v50 }
0x2898   :  { %v8262_v35 = vmul.f32 %v10766_v22, %v8261_v8 }
0x289a   :  { %v8263_v5 = vadd.f32 -0.28449672, %v8262_v35 }
0x289c   :  { %v8264_v17 = vmul.f32 %v10766_v22, %v8263_v5 }
0x289e   :  { %v8265_v58 = vadd.f32 0.2548296, %v8264_v17 }
0x28a0   :  { %v8266_v56 = vmul.f32 %v10766_v22, %v8265_v58 }
0x28a2   :  { %v8271_v36 = vmul.f32 %v10768_v39, %v8266_v56 }
0x28a4   :  { %v8272_v42 = vsub.f32 1.0, %v8271_v36 }
0x28a6   :  { %v8273_v31 = vmul.f32 %v8272_v42, %v8252_v18 }
0x28a8   :  { %v8274_v52 = vadd.f32 1.0, %v8273_v31 }
0x28aa   :  { %v8275_v47 = vmul.f32 %v8274_v52, %v8249_v10 }
0x28ac   :  { %10493 = vmatmul.mubr.msk.f32.vlgmr.msra.gmra.mxu1 %vm8284_vm15, %v8275_v47 }
0x296c   :  { %v8354_v38 = vpop.f32.mrf.mxu1 }
0x296d   :  { %v8358_v27 = vadd.f32 %v8354_v38, %v12861_v43 }
0x296e   :  { %v10494_v2 = vpop.f32.mrf.mxu1 }
0x296f   :  { %v8366_v23 = vadd.f32 %v8990_v33, %v8358_v27 }
0x2971   :  { %v8369_v6 = vsel %vm2746_vm3, %v8366_v23, 0.0 }
0x2972   :  { %8370 = vadd.xlane.f32.xlu0 %v8369_v6 }
0x29fb   :  { %v8371_v9 = vpop.xlane.xlu0 %8370 }
0x29fc   :  { %v8372_v45 = vmul.f32 0.03125, %v8371_v9 }
0x29fe   :  { %v8373_v34 = vsub.f32 %v8366_v23, %v8372_v45 }
0x2a00   :  { %v8374_v49 = vmul.f32 %v8373_v34, %v8373_v34 }
0x2a02   :  { %v8375_v44 = vsel %vm2746_vm3, %v8374_v49, 0.0 }
0x2a03   :  { %8376 = vadd.xlane.f32.xlu1 %v8375_v44 }
0x2a8c   :  { %v8377_v0 = vpop.xlane.xlu1 %8376 }
0x2a8d   :  { %v8378_v48 = vmul.f32 0.03125, %v8377_v0 }
0x2a8f   :  { %v8379_v43 = vadd.f32 1e-05, %v8378_v48 }
0x2a91   :  { %10769 = vrsqrt.f32 %v8379_v43 }
0x2a9e   :  { %v10770_v41 = vpop.eup %10769 }
0x2a9f   :  { %v8381_v13 = vmul.f32 %v10770_v41, %v8373_v34 }
0x2aa1   :  { %v8388_v4 = vmul.f32 %v8991_v19, %v8381_v13 }
0x2aa3   :  { %v8395_v40 = vadd.f32 %v8992_v15, %v8388_v4 }
0x2aa5   :  { %10496 = vmatpush3.msra.mxu0 %v8395_v40 }
0x2aa6   :  { %10498 = vmatmul.mubr.msk.f32.vlgmr.msra.gmra.mxu0 %vm971_vm2, %v8396_v11  ;;  %10500 = vmatprep.subr.mxu0 %v10848_v46 }
0x2aa7   :  { %10501 = vmatpush3.msra.mxu0 %v8473_v1  ;;  %10508 = vmatprep.mubr.msk.f32.mxu0 %vm10849_vm13, %v10848_v46 }
0x2aa8   :  { %10502 = vmatprep.subr.mxu0 %v10848_v46 }
0x2aa9   :  { %10503 = vmatpush3.msra.mxu0 %v8472_v63 }
0x2aaa   :  { %10504 = vmatprep.subr.mxu0 %v10848_v46 }
0x2aab   :  { %10505 = vmatpush3.msra.mxu0 %v8471_v24 }
0x2aac   :  { %10506 = vmatprep.subr.mxu0 %v10848_v46 }
0x2aad   :  { %10507 = vmatpush3.msra.mxu0 %v8470_v54 }
0x2b66   :  { %v8466_v57 = vpop.f32.mrf.mxu0 }
0x2b67   :  { %10509 = vmatmul.mubr.msk.f32.vlgmr.msra.gmra.mxu0 %vm2746_vm3, %v8466_v57 }
0x2b68   :  { %v10499_v30 = vpop.f32.mrf.mxu0 }
0x2c27   :  { %v8550_v7 = vpop.f32.mrf.mxu0 }
0x2c28   :  { %v8551_v20 = vadd.f32 %v8994_v51, %v8550_v7 }
0x2c29   :  { %v10510_v59 = vpop.f32.mrf.mxu0 }
0x2c2a   :  { %8555 = vst.msk [vmem:[#allocation2] sm:$0x3] %vm8554_vm0, %v8551_v20 }
0x2c2b   :  { %10782 = shalt.err (!%p10779_p4)
}
0x2c2c   :  { %8565 = dma.vmem_to_hbm [thread:$0]  %s8563_s14, 32, %s11129_s12, [#allocation3]  }
0x2c2d   :  { %10791 = dma.done.wait [#allocation3], 32  }
0x2c2e   :  { %10792 = vsyncadd [#allocation3], 4294967264 }
0x2c2f   :  { %8569 = vsyncpa [#allocation3], 1 }

</bundles_post_ra>
